<compile_context>
chip_gen: v7x
topology: tpu7x:2x2x1
jax: 0.10.0
libtpu: 0.0.40
codegen_flags: <defaults>
</compile_context>

<pallas_src>
import functools

import jax
import jax.numpy as jnp
from jax.experimental import pallas as pl
from jax.experimental.pallas import tpu as pltpu

BN_EPS = 1e-5


# --------------------------------------------------------------------------
# Tiling helpers
# --------------------------------------------------------------------------
def _choose_tile(M):
    """Pick a row tile (bm) and the padded row count Mp (multiple of bm)."""
    for bm in (512, 256, 128):
        if M % bm == 0:
            return bm, M
    if M < 128:
        return M, M                      # tiny M: single block (full dim)
    bm = 128
    return bm, ((M + bm - 1) // bm) * bm  # pad rows to a multiple of 128


def _pad_rows(a, Mp):
    if a.shape[0] == Mp:
        return a
    pad = [(0, Mp - a.shape[0])] + [(0, 0)] * (a.ndim - 1)
    return jnp.pad(a, pad)


# --------------------------------------------------------------------------
# Pallas kernels
# --------------------------------------------------------------------------
def _mm_kernel(x_ref, w_ref, shift_ref, o_ref, *, input_relu, out_relu):
    x = x_ref[...]
    if input_relu:
        x = jnp.maximum(x, 0)
    y = jnp.dot(x, w_ref[...], preferred_element_type=jnp.float32)
    y = y + shift_ref[...]
    if out_relu:
        y = jnp.maximum(y, 0.0)
    o_ref[...] = y


def _mm_res_kernel(x_ref, w_ref, shift_ref, res_ref, o_ref, *, input_relu):
    x = x_ref[...]
    if input_relu:
        x = jnp.maximum(x, 0)
    y = jnp.dot(x, w_ref[...], preferred_element_type=jnp.float32)
    o_ref[...] = y + shift_ref[...] + res_ref[...]


def _shortcut_kernel(h1_ref, h2_ref, w1_ref, w2_ref, shift_ref, o_ref):
    a = jnp.maximum(h1_ref[...], 0)           # ReLU fused (relu commutes with the
    b = jnp.maximum(h2_ref[...], 0)           # subsample / zero-pad done in the wrapper)
    y1 = jnp.dot(a, w1_ref[...], preferred_element_type=jnp.float32)
    y2 = jnp.dot(b, w2_ref[...], preferred_element_type=jnp.float32)
    o_ref[...] = jnp.concatenate([y1, y2], axis=-1) + shift_ref[...]


def _affine_kernel(x_ref, scale_ref, shift_ref, o_ref):
    o_ref[...] = x_ref[...] * scale_ref[...] + shift_ref[...]


def _relu_meanpool_kernel(x_ref, o_ref):
    # x: [N, S, C]; relu then mean over the spatial axis S (== avg_pool2d(8) when S = 8*8)
    o_ref[...] = jnp.mean(jnp.maximum(x_ref[...], 0.0), axis=1)


# --------------------------------------------------------------------------
# Pallas wrappers
# --------------------------------------------------------------------------
def matmul_shift(x, w, shift, *, residual=None, input_relu=False, out_relu=False):
    """y = [relu](x) @ w + shift [+ residual] [; relu].  x/w are cast to bf16, f32 acc."""
    M, K = x.shape
    Cout = w.shape[1]
    bm, Mp = _choose_tile(M)
    xp = _pad_rows(x.astype(jnp.bfloat16), Mp)
    wb = w.astype(jnp.bfloat16)
    sb = shift.reshape(1, Cout).astype(jnp.float32)

    inputs = [xp, wb, sb]
    in_specs = [
        pl.BlockSpec((bm, K), lambda i: (i, 0)),
        pl.BlockSpec((K, Cout), lambda i: (0, 0)),
        pl.BlockSpec((1, Cout), lambda i: (0, 0)),
    ]
    if residual is not None:
        inputs.append(_pad_rows(residual.astype(jnp.float32), Mp))
        in_specs.append(pl.BlockSpec((bm, Cout), lambda i: (i, 0)))
        kern = functools.partial(_mm_res_kernel, input_relu=input_relu)
    else:
        kern = functools.partial(_mm_kernel, input_relu=input_relu, out_relu=out_relu)

    out = pl.pallas_call(
        kern,
        out_shape=jax.ShapeDtypeStruct((Mp, Cout), jnp.float32),
        grid=(Mp // bm,),
        in_specs=in_specs,
        out_specs=pl.BlockSpec((bm, Cout), lambda i: (i, 0)),
        compiler_params=pltpu.CompilerParams(dimension_semantics=("parallel",)),
    )(*inputs)
    return out[:M] if Mp != M else out


def shortcut_matmul(h1, h2, w1, w2, shift):
    """out = concat(relu(h1) @ w1, relu(h2) @ w2) + shift   (BN scale folded into w1/w2)."""
    M, Cin = h1.shape
    half = w1.shape[1]
    out_ch = 2 * half
    bm, Mp = _choose_tile(M)
    h1p = _pad_rows(h1.astype(jnp.bfloat16), Mp)
    h2p = _pad_rows(h2.astype(jnp.bfloat16), Mp)
    out = pl.pallas_call(
        _shortcut_kernel,
        out_shape=jax.ShapeDtypeStruct((Mp, out_ch), jnp.float32),
        grid=(Mp // bm,),
        in_specs=[
            pl.BlockSpec((bm, Cin), lambda i: (i, 0)),
            pl.BlockSpec((bm, Cin), lambda i: (i, 0)),
            pl.BlockSpec((Cin, half), lambda i: (0, 0)),
            pl.BlockSpec((Cin, half), lambda i: (0, 0)),
            pl.BlockSpec((1, out_ch), lambda i: (0, 0)),
        ],
        out_specs=pl.BlockSpec((bm, out_ch), lambda i: (i, 0)),
        compiler_params=pltpu.CompilerParams(dimension_semantics=("parallel",)),
    )(h1p, h2p, w1.astype(jnp.bfloat16), w2.astype(jnp.bfloat16),
      shift.reshape(1, out_ch).astype(jnp.float32))
    return out[:M] if Mp != M else out


def affine_pallas(x2d, scale, shift):
    """Per-channel affine used for the input Normalize: y = x*scale + shift."""
    M, C = x2d.shape
    bm, Mp = _choose_tile(M)
    xp = _pad_rows(x2d, Mp)
    out = pl.pallas_call(
        _affine_kernel,
        out_shape=jax.ShapeDtypeStruct((Mp, C), jnp.float32),
        grid=(Mp // bm,),
        in_specs=[
            pl.BlockSpec((bm, C), lambda i: (i, 0)),
            pl.BlockSpec((1, C), lambda i: (0, 0)),
            pl.BlockSpec((1, C), lambda i: (0, 0)),
        ],
        out_specs=pl.BlockSpec((bm, C), lambda i: (i, 0)),
        compiler_params=pltpu.CompilerParams(dimension_semantics=("parallel",)),
    )(xp, scale.reshape(1, C).astype(jnp.float32), shift.reshape(1, C).astype(jnp.float32))
    return out[:M] if Mp != M else out


def relu_meanpool_pallas(x_nsc):
    # matches F.avg_pool2d(h, 8) only when the final feature map is exactly 8x8 (32x32 input)
    N, S, C = x_nsc.shape
    return pl.pallas_call(
        _relu_meanpool_kernel,
        out_shape=jax.ShapeDtypeStruct((N, C), jnp.float32),
        grid=(1,),
        in_specs=[pl.BlockSpec((N, S, C), lambda i: (0, 0, 0))],
        out_specs=pl.BlockSpec((N, C), lambda i: (0, 0)),
    )(x_nsc)


# --------------------------------------------------------------------------
# Glue: im2col, BN folding, block wrappers
# --------------------------------------------------------------------------
# TODO(synk): im2col patches are still materialized in HBM; a haloed-BlockSpec /
# manual-DMA conv kernel that forms the 9 shifted views in VMEM would remove the
# 9x patch blow-up entirely.
def im2col(x, ksize, stride, pad):
    """x: [N, H, W, C] -> ([N*Ho*Wo, k*k*C], (N, Ho, Wo)); patch order (kh, kw, C)."""
    N, H, W, C = x.shape
    xp = jnp.pad(x, ((0, 0), (pad, pad), (pad, pad), (0, 0)))
    Ho = (H + 2 * pad - ksize) // stride + 1
    Wo = (W + 2 * pad - ksize) // stride + 1
    cols = []
    for i in range(ksize):
        for j in range(ksize):
            cols.append(xp[:, i:i + Ho * stride:stride, j:j + Wo * stride:stride, :])
    patches = jnp.concatenate(cols, axis=-1)              # [N, Ho, Wo, k*k*C]
    return patches.reshape(N * Ho * Wo, ksize * ksize * C), (N, Ho, Wo)


def bn_fold(gamma, beta, mean, var):
    scale = gamma / jnp.sqrt(var + BN_EPS)
    shift = beta - mean * scale
    return scale, shift


def shortcut_forward(x, p, stride):
    # Shortcut.forward with the leading ReLU fused into the kernel (relu commutes with
    # the zero pad / crop / stride-subsample since relu(0) == 0).
    N, H, W, Cin = x.shape
    h1 = x[:, ::stride, ::stride, :]                                        # avg_pool2d(1, stride)
    h2 = jnp.pad(x[:, 1:, 1:, :], ((0, 0), (0, 1), (0, 1), (0, 0)))         # F.pad(h, (-1,1,-1,1))
    h2 = h2[:, ::stride, ::stride, :]
    Ho, Wo = h1.shape[1], h1.shape[2]
    half = p["w1"].shape[-1]
    out_ch = 2 * half
    scale, shift = bn_fold(*p["bn"])
    w1 = p["w1"].reshape(Cin, half) * scale[:half]          # BN scale folded per half
    w2 = p["w2"].reshape(Cin, half) * scale[half:]
    y = shortcut_matmul(h1.reshape(-1, Cin), h2.reshape(-1, Cin), w1, w2, shift)
    return y.reshape(N, Ho, Wo, out_ch)


def shake_block_forward(x, p, stride, equal_io):
    N, H, W, Cin = x.shape
    b1, b2 = p["branch1"], p["branch2"]
    cout = b1["w1"].shape[-1]

    # --- conv1 of both branches fused into one matmul ------------------------------
    # branch: ReLU -> conv1 -> BN1 -> ReLU.  BN1 scale folded into weights; the leading
    # ReLU is applied to the im2col patches inside the kernel; trailing ReLU in epilogue.
    s1a, t1a = bn_fold(*b1["bn1"])
    s1b, t1b = bn_fold(*b2["bn1"])
    w1f = jnp.concatenate([b1["w1"] * s1a, b2["w1"] * s1b], axis=-1)    # (3,3,Cin,2*cout)
    t1f = jnp.concatenate([t1a, t1b])
    cols, (N, Ho, Wo) = im2col(x.astype(jnp.bfloat16), 3, stride, 1)
    h_mid = matmul_shift(cols, w1f.reshape(9 * Cin, 2 * cout), t1f,
                         input_relu=True, out_relu=True)
    h_mid = h_mid.reshape(N, Ho, Wo, 2 * cout)              # channels = [branch1 | branch2]

    # --- residual path --------------------------------------------------------------
    h0 = x if equal_io else shortcut_forward(x, p["shortcut"], stride)

    # --- conv2 + BN2 of both branches + ShakeShake(alpha=0.5) + residual, fused ------
    # 0.5*BN2a(conv2a(h1)) + 0.5*BN2b(conv2b(h2)) == one matmul of the concatenated
    # channels against the K-stacked, 0.5*scale-folded weights, plus the averaged shift.
    s2a, t2a = bn_fold(*b1["bn2"])
    s2b, t2b = bn_fold(*b2["bn2"])
    w2f = jnp.concatenate([0.5 * b1["w2"] * s2a, 0.5 * b2["w2"] * s2b], axis=2)  # (3,3,2*cout,cout)
    t2f = 0.5 * (t2a + t2b)
    cols2, _ = im2col(h_mid.astype(jnp.bfloat16), 3, 1, 1)
    out = matmul_shift(cols2, w2f.reshape(9 * 2 * cout, cout), t2f,
                       residual=h0.reshape(-1, cout))
    return out.reshape(N, Ho, Wo, cout)


# --------------------------------------------------------------------------
# Deterministic parameter construction (matches module __init__ shapes/inits)
# --------------------------------------------------------------------------
def kaiming_conv(key, kh, kw, cin, cout):
    # kaiming_normal_(mode='fan_out', nonlinearity='relu'): std = sqrt(2 / (cout*kh*kw))
    std = (2.0 / (cout * kh * kw)) ** 0.5
    return jax.random.normal(key, (kh, kw, cin, cout), jnp.float32) * std


def bn_params(c):
    # (gamma=1, beta=0, running_mean=0, running_var=1) -> eval BatchNorm
    return (jnp.ones((c,), jnp.float32), jnp.zeros((c,), jnp.float32),
            jnp.zeros((c,), jnp.float32), jnp.ones((c,), jnp.float32))


def make_params(key, depth, w_base, label):
    n_units = (depth - 2) // 6
    in_chs = [16, w_base, w_base * 2, w_base * 4]   # python statics (NOT stored in params)
    keys = iter(jax.random.split(key, 256))
    params = {}
    params["c_in_w"] = kaiming_conv(next(keys), 3, 3, 3, in_chs[0])
    params["c_in_b"] = jnp.zeros((in_chs[0],), jnp.float32)

    def make_block(cin, cout):
        def make_branch():
            return {"w1": kaiming_conv(next(keys), 3, 3, cin, cout), "bn1": bn_params(cout),
                    "w2": kaiming_conv(next(keys), 3, 3, cout, cout), "bn2": bn_params(cout)}
        blk = {"branch1": make_branch(), "branch2": make_branch()}
        if cin != cout:
            blk["shortcut"] = {"w1": kaiming_conv(next(keys), 1, 1, cin, cout // 2),
                               "w2": kaiming_conv(next(keys), 1, 1, cin, cout // 2),
                               "bn": bn_params(cout)}
        return blk

    def make_layer(cin, cout):
        blocks, c = [], cin
        for _ in range(n_units):
            blocks.append(make_block(c, cout))
            c = cout
        return blocks

    params["layer1"] = make_layer(in_chs[0], in_chs[1])
    params["layer2"] = make_layer(in_chs[1], in_chs[2])
    params["layer3"] = make_layer(in_chs[2], in_chs[3])
    params["fc_w"] = jax.random.normal(next(keys), (in_chs[3], label), jnp.float32) * 0.01
    params["fc_b"] = jnp.zeros((label,), jnp.float32)
    params["norm_mean"] = jnp.array([0.491, 0.482, 0.447], jnp.float32)
    params["norm_std"] = jnp.array([0.247, 0.243, 0.262], jnp.float32)
    return params


# --------------------------------------------------------------------------
# Full forward (ShakeResNet.forward with training=False)
# --------------------------------------------------------------------------
def shake_resnet_forward(params, x_nchw, depth, w_base, label):
    in_chs = [16, w_base, w_base * 2, w_base * 4]   # static python ints (fixes jit trace bug)
    x = jnp.transpose(x_nchw, (0, 2, 3, 1)).astype(jnp.float32)   # NCHW -> NHWC
    N, H, W, C = x.shape

    # Normalize (per-channel): (x - mean) / std
    inv_std = 1.0 / params["norm_std"]
    nshift = -params["norm_mean"] * inv_std
    x = affine_pallas(x.reshape(-1, C), inv_std, nshift).reshape(N, H, W, C)

    # c_in: Conv2d(3, 16, 3, s=1, p=1) with (zero-init) bias, no BN, no ReLU
    cols, (N, Ho, Wo) = im2col(x.astype(jnp.bfloat16), 3, 1, 1)
    x = matmul_shift(cols, params["c_in_w"].reshape(9 * 3, in_chs[0]),
                     params["c_in_b"]).reshape(N, Ho, Wo, in_chs[0])

    def run_layer(x, blocks, cin, cout, first_stride):
        c, stride = cin, first_stride
        for blk in blocks:
            x = shake_block_forward(x, blk, stride, equal_io=(c == cout))
            c, stride = cout, 1
        return x

    x = run_layer(x, params["layer1"], in_chs[0], in_chs[1], 1)
    x = run_layer(x, params["layer2"], in_chs[1], in_chs[2], 2)
    x = run_layer(x, params["layer3"], in_chs[2], in_chs[3], 2)

    # relu -> avg_pool2d(8) -> view(-1, in_chs[3])
    N, H, W, C = x.shape
    feats = relu_meanpool_pallas(x.reshape(N, H * W, C))          # [N, C]

    # fc_out
    logits = matmul_shift(feats, params["fc_w"], params["fc_b"])
    return logits   # PyTorch forward(training=False) returns (logits, None)


# TODO(synk): training-time paths (random ShakeShake alpha, SRA/PadCrop/HFlip/Cutout
# augmentation, cosine-similarity weighting, autograd backward) are outside the
# inference hot path and are not implemented.

if __name__ == "__main__":
    depth, w_base, label = 8, 16, 10     # n_units = 1 per layer; channels 16/16/32/64
    batch, resolution = 2, 32            # avg_pool2d(8) after two stride-2 stages => 32x32 input

    key = jax.random.PRNGKey(0)
    pkey, xkey = jax.random.split(key)
    params = make_params(pkey, depth, w_base, label)
    x = jax.random.normal(xkey, (batch, 3, resolution, resolution), jnp.float32)

    fwd = jax.jit(functools.partial(shake_resnet_forward,
                                    depth=depth, w_base=w_base, label=label))
    logits = fwd(params, x)
    jax.block_until_ready(logits)
    assert logits.shape == (batch, label)
    print("KERNEL_OK")
</pallas_src>

<mosaic_0001>
module attributes {stable_mosaic.version = 11 : i64} {
  func.func @_affine_kernel(%arg0: i32, %arg1: memref<512x3xf32, #tpu.memory_space<vmem>>, %arg2: memref<1x3xf32, #tpu.memory_space<vmem>>, %arg3: memref<1x3xf32, #tpu.memory_space<vmem>>, %arg4: memref<512x3xf32, #tpu.memory_space<vmem>>) attributes {dimension_semantics = [#tpu.dimension_semantics<parallel>], iteration_bounds = array<i64: 4>, scalar_prefetch = 0 : i64, scratch_operands = 0 : i64, tpu.core_type = #tpu.core_type<tc>, window_params = [{transform_indices = @transform_0, window_bounds = array<i64: 512, 3>}, {pipeline_mode = #tpu.pipeline_mode<synchronous>, transform_indices = @transform_1, window_bounds = array<i64: 1, 3>}, {pipeline_mode = #tpu.pipeline_mode<synchronous>, transform_indices = @transform_2, window_bounds = array<i64: 1, 3>}, {transform_indices = @transform_3, window_bounds = array<i64: 512, 3>}]} {
    %c0 = arith.constant 0 : index
    %c0_0 = arith.constant 0 : index
    %0 = vector.load %arg1[%c0, %c0_0] : memref<512x3xf32, #tpu.memory_space<vmem>>, vector<512x3xf32>
    %c0_1 = arith.constant 0 : index
    %c0_2 = arith.constant 0 : index
    %1 = vector.load %arg2[%c0_1, %c0_2] : memref<1x3xf32, #tpu.memory_space<vmem>>, vector<1x3xf32>
    %2 = vector.broadcast %1 : vector<1x3xf32> to vector<512x3xf32>
    %3 = arith.mulf %0, %2 : vector<512x3xf32>
    %c0_3 = arith.constant 0 : index
    %c0_4 = arith.constant 0 : index
    %4 = vector.load %arg3[%c0_3, %c0_4] : memref<1x3xf32, #tpu.memory_space<vmem>>, vector<1x3xf32>
    %5 = vector.broadcast %4 : vector<1x3xf32> to vector<512x3xf32>
    %6 = arith.addf %3, %5 : vector<512x3xf32>
    %c0_5 = arith.constant 0 : index
    %c0_6 = arith.constant 0 : index
    %7 = vector.load %arg4[%c0_5, %c0_6] : memref<512x3xf32, #tpu.memory_space<vmem>>, vector<512x3xf32>
    tpu.vector_store %arg4[%c0_5, %c0_6], %6 {strides = array<i32>} : memref<512x3xf32, #tpu.memory_space<vmem>>, vector<512x3xf32>,
    return
  }
  func.func @transform_0(%arg0: i32) -> (i32, i32) {
    %c0_i32 = arith.constant 0 : i32
    %c0_i32_0 = arith.constant 0 : i32
    return %arg0, %c0_i32 : i32, i32
  }
  func.func @transform_1(%arg0: i32) -> (i32, i32) {
    %c0_i32 = arith.constant 0 : i32
    %c0_i32_0 = arith.constant 0 : i32
    %c0_i32_1 = arith.constant 0 : i32
    return %c0_i32, %c0_i32_0 : i32, i32
  }
  func.func @transform_2(%arg0: i32) -> (i32, i32) {
    %c0_i32 = arith.constant 0 : i32
    %c0_i32_0 = arith.constant 0 : i32
    %c0_i32_1 = arith.constant 0 : i32
    return %c0_i32, %c0_i32_0 : i32, i32
  }
  func.func @transform_3(%arg0: i32) -> (i32, i32) {
    %c0_i32 = arith.constant 0 : i32
    %c0_i32_0 = arith.constant 0 : i32
    return %arg0, %c0_i32 : i32, i32
  }
}

module attributes {stable_mosaic.version = 11 : i64} {
  func.func @_mm_kernel(%arg0: i32, %arg1: memref<512x27xbf16, #tpu.memory_space<vmem>>, %arg2: memref<27x16xbf16, #tpu.memory_space<vmem>>, %arg3: memref<1x16xf32, #tpu.memory_space<vmem>>, %arg4: memref<512x16xf32, #tpu.memory_space<vmem>>) attributes {dimension_semantics = [#tpu.dimension_semantics<parallel>], iteration_bounds = array<i64: 4>, scalar_prefetch = 0 : i64, scratch_operands = 0 : i64, tpu.core_type = #tpu.core_type<tc>, window_params = [{transform_indices = @transform_0, window_bounds = array<i64: 512, 27>}, {pipeline_mode = #tpu.pipeline_mode<synchronous>, transform_indices = @transform_1, window_bounds = array<i64: 27, 16>}, {pipeline_mode = #tpu.pipeline_mode<synchronous>, transform_indices = @transform_2, window_bounds = array<i64: 1, 16>}, {transform_indices = @transform_3, window_bounds = array<i64: 512, 16>}]} {
    %c0 = arith.constant 0 : index
    %c0_0 = arith.constant 0 : index
    %0 = vector.load %arg1[%c0, %c0_0] : memref<512x27xbf16, #tpu.memory_space<vmem>>, vector<512x27xbf16>
    %c0_1 = arith.constant 0 : index
    %c0_2 = arith.constant 0 : index
    %1 = vector.load %arg2[%c0_1, %c0_2] : memref<27x16xbf16, #tpu.memory_space<vmem>>, vector<27x16xbf16>
    %cst = arith.constant dense<0.000000e+00> : vector<512x16xf32>
    %2 = tpu.matmul %0, %1, %cst {dimension_numbers = #tpu.dot_dimension_numbers<[1], [0], [0], [1], [0, 0, 1, 1], [], []>} : vector<512x27xbf16>, vector<27x16xbf16>, vector<512x16xf32> -> vector<512x16xf32>
    %c0_3 = arith.constant 0 : index
    %c0_4 = arith.constant 0 : index
    %3 = vector.load %arg3[%c0_3, %c0_4] : memref<1x16xf32, #tpu.memory_space<vmem>>, vector<1x16xf32>
    %4 = vector.broadcast %3 : vector<1x16xf32> to vector<512x16xf32>
    %5 = arith.addf %2, %4 : vector<512x16xf32>
    %c0_5 = arith.constant 0 : index
    %c0_6 = arith.constant 0 : index
    %6 = vector.load %arg4[%c0_5, %c0_6] : memref<512x16xf32, #tpu.memory_space<vmem>>, vector<512x16xf32>
    tpu.vector_store %arg4[%c0_5, %c0_6], %5 {strides = array<i32>} : memref<512x16xf32, #tpu.memory_space<vmem>>, vector<512x16xf32>,
    return
  }
  func.func @transform_0(%arg0: i32) -> (i32, i32) {
    %c0_i32 = arith.constant 0 : i32
    %c0_i32_0 = arith.constant 0 : i32
    return %arg0, %c0_i32 : i32, i32
  }
  func.func @transform_1(%arg0: i32) -> (i32, i32) {
    %c0_i32 = arith.constant 0 : i32
    %c0_i32_0 = arith.constant 0 : i32
    %c0_i32_1 = arith.constant 0 : i32
    return %c0_i32, %c0_i32_0 : i32, i32
  }
  func.func @transform_2(%arg0: i32) -> (i32, i32) {
    %c0_i32 = arith.constant 0 : i32
    %c0_i32_0 = arith.constant 0 : i32
    %c0_i32_1 = arith.constant 0 : i32
    return %c0_i32, %c0_i32_0 : i32, i32
  }
  func.func @transform_3(%arg0: i32) -> (i32, i32) {
    %c0_i32 = arith.constant 0 : i32
    %c0_i32_0 = arith.constant 0 : i32
    return %arg0, %c0_i32 : i32, i32
  }
}

module attributes {stable_mosaic.version = 11 : i64} {
  func.func @_mm_kernel(%arg0: i32, %arg1: memref<512x144xbf16, #tpu.memory_space<vmem>>, %arg2: memref<144x32xbf16, #tpu.memory_space<vmem>>, %arg3: memref<1x32xf32, #tpu.memory_space<vmem>>, %arg4: memref<512x32xf32, #tpu.memory_space<vmem>>) attributes {dimension_semantics = [#tpu.dimension_semantics<parallel>], iteration_bounds = array<i64: 4>, scalar_prefetch = 0 : i64, scratch_operands = 0 : i64, tpu.core_type = #tpu.core_type<tc>, window_params = [{transform_indices = @transform_0, window_bounds = array<i64: 512, 144>}, {pipeline_mode = #tpu.pipeline_mode<synchronous>, transform_indices = @transform_1, window_bounds = array<i64: 144, 32>}, {pipeline_mode = #tpu.pipeline_mode<synchronous>, transform_indices = @transform_2, window_bounds = array<i64: 1, 32>}, {transform_indices = @transform_3, window_bounds = array<i64: 512, 32>}]} {
    %c0 = arith.constant 0 : index
    %c0_0 = arith.constant 0 : index
    %0 = vector.load %arg1[%c0, %c0_0] : memref<512x144xbf16, #tpu.memory_space<vmem>>, vector<512x144xbf16>
    %cst = arith.constant 0.000000e+00 : bf16
    %1 = vector.broadcast %cst : bf16 to vector<512x144xbf16>
    %2 = arith.maximumf %0, %1 : vector<512x144xbf16>
    %c0_1 = arith.constant 0 : index
    %c0_2 = arith.constant 0 : index
    %3 = vector.load %arg2[%c0_1, %c0_2] : memref<144x32xbf16, #tpu.memory_space<vmem>>, vector<144x32xbf16>
    %cst_3 = arith.constant dense<0.000000e+00> : vector<512x32xf32>
    %4 = tpu.matmul %2, %3, %cst_3 {dimension_numbers = #tpu.dot_dimension_numbers<[1], [0], [0], [1], [0, 0, 1, 1], [], []>} : vector<512x144xbf16>, vector<144x32xbf16>, vector<512x32xf32> -> vector<512x32xf32>
    %c0_4 = arith.constant 0 : index
    %c0_5 = arith.constant 0 : index
    %5 = vector.load %arg3[%c0_4, %c0_5] : memref<1x32xf32, #tpu.memory_space<vmem>>, vector<1x32xf32>
    %6 = vector.broadcast %5 : vector<1x32xf32> to vector<512x32xf32>
    %7 = arith.addf %4, %6 : vector<512x32xf32>
    %cst_6 = arith.constant 0.000000e+00 : f32
    %8 = vector.broadcast %cst_6 : f32 to vector<512x32xf32>
    %9 = arith.maximumf %7, %8 : vector<512x32xf32>
    %c0_7 = arith.constant 0 : index
    %c0_8 = arith.constant 0 : index
    %10 = vector.load %arg4[%c0_7, %c0_8] : memref<512x32xf32, #tpu.memory_space<vmem>>, vector<512x32xf32>
    tpu.vector_store %arg4[%c0_7, %c0_8], %9 {strides = array<i32>} : memref<512x32xf32, #tpu.memory_space<vmem>>, vector<512x32xf32>,
    return
  }
  func.func @transform_0(%arg0: i32) -> (i32, i32) {
    %c0_i32 = arith.constant 0 : i32
    %c0_i32_0 = arith.constant 0 : i32
    return %arg0, %c0_i32 : i32, i32
  }
  func.func @transform_1(%arg0: i32) -> (i32, i32) {
    %c0_i32 = arith.constant 0 : i32
    %c0_i32_0 = arith.constant 0 : i32
    %c0_i32_1 = arith.constant 0 : i32
    return %c0_i32, %c0_i32_0 : i32, i32
  }
  func.func @transform_2(%arg0: i32) -> (i32, i32) {
    %c0_i32 = arith.constant 0 : i32
    %c0_i32_0 = arith.constant 0 : i32
    %c0_i32_1 = arith.constant 0 : i32
    return %c0_i32, %c0_i32_0 : i32, i32
  }
  func.func @transform_3(%arg0: i32) -> (i32, i32) {
    %c0_i32 = arith.constant 0 : i32
    %c0_i32_0 = arith.constant 0 : i32
    return %arg0, %c0_i32 : i32, i32
  }
}

module attributes {stable_mosaic.version = 11 : i64} {
  func.func @_mm_res_kernel(%arg0: i32, %arg1: memref<512x288xbf16, #tpu.memory_space<vmem>>, %arg2: memref<288x16xbf16, #tpu.memory_space<vmem>>, %arg3: memref<1x16xf32, #tpu.memory_space<vmem>>, %arg4: memref<512x16xf32, #tpu.memory_space<vmem>>, %arg5: memref<512x16xf32, #tpu.memory_space<vmem>>) attributes {dimension_semantics = [#tpu.dimension_semantics<parallel>], iteration_bounds = array<i64: 4>, scalar_prefetch = 0 : i64, scratch_operands = 0 : i64, tpu.core_type = #tpu.core_type<tc>, window_params = [{transform_indices = @transform_0, window_bounds = array<i64: 512, 288>}, {pipeline_mode = #tpu.pipeline_mode<synchronous>, transform_indices = @transform_1, window_bounds = array<i64: 288, 16>}, {pipeline_mode = #tpu.pipeline_mode<synchronous>, transform_indices = @transform_2, window_bounds = array<i64: 1, 16>}, {transform_indices = @transform_3, window_bounds = array<i64: 512, 16>}, {transform_indices = @transform_4, window_bounds = array<i64: 512, 16>}]} {
    %c0 = arith.constant 0 : index
    %c0_0 = arith.constant 0 : index
    %0 = vector.load %arg1[%c0, %c0_0] : memref<512x288xbf16, #tpu.memory_space<vmem>>, vector<512x288xbf16>
    %c0_1 = arith.constant 0 : index
    %c0_2 = arith.constant 0 : index
    %1 = vector.load %arg2[%c0_1, %c0_2] : memref<288x16xbf16, #tpu.memory_space<vmem>>, vector<288x16xbf16>
    %cst = arith.constant dense<0.000000e+00> : vector<512x16xf32>
    %2 = tpu.matmul %0, %1, %cst {dimension_numbers = #tpu.dot_dimension_numbers<[1], [0], [0], [1], [0, 0, 1, 1], [], []>} : vector<512x288xbf16>, vector<288x16xbf16>, vector<512x16xf32> -> vector<512x16xf32>
    %c0_3 = arith.constant 0 : index
    %c0_4 = arith.constant 0 : index
    %3 = vector.load %arg3[%c0_3, %c0_4] : memref<1x16xf32, #tpu.memory_space<vmem>>, vector<1x16xf32>
    %4 = vector.broadcast %3 : vector<1x16xf32> to vector<512x16xf32>
    %5 = arith.addf %2, %4 : vector<512x16xf32>
    %c0_5 = arith.constant 0 : index
    %c0_6 = arith.constant 0 : index
    %6 = vector.load %arg4[%c0_5, %c0_6] : memref<512x16xf32, #tpu.memory_space<vmem>>, vector<512x16xf32>
    %7 = arith.addf %5, %6 : vector<512x16xf32>
    %c0_7 = arith.constant 0 : index
    %c0_8 = arith.constant 0 : index
    %8 = vector.load %arg5[%c0_7, %c0_8] : memref<512x16xf32, #tpu.memory_space<vmem>>, vector<512x16xf32>
    tpu.vector_store %arg5[%c0_7, %c0_8], %7 {strides = array<i32>} : memref<512x16xf32, #tpu.memory_space<vmem>>, vector<512x16xf32>,
    return
  }
  func.func @transform_0(%arg0: i32) -> (i32, i32) {
    %c0_i32 = arith.constant 0 : i32
    %c0_i32_0 = arith.constant 0 : i32
    return %arg0, %c0_i32 : i32, i32
  }
  func.func @transform_1(%arg0: i32) -> (i32, i32) {
    %c0_i32 = arith.constant 0 : i32
    %c0_i32_0 = arith.constant 0 : i32
    %c0_i32_1 = arith.constant 0 : i32
    return %c0_i32, %c0_i32_0 : i32, i32
  }
  func.func @transform_2(%arg0: i32) -> (i32, i32) {
    %c0_i32 = arith.constant 0 : i32
    %c0_i32_0 = arith.constant 0 : i32
    %c0_i32_1 = arith.constant 0 : i32
    return %c0_i32, %c0_i32_0 : i32, i32
  }
  func.func @transform_3(%arg0: i32) -> (i32, i32) {
    %c0_i32 = arith.constant 0 : i32
    %c0_i32_0 = arith.constant 0 : i32
    return %arg0, %c0_i32 : i32, i32
  }
  func.func @transform_4(%arg0: i32) -> (i32, i32) {
    %c0_i32 = arith.constant 0 : i32
    %c0_i32_0 = arith.constant 0 : i32
    return %arg0, %c0_i32 : i32, i32
  }
}

module attributes {stable_mosaic.version = 11 : i64} {
  func.func @_shortcut_kernel(%arg0: i32, %arg1: memref<512x16xbf16, #tpu.memory_space<vmem>>, %arg2: memref<512x16xbf16, #tpu.memory_space<vmem>>, %arg3: memref<16x16xbf16, #tpu.memory_space<vmem>>, %arg4: memref<16x16xbf16, #tpu.memory_space<vmem>>, %arg5: memref<1x32xf32, #tpu.memory_space<vmem>>, %arg6: memref<512x32xf32, #tpu.memory_space<vmem>>) attributes {dimension_semantics = [#tpu.dimension_semantics<parallel>], iteration_bounds = array<i64: 1>, scalar_prefetch = 0 : i64, scratch_operands = 0 : i64, tpu.core_type = #tpu.core_type<tc>, window_params = [{transform_indices = @transform_0, window_bounds = array<i64: 512, 16>}, {transform_indices = @transform_1, window_bounds = array<i64: 512, 16>}, {pipeline_mode = #tpu.pipeline_mode<synchronous>, transform_indices = @transform_2, window_bounds = array<i64: 16, 16>}, {pipeline_mode = #tpu.pipeline_mode<synchronous>, transform_indices = @transform_3, window_bounds = array<i64: 16, 16>}, {pipeline_mode = #tpu.pipeline_mode<synchronous>, transform_indices = @transform_4, window_bounds = array<i64: 1, 32>}, {transform_indices = @transform_5, window_bounds = array<i64: 512, 32>}]} {
    %c0 = arith.constant 0 : index
    %c0_0 = arith.constant 0 : index
    %0 = vector.load %arg1[%c0, %c0_0] : memref<512x16xbf16, #tpu.memory_space<vmem>>, vector<512x16xbf16>
    %cst = arith.constant 0.000000e+00 : bf16
    %1 = vector.broadcast %cst : bf16 to vector<512x16xbf16>
    %2 = arith.maximumf %0, %1 : vector<512x16xbf16>
    %c0_1 = arith.constant 0 : index
    %c0_2 = arith.constant 0 : index
    %3 = vector.load %arg2[%c0_1, %c0_2] : memref<512x16xbf16, #tpu.memory_space<vmem>>, vector<512x16xbf16>
    %cst_3 = arith.constant 0.000000e+00 : bf16
    %4 = vector.broadcast %cst_3 : bf16 to vector<512x16xbf16>
    %5 = arith.maximumf %3, %4 : vector<512x16xbf16>
    %c0_4 = arith.constant 0 : index
    %c0_5 = arith.constant 0 : index
    %6 = vector.load %arg3[%c0_4, %c0_5] : memref<16x16xbf16, #tpu.memory_space<vmem>>, vector<16x16xbf16>
    %cst_6 = arith.constant dense<0.000000e+00> : vector<512x16xf32>
    %7 = tpu.matmul %2, %6, %cst_6 {dimension_numbers = #tpu.dot_dimension_numbers<[1], [0], [0], [1], [0, 0, 1, 1], [], []>} : vector<512x16xbf16>, vector<16x16xbf16>, vector<512x16xf32> -> vector<512x16xf32>
    %c0_7 = arith.constant 0 : index
    %c0_8 = arith.constant 0 : index
    %8 = vector.load %arg4[%c0_7, %c0_8] : memref<16x16xbf16, #tpu.memory_space<vmem>>, vector<16x16xbf16>
    %cst_9 = arith.constant dense<0.000000e+00> : vector<512x16xf32>
    %9 = tpu.matmul %5, %8, %cst_9 {dimension_numbers = #tpu.dot_dimension_numbers<[1], [0], [0], [1], [0, 0, 1, 1], [], []>} : vector<512x16xbf16>, vector<16x16xbf16>, vector<512x16xf32> -> vector<512x16xf32>
    %10 = tpu.concatenate %7, %9 in 1 : vector<512x16xf32>, vector<512x16xf32> -> vector<512x32xf32>
    %c0_10 = arith.constant 0 : index
    %c0_11 = arith.constant 0 : index
    %11 = vector.load %arg5[%c0_10, %c0_11] : memref<1x32xf32, #tpu.memory_space<vmem>>, vector<1x32xf32>
    %12 = vector.broadcast %11 : vector<1x32xf32> to vector<512x32xf32>
    %13 = arith.addf %10, %12 : vector<512x32xf32>
    %c0_12 = arith.constant 0 : index
    %c0_13 = arith.constant 0 : index
    %14 = vector.load %arg6[%c0_12, %c0_13] : memref<512x32xf32, #tpu.memory_space<vmem>>, vector<512x32xf32>
    tpu.vector_store %arg6[%c0_12, %c0_13], %13 {strides = array<i32>} : memref<512x32xf32, #tpu.memory_space<vmem>>, vector<512x32xf32>,
    return
  }
  func.func @transform_0(%arg0: i32) -> (i32, i32) {
    %c0_i32 = arith.constant 0 : i32
    %c0_i32_0 = arith.constant 0 : i32
    return %arg0, %c0_i32 : i32, i32
  }
  func.func @transform_1(%arg0: i32) -> (i32, i32) {
    %c0_i32 = arith.constant 0 : i32
    %c0_i32_0 = arith.constant 0 : i32
    return %arg0, %c0_i32 : i32, i32
  }
  func.func @transform_2(%arg0: i32) -> (i32, i32) {
    %c0_i32 = arith.constant 0 : i32
    %c0_i32_0 = arith.constant 0 : i32
    %c0_i32_1 = arith.constant 0 : i32
    return %c0_i32, %c0_i32_0 : i32, i32
  }
  func.func @transform_3(%arg0: i32) -> (i32, i32) {
    %c0_i32 = arith.constant 0 : i32
    %c0_i32_0 = arith.constant 0 : i32
    %c0_i32_1 = arith.constant 0 : i32
    return %c0_i32, %c0_i32_0 : i32, i32
  }
  func.func @transform_4(%arg0: i32) -> (i32, i32) {
    %c0_i32 = arith.constant 0 : i32
    %c0_i32_0 = arith.constant 0 : i32
    %c0_i32_1 = arith.constant 0 : i32
    return %c0_i32, %c0_i32_0 : i32, i32
  }
  func.func @transform_5(%arg0: i32) -> (i32, i32) {
    %c0_i32 = arith.constant 0 : i32
    %c0_i32_0 = arith.constant 0 : i32
    return %arg0, %c0_i32 : i32, i32
  }
}

module attributes {stable_mosaic.version = 11 : i64} {
  func.func @_mm_kernel(%arg0: i32, %arg1: memref<512x144xbf16, #tpu.memory_space<vmem>>, %arg2: memref<144x64xbf16, #tpu.memory_space<vmem>>, %arg3: memref<1x64xf32, #tpu.memory_space<vmem>>, %arg4: memref<512x64xf32, #tpu.memory_space<vmem>>) attributes {dimension_semantics = [#tpu.dimension_semantics<parallel>], iteration_bounds = array<i64: 1>, scalar_prefetch = 0 : i64, scratch_operands = 0 : i64, tpu.core_type = #tpu.core_type<tc>, window_params = [{transform_indices = @transform_0, window_bounds = array<i64: 512, 144>}, {pipeline_mode = #tpu.pipeline_mode<synchronous>, transform_indices = @transform_1, window_bounds = array<i64: 144, 64>}, {pipeline_mode = #tpu.pipeline_mode<synchronous>, transform_indices = @transform_2, window_bounds = array<i64: 1, 64>}, {transform_indices = @transform_3, window_bounds = array<i64: 512, 64>}]} {
    %c0 = arith.constant 0 : index
    %c0_0 = arith.constant 0 : index
    %0 = vector.load %arg1[%c0, %c0_0] : memref<512x144xbf16, #tpu.memory_space<vmem>>, vector<512x144xbf16>
    %cst = arith.constant 0.000000e+00 : bf16
    %1 = vector.broadcast %cst : bf16 to vector<512x144xbf16>
    %2 = arith.maximumf %0, %1 : vector<512x144xbf16>
    %c0_1 = arith.constant 0 : index
    %c0_2 = arith.constant 0 : index
    %3 = vector.load %arg2[%c0_1, %c0_2] : memref<144x64xbf16, #tpu.memory_space<vmem>>, vector<144x64xbf16>
    %cst_3 = arith.constant dense<0.000000e+00> : vector<512x64xf32>
    %4 = tpu.matmul %2, %3, %cst_3 {dimension_numbers = #tpu.dot_dimension_numbers<[1], [0], [0], [1], [0, 0, 1, 1], [], []>} : vector<512x144xbf16>, vector<144x64xbf16>, vector<512x64xf32> -> vector<512x64xf32>
    %c0_4 = arith.constant 0 : index
    %c0_5 = arith.constant 0 : index
    %5 = vector.load %arg3[%c0_4, %c0_5] : memref<1x64xf32, #tpu.memory_space<vmem>>, vector<1x64xf32>
    %6 = vector.broadcast %5 : vector<1x64xf32> to vector<512x64xf32>
    %7 = arith.addf %4, %6 : vector<512x64xf32>
    %cst_6 = arith.constant 0.000000e+00 : f32
    %8 = vector.broadcast %cst_6 : f32 to vector<512x64xf32>
    %9 = arith.maximumf %7, %8 : vector<512x64xf32>
    %c0_7 = arith.constant 0 : index
    %c0_8 = arith.constant 0 : index
    %10 = vector.load %arg4[%c0_7, %c0_8] : memref<512x64xf32, #tpu.memory_space<vmem>>, vector<512x64xf32>
    tpu.vector_store %arg4[%c0_7, %c0_8], %9 {strides = array<i32>} : memref<512x64xf32, #tpu.memory_space<vmem>>, vector<512x64xf32>,
    return
  }
  func.func @transform_0(%arg0: i32) -> (i32, i32) {
    %c0_i32 = arith.constant 0 : i32
    %c0_i32_0 = arith.constant 0 : i32
    return %arg0, %c0_i32 : i32, i32
  }
  func.func @transform_1(%arg0: i32) -> (i32, i32) {
    %c0_i32 = arith.constant 0 : i32
    %c0_i32_0 = arith.constant 0 : i32
    %c0_i32_1 = arith.constant 0 : i32
    return %c0_i32, %c0_i32_0 : i32, i32
  }
  func.func @transform_2(%arg0: i32) -> (i32, i32) {
    %c0_i32 = arith.constant 0 : i32
    %c0_i32_0 = arith.constant 0 : i32
    %c0_i32_1 = arith.constant 0 : i32
    return %c0_i32, %c0_i32_0 : i32, i32
  }
  func.func @transform_3(%arg0: i32) -> (i32, i32) {
    %c0_i32 = arith.constant 0 : i32
    %c0_i32_0 = arith.constant 0 : i32
    return %arg0, %c0_i32 : i32, i32
  }
}

module attributes {stable_mosaic.version = 11 : i64} {
  func.func @_mm_res_kernel(%arg0: i32, %arg1: memref<512x576xbf16, #tpu.memory_space<vmem>>, %arg2: memref<576x32xbf16, #tpu.memory_space<vmem>>, %arg3: memref<1x32xf32, #tpu.memory_space<vmem>>, %arg4: memref<512x32xf32, #tpu.memory_space<vmem>>, %arg5: memref<512x32xf32, #tpu.memory_space<vmem>>) attributes {dimension_semantics = [#tpu.dimension_semantics<parallel>], iteration_bounds = array<i64: 1>, scalar_prefetch = 0 : i64, scratch_operands = 0 : i64, tpu.core_type = #tpu.core_type<tc>, window_params = [{transform_indices = @transform_0, window_bounds = array<i64: 512, 576>}, {pipeline_mode = #tpu.pipeline_mode<synchronous>, transform_indices = @transform_1, window_bounds = array<i64: 576, 32>}, {pipeline_mode = #tpu.pipeline_mode<synchronous>, transform_indices = @transform_2, window_bounds = array<i64: 1, 32>}, {transform_indices = @transform_3, window_bounds = array<i64: 512, 32>}, {transform_indices = @transform_4, window_bounds = array<i64: 512, 32>}]} {
    %c0 = arith.constant 0 : index
    %c0_0 = arith.constant 0 : index
    %0 = vector.load %arg1[%c0, %c0_0] : memref<512x576xbf16, #tpu.memory_space<vmem>>, vector<512x576xbf16>
    %c0_1 = arith.constant 0 : index
    %c0_2 = arith.constant 0 : index
    %1 = vector.load %arg2[%c0_1, %c0_2] : memref<576x32xbf16, #tpu.memory_space<vmem>>, vector<576x32xbf16>
    %cst = arith.constant dense<0.000000e+00> : vector<512x32xf32>
    %2 = tpu.matmul %0, %1, %cst {dimension_numbers = #tpu.dot_dimension_numbers<[1], [0], [0], [1], [0, 0, 1, 1], [], []>} : vector<512x576xbf16>, vector<576x32xbf16>, vector<512x32xf32> -> vector<512x32xf32>
    %c0_3 = arith.constant 0 : index
    %c0_4 = arith.constant 0 : index
    %3 = vector.load %arg3[%c0_3, %c0_4] : memref<1x32xf32, #tpu.memory_space<vmem>>, vector<1x32xf32>
    %4 = vector.broadcast %3 : vector<1x32xf32> to vector<512x32xf32>
    %5 = arith.addf %2, %4 : vector<512x32xf32>
    %c0_5 = arith.constant 0 : index
    %c0_6 = arith.constant 0 : index
    %6 = vector.load %arg4[%c0_5, %c0_6] : memref<512x32xf32, #tpu.memory_space<vmem>>, vector<512x32xf32>
    %7 = arith.addf %5, %6 : vector<512x32xf32>
    %c0_7 = arith.constant 0 : index
    %c0_8 = arith.constant 0 : index
    %8 = vector.load %arg5[%c0_7, %c0_8] : memref<512x32xf32, #tpu.memory_space<vmem>>, vector<512x32xf32>
    tpu.vector_store %arg5[%c0_7, %c0_8], %7 {strides = array<i32>} : memref<512x32xf32, #tpu.memory_space<vmem>>, vector<512x32xf32>,
    return
  }
  func.func @transform_0(%arg0: i32) -> (i32, i32) {
    %c0_i32 = arith.constant 0 : i32
    %c0_i32_0 = arith.constant 0 : i32
    return %arg0, %c0_i32 : i32, i32
  }
  func.func @transform_1(%arg0: i32) -> (i32, i32) {
    %c0_i32 = arith.constant 0 : i32
    %c0_i32_0 = arith.constant 0 : i32
    %c0_i32_1 = arith.constant 0 : i32
    return %c0_i32, %c0_i32_0 : i32, i32
  }
  func.func @transform_2(%arg0: i32) -> (i32, i32) {
    %c0_i32 = arith.constant 0 : i32
    %c0_i32_0 = arith.constant 0 : i32
    %c0_i32_1 = arith.constant 0 : i32
    return %c0_i32, %c0_i32_0 : i32, i32
  }
  func.func @transform_3(%arg0: i32) -> (i32, i32) {
    %c0_i32 = arith.constant 0 : i32
    %c0_i32_0 = arith.constant 0 : i32
    return %arg0, %c0_i32 : i32, i32
  }
  func.func @transform_4(%arg0: i32) -> (i32, i32) {
    %c0_i32 = arith.constant 0 : i32
    %c0_i32_0 = arith.constant 0 : i32
    return %arg0, %c0_i32 : i32, i32
  }
}

module attributes {stable_mosaic.version = 11 : i64} {
  func.func @_shortcut_kernel(%arg0: i32, %arg1: memref<128x32xbf16, #tpu.memory_space<vmem>>, %arg2: memref<128x32xbf16, #tpu.memory_space<vmem>>, %arg3: memref<32x32xbf16, #tpu.memory_space<vmem>>, %arg4: memref<32x32xbf16, #tpu.memory_space<vmem>>, %arg5: memref<1x64xf32, #tpu.memory_space<vmem>>, %arg6: memref<128x64xf32, #tpu.memory_space<vmem>>) attributes {dimension_semantics = [#tpu.dimension_semantics<parallel>], iteration_bounds = array<i64: 1>, scalar_prefetch = 0 : i64, scratch_operands = 0 : i64, tpu.core_type = #tpu.core_type<tc>, window_params = [{transform_indices = @transform_0, window_bounds = array<i64: 128, 32>}, {transform_indices = @transform_1, window_bounds = array<i64: 128, 32>}, {pipeline_mode = #tpu.pipeline_mode<synchronous>, transform_indices = @transform_2, window_bounds = array<i64: 32, 32>}, {pipeline_mode = #tpu.pipeline_mode<synchronous>, transform_indices = @transform_3, window_bounds = array<i64: 32, 32>}, {pipeline_mode = #tpu.pipeline_mode<synchronous>, transform_indices = @transform_4, window_bounds = array<i64: 1, 64>}, {transform_indices = @transform_5, window_bounds = array<i64: 128, 64>}]} {
    %c0 = arith.constant 0 : index
    %c0_0 = arith.constant 0 : index
    %0 = vector.load %arg1[%c0, %c0_0] : memref<128x32xbf16, #tpu.memory_space<vmem>>, vector<128x32xbf16>
    %cst = arith.constant 0.000000e+00 : bf16
    %1 = vector.broadcast %cst : bf16 to vector<128x32xbf16>
    %2 = arith.maximumf %0, %1 : vector<128x32xbf16>
    %c0_1 = arith.constant 0 : index
    %c0_2 = arith.constant 0 : index
    %3 = vector.load %arg2[%c0_1, %c0_2] : memref<128x32xbf16, #tpu.memory_space<vmem>>, vector<128x32xbf16>
    %cst_3 = arith.constant 0.000000e+00 : bf16
    %4 = vector.broadcast %cst_3 : bf16 to vector<128x32xbf16>
    %5 = arith.maximumf %3, %4 : vector<128x32xbf16>
    %c0_4 = arith.constant 0 : index
    %c0_5 = arith.constant 0 : index
    %6 = vector.load %arg3[%c0_4, %c0_5] : memref<32x32xbf16, #tpu.memory_space<vmem>>, vector<32x32xbf16>
    %cst_6 = arith.constant dense<0.000000e+00> : vector<128x32xf32>
    %7 = tpu.matmul %2, %6, %cst_6 {dimension_numbers = #tpu.dot_dimension_numbers<[1], [0], [0], [1], [0, 0, 1, 1], [], []>} : vector<128x32xbf16>, vector<32x32xbf16>, vector<128x32xf32> -> vector<128x32xf32>
    %c0_7 = arith.constant 0 : index
    %c0_8 = arith.constant 0 : index
    %8 = vector.load %arg4[%c0_7, %c0_8] : memref<32x32xbf16, #tpu.memory_space<vmem>>, vector<32x32xbf16>
    %cst_9 = arith.constant dense<0.000000e+00> : vector<128x32xf32>
    %9 = tpu.matmul %5, %8, %cst_9 {dimension_numbers = #tpu.dot_dimension_numbers<[1], [0], [0], [1], [0, 0, 1, 1], [], []>} : vector<128x32xbf16>, vector<32x32xbf16>, vector<128x32xf32> -> vector<128x32xf32>
    %10 = tpu.concatenate %7, %9 in 1 : vector<128x32xf32>, vector<128x32xf32> -> vector<128x64xf32>
    %c0_10 = arith.constant 0 : index
    %c0_11 = arith.constant 0 : index
    %11 = vector.load %arg5[%c0_10, %c0_11] : memref<1x64xf32, #tpu.memory_space<vmem>>, vector<1x64xf32>
    %12 = vector.broadcast %11 : vector<1x64xf32> to vector<128x64xf32>
    %13 = arith.addf %10, %12 : vector<128x64xf32>
    %c0_12 = arith.constant 0 : index
    %c0_13 = arith.constant 0 : index
    %14 = vector.load %arg6[%c0_12, %c0_13] : memref<128x64xf32, #tpu.memory_space<vmem>>, vector<128x64xf32>
    tpu.vector_store %arg6[%c0_12, %c0_13], %13 {strides = array<i32>} : memref<128x64xf32, #tpu.memory_space<vmem>>, vector<128x64xf32>,
    return
  }
  func.func @transform_0(%arg0: i32) -> (i32, i32) {
    %c0_i32 = arith.constant 0 : i32
    %c0_i32_0 = arith.constant 0 : i32
    return %arg0, %c0_i32 : i32, i32
  }
  func.func @transform_1(%arg0: i32) -> (i32, i32) {
    %c0_i32 = arith.constant 0 : i32
    %c0_i32_0 = arith.constant 0 : i32
    return %arg0, %c0_i32 : i32, i32
  }
  func.func @transform_2(%arg0: i32) -> (i32, i32) {
    %c0_i32 = arith.constant 0 : i32
    %c0_i32_0 = arith.constant 0 : i32
    %c0_i32_1 = arith.constant 0 : i32
    return %c0_i32, %c0_i32_0 : i32, i32
  }
  func.func @transform_3(%arg0: i32) -> (i32, i32) {
    %c0_i32 = arith.constant 0 : i32
    %c0_i32_0 = arith.constant 0 : i32
    %c0_i32_1 = arith.constant 0 : i32
    return %c0_i32, %c0_i32_0 : i32, i32
  }
  func.func @transform_4(%arg0: i32) -> (i32, i32) {
    %c0_i32 = arith.constant 0 : i32
    %c0_i32_0 = arith.constant 0 : i32
    %c0_i32_1 = arith.constant 0 : i32
    return %c0_i32, %c0_i32_0 : i32, i32
  }
  func.func @transform_5(%arg0: i32) -> (i32, i32) {
    %c0_i32 = arith.constant 0 : i32
    %c0_i32_0 = arith.constant 0 : i32
    return %arg0, %c0_i32 : i32, i32
  }
}

module attributes {stable_mosaic.version = 11 : i64} {
  func.func @_mm_kernel(%arg0: i32, %arg1: memref<128x288xbf16, #tpu.memory_space<vmem>>, %arg2: memref<288x128xbf16, #tpu.memory_space<vmem>>, %arg3: memref<1x128xf32, #tpu.memory_space<vmem>>, %arg4: memref<128x128xf32, #tpu.memory_space<vmem>>) attributes {dimension_semantics = [#tpu.dimension_semantics<parallel>], iteration_bounds = array<i64: 1>, scalar_prefetch = 0 : i64, scratch_operands = 0 : i64, tpu.core_type = #tpu.core_type<tc>, window_params = [{transform_indices = @transform_0, window_bounds = array<i64: 128, 288>}, {pipeline_mode = #tpu.pipeline_mode<synchronous>, transform_indices = @transform_1, window_bounds = array<i64: 288, 128>}, {pipeline_mode = #tpu.pipeline_mode<synchronous>, transform_indices = @transform_2, window_bounds = array<i64: 1, 128>}, {transform_indices = @transform_3, window_bounds = array<i64: 128, 128>}]} {
    %c0 = arith.constant 0 : index
    %c0_0 = arith.constant 0 : index
    %0 = vector.load %arg1[%c0, %c0_0] : memref<128x288xbf16, #tpu.memory_space<vmem>>, vector<128x288xbf16>
    %cst = arith.constant 0.000000e+00 : bf16
    %1 = vector.broadcast %cst : bf16 to vector<128x288xbf16>
    %2 = arith.maximumf %0, %1 : vector<128x288xbf16>
    %c0_1 = arith.constant 0 : index
    %c0_2 = arith.constant 0 : index
    %3 = vector.load %arg2[%c0_1, %c0_2] : memref<288x128xbf16, #tpu.memory_space<vmem>>, vector<288x128xbf16>
    %cst_3 = arith.constant dense<0.000000e+00> : vector<128x128xf32>
    %4 = tpu.matmul %2, %3, %cst_3 {dimension_numbers = #tpu.dot_dimension_numbers<[1], [0], [0], [1], [0, 0, 1, 1], [], []>} : vector<128x288xbf16>, vector<288x128xbf16>, vector<128x128xf32> -> vector<128x128xf32>
    %c0_4 = arith.constant 0 : index
    %c0_5 = arith.constant 0 : index
    %5 = vector.load %arg3[%c0_4, %c0_5] : memref<1x128xf32, #tpu.memory_space<vmem>>, vector<1x128xf32>
    %6 = vector.broadcast %5 : vector<1x128xf32> to vector<128x128xf32>
    %7 = arith.addf %4, %6 : vector<128x128xf32>
    %cst_6 = arith.constant 0.000000e+00 : f32
    %8 = vector.broadcast %cst_6 : f32 to vector<128x128xf32>
    %9 = arith.maximumf %7, %8 : vector<128x128xf32>
    %c0_7 = arith.constant 0 : index
    %c0_8 = arith.constant 0 : index
    %10 = vector.load %arg4[%c0_7, %c0_8] : memref<128x128xf32, #tpu.memory_space<vmem>>, vector<128x128xf32>
    tpu.vector_store %arg4[%c0_7, %c0_8], %9 {strides = array<i32>} : memref<128x128xf32, #tpu.memory_space<vmem>>, vector<128x128xf32>,
    return
  }
  func.func @transform_0(%arg0: i32) -> (i32, i32) {
    %c0_i32 = arith.constant 0 : i32
    %c0_i32_0 = arith.constant 0 : i32
    return %arg0, %c0_i32 : i32, i32
  }
  func.func @transform_1(%arg0: i32) -> (i32, i32) {
    %c0_i32 = arith.constant 0 : i32
    %c0_i32_0 = arith.constant 0 : i32
    %c0_i32_1 = arith.constant 0 : i32
    return %c0_i32, %c0_i32_0 : i32, i32
  }
  func.func @transform_2(%arg0: i32) -> (i32, i32) {
    %c0_i32 = arith.constant 0 : i32
    %c0_i32_0 = arith.constant 0 : i32
    %c0_i32_1 = arith.constant 0 : i32
    return %c0_i32, %c0_i32_0 : i32, i32
  }
  func.func @transform_3(%arg0: i32) -> (i32, i32) {
    %c0_i32 = arith.constant 0 : i32
    %c0_i32_0 = arith.constant 0 : i32
    return %arg0, %c0_i32 : i32, i32
  }
}

module attributes {stable_mosaic.version = 11 : i64} {
  func.func @_mm_res_kernel(%arg0: i32, %arg1: memref<128x1152xbf16, #tpu.memory_space<vmem>>, %arg2: memref<1152x64xbf16, #tpu.memory_space<vmem>>, %arg3: memref<1x64xf32, #tpu.memory_space<vmem>>, %arg4: memref<128x64xf32, #tpu.memory_space<vmem>>, %arg5: memref<128x64xf32, #tpu.memory_space<vmem>>) attributes {dimension_semantics = [#tpu.dimension_semantics<parallel>], iteration_bounds = array<i64: 1>, scalar_prefetch = 0 : i64, scratch_operands = 0 : i64, tpu.core_type = #tpu.core_type<tc>, window_params = [{transform_indices = @transform_0, window_bounds = array<i64: 128, 1152>}, {pipeline_mode = #tpu.pipeline_mode<synchronous>, transform_indices = @transform_1, window_bounds = array<i64: 1152, 64>}, {pipeline_mode = #tpu.pipeline_mode<synchronous>, transform_indices = @transform_2, window_bounds = array<i64: 1, 64>}, {transform_indices = @transform_3, window_bounds = array<i64: 128, 64>}, {transform_indices = @transform_4, window_bounds = array<i64: 128, 64>}]} {
    %c0 = arith.constant 0 : index
    %c0_0 = arith.constant 0 : index
    %0 = vector.load %arg1[%c0, %c0_0] : memref<128x1152xbf16, #tpu.memory_space<vmem>>, vector<128x1152xbf16>
    %c0_1 = arith.constant 0 : index
    %c0_2 = arith.constant 0 : index
    %1 = vector.load %arg2[%c0_1, %c0_2] : memref<1152x64xbf16, #tpu.memory_space<vmem>>, vector<1152x64xbf16>
    %cst = arith.constant dense<0.000000e+00> : vector<128x64xf32>
    %2 = tpu.matmul %0, %1, %cst {dimension_numbers = #tpu.dot_dimension_numbers<[1], [0], [0], [1], [0, 0, 1, 1], [], []>} : vector<128x1152xbf16>, vector<1152x64xbf16>, vector<128x64xf32> -> vector<128x64xf32>
    %c0_3 = arith.constant 0 : index
    %c0_4 = arith.constant 0 : index
    %3 = vector.load %arg3[%c0_3, %c0_4] : memref<1x64xf32, #tpu.memory_space<vmem>>, vector<1x64xf32>
    %4 = vector.broadcast %3 : vector<1x64xf32> to vector<128x64xf32>
    %5 = arith.addf %2, %4 : vector<128x64xf32>
    %c0_5 = arith.constant 0 : index
    %c0_6 = arith.constant 0 : index
    %6 = vector.load %arg4[%c0_5, %c0_6] : memref<128x64xf32, #tpu.memory_space<vmem>>, vector<128x64xf32>
    %7 = arith.addf %5, %6 : vector<128x64xf32>
    %c0_7 = arith.constant 0 : index
    %c0_8 = arith.constant 0 : index
    %8 = vector.load %arg5[%c0_7, %c0_8] : memref<128x64xf32, #tpu.memory_space<vmem>>, vector<128x64xf32>
    tpu.vector_store %arg5[%c0_7, %c0_8], %7 {strides = array<i32>} : memref<128x64xf32, #tpu.memory_space<vmem>>, vector<128x64xf32>,
    return
  }
  func.func @transform_0(%arg0: i32) -> (i32, i32) {
    %c0_i32 = arith.constant 0 : i32
    %c0_i32_0 = arith.constant 0 : i32
    return %arg0, %c0_i32 : i32, i32
  }
  func.func @transform_1(%arg0: i32) -> (i32, i32) {
    %c0_i32 = arith.constant 0 : i32
    %c0_i32_0 = arith.constant 0 : i32
    %c0_i32_1 = arith.constant 0 : i32
    return %c0_i32, %c0_i32_0 : i32, i32
  }
  func.func @transform_2(%arg0: i32) -> (i32, i32) {
    %c0_i32 = arith.constant 0 : i32
    %c0_i32_0 = arith.constant 0 : i32
    %c0_i32_1 = arith.constant 0 : i32
    return %c0_i32, %c0_i32_0 : i32, i32
  }
  func.func @transform_3(%arg0: i32) -> (i32, i32) {
    %c0_i32 = arith.constant 0 : i32
    %c0_i32_0 = arith.constant 0 : i32
    return %arg0, %c0_i32 : i32, i32
  }
  func.func @transform_4(%arg0: i32) -> (i32, i32) {
    %c0_i32 = arith.constant 0 : i32
    %c0_i32_0 = arith.constant 0 : i32
    return %arg0, %c0_i32 : i32, i32
  }
}

module attributes {stable_mosaic.version = 11 : i64} {
  func.func @_relu_meanpool_kernel(%arg0: i32, %arg1: memref<2x64x64xf32, #tpu.memory_space<vmem>>, %arg2: memref<2x64xf32, #tpu.memory_space<vmem>>) attributes {dimension_semantics = [#tpu.dimension_semantics<arbitrary>], iteration_bounds = array<i64: 1>, scalar_prefetch = 0 : i64, scratch_operands = 0 : i64, tpu.core_type = #tpu.core_type<tc>, window_params = [{pipeline_mode = #tpu.pipeline_mode<synchronous>, transform_indices = @transform_0, window_bounds = array<i64: 2, 64, 64>}, {pipeline_mode = #tpu.pipeline_mode<synchronous>, transform_indices = @transform_1, window_bounds = array<i64: 2, 64>}]} {
    %c0 = arith.constant 0 : index
    %c0_0 = arith.constant 0 : index
    %c0_1 = arith.constant 0 : index
    %0 = vector.load %arg1[%c0, %c0_0, %c0_1] : memref<2x64x64xf32, #tpu.memory_space<vmem>>, vector<2x64x64xf32>
    %cst = arith.constant 0.000000e+00 : f32
    %1 = vector.broadcast %cst : f32 to vector<2x64x64xf32>
    %2 = arith.maximumf %0, %1 : vector<2x64x64xf32>
    %cst_2 = arith.constant dense<0.000000e+00> : vector<2x64xf32>
    %3 = vector.multi_reduction <add>, %2, %cst_2 [1] : vector<2x64x64xf32> to vector<2x64xf32>
    %cst_3 = arith.constant 6.400000e+01 : f32
    %4 = vector.broadcast %cst_3 : f32 to vector<2x64xf32>
    %5 = arith.divf %3, %4 : vector<2x64xf32>
    %c0_4 = arith.constant 0 : index
    %c0_5 = arith.constant 0 : index
    %6 = vector.load %arg2[%c0_4, %c0_5] : memref<2x64xf32, #tpu.memory_space<vmem>>, vector<2x64xf32>
    tpu.vector_store %arg2[%c0_4, %c0_5], %5 {strides = array<i32>} : memref<2x64xf32, #tpu.memory_space<vmem>>, vector<2x64xf32>,
    return
  }
  func.func @transform_0(%arg0: i32) -> (i32, i32, i32) {
    %c0_i32 = arith.constant 0 : i32
    %c0_i32_0 = arith.constant 0 : i32
    %c0_i32_1 = arith.constant 0 : i32
    %c0_i32_2 = arith.constant 0 : i32
    return %c0_i32, %c0_i32_0, %c0_i32_1 : i32, i32, i32
  }
  func.func @transform_1(%arg0: i32) -> (i32, i32) {
    %c0_i32 = arith.constant 0 : i32
    %c0_i32_0 = arith.constant 0 : i32
    %c0_i32_1 = arith.constant 0 : i32
    return %c0_i32, %c0_i32_0 : i32, i32
  }
}

module attributes {stable_mosaic.version = 11 : i64} {
  func.func @_mm_kernel(%arg0: i32, %arg1: memref<2x64xbf16, #tpu.memory_space<vmem>>, %arg2: memref<64x10xbf16, #tpu.memory_space<vmem>>, %arg3: memref<1x10xf32, #tpu.memory_space<vmem>>, %arg4: memref<2x10xf32, #tpu.memory_space<vmem>>) attributes {dimension_semantics = [#tpu.dimension_semantics<parallel>], iteration_bounds = array<i64: 1>, scalar_prefetch = 0 : i64, scratch_operands = 0 : i64, tpu.core_type = #tpu.core_type<tc>, window_params = [{transform_indices = @transform_0, window_bounds = array<i64: 2, 64>}, {pipeline_mode = #tpu.pipeline_mode<synchronous>, transform_indices = @transform_1, window_bounds = array<i64: 64, 10>}, {pipeline_mode = #tpu.pipeline_mode<synchronous>, transform_indices = @transform_2, window_bounds = array<i64: 1, 10>}, {transform_indices = @transform_3, window_bounds = array<i64: 2, 10>}]} {
    %c0 = arith.constant 0 : index
    %c0_0 = arith.constant 0 : index
    %0 = vector.load %arg1[%c0, %c0_0] : memref<2x64xbf16, #tpu.memory_space<vmem>>, vector<2x64xbf16>
    %c0_1 = arith.constant 0 : index
    %c0_2 = arith.constant 0 : index
    %1 = vector.load %arg2[%c0_1, %c0_2] : memref<64x10xbf16, #tpu.memory_space<vmem>>, vector<64x10xbf16>
    %cst = arith.constant dense<0.000000e+00> : vector<2x10xf32>
    %2 = tpu.matmul %0, %1, %cst {dimension_numbers = #tpu.dot_dimension_numbers<[1], [0], [0], [1], [0, 0, 1, 1], [], []>} : vector<2x64xbf16>, vector<64x10xbf16>, vector<2x10xf32> -> vector<2x10xf32>
    %c0_3 = arith.constant 0 : index
    %c0_4 = arith.constant 0 : index
    %3 = vector.load %arg3[%c0_3, %c0_4] : memref<1x10xf32, #tpu.memory_space<vmem>>, vector<1x10xf32>
    %4 = vector.broadcast %3 : vector<1x10xf32> to vector<2x10xf32>
    %5 = arith.addf %2, %4 : vector<2x10xf32>
    %c0_5 = arith.constant 0 : index
    %c0_6 = arith.constant 0 : index
    %6 = vector.load %arg4[%c0_5, %c0_6] : memref<2x10xf32, #tpu.memory_space<vmem>>, vector<2x10xf32>
    tpu.vector_store %arg4[%c0_5, %c0_6], %5 {strides = array<i32>} : memref<2x10xf32, #tpu.memory_space<vmem>>, vector<2x10xf32>,
    return
  }
  func.func @transform_0(%arg0: i32) -> (i32, i32) {
    %c0_i32 = arith.constant 0 : i32
    %c0_i32_0 = arith.constant 0 : i32
    return %arg0, %c0_i32 : i32, i32
  }
  func.func @transform_1(%arg0: i32) -> (i32, i32) {
    %c0_i32 = arith.constant 0 : i32
    %c0_i32_0 = arith.constant 0 : i32
    %c0_i32_1 = arith.constant 0 : i32
    return %c0_i32, %c0_i32_0 : i32, i32
  }
  func.func @transform_2(%arg0: i32) -> (i32, i32) {
    %c0_i32 = arith.constant 0 : i32
    %c0_i32_0 = arith.constant 0 : i32
    %c0_i32_1 = arith.constant 0 : i32
    return %c0_i32, %c0_i32_0 : i32, i32
  }
  func.func @transform_3(%arg0: i32) -> (i32, i32) {
    %c0_i32 = arith.constant 0 : i32
    %c0_i32_0 = arith.constant 0 : i32
    return %arg0, %c0_i32 : i32, i32
  }
}

</mosaic_0001>

<bundles_post_ra>
// kernel: shake_resnet_forward.12
= control target key start
LH: loop header
LB: loop body
LE: loop exit
PB: predicated region body
PF: predicated region fallthrough
CT: control target
= control target key end

     0   :  { %s550_s12 = smov 0   ;;  %s901_s0 = inlined_call_operand.vmem [shape: f32[2048,3], index: 0, kind: input, shape index: {}]   ;;  %s902_s1 = inlined_call_operand.vmem [shape: f32[1,3], index: 1, kind: input, shape index: {}]   ;;  %s903_s2 = inlined_call_operand.vmem [shape: f32[1,3], index: 2, kind: input, shape index: {}]   ;;  %s904_s3 = inlined_call_operand.vmem [shape: f32[2048,3], index: 3, kind: output, shape index: {}]  }
   0x1 LB: > { %s501_s13 = sadd.s32 4294967295, %s528_s12   ;;  %p505_p0 = scmp.ge.s32.totalorder %s528_s12, 1  ;;  %s528_s12 = sphi %s550_s12, %s13_s12  }
   0x2   : > { %p138_p1 = scmp.lt.s32.totalorder %s528_s12, 5 }
   0x4   : > { %p139_p2 = pnand %p505_p0, %p138_p1 }
   0x5   : > { %s506_s14 = sshll.u32 (!%p139_p2), %s501_s13, 6  ;;  %v561_v0 = vld [vmem:[%s902_s1] ss:$0 sm:$0xff] (!%p139_p2)  ;;  %vm380_vm0 = vcmask (!%p139_p2), 23552  }
   0x6   : > { %142 = sbr.rel (%p139_p2) target bundleno = 59 (0x3b), region = 32  ;;  %p163_p3 = scmp.lt.s32.totalorder (!%p139_p2), %s506_s14, 255  ;;  %v571_v1 = vld [vmem:[%s903_s2] ss:$0 sm:$0xff] (!%p139_p2) }
   0xd   : > { %s906_s14 = smov (!%p163_p3, %s506_s14), 255 }
   0xe   : > { %s507_s15 = sshll.u32 %s906_s14, 3 }
   0xf   : > { %s566_s20 = scalar_lea.vmem %s901_s0, %s507_s15  ;;  %s585_s25 = scalar_lea.vmem %s904_s3, %s507_s15 }
  0x10   : > { %v174_v2 = vld [vmem:[%s566_s20] sm:$0xff]  ;;  %v175_v3 = vld [vmem:[%s566_s20 + $0x8] sm:$0xff]  ;;  %v176_v4 = vld [vmem:[%s566_s20 + $0x10] sm:$0xff] }
  0x11   : > { %v245_v5 = vmul.f32 %v561_v0, %v174_v2  ;;  %v246_v6 = vmul.f32 %v561_v0, %v175_v3  ;;  %v247_v7 = vmul.f32 %v561_v0, %v176_v4  ;;  %v177_v8 = vld [vmem:[%s566_s20 + $0x18] sm:$0xff]  ;;  %v178_v9 = vld [vmem:[%s566_s20 + $0x20] sm:$0xff]  ;;  %v179_v10 = vld [vmem:[%s566_s20 + $0x28] sm:$0xff] }
  0x12   : > { %v248_v11 = vmul.f32 %v561_v0, %v177_v8  ;;  %v249_v12 = vmul.f32 %v561_v0, %v178_v9  ;;  %v250_v13 = vmul.f32 %v561_v0, %v179_v10  ;;  %v180_v14 = vld [vmem:[%s566_s20 + $0x30] sm:$0xff]  ;;  %v181_v15 = vld [vmem:[%s566_s20 + $0x38] sm:$0xff]  ;;  %v182_v16 = vld [vmem:[%s566_s20 + $0x40] sm:$0xff] }
  0x13   : > { %v316_v17 = vadd.f32 %v571_v1, %v245_v5  ;;  %v317_v18 = vadd.f32 %v571_v1, %v246_v6  ;;  %v318_v19 = vadd.f32 %v571_v1, %v247_v7  ;;  %v251_v20 = vmul.f32 %v561_v0, %v180_v14  ;;  %v183_v21 = vld [vmem:[%s566_s20 + $0x48] sm:$0xff]  ;;  %v184_v22 = vld [vmem:[%s566_s20 + $0x50] sm:$0xff]  ;;  %v185_v23 = vld [vmem:[%s566_s20 + $0x58] sm:$0xff] }
  0x14   : > { %v319_v24 = vadd.f32 %v571_v1, %v248_v11  ;;  %v320_v25 = vadd.f32 %v571_v1, %v249_v12  ;;  %v321_v26 = vadd.f32 %v571_v1, %v250_v13  ;;  %v252_v27 = vmul.f32 %v561_v0, %v181_v15  ;;  %v186_v28 = vld [vmem:[%s566_s20 + $0x60] sm:$0xff]  ;;  %v187_v29 = vld [vmem:[%s566_s20 + $0x68] sm:$0xff]  ;;  %v188_v30 = vld [vmem:[%s566_s20 + $0x70] sm:$0xff] }
  0x15   : > { %381 = vst.msk [vmem:[%s585_s25] sm:$0xff] %vm380_vm0, %v316_v17  ;;  %382 = vst.msk [vmem:[%s585_s25 + $0x8] sm:$0xff] %vm380_vm0, %v317_v18  ;;  %v322_v31 = vadd.f32 %v571_v1, %v251_v20  ;;  %v253_v32 = vmul.f32 %v561_v0, %v182_v16  ;;  %v254_v33 = vmul.f32 %v561_v0, %v183_v21  ;;  %v189_v35 = vld [vmem:[%s566_s20 + $0x78] sm:$0xff]  ;;  %v190_v40 = vld [vmem:[%s566_s20 + $0x80] sm:$0xff] }
  0x16   : > { %383 = vst.msk [vmem:[%s585_s25 + $0x10] sm:$0xff] %vm380_vm0, %v318_v19  ;;  %v255_v34 = vmul.f32 %v561_v0, %v184_v22  ;;  %384 = vst.msk [vmem:[%s585_s25 + $0x18] sm:$0xff] %vm380_vm0, %v319_v24  ;;  %v323_v36 = vadd.f32 %v571_v1, %v252_v27  ;;  %v256_v37 = vmul.f32 %v561_v0, %v185_v23  ;;  %v191_v41 = vld [vmem:[%s566_s20 + $0x88] sm:$0xff]  ;;  %v192_v42 = vld [vmem:[%s566_s20 + $0x90] sm:$0xff] }
  0x17   : > { %385 = vst.msk [vmem:[%s585_s25 + $0x20] sm:$0xff] %vm380_vm0, %v320_v25  ;;  %386 = vst.msk [vmem:[%s585_s25 + $0x28] sm:$0xff] %vm380_vm0, %v321_v26  ;;  %v257_v38 = vmul.f32 %v561_v0, %v186_v28  ;;  %v258_v39 = vmul.f32 %v561_v0, %v187_v29  ;;  %v324_v43 = vadd.f32 %v571_v1, %v253_v32  ;;  %v193_v47 = vld [vmem:[%s566_s20 + $0x98] sm:$0xff]  ;;  %v194_v48 = vld [vmem:[%s566_s20 + $0xa0] sm:$0xff] }
  0x18   : > { %387 = vst.msk [vmem:[%s585_s25 + $0x30] sm:$0xff] %vm380_vm0, %v322_v31  ;;  %v325_v44 = vadd.f32 %v571_v1, %v254_v33  ;;  %v326_v45 = vadd.f32 %v571_v1, %v255_v34  ;;  %v259_v46 = vmul.f32 %v561_v0, %v188_v30  ;;  %v195_v49 = vld [vmem:[%s566_s20 + $0xa8] sm:$0xff]  ;;  %388 = vst.msk [vmem:[%s585_s25 + $0x38] sm:$0xff] %vm380_vm0, %v323_v36  ;;  %v196_v54 = vld [vmem:[%s566_s20 + $0xb0] sm:$0xff] }
  0x19   : > { %v327_v50 = vadd.f32 %v571_v1, %v256_v37  ;;  %v328_v51 = vadd.f32 %v571_v1, %v257_v38  ;;  %v329_v52 = vadd.f32 %v571_v1, %v258_v39  ;;  %v260_v53 = vmul.f32 %v561_v0, %v189_v35  ;;  %389 = vst.msk [vmem:[%s585_s25 + $0x40] sm:$0xff] %vm380_vm0, %v324_v43  ;;  %v197_v59 = vld [vmem:[%s566_s20 + $0xb8] sm:$0xff]  ;;  %v198_v2 = vld [vmem:[%s566_s20 + $0xc0] sm:$0xff]  ;;  %v199_v3 = vld [vmem:[%s566_s20 + $0xc8] sm:$0xff] }
  0x1a   : > { %390 = vst.msk [vmem:[%s585_s25 + $0x48] sm:$0xff] %vm380_vm0, %v325_v44  ;;  %391 = vst.msk [vmem:[%s585_s25 + $0x50] sm:$0xff] %vm380_vm0, %v326_v45  ;;  %v330_v55 = vadd.f32 %v571_v1, %v259_v46  ;;  %v261_v56 = vmul.f32 %v561_v0, %v190_v40  ;;  %v262_v57 = vmul.f32 %v561_v0, %v191_v41  ;;  %v200_v4 = vld [vmem:[%s566_s20 + $0xd0] sm:$0xff]  ;;  %v201_v9 = vld [vmem:[%s566_s20 + $0xd8] sm:$0xff] }
  0x1b   : > { %v263_v58 = vmul.f32 %v561_v0, %v192_v42  ;;  %392 = vst.msk [vmem:[%s585_s25 + $0x58] sm:$0xff] %vm380_vm0, %v327_v50  ;;  %393 = vst.msk [vmem:[%s585_s25 + $0x60] sm:$0xff] %vm380_vm0, %v328_v51  ;;  %v331_v60 = vadd.f32 %v571_v1, %v260_v53  ;;  %v264_v61 = vmul.f32 %v561_v0, %v193_v47  ;;  %v202_v10 = vld [vmem:[%s566_s20 + $0xe0] sm:$0xff]  ;;  %v203_v11 = vld [vmem:[%s566_s20 + $0xe8] sm:$0xff] }
  0x1c   : > { %394 = vst.msk [vmem:[%s585_s25 + $0x68] sm:$0xff] %vm380_vm0, %v329_v52  ;;  %v265_v62 = vmul.f32 %v561_v0, %v194_v48  ;;  %v266_v63 = vmul.f32 %v561_v0, %v195_v49  ;;  %395 = vst.msk [vmem:[%s585_s25 + $0x70] sm:$0xff] %vm380_vm0, %v330_v55  ;;  %v332_v5 = vadd.f32 %v571_v1, %v261_v56  ;;  %v204_v16 = vld [vmem:[%s566_s20 + $0xf0] sm:$0xff]  ;;  %v205_v21 = vld [vmem:[%s566_s20 + $0xf8] sm:$0xff] }
  0x1d   : > { %v333_v6 = vadd.f32 %v571_v1, %v262_v57  ;;  %v334_v7 = vadd.f32 %v571_v1, %v263_v58  ;;  %v267_v8 = vmul.f32 %v561_v0, %v196_v54  ;;  %396 = vst.msk [vmem:[%s585_s25 + $0x78] sm:$0xff] %vm380_vm0, %v331_v60  ;;  %v335_v12 = vadd.f32 %v571_v1, %v264_v61  ;;  %v206_v26 = vld [vmem:[%s566_s20 + $0x100] sm:$0xff]  ;;  %v207_v27 = vld [vmem:[%s566_s20 + $0x108] sm:$0xff]  ;;  %v208_v28 = vld [vmem:[%s566_s20 + $0x110] sm:$0xff] }
  0x1e   : > { %v336_v13 = vadd.f32 %v571_v1, %v265_v62  ;;  %v337_v14 = vadd.f32 %v571_v1, %v266_v63  ;;  %v268_v15 = vmul.f32 %v561_v0, %v197_v59  ;;  %397 = vst.msk [vmem:[%s585_s25 + $0x80] sm:$0xff] %vm380_vm0, %v332_v5  ;;  %v269_v18 = vmul.f32 %v561_v0, %v198_v2  ;;  %v209_v33 = vld [vmem:[%s566_s20 + $0x118] sm:$0xff]  ;;  %v210_v34 = vld [vmem:[%s566_s20 + $0x120] sm:$0xff]  ;;  %v211_v35 = vld [vmem:[%s566_s20 + $0x128] sm:$0xff] }
  0x1f   : > { %398 = vst.msk [vmem:[%s585_s25 + $0x88] sm:$0xff] %vm380_vm0, %v333_v6  ;;  %399 = vst.msk [vmem:[%s585_s25 + $0x90] sm:$0xff] %vm380_vm0, %v334_v7  ;;  %v338_v17 = vadd.f32 %v571_v1, %v267_v8  ;;  %v270_v19 = vmul.f32 %v561_v0, %v199_v3  ;;  %v271_v20 = vmul.f32 %v561_v0, %v200_v4  ;;  %v212_v40 = vld [vmem:[%s566_s20 + $0x130] sm:$0xff]  ;;  %v213_v45 = vld [vmem:[%s566_s20 + $0x138] sm:$0xff] }
  0x20   : > { %400 = vst.msk [vmem:[%s585_s25 + $0x98] sm:$0xff] %vm380_vm0, %v335_v12  ;;  %401 = vst.msk [vmem:[%s585_s25 + $0xa0] sm:$0xff] %vm380_vm0, %v336_v13  ;;  %v339_v22 = vadd.f32 %v571_v1, %v268_v15  ;;  %v272_v23 = vmul.f32 %v561_v0, %v201_v9  ;;  %v273_v24 = vmul.f32 %v561_v0, %v202_v10  ;;  %v214_v50 = vld [vmem:[%s566_s20 + $0x140] sm:$0xff]  ;;  %v215_v51 = vld [vmem:[%s566_s20 + $0x148] sm:$0xff] }
  0x21   : > { %402 = vst.msk [vmem:[%s585_s25 + $0xa8] sm:$0xff] %vm380_vm0, %v337_v14  ;;  %v274_v25 = vmul.f32 %v561_v0, %v203_v11  ;;  %403 = vst.msk [vmem:[%s585_s25 + $0xb0] sm:$0xff] %vm380_vm0, %v338_v17  ;;  %v340_v29 = vadd.f32 %v571_v1, %v269_v18  ;;  %v341_v30 = vadd.f32 %v571_v1, %v270_v19  ;;  %v216_v52 = vld [vmem:[%s566_s20 + $0x150] sm:$0xff]  ;;  %v217_v57 = vld [vmem:[%s566_s20 + $0x158] sm:$0xff] }
  0x22   : > { %v342_v31 = vadd.f32 %v571_v1, %v271_v20  ;;  %v275_v32 = vmul.f32 %v561_v0, %v204_v16  ;;  %404 = vst.msk [vmem:[%s585_s25 + $0xb8] sm:$0xff] %vm380_vm0, %v339_v22  ;;  %v343_v36 = vadd.f32 %v571_v1, %v272_v23  ;;  %v344_v37 = vadd.f32 %v571_v1, %v273_v24  ;;  %v218_v58 = vld [vmem:[%s566_s20 + $0x160] sm:$0xff]  ;;  %v219_v59 = vld [vmem:[%s566_s20 + $0x168] sm:$0xff]  ;;  %v220_v2 = vld [vmem:[%s566_s20 + $0x170] sm:$0xff] }
  0x23   : > { %v345_v38 = vadd.f32 %v571_v1, %v274_v25  ;;  %v276_v39 = vmul.f32 %v561_v0, %v205_v21  ;;  %405 = vst.msk [vmem:[%s585_s25 + $0xc0] sm:$0xff] %vm380_vm0, %v340_v29  ;;  %406 = vst.msk [vmem:[%s585_s25 + $0xc8] sm:$0xff] %vm380_vm0, %v341_v30  ;;  %v277_v42 = vmul.f32 %v561_v0, %v206_v26  ;;  %v221_v7 = vld [vmem:[%s566_s20 + $0x178] sm:$0xff]  ;;  %v222_v12 = vld [vmem:[%s566_s20 + $0x180] sm:$0xff] }
  0x24   : > { %407 = vst.msk [vmem:[%s585_s25 + $0xd0] sm:$0xff] %vm380_vm0, %v342_v31  ;;  %v346_v41 = vadd.f32 %v571_v1, %v275_v32  ;;  %v278_v43 = vmul.f32 %v561_v0, %v207_v27  ;;  %v279_v44 = vmul.f32 %v561_v0, %v208_v28  ;;  %408 = vst.msk [vmem:[%s585_s25 + $0xd8] sm:$0xff] %vm380_vm0, %v343_v36  ;;  %v223_v13 = vld [vmem:[%s566_s20 + $0x188] sm:$0xff]  ;;  %v224_v14 = vld [vmem:[%s566_s20 + $0x190] sm:$0xff] }
  0x25   : > { %409 = vst.msk [vmem:[%s585_s25 + $0xe0] sm:$0xff] %vm380_vm0, %v344_v37  ;;  %410 = vst.msk [vmem:[%s585_s25 + $0xe8] sm:$0xff] %vm380_vm0, %v345_v38  ;;  %v347_v46 = vadd.f32 %v571_v1, %v276_v39  ;;  %v280_v47 = vmul.f32 %v561_v0, %v209_v33  ;;  %v281_v48 = vmul.f32 %v561_v0, %v210_v34  ;;  %v225_v19 = vld [vmem:[%s566_s20 + $0x198] sm:$0xff]  ;;  %v226_v20 = vld [vmem:[%s566_s20 + $0x1a0] sm:$0xff] }
  0x26   : > { %v282_v49 = vmul.f32 %v561_v0, %v211_v35  ;;  %411 = vst.msk [vmem:[%s585_s25 + $0xf0] sm:$0xff] %vm380_vm0, %v346_v41  ;;  %v348_v53 = vadd.f32 %v571_v1, %v277_v42  ;;  %v349_v54 = vadd.f32 %v571_v1, %v278_v43  ;;  %v350_v55 = vadd.f32 %v571_v1, %v279_v44  ;;  %v227_v21 = vld [vmem:[%s566_s20 + $0x1a8] sm:$0xff]  ;;  %v228_v26 = vld [vmem:[%s566_s20 + $0x1b0] sm:$0xff]  ;;  %v229_v31 = vld [vmem:[%s566_s20 + $0x1b8] sm:$0xff] }
  0x27   : > { %v283_v56 = vmul.f32 %v561_v0, %v212_v40  ;;  %412 = vst.msk [vmem:[%s585_s25 + $0xf8] sm:$0xff] %vm380_vm0, %v347_v46  ;;  %v351_v60 = vadd.f32 %v571_v1, %v280_v47  ;;  %v352_v61 = vadd.f32 %v571_v1, %v281_v48  ;;  %v284_v63 = vmul.f32 %v561_v0, %v213_v45  ;;  %v230_v36 = vld [vmem:[%s566_s20 + $0x1c0] sm:$0xff]  ;;  %v231_v37 = vld [vmem:[%s566_s20 + $0x1c8] sm:$0xff]  ;;  %v232_v38 = vld [vmem:[%s566_s20 + $0x1d0] sm:$0xff] }
  0x28   : > { %v353_v62 = vadd.f32 %v571_v1, %v282_v49  ;;  %413 = vst.msk [vmem:[%s585_s25 + $0x100] sm:$0xff] %vm380_vm0, %v348_v53  ;;  %414 = vst.msk [vmem:[%s585_s25 + $0x108] sm:$0xff] %vm380_vm0, %v349_v54  ;;  %v285_v4 = vmul.f32 %v561_v0, %v214_v50  ;;  %v286_v5 = vmul.f32 %v561_v0, %v215_v51  ;;  %v233_v43 = vld [vmem:[%s566_s20 + $0x1d8] sm:$0xff]  ;;  %v234_v44 = vld [vmem:[%s566_s20 + $0x1e0] sm:$0xff] }
  0x29   : > { %415 = vst.msk [vmem:[%s585_s25 + $0x110] sm:$0xff] %vm380_vm0, %v350_v55  ;;  %v354_v3 = vadd.f32 %v571_v1, %v283_v56  ;;  %v287_v6 = vmul.f32 %v561_v0, %v216_v52  ;;  %416 = vst.msk [vmem:[%s585_s25 + $0x118] sm:$0xff] %vm380_vm0, %v351_v60  ;;  %v355_v8 = vadd.f32 %v571_v1, %v284_v63  ;;  %v235_v45 = vld [vmem:[%s566_s20 + $0x1e8] sm:$0xff]  ;;  %v236_v50 = vld [vmem:[%s566_s20 + $0x1f0] sm:$0xff] }
  0x2a   : > { %417 = vst.msk [vmem:[%s585_s25 + $0x120] sm:$0xff] %vm380_vm0, %v352_v61  ;;  %418 = vst.msk [vmem:[%s585_s25 + $0x128] sm:$0xff] %vm380_vm0, %v353_v62  ;;  %v288_v9 = vmul.f32 %v561_v0, %v217_v57  ;;  %v289_v10 = vmul.f32 %v561_v0, %v218_v58  ;;  %v290_v11 = vmul.f32 %v561_v0, %v219_v59  ;;  %v237_v55 = vld [vmem:[%s566_s20 + $0x1f8] sm:$0xff] }
  0x2b   : > { %419 = vst.msk [vmem:[%s585_s25 + $0x130] sm:$0xff] %vm380_vm0, %v354_v3  ;;  %v356_v15 = vadd.f32 %v571_v1, %v285_v4  ;;  %v357_v16 = vadd.f32 %v571_v1, %v286_v5  ;;  %v358_v17 = vadd.f32 %v571_v1, %v287_v6  ;;  %v291_v18 = vmul.f32 %v561_v0, %v220_v2 }
  0x2c   : > { %420 = vst.msk [vmem:[%s585_s25 + $0x138] sm:$0xff] %vm380_vm0, %v355_v8  ;;  %v359_v22 = vadd.f32 %v571_v1, %v288_v9  ;;  %v360_v23 = vadd.f32 %v571_v1, %v289_v10  ;;  %v361_v24 = vadd.f32 %v571_v1, %v290_v11  ;;  %v292_v25 = vmul.f32 %v561_v0, %v221_v7 }
  0x2d   : > { %421 = vst.msk [vmem:[%s585_s25 + $0x140] sm:$0xff] %vm380_vm0, %v356_v15  ;;  %422 = vst.msk [vmem:[%s585_s25 + $0x148] sm:$0xff] %vm380_vm0, %v357_v16  ;;  %v362_v27 = vadd.f32 %v571_v1, %v291_v18  ;;  %v293_v28 = vmul.f32 %v561_v0, %v222_v12  ;;  %v294_v29 = vmul.f32 %v561_v0, %v223_v13 }
  0x2e   : > { %423 = vst.msk [vmem:[%s585_s25 + $0x150] sm:$0xff] %vm380_vm0, %v358_v17  ;;  %v295_v30 = vmul.f32 %v561_v0, %v224_v14  ;;  %424 = vst.msk [vmem:[%s585_s25 + $0x158] sm:$0xff] %vm380_vm0, %v359_v22  ;;  %v363_v32 = vadd.f32 %v571_v1, %v292_v25  ;;  %v296_v33 = vmul.f32 %v561_v0, %v225_v19 }
  0x2f   : > { %425 = vst.msk [vmem:[%s585_s25 + $0x160] sm:$0xff] %vm380_vm0, %v360_v23  ;;  %426 = vst.msk [vmem:[%s585_s25 + $0x168] sm:$0xff] %vm380_vm0, %v361_v24  ;;  %v297_v34 = vmul.f32 %v561_v0, %v226_v20  ;;  %v298_v35 = vmul.f32 %v561_v0, %v227_v21  ;;  %v364_v39 = vadd.f32 %v571_v1, %v293_v28 }
  0x30   : > { %427 = vst.msk [vmem:[%s585_s25 + $0x170] sm:$0xff] %vm380_vm0, %v362_v27  ;;  %v365_v40 = vadd.f32 %v571_v1, %v294_v29  ;;  %v366_v41 = vadd.f32 %v571_v1, %v295_v30  ;;  %v299_v42 = vmul.f32 %v561_v0, %v228_v26  ;;  %428 = vst.msk [vmem:[%s585_s25 + $0x178] sm:$0xff] %vm380_vm0, %v363_v32 }
  0x31   : > { %v367_v46 = vadd.f32 %v571_v1, %v296_v33  ;;  %v368_v47 = vadd.f32 %v571_v1, %v297_v34  ;;  %v369_v48 = vadd.f32 %v571_v1, %v298_v35  ;;  %v300_v49 = vmul.f32 %v561_v0, %v229_v31  ;;  %429 = vst.msk [vmem:[%s585_s25 + $0x180] sm:$0xff] %vm380_vm0, %v364_v39 }
  0x32   : > { %430 = vst.msk [vmem:[%s585_s25 + $0x188] sm:$0xff] %vm380_vm0, %v365_v40  ;;  %431 = vst.msk [vmem:[%s585_s25 + $0x190] sm:$0xff] %vm380_vm0, %v366_v41  ;;  %v370_v51 = vadd.f32 %v571_v1, %v299_v42  ;;  %v301_v52 = vmul.f32 %v561_v0, %v230_v36  ;;  %v302_v53 = vmul.f32 %v561_v0, %v231_v37 }
  0x33   : > { %v303_v54 = vmul.f32 %v561_v0, %v232_v38  ;;  %432 = vst.msk [vmem:[%s585_s25 + $0x198] sm:$0xff] %vm380_vm0, %v367_v46  ;;  %433 = vst.msk [vmem:[%s585_s25 + $0x1a0] sm:$0xff] %vm380_vm0, %v368_v47  ;;  %v371_v56 = vadd.f32 %v571_v1, %v300_v49  ;;  %v304_v57 = vmul.f32 %v561_v0, %v233_v43 }
  0x34   : > { %434 = vst.msk [vmem:[%s585_s25 + $0x1a8] sm:$0xff] %vm380_vm0, %v369_v48  ;;  %v305_v58 = vmul.f32 %v561_v0, %v234_v44  ;;  %v306_v59 = vmul.f32 %v561_v0, %v235_v45  ;;  %435 = vst.msk [vmem:[%s585_s25 + $0x1b0] sm:$0xff] %vm380_vm0, %v370_v51  ;;  %v372_v60 = vadd.f32 %v571_v1, %v301_v52 }
  0x35   : > { %v373_v61 = vadd.f32 %v571_v1, %v302_v53  ;;  %v374_v62 = vadd.f32 %v571_v1, %v303_v54  ;;  %v307_v63 = vmul.f32 %v561_v0, %v236_v50  ;;  %436 = vst.msk [vmem:[%s585_s25 + $0x1b8] sm:$0xff] %vm380_vm0, %v371_v56  ;;  %v375_v2 = vadd.f32 %v571_v1, %v304_v57 }
  0x36   : > { %v376_v3 = vadd.f32 %v571_v1, %v305_v58  ;;  %v377_v4 = vadd.f32 %v571_v1, %v306_v59  ;;  %v308_v5 = vmul.f32 %v561_v0, %v237_v55  ;;  %437 = vst.msk [vmem:[%s585_s25 + $0x1c0] sm:$0xff] %vm380_vm0, %v372_v60 }
  0x37   : > { %438 = vst.msk [vmem:[%s585_s25 + $0x1c8] sm:$0xff] %vm380_vm0, %v373_v61  ;;  %439 = vst.msk [vmem:[%s585_s25 + $0x1d0] sm:$0xff] %vm380_vm0, %v374_v62  ;;  %v378_v6 = vadd.f32 %v571_v1, %v307_v63 }
  0x38   : > { %440 = vst.msk [vmem:[%s585_s25 + $0x1d8] sm:$0xff] %vm380_vm0, %v375_v2  ;;  %441 = vst.msk [vmem:[%s585_s25 + $0x1e0] sm:$0xff] %vm380_vm0, %v376_v3  ;;  %v379_v7 = vadd.f32 %v571_v1, %v308_v5 }
  0x39   : > { %442 = vst.msk [vmem:[%s585_s25 + $0x1e8] sm:$0xff] %vm380_vm0, %v377_v4  ;;  %443 = vst.msk [vmem:[%s585_s25 + $0x1f0] sm:$0xff] %vm380_vm0, %v378_v6 }
  0x3a   : > { %444 = vst.msk [vmem:[%s585_s25 + $0x1f8] sm:$0xff] %vm380_vm0, %v379_v7 }
  0x3b PF: > { %s13_s12 = sadd.s32 1, %s528_s12  }
  0x3c   : > { %p10_p4 = scmp.ge.s32.totalorder %s13_s12, 6  }
  0x3e   :  { %12 = sbr.rel (!%p10_p4) target bundleno = 1 (0x1), region = 62 }

// kernel: shake_resnet_forward.13
= control target key start
LH: loop header
LB: loop body
LE: loop exit
PB: predicated region body
PF: predicated region fallthrough
CT: control target
= control target key end

     0   :  { %s1191_s12 = smov 0   ;;  %s1483_s0 = inlined_call_operand.vmem [shape: bf16[2048,27], index: 0, kind: input, shape index: {}]   ;;  %s1484_s1 = inlined_call_operand.vmem [shape: bf16[27,16], index: 1, kind: input, shape index: {}]   ;;  %s1485_s2 = inlined_call_operand.vmem [shape: f32[1,16], index: 2, kind: input, shape index: {}]   ;;  %s1486_s3 = inlined_call_operand.vmem [shape: f32[2048,16], index: 3, kind: output, shape index: {}]  }
   0x1 LB: > { %s935_s13 = sadd.s32 4294967295, %s1168_s12   ;;  %p939_p0 = scmp.ge.s32.totalorder %s1168_s12, 1  ;;  %s1168_s12 = sphi %s1191_s12, %s13_s12  }
   0x2   : > { %p138_p1 = scmp.lt.s32.totalorder %s1168_s12, 5 }
   0x4   : > { %p139_p2 = pnand %p939_p0, %p138_p1 }
   0x5   : > { %v1128_v0 = vld [vmem:[%s1484_s1] sm:$0xff] (!%p139_p2)   ;;  %vm518_vm0 = vcmask (!%p139_p2), 1044480   ;;  %v1129_v1 = vld [vmem:[%s1484_s1 + $0x8] sm:$0x3f] (!%p139_p2)   ;;  %vm519_vm1 = vcmask (!%p139_p2), 1045504   ;;  %s940_s18 = sshll.u32 (!%p139_p2), %s935_s13, 6 }
   0x6   : > { %142 = sbr.rel (%p139_p2) target bundleno = 293 (0x125), region = 32  ;;  %1047 = vmatprep.subr.bf16.mxu0 (!%p139_p2), %v1128_v0  ;;  %1115 = vmatprep.subr.bf16.mxu1 (!%p139_p2), %v1128_v0  ;;  %v1170_v2 = vmov (!%p139_p2), 65535   ;;  %p163_p3 = scmp.lt.s32.totalorder (!%p139_p2), %s940_s18, 255  ;;  %vm421_vm2 = vcmask (!%p139_p2), 220160   ;;  %v1281_v38 = vld [vmem:[%s1485_s2] ss:$0 sm:$0xff] (!%p139_p2) }
   0x7   : > { %1048 = vmatpush3.bf16.msra.mxu0 (!%p139_p2), %v1128_v0  ;;  %1117 = vmatpush3.bf16.msra.mxu1 (!%p139_p2), %v1128_v0  ;;  %v520_v3 = vsel (!%p139_p2), %vm518_vm0, 4294967295, %v1170_v2  ;;  %vm814_vm3 = vcmask (!%p139_p2), 130048  }
   0x8   : > { %v521_v4 = vsel (!%p139_p2), %vm519_vm1, %v520_v3, 0 }
   0x9   : > { %v523_v5 = vand.u32 (!%p139_p2), %v1129_v1, %v521_v4 }
   0xb   : > { %1049 = vmatprep.subr.bf16.mxu0 (!%p139_p2), %v523_v5  ;;  %1116 = vmatprep.subr.bf16.mxu1 (!%p139_p2), %v523_v5 }
   0xc   : > { %1050 = vmatpush3.bf16.msra.mxu0 (!%p139_p2), %v523_v5  ;;  %1118 = vmatpush3.bf16.msra.mxu1 (!%p139_p2), %v523_v5 }
   0xd   : > { %s1488_s18 = smov (!%p163_p3, %s940_s18), 255 }
   0xe   : > { %s941_s19 = sshll.u32 %s1488_s18, 2  ;;  %s943_s23 = sshll.u32 %s1488_s18, 3 }
   0xf   : > { %s1211_s22 = scalar_lea.vmem %s1483_s0, %s941_s19  ;;  %s1286_s28 = scalar_lea.vmem %s1486_s3, %s943_s23 }
  0x10   : > { %v1130_v6 = vld [vmem:[%s1211_s22] sm:$0xff]   ;;  %v1132_v8 = vld [vmem:[%s1211_s22 + $0x8] sm:$0xff]   ;;  %v1134_v10 = vld [vmem:[%s1211_s22 + $0x10] sm:$0xff]  }
  0x11   : > { %v1131_v7 = vld [vmem:[%s1211_s22 + $0x80] sm:$0xff]   ;;  %1051 = vmatprep.mubr.msk.bf16.mxu0 %vm421_vm2, %v1130_v6  ;;  %v1133_v9 = vld [vmem:[%s1211_s22 + $0x88] sm:$0xff]   ;;  %v1135_v11 = vld [vmem:[%s1211_s22 + $0x90] sm:$0xff]  }
  0x12   : > { %1083 = vmatprep.mubr.msk.bf16.mxu1 %vm421_vm2, %v1131_v7  ;;  %1052 = vmatmul.mubr.msk.bf16.vlgmr.msra.gmra.mrb[0].mxu0 %vm421_vm2, %v1132_v8  ;;  %v1136_v12 = vld [vmem:[%s1211_s22 + $0x18] sm:$0xff]   ;;  %v1138_v14 = vld [vmem:[%s1211_s22 + $0x20] sm:$0xff]   ;;  %v1140_v16 = vld [vmem:[%s1211_s22 + $0x28] sm:$0xff]  }
  0x13   : > { %1084 = vmatmul.mubr.msk.bf16.vlgmr.msra.gmra.mrb[0].mxu1 %vm421_vm2, %v1133_v9  ;;  %1055 = vmatprep.mubr.msk.bf16.mxu0 %vm421_vm2, %v1134_v10  ;;  %v1137_v13 = vld [vmem:[%s1211_s22 + $0x98] sm:$0xff]   ;;  %v1139_v15 = vld [vmem:[%s1211_s22 + $0xa0] sm:$0xff]   ;;  %v1141_v17 = vld [vmem:[%s1211_s22 + $0xa8] sm:$0xff]  }
  0x14   : > { %1087 = vmatprep.mubr.msk.bf16.mxu1 %vm421_vm2, %v1135_v11  ;;  %v1142_v18 = vld [vmem:[%s1211_s22 + $0x30] sm:$0xff]   ;;  %v1144_v20 = vld [vmem:[%s1211_s22 + $0x38] sm:$0xff]   ;;  %v1146_v22 = vld [vmem:[%s1211_s22 + $0x40] sm:$0xff]  }
  0x15   : > { %v1143_v19 = vld [vmem:[%s1211_s22 + $0xb0] sm:$0xff]   ;;  %v1145_v21 = vld [vmem:[%s1211_s22 + $0xb8] sm:$0xff]   ;;  %v1147_v23 = vld [vmem:[%s1211_s22 + $0xc0] sm:$0xff]  }
  0x16   : > { %v1148_v24 = vld [vmem:[%s1211_s22 + $0x48] sm:$0xff]   ;;  %v1150_v26 = vld [vmem:[%s1211_s22 + $0x50] sm:$0xff]   ;;  %v1152_v28 = vld [vmem:[%s1211_s22 + $0x58] sm:$0xff]  }
  0x17   : > { %v1149_v25 = vld [vmem:[%s1211_s22 + $0xc8] sm:$0xff]   ;;  %v1151_v27 = vld [vmem:[%s1211_s22 + $0xd0] sm:$0xff]   ;;  %v1153_v29 = vld [vmem:[%s1211_s22 + $0xd8] sm:$0xff]  }
  0x18   : > { %v1154_v30 = vld [vmem:[%s1211_s22 + $0x60] sm:$0xff]   ;;  %v1156_v32 = vld [vmem:[%s1211_s22 + $0x68] sm:$0xff]   ;;  %v1158_v34 = vld [vmem:[%s1211_s22 + $0x70] sm:$0xff]  }
  0x19   : > { %v1155_v31 = vld [vmem:[%s1211_s22 + $0xe0] sm:$0xff]   ;;  %v1157_v33 = vld [vmem:[%s1211_s22 + $0xe8] sm:$0xff]   ;;  %v1159_v35 = vld [vmem:[%s1211_s22 + $0xf0] sm:$0xff]  }
  0x1a   : > { %1056 = vmatmul.mubr.msk.bf16.gmra.mrb[4].mxu0 %vm421_vm2, %v1136_v12  ;;  %v1160_v36 = vld [vmem:[%s1211_s22 + $0x78] sm:$0xff]  }
  0x1b   : > { %1088 = vmatmul.mubr.msk.bf16.gmra.mrb[4].mxu1 %vm421_vm2, %v1137_v13  ;;  %1059 = vmatprep.mubr.msk.bf16.mxu0 %vm421_vm2, %v1138_v14  ;;  %v1161_v37 = vld [vmem:[%s1211_s22 + $0xf8] sm:$0xff]  }
  0x1c   : > { %1091 = vmatprep.mubr.msk.bf16.mxu1 %vm421_vm2, %v1139_v15 }
  0x22   : > { %1060 = vmatmul.mubr.msk.bf16.gmra.mrb[8].mxu0 %vm421_vm2, %v1140_v16 }
  0x23   : > { %1092 = vmatmul.mubr.msk.bf16.gmra.mrb[8].mxu1 %vm421_vm2, %v1141_v17  ;;  %1063 = vmatprep.mubr.msk.bf16.mxu0 %vm421_vm2, %v1142_v18 }
  0x24   : > { %1095 = vmatprep.mubr.msk.bf16.mxu1 %vm421_vm2, %v1143_v19 }
  0x2a   : > { %1064 = vmatmul.mubr.msk.bf16.gmra.mrb[12].mxu0 %vm421_vm2, %v1144_v20 }
  0x2b   : > { %1096 = vmatmul.mubr.msk.bf16.gmra.mrb[12].mxu1 %vm421_vm2, %v1145_v21  ;;  %1067 = vmatprep.mubr.msk.bf16.mxu0 %vm421_vm2, %v1146_v22 }
  0x2c   : > { %1099 = vmatprep.mubr.msk.bf16.mxu1 %vm421_vm2, %v1147_v23 }
  0x32   : > { %1068 = vmatmul.mubr.msk.bf16.gmra.mrb[16].mxu0 %vm421_vm2, %v1148_v24 }
  0x33   : > { %1100 = vmatmul.mubr.msk.bf16.gmra.mrb[16].mxu1 %vm421_vm2, %v1149_v25  ;;  %1071 = vmatprep.mubr.msk.bf16.mxu0 %vm421_vm2, %v1150_v26 }
  0x34   : > { %1103 = vmatprep.mubr.msk.bf16.mxu1 %vm421_vm2, %v1151_v27 }
  0x3a   : > { %1072 = vmatmul.mubr.msk.bf16.gmra.mrb[20].mxu0 %vm421_vm2, %v1152_v28 }
  0x3b   : > { %1104 = vmatmul.mubr.msk.bf16.gmra.mrb[20].mxu1 %vm421_vm2, %v1153_v29  ;;  %1075 = vmatprep.mubr.msk.bf16.mxu0 %vm421_vm2, %v1154_v30 }
  0x3c   : > { %1107 = vmatprep.mubr.msk.bf16.mxu1 %vm421_vm2, %v1155_v31 }
  0x42   : > { %1076 = vmatmul.mubr.msk.bf16.gmra.mrb[24].mxu0 %vm421_vm2, %v1156_v32 }
  0x43   : > { %1108 = vmatmul.mubr.msk.bf16.gmra.mrb[24].mxu1 %vm421_vm2, %v1157_v33  ;;  %1079 = vmatprep.mubr.msk.bf16.mxu0 %vm421_vm2, %v1158_v34 }
  0x44   : > { %1111 = vmatprep.mubr.msk.bf16.mxu1 %vm421_vm2, %v1159_v35 }
  0x4a   : > { %1080 = vmatmul.mubr.msk.bf16.gmra.mrb[28].mxu0 %vm421_vm2, %v1160_v36 }
  0x4b   : > { %1112 = vmatmul.mubr.msk.bf16.gmra.mrb[28].mxu1 %vm421_vm2, %v1161_v37 }
  0xe5   : > { %v1053_v39 = vpop.f32.mrb[0].mxu0 }
  0xe6   : > { %v568_v40 = vadd.f32 %v1053_v39, %v1281_v38  ;;  %v1085_v41 = vpop.f32.mrb[0].mxu1  ;;  %v559_v42 = vpop.f32.mrb[1].mxu0 }
  0xe7   : > { %v696_v43 = vadd.f32 %v1085_v41, %v1281_v38  ;;  %v560_v44 = vadd.f32 %v1281_v38, %v559_v42  ;;  %v687_v45 = vpop.f32.mrb[1].mxu1  ;;  %v1054_v46 = vpop.f32.mrb[2].mxu0 }
  0xe8   : > { %817 = vst.msk [vmem:[%s1286_s28 + $0x10] sm:$0xff] %vm814_vm3, %v568_v40  ;;  %v688_v47 = vadd.f32 %v1281_v38, %v687_v45  ;;  %v571_v48 = vadd.f32 %v1054_v46, %v1281_v38  ;;  %v1086_v49 = vpop.f32.mrb[2].mxu1  ;;  %v562_v50 = vpop.f32.mrb[3].mxu0 }
  0xe9   : > { %849 = vst.msk [vmem:[%s1286_s28 + $0x110] sm:$0xff] %vm814_vm3, %v696_v43  ;;  %815 = vst.msk [vmem:[%s1286_s28] sm:$0xff] %vm814_vm3, %v560_v44  ;;  %v699_v51 = vadd.f32 %v1086_v49, %v1281_v38  ;;  %v563_v52 = vadd.f32 %v1281_v38, %v562_v50  ;;  %v690_v53 = vpop.f32.mrb[3].mxu1 }
  0xea   : > { %847 = vst.msk [vmem:[%s1286_s28 + $0x100] sm:$0xff] %vm814_vm3, %v688_v47  ;;  %818 = vst.msk [vmem:[%s1286_s28 + $0x18] sm:$0xff] %vm814_vm3, %v571_v48  ;;  %v691_v54 = vadd.f32 %v1281_v38, %v690_v53 }
  0xeb   : > { %850 = vst.msk [vmem:[%s1286_s28 + $0x118] sm:$0xff] %vm814_vm3, %v699_v51  ;;  %816 = vst.msk [vmem:[%s1286_s28 + $0x8] sm:$0xff] %vm814_vm3, %v563_v52 }
  0xec   : > { %848 = vst.msk [vmem:[%s1286_s28 + $0x108] sm:$0xff] %vm814_vm3, %v691_v54 }
  0xed   : > { %v1057_v55 = vpop.f32.mrb[4].mxu0 }
  0xee   : > { %v584_v56 = vadd.f32 %v1057_v55, %v1281_v38  ;;  %v1089_v57 = vpop.f32.mrb[4].mxu1  ;;  %v575_v58 = vpop.f32.mrb[5].mxu0 }
  0xef   : > { %v712_v59 = vadd.f32 %v1089_v57, %v1281_v38  ;;  %v576_v60 = vadd.f32 %v1281_v38, %v575_v58  ;;  %v703_v61 = vpop.f32.mrb[5].mxu1  ;;  %v1058_v62 = vpop.f32.mrb[6].mxu0 }
  0xf0   : > { %821 = vst.msk [vmem:[%s1286_s28 + $0x30] sm:$0xff] %vm814_vm3, %v584_v56  ;;  %v704_v63 = vadd.f32 %v1281_v38, %v703_v61  ;;  %v587_v0 = vadd.f32 %v1058_v62, %v1281_v38  ;;  %v1090_v1 = vpop.f32.mrb[6].mxu1  ;;  %v578_v2 = vpop.f32.mrb[7].mxu0 }
  0xf1   : > { %853 = vst.msk [vmem:[%s1286_s28 + $0x130] sm:$0xff] %vm814_vm3, %v712_v59  ;;  %819 = vst.msk [vmem:[%s1286_s28 + $0x20] sm:$0xff] %vm814_vm3, %v576_v60  ;;  %v715_v3 = vadd.f32 %v1090_v1, %v1281_v38  ;;  %v579_v4 = vadd.f32 %v1281_v38, %v578_v2  ;;  %v706_v5 = vpop.f32.mrb[7].mxu1 }
  0xf2   : > { %851 = vst.msk [vmem:[%s1286_s28 + $0x120] sm:$0xff] %vm814_vm3, %v704_v63  ;;  %822 = vst.msk [vmem:[%s1286_s28 + $0x38] sm:$0xff] %vm814_vm3, %v587_v0  ;;  %v707_v6 = vadd.f32 %v1281_v38, %v706_v5 }
  0xf3   : > { %854 = vst.msk [vmem:[%s1286_s28 + $0x138] sm:$0xff] %vm814_vm3, %v715_v3  ;;  %820 = vst.msk [vmem:[%s1286_s28 + $0x28] sm:$0xff] %vm814_vm3, %v579_v4 }
  0xf4   : > { %852 = vst.msk [vmem:[%s1286_s28 + $0x128] sm:$0xff] %vm814_vm3, %v707_v6 }
  0xf5   : > { %v1061_v7 = vpop.f32.mrb[8].mxu0 }
  0xf6   : > { %v600_v8 = vadd.f32 %v1061_v7, %v1281_v38  ;;  %v1093_v9 = vpop.f32.mrb[8].mxu1  ;;  %v591_v10 = vpop.f32.mrb[9].mxu0 }
  0xf7   : > { %v728_v11 = vadd.f32 %v1093_v9, %v1281_v38  ;;  %v592_v12 = vadd.f32 %v1281_v38, %v591_v10  ;;  %v719_v13 = vpop.f32.mrb[9].mxu1  ;;  %v1062_v14 = vpop.f32.mrb[10].mxu0 }
  0xf8   : > { %825 = vst.msk [vmem:[%s1286_s28 + $0x50] sm:$0xff] %vm814_vm3, %v600_v8  ;;  %v720_v15 = vadd.f32 %v1281_v38, %v719_v13  ;;  %v603_v16 = vadd.f32 %v1062_v14, %v1281_v38  ;;  %v1094_v17 = vpop.f32.mrb[10].mxu1  ;;  %v594_v18 = vpop.f32.mrb[11].mxu0 }
  0xf9   : > { %857 = vst.msk [vmem:[%s1286_s28 + $0x150] sm:$0xff] %vm814_vm3, %v728_v11  ;;  %823 = vst.msk [vmem:[%s1286_s28 + $0x40] sm:$0xff] %vm814_vm3, %v592_v12  ;;  %v731_v19 = vadd.f32 %v1094_v17, %v1281_v38  ;;  %v595_v20 = vadd.f32 %v1281_v38, %v594_v18  ;;  %v722_v21 = vpop.f32.mrb[11].mxu1 }
  0xfa   : > { %855 = vst.msk [vmem:[%s1286_s28 + $0x140] sm:$0xff] %vm814_vm3, %v720_v15  ;;  %826 = vst.msk [vmem:[%s1286_s28 + $0x58] sm:$0xff] %vm814_vm3, %v603_v16  ;;  %v723_v22 = vadd.f32 %v1281_v38, %v722_v21 }
  0xfb   : > { %858 = vst.msk [vmem:[%s1286_s28 + $0x158] sm:$0xff] %vm814_vm3, %v731_v19  ;;  %824 = vst.msk [vmem:[%s1286_s28 + $0x48] sm:$0xff] %vm814_vm3, %v595_v20 }
  0xfc   : > { %856 = vst.msk [vmem:[%s1286_s28 + $0x148] sm:$0xff] %vm814_vm3, %v723_v22 }
  0xfd   : > { %v1065_v23 = vpop.f32.mrb[12].mxu0 }
  0xfe   : > { %v616_v24 = vadd.f32 %v1065_v23, %v1281_v38  ;;  %v1097_v25 = vpop.f32.mrb[12].mxu1  ;;  %v607_v26 = vpop.f32.mrb[13].mxu0 }
  0xff   : > { %v744_v27 = vadd.f32 %v1097_v25, %v1281_v38  ;;  %v608_v28 = vadd.f32 %v1281_v38, %v607_v26  ;;  %v735_v29 = vpop.f32.mrb[13].mxu1  ;;  %v1066_v30 = vpop.f32.mrb[14].mxu0 }
 0x100   : > { %829 = vst.msk [vmem:[%s1286_s28 + $0x70] sm:$0xff] %vm814_vm3, %v616_v24  ;;  %v736_v31 = vadd.f32 %v1281_v38, %v735_v29  ;;  %v619_v32 = vadd.f32 %v1066_v30, %v1281_v38  ;;  %v1098_v33 = vpop.f32.mrb[14].mxu1  ;;  %v610_v34 = vpop.f32.mrb[15].mxu0 }
 0x101   : > { %861 = vst.msk [vmem:[%s1286_s28 + $0x170] sm:$0xff] %vm814_vm3, %v744_v27  ;;  %827 = vst.msk [vmem:[%s1286_s28 + $0x60] sm:$0xff] %vm814_vm3, %v608_v28  ;;  %v747_v35 = vadd.f32 %v1098_v33, %v1281_v38  ;;  %v611_v36 = vadd.f32 %v1281_v38, %v610_v34  ;;  %v738_v37 = vpop.f32.mrb[15].mxu1 }
 0x102   : > { %859 = vst.msk [vmem:[%s1286_s28 + $0x160] sm:$0xff] %vm814_vm3, %v736_v31  ;;  %830 = vst.msk [vmem:[%s1286_s28 + $0x78] sm:$0xff] %vm814_vm3, %v619_v32  ;;  %v739_v39 = vadd.f32 %v1281_v38, %v738_v37 }
 0x103   : > { %862 = vst.msk [vmem:[%s1286_s28 + $0x178] sm:$0xff] %vm814_vm3, %v747_v35  ;;  %828 = vst.msk [vmem:[%s1286_s28 + $0x68] sm:$0xff] %vm814_vm3, %v611_v36 }
 0x104   : > { %860 = vst.msk [vmem:[%s1286_s28 + $0x168] sm:$0xff] %vm814_vm3, %v739_v39 }
 0x105   : > { %v1069_v40 = vpop.f32.mrb[16].mxu0 }
 0x106   : > { %v632_v41 = vadd.f32 %v1069_v40, %v1281_v38  ;;  %v1101_v42 = vpop.f32.mrb[16].mxu1  ;;  %v623_v43 = vpop.f32.mrb[17].mxu0 }
 0x107   : > { %v760_v44 = vadd.f32 %v1101_v42, %v1281_v38  ;;  %v624_v45 = vadd.f32 %v1281_v38, %v623_v43  ;;  %v751_v46 = vpop.f32.mrb[17].mxu1  ;;  %v1070_v47 = vpop.f32.mrb[18].mxu0 }
 0x108   : > { %833 = vst.msk [vmem:[%s1286_s28 + $0x90] sm:$0xff] %vm814_vm3, %v632_v41  ;;  %v752_v48 = vadd.f32 %v1281_v38, %v751_v46  ;;  %v635_v49 = vadd.f32 %v1070_v47, %v1281_v38  ;;  %v1102_v50 = vpop.f32.mrb[18].mxu1  ;;  %v626_v51 = vpop.f32.mrb[19].mxu0 }
 0x109   : > { %865 = vst.msk [vmem:[%s1286_s28 + $0x190] sm:$0xff] %vm814_vm3, %v760_v44  ;;  %831 = vst.msk [vmem:[%s1286_s28 + $0x80] sm:$0xff] %vm814_vm3, %v624_v45  ;;  %v763_v52 = vadd.f32 %v1102_v50, %v1281_v38  ;;  %v627_v53 = vadd.f32 %v1281_v38, %v626_v51  ;;  %v754_v54 = vpop.f32.mrb[19].mxu1 }
 0x10a   : > { %863 = vst.msk [vmem:[%s1286_s28 + $0x180] sm:$0xff] %vm814_vm3, %v752_v48  ;;  %834 = vst.msk [vmem:[%s1286_s28 + $0x98] sm:$0xff] %vm814_vm3, %v635_v49  ;;  %v755_v55 = vadd.f32 %v1281_v38, %v754_v54 }
 0x10b   : > { %866 = vst.msk [vmem:[%s1286_s28 + $0x198] sm:$0xff] %vm814_vm3, %v763_v52  ;;  %832 = vst.msk [vmem:[%s1286_s28 + $0x88] sm:$0xff] %vm814_vm3, %v627_v53 }
 0x10c   : > { %864 = vst.msk [vmem:[%s1286_s28 + $0x188] sm:$0xff] %vm814_vm3, %v755_v55 }
 0x10d   : > { %v1073_v56 = vpop.f32.mrb[20].mxu0 }
 0x10e   : > { %v648_v57 = vadd.f32 %v1073_v56, %v1281_v38  ;;  %v1105_v58 = vpop.f32.mrb[20].mxu1  ;;  %v639_v59 = vpop.f32.mrb[21].mxu0 }
 0x10f   : > { %v776_v60 = vadd.f32 %v1105_v58, %v1281_v38  ;;  %v640_v61 = vadd.f32 %v1281_v38, %v639_v59  ;;  %v767_v62 = vpop.f32.mrb[21].mxu1  ;;  %v1074_v63 = vpop.f32.mrb[22].mxu0 }
 0x110   : > { %837 = vst.msk [vmem:[%s1286_s28 + $0xb0] sm:$0xff] %vm814_vm3, %v648_v57  ;;  %v768_v0 = vadd.f32 %v1281_v38, %v767_v62  ;;  %v651_v1 = vadd.f32 %v1074_v63, %v1281_v38  ;;  %v1106_v2 = vpop.f32.mrb[22].mxu1  ;;  %v642_v3 = vpop.f32.mrb[23].mxu0 }
 0x111   : > { %869 = vst.msk [vmem:[%s1286_s28 + $0x1b0] sm:$0xff] %vm814_vm3, %v776_v60  ;;  %835 = vst.msk [vmem:[%s1286_s28 + $0xa0] sm:$0xff] %vm814_vm3, %v640_v61  ;;  %v779_v4 = vadd.f32 %v1106_v2, %v1281_v38  ;;  %v643_v5 = vadd.f32 %v1281_v38, %v642_v3  ;;  %v770_v6 = vpop.f32.mrb[23].mxu1 }
 0x112   : > { %867 = vst.msk [vmem:[%s1286_s28 + $0x1a0] sm:$0xff] %vm814_vm3, %v768_v0  ;;  %838 = vst.msk [vmem:[%s1286_s28 + $0xb8] sm:$0xff] %vm814_vm3, %v651_v1  ;;  %v771_v7 = vadd.f32 %v1281_v38, %v770_v6 }
 0x113   : > { %870 = vst.msk [vmem:[%s1286_s28 + $0x1b8] sm:$0xff] %vm814_vm3, %v779_v4  ;;  %836 = vst.msk [vmem:[%s1286_s28 + $0xa8] sm:$0xff] %vm814_vm3, %v643_v5 }
 0x114   : > { %868 = vst.msk [vmem:[%s1286_s28 + $0x1a8] sm:$0xff] %vm814_vm3, %v771_v7 }
 0x115   : > { %v1077_v8 = vpop.f32.mrb[24].mxu0 }
 0x116   : > { %v664_v9 = vadd.f32 %v1077_v8, %v1281_v38  ;;  %v1109_v10 = vpop.f32.mrb[24].mxu1  ;;  %v655_v11 = vpop.f32.mrb[25].mxu0 }
 0x117   : > { %v792_v12 = vadd.f32 %v1109_v10, %v1281_v38  ;;  %v656_v13 = vadd.f32 %v1281_v38, %v655_v11  ;;  %v783_v14 = vpop.f32.mrb[25].mxu1  ;;  %v1078_v15 = vpop.f32.mrb[26].mxu0 }
 0x118   : > { %841 = vst.msk [vmem:[%s1286_s28 + $0xd0] sm:$0xff] %vm814_vm3, %v664_v9  ;;  %v784_v16 = vadd.f32 %v1281_v38, %v783_v14  ;;  %v667_v17 = vadd.f32 %v1078_v15, %v1281_v38  ;;  %v1110_v18 = vpop.f32.mrb[26].mxu1  ;;  %v658_v19 = vpop.f32.mrb[27].mxu0 }
 0x119   : > { %873 = vst.msk [vmem:[%s1286_s28 + $0x1d0] sm:$0xff] %vm814_vm3, %v792_v12  ;;  %839 = vst.msk [vmem:[%s1286_s28 + $0xc0] sm:$0xff] %vm814_vm3, %v656_v13  ;;  %v795_v20 = vadd.f32 %v1110_v18, %v1281_v38  ;;  %v659_v21 = vadd.f32 %v1281_v38, %v658_v19  ;;  %v786_v22 = vpop.f32.mrb[27].mxu1 }
 0x11a   : > { %871 = vst.msk [vmem:[%s1286_s28 + $0x1c0] sm:$0xff] %vm814_vm3, %v784_v16  ;;  %842 = vst.msk [vmem:[%s1286_s28 + $0xd8] sm:$0xff] %vm814_vm3, %v667_v17  ;;  %v787_v23 = vadd.f32 %v1281_v38, %v786_v22 }
 0x11b   : > { %874 = vst.msk [vmem:[%s1286_s28 + $0x1d8] sm:$0xff] %vm814_vm3, %v795_v20  ;;  %840 = vst.msk [vmem:[%s1286_s28 + $0xc8] sm:$0xff] %vm814_vm3, %v659_v21 }
 0x11c   : > { %872 = vst.msk [vmem:[%s1286_s28 + $0x1c8] sm:$0xff] %vm814_vm3, %v787_v23 }
 0x11d   : > { %v1081_v24 = vpop.f32.mrb[28].mxu0 }
 0x11e   : > { %v680_v25 = vadd.f32 %v1081_v24, %v1281_v38  ;;  %v1113_v26 = vpop.f32.mrb[28].mxu1  ;;  %v671_v27 = vpop.f32.mrb[29].mxu0 }
 0x11f   : > { %v808_v28 = vadd.f32 %v1113_v26, %v1281_v38  ;;  %v672_v29 = vadd.f32 %v1281_v38, %v671_v27  ;;  %v799_v30 = vpop.f32.mrb[29].mxu1  ;;  %v1082_v31 = vpop.f32.mrb[30].mxu0 }
 0x120   : > { %845 = vst.msk [vmem:[%s1286_s28 + $0xf0] sm:$0xff] %vm814_vm3, %v680_v25  ;;  %v800_v32 = vadd.f32 %v1281_v38, %v799_v30  ;;  %v683_v33 = vadd.f32 %v1082_v31, %v1281_v38  ;;  %v1114_v34 = vpop.f32.mrb[30].mxu1  ;;  %v674_v35 = vpop.f32.mrb[31].mxu0 }
 0x121   : > { %877 = vst.msk [vmem:[%s1286_s28 + $0x1f0] sm:$0xff] %vm814_vm3, %v808_v28  ;;  %843 = vst.msk [vmem:[%s1286_s28 + $0xe0] sm:$0xff] %vm814_vm3, %v672_v29  ;;  %v811_v36 = vadd.f32 %v1114_v34, %v1281_v38  ;;  %v675_v37 = vadd.f32 %v1281_v38, %v674_v35  ;;  %v802_v39 = vpop.f32.mrb[31].mxu1 }
 0x122   : > { %875 = vst.msk [vmem:[%s1286_s28 + $0x1e0] sm:$0xff] %vm814_vm3, %v800_v32  ;;  %846 = vst.msk [vmem:[%s1286_s28 + $0xf8] sm:$0xff] %vm814_vm3, %v683_v33  ;;  %v803_v40 = vadd.f32 %v1281_v38, %v802_v39 }
 0x123   : > { %878 = vst.msk [vmem:[%s1286_s28 + $0x1f8] sm:$0xff] %vm814_vm3, %v811_v36  ;;  %844 = vst.msk [vmem:[%s1286_s28 + $0xe8] sm:$0xff] %vm814_vm3, %v675_v37 }
 0x124   : > { %876 = vst.msk [vmem:[%s1286_s28 + $0x1e8] sm:$0xff] %vm814_vm3, %v803_v40 }
 0x125 PF: > { %s13_s12 = sadd.s32 1, %s1168_s12  }
 0x126   : > { %p10_p4 = scmp.ge.s32.totalorder %s13_s12, 6  }
 0x128   :  { %12 = sbr.rel (!%p10_p4) target bundleno = 1 (0x1), region = 62 }

// kernel: shake_resnet_forward.14
= control target key start
LH: loop header
LB: loop body
LE: loop exit
PB: predicated region body
PF: predicated region fallthrough
CT: control target
= control target key end

     0   :  { %s1428_s12 = smov 0   ;;  %s2190_s0 = inlined_call_operand.vmem [shape: bf16[2048,144], index: 0, kind: input, shape index: {}]   ;;  %s2191_s1 = inlined_call_operand.vmem [shape: bf16[144,32], index: 1, kind: input, shape index: {}]   ;;  %s2192_s2 = inlined_call_operand.vmem [shape: f32[1,32], index: 2, kind: input, shape index: {}]   ;;  %s2193_s3 = inlined_call_operand.vmem [shape: f32[2048,32], index: 3, kind: output, shape index: {}]  }
   0x1 LB: > { %s1244_s13 = sadd.s32 4294967295, %s1405_s12   ;;  %p1248_p0 = scmp.ge.s32.totalorder %s1405_s12, 1  ;;  %s1405_s12 = sphi %s1428_s12, %s13_s12  }
   0x2   : > { %p139_p1 = scmp.lt.s32.totalorder %s1405_s12, 5 }
   0x4   : > { %p140_p2 = pnand %p1248_p0, %p139_p1 }
   0x5   : > { %v1390_v0 = vld [vmem:[%s2191_s1] sm:$0xff] (!%p140_p2)   ;;  %v1407_v1 = vmov (!%p140_p2), 0   ;;  %s1249_s16 = sshll.u32 (!%p140_p2), %s1244_s13, 6  ;;  %v1391_v2 = vld [vmem:[%s2191_s1 + $0x8] sm:$0xff] (!%p140_p2)   ;;  %v1392_v3 = vld [vmem:[%s2191_s1 + $0x10] sm:$0xff] (!%p140_p2)   ;;  %vm673_vm0 = vcmask (!%p140_p2), 130048  }
   0x6   : > { %143 = sbr.rel (%p140_p2) target bundleno = 381 (0x17d), region = 32  ;;  %770 = vmatprep.subr.bf16.mxu0 (!%p140_p2), %v1407_v1  ;;  %1363 = vmatprep.subr.bf16.mxu1 (!%p140_p2), %v1407_v1  ;;  %p165_p3 = scmp.lt.s32.totalorder (!%p140_p2), %s1249_s16, 255  ;;  %v1393_v7 = vld [vmem:[%s2191_s1 + $0x18] sm:$0xff] (!%p140_p2)   ;;  %v1394_v15 = vld [vmem:[%s2191_s1 + $0x20] sm:$0xff] (!%p140_p2)   ;;  %v1395_v20 = vld [vmem:[%s2191_s1 + $0x28] sm:$0xff] (!%p140_p2)   ;;  %vm1123_vm1 = vcmask (!%p140_p2), 261120  }
   0x7   : > { %771 = vmatpush1.bf16.msra.mxu0 (!%p140_p2), %v1390_v0  ;;  %1372 = vmatpush1.bf16.msra.mxu1 (!%p140_p2), %v1390_v0  ;;  %v1396_v29 = vld [vmem:[%s2191_s1 + $0x30] sm:$0xff] (!%p140_p2)   ;;  %v1397_v45 = vld [vmem:[%s2191_s1 + $0x38] sm:$0xff] (!%p140_p2)  }
   0x8   : > { %772 = vmatprep.subr.bf16.mxu0 (!%p140_p2), %v1407_v1  ;;  %1364 = vmatprep.subr.bf16.mxu1 (!%p140_p2), %v1407_v1 }
   0xb   : > { %773 = vmatpush1.bf16.msra.mxu0 (!%p140_p2), %v1391_v2  ;;  %1373 = vmatpush1.bf16.msra.mxu1 (!%p140_p2), %v1391_v2 }
   0xc   : > { %774 = vmatprep.subr.bf16.mxu0 (!%p140_p2), %v1407_v1  ;;  %1365 = vmatprep.subr.bf16.mxu1 (!%p140_p2), %v1407_v1 }
   0xd   : > { %s2226_s16 = smov (!%p165_p3, %s1249_s16), 255 }
   0xe   : > { %s1362_s21 = sshll.u32 %s2226_s16, 3 }
   0xf   : > { %s1459_s24 = scalar_lea.vmem %s2190_s0, %s1362_s21  ;;  %775 = vmatpush1.bf16.msra.mxu0 %v1392_v3  ;;  %1374 = vmatpush1.bf16.msra.mxu1 %v1392_v3  ;;  %s1995_s15 = scalar_lea.vmem %s2193_s3, %s1362_s21 }
  0x10   : > { %v178_v4 = vld [vmem:[%s1459_s24] sm:$0xff]  ;;  %v179_v5 = vld [vmem:[%s1459_s24 + $0x8] sm:$0xff]  ;;  %776 = vmatprep.subr.bf16.mxu0 %v1407_v1  ;;  %1366 = vmatprep.subr.bf16.mxu1 %v1407_v1  ;;  %v180_v16 = vld [vmem:[%s1459_s24 + $0x10] sm:$0xff] }
  0x11   : > { %v210_v6 = vld [vmem:[%s1459_s24 + $0x100] sm:$0xff]  ;;  %v1468_v8 = vmax.bf16 %v1407_v1, %v178_v4  ;;  %v1471_v9 = vmax.bf16 %v1407_v1, %v179_v5  ;;  %v211_v10 = vld [vmem:[%s1459_s24 + $0x108] sm:$0xff]  ;;  %v181_v17 = vld [vmem:[%s1459_s24 + $0x18] sm:$0xff]  ;;  %v1504_v22 = vmax.bf16 %v1407_v1, %v180_v16 }
  0x12   : > { %v1475_v11 = vmax.bf16 %v1407_v1, %v210_v6  ;;  %v1480_v12 = vmax.bf16 %v1407_v1, %v211_v10  ;;  %v212_v18 = vld [vmem:[%s1459_s24 + $0x110] sm:$0xff]  ;;  %v213_v19 = vld [vmem:[%s1459_s24 + $0x118] sm:$0xff]  ;;  %v182_v21 = vld [vmem:[%s1459_s24 + $0x20] sm:$0xff]  ;;  %v1507_v23 = vmax.bf16 %v1407_v1, %v181_v17 }
  0x13   : > { %v1256_v13 = vcombine.high %v1468_v8, %v1471_v9  ;;  %777 = vmatpush1.bf16.msra.mxu0 %v1393_v7  ;;  %1375 = vmatpush1.bf16.msra.mxu1 %v1393_v7  ;;  %v1510_v24 = vmax.bf16 %v1407_v1, %v212_v18  ;;  %v1513_v25 = vmax.bf16 %v1407_v1, %v213_v19  ;;  %v183_v26 = vld [vmem:[%s1459_s24 + $0x28] sm:$0xff]  ;;  %v214_v27 = vld [vmem:[%s1459_s24 + $0x120] sm:$0xff]  ;;  %v192_v32 = vld [vmem:[%s1459_s24 + $0x70] sm:$0xff] }
  0x14   : > { %v1288_v14 = vcombine.high %v1475_v11, %v1480_v12  ;;  %778 = vmatprep.subr.bf16.mxu0 %v1407_v1  ;;  %1367 = vmatprep.subr.bf16.mxu1 %v1407_v1  ;;  %v215_v28 = vld [vmem:[%s1459_s24 + $0x128] sm:$0xff]  ;;  %v1255_v30 = vcombine.low %v1468_v8, %v1471_v9  ;;  %v1524_v31 = vmax.bf16 %v1407_v1, %v182_v21  ;;  %v193_v33 = vld [vmem:[%s1459_s24 + $0x78] sm:$0xff]  ;;  %v224_v34 = vld [vmem:[%s1459_s24 + $0x170] sm:$0xff] }
  0x15   : > { %1328 = vmatprep.mubr.msk.bf16.mxu0 %vm673_vm0, %v1256_v13  ;;  %v1532_v35 = vmax.bf16 %v1407_v1, %v183_v26  ;;  %v1535_v36 = vmax.bf16 %v1407_v1, %v214_v27  ;;  %v1538_v37 = vmax.bf16 %v1407_v1, %v215_v28  ;;  %v184_v38 = vld [vmem:[%s1459_s24 + $0x30] sm:$0xff]  ;;  %v185_v39 = vld [vmem:[%s1459_s24 + $0x38] sm:$0xff]  ;;  %v1287_v41 = vcombine.low %v1475_v11, %v1480_v12  ;;  %v194_v50 = vld [vmem:[%s1459_s24 + $0x80] sm:$0xff] }
  0x16   : > { %1344 = vmatprep.mubr.msk.bf16.mxu1 %vm673_vm0, %v1288_v14  ;;  %v225_v40 = vld [vmem:[%s1459_s24 + $0x178] sm:$0xff]  ;;  %v1258_v42 = vcombine.high %v1504_v22, %v1507_v23  ;;  %v1290_v43 = vcombine.high %v1510_v24, %v1513_v25  ;;  %v1257_v44 = vcombine.low %v1504_v22, %v1507_v23  ;;  %v1289_v46 = vcombine.low %v1510_v24, %v1513_v25  ;;  %v195_v51 = vld [vmem:[%s1459_s24 + $0x88] sm:$0xff]  ;;  %v226_v55 = vld [vmem:[%s1459_s24 + $0x180] sm:$0xff] }
  0x17   : > { %779 = vmatpush1.bf16.msra.mxu0 %v1394_v15  ;;  %1376 = vmatpush1.bf16.msra.mxu1 %v1394_v15  ;;  %v1557_v47 = vmax.bf16 %v1407_v1, %v192_v32  ;;  %v1560_v48 = vmax.bf16 %v1407_v1, %v193_v33  ;;  %v1563_v49 = vmax.bf16 %v1407_v1, %v224_v34  ;;  %v227_v56 = vld [vmem:[%s1459_s24 + $0x188] sm:$0xff]  ;;  %v196_v57 = vld [vmem:[%s1459_s24 + $0x90] sm:$0xff]  ;;  %v197_v61 = vld [vmem:[%s1459_s24 + $0x98] sm:$0xff] }
  0x18   : > { %780 = vmatprep.subr.bf16.mxu0 %v1407_v1  ;;  %1368 = vmatprep.subr.bf16.mxu1 %v1407_v1  ;;  %v1568_v52 = vmax.bf16 %v1407_v1, %v184_v38  ;;  %v1571_v53 = vmax.bf16 %v1407_v1, %v185_v39  ;;  %v1574_v54 = vmax.bf16 %v1407_v1, %v225_v40  ;;  %v228_v62 = vld [vmem:[%s1459_s24 + $0x190] sm:$0xff]  ;;  %v229_v63 = vld [vmem:[%s1459_s24 + $0x198] sm:$0xff]  ;;  %v1398_v5 = vld [vmem:[%s2191_s1 + $0x40] sm:$0xff]  }
  0x19   : > { %v1260_v58 = vcombine.high %v1524_v31, %v1532_v35  ;;  %v1292_v59 = vcombine.high %v1535_v36, %v1538_v37  ;;  %v1270_v60 = vcombine.high %v1557_v47, %v1560_v48  ;;  %v1269_v2 = vcombine.low %v1557_v47, %v1560_v48  ;;  %v198_v17 = vld [vmem:[%s1459_s24 + $0xa0] sm:$0xff]  ;;  %v199_v18 = vld [vmem:[%s1459_s24 + $0xa8] sm:$0xff]  ;;  %v200_v28 = vld [vmem:[%s1459_s24 + $0xb0] sm:$0xff] }
  0x1a   : > { %v1302_v0 = vcombine.high %v1563_v49, %v1574_v54  ;;  %v1301_v3 = vcombine.low %v1563_v49, %v1574_v54  ;;  %v1597_v4 = vmax.bf16 %v1407_v1, %v194_v50  ;;  %v1603_v6 = vmax.bf16 %v1407_v1, %v195_v51  ;;  %v230_v19 = vld [vmem:[%s1459_s24 + $0x1a0] sm:$0xff]  ;;  %v231_v27 = vld [vmem:[%s1459_s24 + $0x1a8] sm:$0xff]  ;;  %v232_v39 = vld [vmem:[%s1459_s24 + $0x1b0] sm:$0xff] }
  0x1b   : > { %781 = vmatpush1.bf16.msra.mxu0 %v1395_v20  ;;  %1377 = vmatpush1.bf16.msra.mxu1 %v1395_v20  ;;  %v1606_v7 = vmax.bf16 %v1407_v1, %v226_v55  ;;  %v1609_v10 = vmax.bf16 %v1407_v1, %v227_v56  ;;  %v1612_v13 = vmax.bf16 %v1407_v1, %v196_v57  ;;  %v233_v40 = vld [vmem:[%s1459_s24 + $0x1b8] sm:$0xff]  ;;  %v206_v12 = vld [vmem:[%s1459_s24 + $0xe0] sm:$0xff]  ;;  %v216_v21 = vld [vmem:[%s1459_s24 + $0x130] sm:$0xff] }
  0x1c   : > { %782 = vmatprep.subr.bf16.mxu0 %v1407_v1  ;;  %1369 = vmatprep.subr.bf16.mxu1 %v1407_v1  ;;  %v1615_v14 = vmax.bf16 %v1407_v1, %v197_v61  ;;  %v1618_v15 = vmax.bf16 %v1407_v1, %v228_v62  ;;  %v1621_v16 = vmax.bf16 %v1407_v1, %v229_v63  ;;  %v202_v62 = vld [vmem:[%s1459_s24 + $0xc0] sm:$0xff]  ;;  %v203_v63 = vld [vmem:[%s1459_s24 + $0xc8] sm:$0xff]  ;;  %v237_v34 = vld [vmem:[%s1459_s24 + $0x1d8] sm:$0xff] }
  0x1d   : > { %v1650_v50 = vmax.bf16 %v1407_v1, %v198_v17  ;;  %v1653_v51 = vmax.bf16 %v1407_v1, %v199_v18  ;;  %v1656_v55 = vmax.bf16 %v1407_v1, %v230_v19  ;;  %v1659_v56 = vmax.bf16 %v1407_v1, %v231_v27  ;;  %v234_v27 = vld [vmem:[%s1459_s24 + $0x1c0] sm:$0xff]  ;;  %v209_v17 = vld [vmem:[%s1459_s24 + $0xf8] sm:$0xff] }
  0x1e   : > { %v1662_v57 = vmax.bf16 %v1407_v1, %v200_v28  ;;  %v1674_v18 = vmax.bf16 %v1407_v1, %v232_v39  ;;  %v1677_v19 = vmax.bf16 %v1407_v1, %v233_v40  ;;  %v235_v28 = vld [vmem:[%s1459_s24 + $0x1c8] sm:$0xff]  ;;  %v236_v40 = vld [vmem:[%s1459_s24 + $0x1d0] sm:$0xff]  ;;  %v1704_v38 = vmax.bf16 %v1407_v1, %v202_v62  ;;  %v217_v32 = vld [vmem:[%s1459_s24 + $0x138] sm:$0xff] }
  0x1f   : > { %783 = vmatpush1.bf16.msra.mxu0 %v1396_v29  ;;  %1378 = vmatpush1.bf16.msra.mxu1 %v1396_v29  ;;  %v201_v29 = vld [vmem:[%s1459_s24 + $0xb8] sm:$0xff]  ;;  %v1715_v8 = vmax.bf16 %v1407_v1, %v203_v63  ;;  %v1718_v9 = vmax.bf16 %v1407_v1, %v234_v27  ;;  %v1721_v11 = vmax.bf16 %v1407_v1, %v235_v28  ;;  %v238_v63 = vld [vmem:[%s1459_s24 + $0x1e0] sm:$0xff]  ;;  %v239_v27 = vld [vmem:[%s1459_s24 + $0x1e8] sm:$0xff] }
  0x20   : > { %784 = vmatprep.subr.bf16.mxu0 %v1407_v1  ;;  %1370 = vmatprep.subr.bf16.mxu1 %v1407_v1  ;;  %v1665_v61 = vmax.bf16 %v1407_v1, %v201_v29  ;;  %v1735_v62 = vmax.bf16 %v1407_v1, %v237_v34  ;;  %v208_v39 = vld [vmem:[%s1459_s24 + $0xf0] sm:$0xff]  ;;  %v241_v29 = vld [vmem:[%s1459_s24 + $0x1f8] sm:$0xff]  ;;  %v1766_v26 = vmax.bf16 %v1407_v1, %v238_v63 }
  0x21   : > { %v240_v34 = vld [vmem:[%s1459_s24 + $0x1f0] sm:$0xff]  ;;  %v1769_v33 = vmax.bf16 %v1407_v1, %v239_v27  ;;  %v1774_v20 = vmax.bf16 %v1407_v1, %v208_v39  ;;  %v1777_v28 = vmax.bf16 %v1407_v1, %v209_v17  ;;  %v280_v22 = vmax.bf16 %v1407_v1, %v216_v21  ;;  %v218_v21 = vld [vmem:[%s1459_s24 + $0x140] sm:$0xff]  ;;  %v191_v27 = vld [vmem:[%s1459_s24 + $0x68] sm:$0xff] }
  0x22   : > { %v281_v23 = vmax.bf16 %v1407_v1, %v217_v32  ;;  %v1259_v25 = vcombine.low %v1524_v31, %v1532_v35  ;;  %v219_v32 = vld [vmem:[%s1459_s24 + $0x148] sm:$0xff]  ;;  %v282_v35 = vmax.bf16 %v1407_v1, %v218_v21  ;;  %v2197_v47 = vcombine.low %v1606_v7, %v1609_v10 }
  0x23   : > { %785 = vmatpush1.bf16.msra.mxu0 %v1397_v45  ;;  %1379 = vmatpush1.bf16.msra.mxu1 %v1397_v45  ;;  %v204_v45 = vld [vmem:[%s1459_s24 + $0xd0] sm:$0xff]  ;;  %v2198_v48 = vcombine.high %v1612_v13, %v1615_v14  ;;  %v2199_v49 = vcombine.high %v1618_v15, %v1621_v16  ;;  %v2200_v54 = vcombine.low %v1612_v13, %v1615_v14 }
  0x24   : > { %786 = vmatprep.subr.bf16.mxu0 %v1407_v1  ;;  %1371 = vmatprep.subr.bf16.mxu1 %v1407_v1  ;;  %v1293_v39 = vcombine.low %v280_v22, %v281_v23  ;;  %v2207_v13 = vcombine.high %v1674_v18, %v1677_v19  ;;  %v2208_v14 = vcombine.low %v1662_v57, %v1665_v61 }
  0x27   : > { %787 = vmatpush1.bf16.msra.mxu0 %v1398_v5  ;;  %1380 = vmatpush1.bf16.msra.mxu1 %v1398_v5  ;;  %v205_v5 = vld [vmem:[%s1459_s24 + $0xd8] sm:$0xff] }
  0x2a   : > { %803 = vmatmul.mubr.bf16.vlgmr.msra.gmra.mrb[0].mxu0 %v1255_v30  ;;  %931 = vmatmul.mubr.bf16.vlgmr.msra.gmra.mrb[0].mxu1 %v1287_v41  ;;  %v207_v30 = vld [vmem:[%s1459_s24 + $0xe8] sm:$0xff]  ;;  %v1726_v41 = vmax.bf16 %v1407_v1, %v204_v45  ;;  %v190_v45 = vld [vmem:[%s1459_s24 + $0x60] sm:$0xff] }
  0x2b   : > { %1329 = vmatprep.mubr.msk.bf16.mxu0 %vm673_vm0, %v1258_v42  ;;  %1345 = vmatprep.mubr.msk.bf16.mxu1 %vm673_vm0, %v1290_v43  ;;  %v1729_v42 = vmax.bf16 %v1407_v1, %v205_v5  ;;  %v1732_v43 = vmax.bf16 %v1407_v1, %v236_v40  ;;  %v1760_v5 = vmax.bf16 %v1407_v1, %v206_v12 }
  0x2c   : > { %v1763_v40 = vmax.bf16 %v1407_v1, %v207_v30  ;;  %v1780_v12 = vmax.bf16 %v1407_v1, %v240_v34  ;;  %v1783_v30 = vmax.bf16 %v1407_v1, %v241_v29  ;;  %v186_v34 = vld [vmem:[%s1459_s24 + $0x40] sm:$0xff] }
  0x2d   : > { %v250_v24 = vmax.bf16 %v1407_v1, %v186_v34  ;;  %v220_v34 = vld [vmem:[%s1459_s24 + $0x150] sm:$0xff] }
  0x2e   : > { %v1284_v63 = vcombine.high %v1760_v5, %v1763_v40 }
  0x32   : > { %811 = vmatmul.mubr.bf16.gmra.mrb[4].mxu0 %v1257_v44  ;;  %939 = vmatmul.mubr.bf16.gmra.mrb[4].mxu1 %v1289_v46  ;;  %v1291_v44 = vcombine.low %v1535_v36, %v1538_v37  ;;  %v1262_v46 = vcombine.high %v1568_v52, %v1571_v53  ;;  %v283_v36 = vmax.bf16 %v1407_v1, %v219_v32 }
  0x33   : > { %1330 = vmatprep.mubr.msk.bf16.mxu0 %vm673_vm0, %v1260_v58  ;;  %1346 = vmatprep.mubr.msk.bf16.mxu1 %vm673_vm0, %v1292_v59  ;;  %v1294_v58 = vcombine.high %v280_v22, %v281_v23  ;;  %v187_v59 = vld [vmem:[%s1459_s24 + $0x48] sm:$0xff]  ;;  %v1261_v37 = vcombine.low %v1568_v52, %v1571_v53  ;;  %v284_v53 = vmax.bf16 %v1407_v1, %v220_v34 }
  0x34   : > { %v251_v31 = vmax.bf16 %v1407_v1, %v187_v59  ;;  %v1296_v17 = vcombine.high %v282_v35, %v283_v36  ;;  %v1295_v59 = vcombine.low %v282_v35, %v283_v36 }
  0x36   : > { %v1264_v29 = vcombine.high %v250_v24, %v251_v31  ;;  %v1263_v23 = vcombine.low %v250_v24, %v251_v31 }
  0x3a   : > { %819 = vmatmul.mubr.bf16.gmra.mrb[8].mxu0 %v1259_v25  ;;  %947 = vmatmul.mubr.bf16.gmra.mrb[8].mxu1 %v1291_v44  ;;  %v188_v25 = vld [vmem:[%s1459_s24 + $0x50] sm:$0xff]  ;;  %v189_v44 = vld [vmem:[%s1459_s24 + $0x58] sm:$0xff] }
  0x3b   : > { %1331 = vmatprep.mubr.msk.bf16.mxu0 %vm673_vm0, %v1262_v46  ;;  %1347 = vmatprep.mubr.msk.bf16.mxu1 %vm673_vm0, %v1294_v58  ;;  %v221_v46 = vld [vmem:[%s1459_s24 + $0x158] sm:$0xff]  ;;  %v252_v58 = vmax.bf16 %v1407_v1, %v188_v25  ;;  %v253_v52 = vmax.bf16 %v1407_v1, %v189_v44 }
  0x3c   : > { %v285_v22 = vmax.bf16 %v1407_v1, %v221_v46 }
  0x3d   : > { %v1266_v21 = vcombine.high %v252_v58, %v253_v52  ;;  %v1265_v31 = vcombine.low %v252_v58, %v253_v52 }
  0x3e   : > { %v1298_v32 = vcombine.high %v284_v53, %v285_v22  ;;  %v1297_v35 = vcombine.low %v284_v53, %v285_v22 }
  0x42   : > { %827 = vmatmul.mubr.bf16.gmra.mrb[12].mxu0 %v1261_v37  ;;  %955 = vmatmul.mubr.bf16.gmra.mrb[12].mxu1 %v1293_v39  ;;  %v222_v37 = vld [vmem:[%s1459_s24 + $0x160] sm:$0xff]  ;;  %v223_v39 = vld [vmem:[%s1459_s24 + $0x168] sm:$0xff] }
  0x43   : > { %1332 = vmatprep.mubr.msk.bf16.mxu0 %vm673_vm0, %v1264_v29  ;;  %1348 = vmatprep.mubr.msk.bf16.mxu1 %vm673_vm0, %v1296_v17  ;;  %v254_v29 = vmax.bf16 %v1407_v1, %v190_v45  ;;  %v255_v17 = vmax.bf16 %v1407_v1, %v191_v27  ;;  %v286_v25 = vmax.bf16 %v1407_v1, %v222_v37 }
  0x44   : > { %v287_v24 = vmax.bf16 %v1407_v1, %v223_v39  ;;  %v2194_v1 = vcombine.high %v1597_v4, %v1603_v6 }
  0x45   : > { %v1268_v36 = vcombine.high %v254_v29, %v255_v17  ;;  %v1267_v45 = vcombine.low %v254_v29, %v255_v17 }
  0x46   : > { %v1300_v44 = vcombine.high %v286_v25, %v287_v24  ;;  %v1299_v34 = vcombine.low %v286_v25, %v287_v24 }
  0x4a   : > { %835 = vmatmul.mubr.bf16.gmra.mrb[16].mxu0 %v1263_v23  ;;  %963 = vmatmul.mubr.bf16.gmra.mrb[16].mxu1 %v1295_v59 }
  0x4b   : > { %1333 = vmatprep.mubr.msk.bf16.mxu0 %vm673_vm0, %v1266_v21  ;;  %1349 = vmatprep.mubr.msk.bf16.mxu1 %vm673_vm0, %v1298_v32 }
  0x52   : > { %843 = vmatmul.mubr.bf16.gmra.mrb[20].mxu0 %v1265_v31  ;;  %971 = vmatmul.mubr.bf16.gmra.mrb[20].mxu1 %v1297_v35 }
  0x53   : > { %1334 = vmatprep.mubr.msk.bf16.mxu0 %vm673_vm0, %v1268_v36  ;;  %1350 = vmatprep.mubr.msk.bf16.mxu1 %vm673_vm0, %v1300_v44 }
  0x5a   : > { %851 = vmatmul.mubr.bf16.gmra.mrb[24].mxu0 %v1267_v45  ;;  %979 = vmatmul.mubr.bf16.gmra.mrb[24].mxu1 %v1299_v34 }
  0x5b   : > { %1335 = vmatprep.mubr.msk.bf16.mxu0 %vm673_vm0, %v1270_v60  ;;  %1351 = vmatprep.mubr.msk.bf16.mxu1 %vm673_vm0, %v1302_v0  ;;  %v2195_v60 = vcombine.high %v1606_v7, %v1609_v10  ;;  %v2196_v0 = vcombine.low %v1597_v4, %v1603_v6  ;;  %v2203_v4 = vcombine.high %v1656_v55, %v1659_v56 }
  0x5c   : > { %v2204_v6 = vcombine.low %v1650_v50, %v1653_v51  ;;  %v2205_v7 = vcombine.low %v1656_v55, %v1659_v56  ;;  %v2206_v10 = vcombine.high %v1662_v57, %v1665_v61  ;;  %v2213_v55 = vcombine.low %v1718_v9, %v1721_v11 }
  0x5d   : > { %v2214_v56 = vcombine.high %v1726_v41, %v1729_v42  ;;  %v2215_v57 = vcombine.high %v1732_v43, %v1735_v62  ;;  %v2216_v61 = vcombine.low %v1726_v41, %v1729_v42  ;;  %v2223_v41 = vcombine.low %v1774_v20, %v1777_v28 }
  0x5e   : > { %v2224_v42 = vcombine.low %v1780_v12, %v1783_v30 }
  0x62   : > { %859 = vmatmul.mubr.bf16.gmra.mrb[28].mxu0 %v1269_v2  ;;  %987 = vmatmul.mubr.bf16.gmra.mrb[28].mxu1 %v1301_v3  ;;  %v2201_v2 = vcombine.low %v1618_v15, %v1621_v16  ;;  %v2202_v3 = vcombine.high %v1650_v50, %v1653_v51  ;;  %v2209_v15 = vcombine.low %v1674_v18, %v1677_v19 }
  0x63   : > { %1336 = vmatprep.mubr.msk.bf16.mxu0 %vm673_vm0, %v2194_v1  ;;  %1352 = vmatprep.mubr.msk.bf16.mxu1 %vm673_vm0, %v2195_v60  ;;  %v2210_v16 = vcombine.high %v1704_v38, %v1715_v8  ;;  %v2211_v50 = vcombine.high %v1718_v9, %v1721_v11  ;;  %v2212_v51 = vcombine.low %v1704_v38, %v1715_v8 }
  0x64   : > { %v2217_v38 = vcombine.low %v1732_v43, %v1735_v62  ;;  %v2218_v18 = vcombine.high %v1766_v26, %v1769_v33  ;;  %v2219_v19 = vcombine.low %v1760_v5, %v1763_v40  ;;  %v2220_v8 = vcombine.low %v1766_v26, %v1769_v33  ;;  %v1986_v26 = vld [vmem:[%s2192_s2] ss:$0 sm:$0xff] }
  0x65   : > { %v2221_v9 = vcombine.high %v1774_v20, %v1777_v28  ;;  %v2222_v11 = vcombine.high %v1780_v12, %v1783_v30 }
  0x6a   : > { %867 = vmatmul.mubr.bf16.gmra.mrb[32].mxu0 %v2196_v0  ;;  %995 = vmatmul.mubr.bf16.gmra.mrb[32].mxu1 %v2197_v47 }
  0x6b   : > { %1337 = vmatprep.mubr.msk.bf16.mxu0 %vm673_vm0, %v2198_v48  ;;  %1353 = vmatprep.mubr.msk.bf16.mxu1 %vm673_vm0, %v2199_v49 }
  0x72   : > { %875 = vmatmul.mubr.bf16.gmra.mrb[36].mxu0 %v2200_v54  ;;  %1003 = vmatmul.mubr.bf16.gmra.mrb[36].mxu1 %v2201_v2 }
  0x73   : > { %1338 = vmatprep.mubr.msk.bf16.mxu0 %vm673_vm0, %v2202_v3  ;;  %1354 = vmatprep.mubr.msk.bf16.mxu1 %vm673_vm0, %v2203_v4 }
  0x7a   : > { %883 = vmatmul.mubr.bf16.gmra.mrb[40].mxu0 %v2204_v6  ;;  %1011 = vmatmul.mubr.bf16.gmra.mrb[40].mxu1 %v2205_v7 }
  0x7b   : > { %1339 = vmatprep.mubr.msk.bf16.mxu0 %vm673_vm0, %v2206_v10  ;;  %1355 = vmatprep.mubr.msk.bf16.mxu1 %vm673_vm0, %v2207_v13 }
  0x82   : > { %891 = vmatmul.mubr.bf16.gmra.mrb[44].mxu0 %v2208_v14  ;;  %1019 = vmatmul.mubr.bf16.gmra.mrb[44].mxu1 %v2209_v15 }
  0x83   : > { %1340 = vmatprep.mubr.msk.bf16.mxu0 %vm673_vm0, %v2210_v16  ;;  %1356 = vmatprep.mubr.msk.bf16.mxu1 %vm673_vm0, %v2211_v50 }
  0x8a   : > { %899 = vmatmul.mubr.bf16.gmra.mrb[48].mxu0 %v2212_v51  ;;  %1027 = vmatmul.mubr.bf16.gmra.mrb[48].mxu1 %v2213_v55 }
  0x8b   : > { %1341 = vmatprep.mubr.msk.bf16.mxu0 %vm673_vm0, %v2214_v56  ;;  %1357 = vmatprep.mubr.msk.bf16.mxu1 %vm673_vm0, %v2215_v57 }
  0x92   : > { %907 = vmatmul.mubr.bf16.gmra.mrb[52].mxu0 %v2216_v61  ;;  %1035 = vmatmul.mubr.bf16.gmra.mrb[52].mxu1 %v2217_v38 }
  0x93   : > { %1342 = vmatprep.mubr.msk.bf16.mxu0 %vm673_vm0, %v1284_v63  ;;  %1358 = vmatprep.mubr.msk.bf16.mxu1 %vm673_vm0, %v2218_v18 }
  0x9a   : > { %915 = vmatmul.mubr.bf16.gmra.mrb[56].mxu0 %v2219_v19  ;;  %1043 = vmatmul.mubr.bf16.gmra.mrb[56].mxu1 %v2220_v8 }
  0x9b   : > { %1343 = vmatprep.mubr.msk.bf16.mxu0 %vm673_vm0, %v2221_v9  ;;  %1359 = vmatprep.mubr.msk.bf16.mxu1 %vm673_vm0, %v2222_v11 }
  0xa2   : > { %923 = vmatmul.mubr.bf16.gmra.mrb[60].mxu0 %v2223_v41  ;;  %1051 = vmatmul.mubr.bf16.gmra.mrb[60].mxu1 %v2224_v42 }
  0xfd   : > { %v804_v33 = vpop.f32.mrb[0].mxu0  ;;  %v932_v43 = vpop.f32.mrb[0].mxu1 }
  0xfe   : > { %v805_v62 = vadd.f32 %v1986_v26, %v804_v33  ;;  %v933_v5 = vadd.f32 %v1986_v26, %v932_v43  ;;  %v806_v40 = vpop.f32.mrb[1].mxu0  ;;  %v934_v63 = vpop.f32.mrb[1].mxu1 }
  0xff   : > { %v807_v20 = vpop.f32.mrb[2].mxu0  ;;  %v935_v28 = vpop.f32.mrb[2].mxu1 }
 0x100   : > { %v1059_v12 = vmax.f32 %v805_v62, 0.0  ;;  %v1091_v30 = vmax.f32 %v933_v5, 0.0  ;;  %v808_v27 = vadd.f32 %v1986_v26, %v807_v20  ;;  %v936_v46 = vadd.f32 %v1986_v26, %v935_v28  ;;  %v809_v58 = vpop.f32.mrb[3].mxu0  ;;  %v937_v52 = vpop.f32.mrb[3].mxu1 }
 0x102   : > { %1124 = vst.msk [vmem:[%s1995_s15] sm:$0xff] %vm1123_vm1, %v1059_v12  ;;  %1156 = vst.msk [vmem:[%s1995_s15 + $0x100] sm:$0xff] %vm1123_vm1, %v1091_v30  ;;  %v1060_v53 = vmax.f32 %v808_v27, 0.0  ;;  %v1092_v22 = vmax.f32 %v936_v46, 0.0 }
 0x104   : > { %1125 = vst.msk [vmem:[%s1995_s15 + $0x8] sm:$0xff] %vm1123_vm1, %v1060_v53  ;;  %1157 = vst.msk [vmem:[%s1995_s15 + $0x108] sm:$0xff] %vm1123_vm1, %v1092_v22 }
 0x105   : > { %v812_v23 = vpop.f32.mrb[4].mxu0  ;;  %v940_v59 = vpop.f32.mrb[4].mxu1 }
 0x106   : > { %v813_v21 = vadd.f32 %v1986_v26, %v812_v23  ;;  %v941_v32 = vadd.f32 %v1986_v26, %v940_v59  ;;  %v814_v37 = vpop.f32.mrb[5].mxu0  ;;  %v942_v39 = vpop.f32.mrb[5].mxu1 }
 0x107   : > { %v815_v29 = vpop.f32.mrb[6].mxu0  ;;  %v943_v17 = vpop.f32.mrb[6].mxu1 }
 0x108   : > { %v1061_v25 = vmax.f32 %v813_v21, 0.0  ;;  %v1093_v24 = vmax.f32 %v941_v32, 0.0  ;;  %v816_v31 = vadd.f32 %v1986_v26, %v815_v29  ;;  %v944_v35 = vadd.f32 %v1986_v26, %v943_v17  ;;  %v817_v36 = vpop.f32.mrb[7].mxu0  ;;  %v945_v44 = vpop.f32.mrb[7].mxu1 }
 0x10a   : > { %1126 = vst.msk [vmem:[%s1995_s15 + $0x10] sm:$0xff] %vm1123_vm1, %v1061_v25  ;;  %1158 = vst.msk [vmem:[%s1995_s15 + $0x110] sm:$0xff] %vm1123_vm1, %v1093_v24  ;;  %v1062_v45 = vmax.f32 %v816_v31, 0.0  ;;  %v1094_v34 = vmax.f32 %v944_v35, 0.0 }
 0x10c   : > { %1127 = vst.msk [vmem:[%s1995_s15 + $0x18] sm:$0xff] %vm1123_vm1, %v1062_v45  ;;  %1159 = vst.msk [vmem:[%s1995_s15 + $0x118] sm:$0xff] %vm1123_vm1, %v1094_v34 }
 0x10d   : > { %v820_v1 = vpop.f32.mrb[8].mxu0  ;;  %v948_v60 = vpop.f32.mrb[8].mxu1 }
 0x10e   : > { %v821_v0 = vadd.f32 %v1986_v26, %v820_v1  ;;  %v949_v47 = vadd.f32 %v1986_v26, %v948_v60  ;;  %v822_v48 = vpop.f32.mrb[9].mxu0  ;;  %v950_v49 = vpop.f32.mrb[9].mxu1 }
 0x10f   : > { %v823_v54 = vpop.f32.mrb[10].mxu0  ;;  %v951_v2 = vpop.f32.mrb[10].mxu1 }
 0x110   : > { %v1063_v3 = vmax.f32 %v821_v0, 0.0  ;;  %v1095_v4 = vmax.f32 %v949_v47, 0.0  ;;  %v824_v6 = vadd.f32 %v1986_v26, %v823_v54  ;;  %v952_v7 = vadd.f32 %v1986_v26, %v951_v2  ;;  %v825_v10 = vpop.f32.mrb[11].mxu0  ;;  %v953_v13 = vpop.f32.mrb[11].mxu1 }
 0x112   : > { %1128 = vst.msk [vmem:[%s1995_s15 + $0x20] sm:$0xff] %vm1123_vm1, %v1063_v3  ;;  %1160 = vst.msk [vmem:[%s1995_s15 + $0x120] sm:$0xff] %vm1123_vm1, %v1095_v4  ;;  %v1064_v14 = vmax.f32 %v824_v6, 0.0  ;;  %v1096_v15 = vmax.f32 %v952_v7, 0.0 }
 0x114   : > { %1129 = vst.msk [vmem:[%s1995_s15 + $0x28] sm:$0xff] %vm1123_vm1, %v1064_v14  ;;  %1161 = vst.msk [vmem:[%s1995_s15 + $0x128] sm:$0xff] %vm1123_vm1, %v1096_v15 }
 0x115   : > { %v828_v16 = vpop.f32.mrb[12].mxu0  ;;  %v956_v50 = vpop.f32.mrb[12].mxu1 }
 0x116   : > { %v829_v51 = vadd.f32 %v1986_v26, %v828_v16  ;;  %v957_v55 = vadd.f32 %v1986_v26, %v956_v50  ;;  %v830_v56 = vpop.f32.mrb[13].mxu0  ;;  %v958_v57 = vpop.f32.mrb[13].mxu1 }
 0x117   : > { %v831_v61 = vpop.f32.mrb[14].mxu0  ;;  %v959_v38 = vpop.f32.mrb[14].mxu1 }
 0x118   : > { %v1065_v18 = vmax.f32 %v829_v51, 0.0  ;;  %v1097_v19 = vmax.f32 %v957_v55, 0.0  ;;  %v832_v8 = vadd.f32 %v1986_v26, %v831_v61  ;;  %v960_v9 = vadd.f32 %v1986_v26, %v959_v38  ;;  %v833_v11 = vpop.f32.mrb[15].mxu0  ;;  %v961_v41 = vpop.f32.mrb[15].mxu1 }
 0x11a   : > { %1130 = vst.msk [vmem:[%s1995_s15 + $0x30] sm:$0xff] %vm1123_vm1, %v1065_v18  ;;  %1162 = vst.msk [vmem:[%s1995_s15 + $0x130] sm:$0xff] %vm1123_vm1, %v1097_v19  ;;  %v1066_v42 = vmax.f32 %v832_v8, 0.0  ;;  %v1098_v33 = vmax.f32 %v960_v9, 0.0 }
 0x11c   : > { %1131 = vst.msk [vmem:[%s1995_s15 + $0x38] sm:$0xff] %vm1123_vm1, %v1066_v42  ;;  %1163 = vst.msk [vmem:[%s1995_s15 + $0x138] sm:$0xff] %vm1123_vm1, %v1098_v33 }
 0x11d   : > { %v836_v43 = vpop.f32.mrb[16].mxu0  ;;  %v964_v62 = vpop.f32.mrb[16].mxu1 }
 0x11e   : > { %v837_v5 = vadd.f32 %v1986_v26, %v836_v43  ;;  %v965_v40 = vadd.f32 %v1986_v26, %v964_v62  ;;  %v838_v63 = vpop.f32.mrb[17].mxu0  ;;  %v966_v20 = vpop.f32.mrb[17].mxu1 }
 0x11f   : > { %v839_v28 = vpop.f32.mrb[18].mxu0  ;;  %v967_v12 = vpop.f32.mrb[18].mxu1 }
 0x120   : > { %v1067_v30 = vmax.f32 %v837_v5, 0.0  ;;  %v1099_v27 = vmax.f32 %v965_v40, 0.0  ;;  %v840_v46 = vadd.f32 %v1986_v26, %v839_v28  ;;  %v968_v58 = vadd.f32 %v1986_v26, %v967_v12  ;;  %v841_v52 = vpop.f32.mrb[19].mxu0  ;;  %v969_v53 = vpop.f32.mrb[19].mxu1 }
 0x122   : > { %1132 = vst.msk [vmem:[%s1995_s15 + $0x40] sm:$0xff] %vm1123_vm1, %v1067_v30  ;;  %1164 = vst.msk [vmem:[%s1995_s15 + $0x140] sm:$0xff] %vm1123_vm1, %v1099_v27  ;;  %v1068_v22 = vmax.f32 %v840_v46, 0.0  ;;  %v1100_v23 = vmax.f32 %v968_v58, 0.0 }
 0x124   : > { %1133 = vst.msk [vmem:[%s1995_s15 + $0x48] sm:$0xff] %vm1123_vm1, %v1068_v22  ;;  %1165 = vst.msk [vmem:[%s1995_s15 + $0x148] sm:$0xff] %vm1123_vm1, %v1100_v23 }
 0x125   : > { %v844_v59 = vpop.f32.mrb[20].mxu0  ;;  %v972_v21 = vpop.f32.mrb[20].mxu1 }
 0x126   : > { %v845_v32 = vadd.f32 %v1986_v26, %v844_v59  ;;  %v973_v37 = vadd.f32 %v1986_v26, %v972_v21  ;;  %v846_v39 = vpop.f32.mrb[21].mxu0  ;;  %v974_v29 = vpop.f32.mrb[21].mxu1 }
 0x127   : > { %v847_v17 = vpop.f32.mrb[22].mxu0  ;;  %v975_v25 = vpop.f32.mrb[22].mxu1 }
 0x128   : > { %v1069_v24 = vmax.f32 %v845_v32, 0.0  ;;  %v1101_v31 = vmax.f32 %v973_v37, 0.0  ;;  %v848_v35 = vadd.f32 %v1986_v26, %v847_v17  ;;  %v976_v36 = vadd.f32 %v1986_v26, %v975_v25  ;;  %v849_v44 = vpop.f32.mrb[23].mxu0  ;;  %v977_v45 = vpop.f32.mrb[23].mxu1 }
 0x12a   : > { %1134 = vst.msk [vmem:[%s1995_s15 + $0x50] sm:$0xff] %vm1123_vm1, %v1069_v24  ;;  %1166 = vst.msk [vmem:[%s1995_s15 + $0x150] sm:$0xff] %vm1123_vm1, %v1101_v31  ;;  %v1070_v34 = vmax.f32 %v848_v35, 0.0  ;;  %v1102_v1 = vmax.f32 %v976_v36, 0.0 }
 0x12c   : > { %1135 = vst.msk [vmem:[%s1995_s15 + $0x58] sm:$0xff] %vm1123_vm1, %v1070_v34  ;;  %1167 = vst.msk [vmem:[%s1995_s15 + $0x158] sm:$0xff] %vm1123_vm1, %v1102_v1 }
 0x12d   : > { %v852_v60 = vpop.f32.mrb[24].mxu0  ;;  %v980_v0 = vpop.f32.mrb[24].mxu1 }
 0x12e   : > { %v853_v47 = vadd.f32 %v1986_v26, %v852_v60  ;;  %v981_v48 = vadd.f32 %v1986_v26, %v980_v0  ;;  %v854_v49 = vpop.f32.mrb[25].mxu0  ;;  %v982_v54 = vpop.f32.mrb[25].mxu1 }
 0x12f   : > { %v855_v2 = vpop.f32.mrb[26].mxu0  ;;  %v983_v3 = vpop.f32.mrb[26].mxu1 }
 0x130   : > { %v1071_v4 = vmax.f32 %v853_v47, 0.0  ;;  %v1103_v6 = vmax.f32 %v981_v48, 0.0  ;;  %v856_v7 = vadd.f32 %v1986_v26, %v855_v2  ;;  %v984_v10 = vadd.f32 %v1986_v26, %v983_v3  ;;  %v857_v13 = vpop.f32.mrb[27].mxu0  ;;  %v985_v14 = vpop.f32.mrb[27].mxu1 }
 0x132   : > { %1136 = vst.msk [vmem:[%s1995_s15 + $0x60] sm:$0xff] %vm1123_vm1, %v1071_v4  ;;  %1168 = vst.msk [vmem:[%s1995_s15 + $0x160] sm:$0xff] %vm1123_vm1, %v1103_v6  ;;  %v1072_v15 = vmax.f32 %v856_v7, 0.0  ;;  %v1104_v16 = vmax.f32 %v984_v10, 0.0 }
 0x134   : > { %1137 = vst.msk [vmem:[%s1995_s15 + $0x68] sm:$0xff] %vm1123_vm1, %v1072_v15  ;;  %1169 = vst.msk [vmem:[%s1995_s15 + $0x168] sm:$0xff] %vm1123_vm1, %v1104_v16 }
 0x135   : > { %v860_v50 = vpop.f32.mrb[28].mxu0  ;;  %v988_v51 = vpop.f32.mrb[28].mxu1 }
 0x136   : > { %v861_v55 = vadd.f32 %v1986_v26, %v860_v50  ;;  %v989_v56 = vadd.f32 %v1986_v26, %v988_v51  ;;  %v862_v57 = vpop.f32.mrb[29].mxu0  ;;  %v990_v61 = vpop.f32.mrb[29].mxu1 }
 0x137   : > { %v863_v38 = vpop.f32.mrb[30].mxu0  ;;  %v991_v18 = vpop.f32.mrb[30].mxu1 }
 0x138   : > { %v1073_v19 = vmax.f32 %v861_v55, 0.0  ;;  %v1105_v8 = vmax.f32 %v989_v56, 0.0  ;;  %v864_v9 = vadd.f32 %v1986_v26, %v863_v38  ;;  %v992_v11 = vadd.f32 %v1986_v26, %v991_v18  ;;  %v865_v41 = vpop.f32.mrb[31].mxu0  ;;  %v993_v42 = vpop.f32.mrb[31].mxu1 }
 0x13a   : > { %1138 = vst.msk [vmem:[%s1995_s15 + $0x70] sm:$0xff] %vm1123_vm1, %v1073_v19  ;;  %1170 = vst.msk [vmem:[%s1995_s15 + $0x170] sm:$0xff] %vm1123_vm1, %v1105_v8  ;;  %v1074_v33 = vmax.f32 %v864_v9, 0.0  ;;  %v1106_v43 = vmax.f32 %v992_v11, 0.0 }
 0x13c   : > { %1139 = vst.msk [vmem:[%s1995_s15 + $0x78] sm:$0xff] %vm1123_vm1, %v1074_v33  ;;  %1171 = vst.msk [vmem:[%s1995_s15 + $0x178] sm:$0xff] %vm1123_vm1, %v1106_v43 }
 0x13d   : > { %v868_v62 = vpop.f32.mrb[32].mxu0  ;;  %v996_v5 = vpop.f32.mrb[32].mxu1 }
 0x13e   : > { %v869_v40 = vadd.f32 %v1986_v26, %v868_v62  ;;  %v997_v63 = vadd.f32 %v1986_v26, %v996_v5  ;;  %v870_v20 = vpop.f32.mrb[33].mxu0  ;;  %v998_v28 = vpop.f32.mrb[33].mxu1 }
 0x13f   : > { %v871_v12 = vpop.f32.mrb[34].mxu0  ;;  %v999_v30 = vpop.f32.mrb[34].mxu1 }
 0x140   : > { %v1075_v27 = vmax.f32 %v869_v40, 0.0  ;;  %v1107_v46 = vmax.f32 %v997_v63, 0.0  ;;  %v872_v58 = vadd.f32 %v1986_v26, %v871_v12  ;;  %v1000_v52 = vadd.f32 %v1986_v26, %v999_v30  ;;  %v873_v53 = vpop.f32.mrb[35].mxu0  ;;  %v1001_v22 = vpop.f32.mrb[35].mxu1 }
 0x142   : > { %1140 = vst.msk [vmem:[%s1995_s15 + $0x80] sm:$0xff] %vm1123_vm1, %v1075_v27  ;;  %1172 = vst.msk [vmem:[%s1995_s15 + $0x180] sm:$0xff] %vm1123_vm1, %v1107_v46  ;;  %v1076_v23 = vmax.f32 %v872_v58, 0.0  ;;  %v1108_v59 = vmax.f32 %v1000_v52, 0.0 }
 0x144   : > { %1141 = vst.msk [vmem:[%s1995_s15 + $0x88] sm:$0xff] %vm1123_vm1, %v1076_v23  ;;  %1173 = vst.msk [vmem:[%s1995_s15 + $0x188] sm:$0xff] %vm1123_vm1, %v1108_v59 }
 0x145   : > { %v876_v21 = vpop.f32.mrb[36].mxu0  ;;  %v1004_v32 = vpop.f32.mrb[36].mxu1 }
 0x146   : > { %v877_v37 = vadd.f32 %v1986_v26, %v876_v21  ;;  %v1005_v39 = vadd.f32 %v1986_v26, %v1004_v32  ;;  %v878_v29 = vpop.f32.mrb[37].mxu0  ;;  %v1006_v17 = vpop.f32.mrb[37].mxu1 }
 0x147   : > { %v879_v25 = vpop.f32.mrb[38].mxu0  ;;  %v1007_v24 = vpop.f32.mrb[38].mxu1 }
 0x148   : > { %v1077_v31 = vmax.f32 %v877_v37, 0.0  ;;  %v1109_v35 = vmax.f32 %v1005_v39, 0.0  ;;  %v880_v36 = vadd.f32 %v1986_v26, %v879_v25  ;;  %v1008_v44 = vadd.f32 %v1986_v26, %v1007_v24  ;;  %v881_v45 = vpop.f32.mrb[39].mxu0  ;;  %v1009_v34 = vpop.f32.mrb[39].mxu1 }
 0x14a   : > { %1142 = vst.msk [vmem:[%s1995_s15 + $0x90] sm:$0xff] %vm1123_vm1, %v1077_v31  ;;  %1174 = vst.msk [vmem:[%s1995_s15 + $0x190] sm:$0xff] %vm1123_vm1, %v1109_v35  ;;  %v1078_v1 = vmax.f32 %v880_v36, 0.0  ;;  %v1110_v60 = vmax.f32 %v1008_v44, 0.0 }
 0x14c   : > { %1143 = vst.msk [vmem:[%s1995_s15 + $0x98] sm:$0xff] %vm1123_vm1, %v1078_v1  ;;  %1175 = vst.msk [vmem:[%s1995_s15 + $0x198] sm:$0xff] %vm1123_vm1, %v1110_v60 }
 0x14d   : > { %v884_v0 = vpop.f32.mrb[40].mxu0  ;;  %v1012_v47 = vpop.f32.mrb[40].mxu1 }
 0x14e   : > { %v885_v48 = vadd.f32 %v1986_v26, %v884_v0  ;;  %v1013_v49 = vadd.f32 %v1986_v26, %v1012_v47  ;;  %v886_v54 = vpop.f32.mrb[41].mxu0  ;;  %v1014_v2 = vpop.f32.mrb[41].mxu1 }
 0x14f   : > { %v887_v3 = vpop.f32.mrb[42].mxu0  ;;  %v1015_v4 = vpop.f32.mrb[42].mxu1 }
 0x150   : > { %v1079_v6 = vmax.f32 %v885_v48, 0.0  ;;  %v1111_v7 = vmax.f32 %v1013_v49, 0.0  ;;  %v888_v10 = vadd.f32 %v1986_v26, %v887_v3  ;;  %v1016_v13 = vadd.f32 %v1986_v26, %v1015_v4  ;;  %v889_v14 = vpop.f32.mrb[43].mxu0  ;;  %v1017_v15 = vpop.f32.mrb[43].mxu1 }
 0x152   : > { %1144 = vst.msk [vmem:[%s1995_s15 + $0xa0] sm:$0xff] %vm1123_vm1, %v1079_v6  ;;  %1176 = vst.msk [vmem:[%s1995_s15 + $0x1a0] sm:$0xff] %vm1123_vm1, %v1111_v7  ;;  %v1080_v16 = vmax.f32 %v888_v10, 0.0  ;;  %v1112_v50 = vmax.f32 %v1016_v13, 0.0 }
 0x154   : > { %1145 = vst.msk [vmem:[%s1995_s15 + $0xa8] sm:$0xff] %vm1123_vm1, %v1080_v16  ;;  %1177 = vst.msk [vmem:[%s1995_s15 + $0x1a8] sm:$0xff] %vm1123_vm1, %v1112_v50 }
 0x155   : > { %v892_v51 = vpop.f32.mrb[44].mxu0  ;;  %v1020_v55 = vpop.f32.mrb[44].mxu1 }
 0x156   : > { %v893_v56 = vadd.f32 %v1986_v26, %v892_v51  ;;  %v1021_v57 = vadd.f32 %v1986_v26, %v1020_v55  ;;  %v894_v61 = vpop.f32.mrb[45].mxu0  ;;  %v1022_v38 = vpop.f32.mrb[45].mxu1 }
 0x157   : > { %v895_v18 = vpop.f32.mrb[46].mxu0  ;;  %v1023_v19 = vpop.f32.mrb[46].mxu1 }
 0x158   : > { %v1081_v8 = vmax.f32 %v893_v56, 0.0  ;;  %v1113_v9 = vmax.f32 %v1021_v57, 0.0  ;;  %v896_v11 = vadd.f32 %v1986_v26, %v895_v18  ;;  %v1024_v41 = vadd.f32 %v1986_v26, %v1023_v19  ;;  %v897_v42 = vpop.f32.mrb[47].mxu0  ;;  %v1025_v33 = vpop.f32.mrb[47].mxu1 }
 0x15a   : > { %1146 = vst.msk [vmem:[%s1995_s15 + $0xb0] sm:$0xff] %vm1123_vm1, %v1081_v8  ;;  %1178 = vst.msk [vmem:[%s1995_s15 + $0x1b0] sm:$0xff] %vm1123_vm1, %v1113_v9  ;;  %v1082_v43 = vmax.f32 %v896_v11, 0.0  ;;  %v1114_v62 = vmax.f32 %v1024_v41, 0.0 }
 0x15c   : > { %1147 = vst.msk [vmem:[%s1995_s15 + $0xb8] sm:$0xff] %vm1123_vm1, %v1082_v43  ;;  %1179 = vst.msk [vmem:[%s1995_s15 + $0x1b8] sm:$0xff] %vm1123_vm1, %v1114_v62 }
 0x15d   : > { %v900_v5 = vpop.f32.mrb[48].mxu0  ;;  %v1028_v40 = vpop.f32.mrb[48].mxu1 }
 0x15e   : > { %v901_v63 = vadd.f32 %v1986_v26, %v900_v5  ;;  %v1029_v20 = vadd.f32 %v1986_v26, %v1028_v40  ;;  %v902_v28 = vpop.f32.mrb[49].mxu0  ;;  %v1030_v12 = vpop.f32.mrb[49].mxu1 }
 0x15f   : > { %v903_v30 = vpop.f32.mrb[50].mxu0  ;;  %v1031_v27 = vpop.f32.mrb[50].mxu1 }
 0x160   : > { %v1083_v46 = vmax.f32 %v901_v63, 0.0  ;;  %v1115_v58 = vmax.f32 %v1029_v20, 0.0  ;;  %v904_v52 = vadd.f32 %v1986_v26, %v903_v30  ;;  %v1032_v53 = vadd.f32 %v1986_v26, %v1031_v27  ;;  %v905_v22 = vpop.f32.mrb[51].mxu0  ;;  %v1033_v23 = vpop.f32.mrb[51].mxu1 }
 0x162   : > { %1148 = vst.msk [vmem:[%s1995_s15 + $0xc0] sm:$0xff] %vm1123_vm1, %v1083_v46  ;;  %1180 = vst.msk [vmem:[%s1995_s15 + $0x1c0] sm:$0xff] %vm1123_vm1, %v1115_v58  ;;  %v1084_v59 = vmax.f32 %v904_v52, 0.0  ;;  %v1116_v21 = vmax.f32 %v1032_v53, 0.0 }
 0x164   : > { %1149 = vst.msk [vmem:[%s1995_s15 + $0xc8] sm:$0xff] %vm1123_vm1, %v1084_v59  ;;  %1181 = vst.msk [vmem:[%s1995_s15 + $0x1c8] sm:$0xff] %vm1123_vm1, %v1116_v21 }
 0x165   : > { %v908_v32 = vpop.f32.mrb[52].mxu0  ;;  %v1036_v37 = vpop.f32.mrb[52].mxu1 }
 0x166   : > { %v909_v39 = vadd.f32 %v1986_v26, %v908_v32  ;;  %v1037_v29 = vadd.f32 %v1986_v26, %v1036_v37  ;;  %v910_v17 = vpop.f32.mrb[53].mxu0  ;;  %v1038_v25 = vpop.f32.mrb[53].mxu1 }
 0x167   : > { %v911_v24 = vpop.f32.mrb[54].mxu0  ;;  %v1039_v31 = vpop.f32.mrb[54].mxu1 }
 0x168   : > { %v1085_v35 = vmax.f32 %v909_v39, 0.0  ;;  %v1117_v36 = vmax.f32 %v1037_v29, 0.0  ;;  %v912_v44 = vadd.f32 %v1986_v26, %v911_v24  ;;  %v1040_v45 = vadd.f32 %v1986_v26, %v1039_v31  ;;  %v913_v34 = vpop.f32.mrb[55].mxu0  ;;  %v1041_v1 = vpop.f32.mrb[55].mxu1 }
 0x16a   : > { %1150 = vst.msk [vmem:[%s1995_s15 + $0xd0] sm:$0xff] %vm1123_vm1, %v1085_v35  ;;  %1182 = vst.msk [vmem:[%s1995_s15 + $0x1d0] sm:$0xff] %vm1123_vm1, %v1117_v36  ;;  %v1086_v60 = vmax.f32 %v912_v44, 0.0  ;;  %v1118_v0 = vmax.f32 %v1040_v45, 0.0 }
 0x16c   : > { %1151 = vst.msk [vmem:[%s1995_s15 + $0xd8] sm:$0xff] %vm1123_vm1, %v1086_v60  ;;  %1183 = vst.msk [vmem:[%s1995_s15 + $0x1d8] sm:$0xff] %vm1123_vm1, %v1118_v0 }
 0x16d   : > { %v916_v47 = vpop.f32.mrb[56].mxu0  ;;  %v1044_v48 = vpop.f32.mrb[56].mxu1 }
 0x16e   : > { %v917_v49 = vadd.f32 %v1986_v26, %v916_v47  ;;  %v1045_v54 = vadd.f32 %v1986_v26, %v1044_v48  ;;  %v918_v2 = vpop.f32.mrb[57].mxu0  ;;  %v1046_v3 = vpop.f32.mrb[57].mxu1 }
 0x16f   : > { %v919_v4 = vpop.f32.mrb[58].mxu0  ;;  %v1047_v6 = vpop.f32.mrb[58].mxu1 }
 0x170   : > { %v1087_v7 = vmax.f32 %v917_v49, 0.0  ;;  %v1119_v10 = vmax.f32 %v1045_v54, 0.0  ;;  %v920_v13 = vadd.f32 %v1986_v26, %v919_v4  ;;  %v1048_v14 = vadd.f32 %v1986_v26, %v1047_v6  ;;  %v921_v15 = vpop.f32.mrb[59].mxu0  ;;  %v1049_v16 = vpop.f32.mrb[59].mxu1 }
 0x172   : > { %1152 = vst.msk [vmem:[%s1995_s15 + $0xe0] sm:$0xff] %vm1123_vm1, %v1087_v7  ;;  %1184 = vst.msk [vmem:[%s1995_s15 + $0x1e0] sm:$0xff] %vm1123_vm1, %v1119_v10  ;;  %v1088_v50 = vmax.f32 %v920_v13, 0.0  ;;  %v1120_v51 = vmax.f32 %v1048_v14, 0.0 }
 0x174   : > { %1153 = vst.msk [vmem:[%s1995_s15 + $0xe8] sm:$0xff] %vm1123_vm1, %v1088_v50  ;;  %1185 = vst.msk [vmem:[%s1995_s15 + $0x1e8] sm:$0xff] %vm1123_vm1, %v1120_v51 }
 0x175   : > { %v924_v55 = vpop.f32.mrb[60].mxu0  ;;  %v1052_v56 = vpop.f32.mrb[60].mxu1 }
 0x176   : > { %v925_v57 = vadd.f32 %v1986_v26, %v924_v55  ;;  %v1053_v61 = vadd.f32 %v1986_v26, %v1052_v56  ;;  %v926_v38 = vpop.f32.mrb[61].mxu0  ;;  %v1054_v18 = vpop.f32.mrb[61].mxu1 }
 0x177   : > { %v927_v19 = vpop.f32.mrb[62].mxu0  ;;  %v1055_v8 = vpop.f32.mrb[62].mxu1 }
 0x178   : > { %v1089_v9 = vmax.f32 %v925_v57, 0.0  ;;  %v1121_v11 = vmax.f32 %v1053_v61, 0.0  ;;  %v928_v41 = vadd.f32 %v1986_v26, %v927_v19  ;;  %v1056_v42 = vadd.f32 %v1986_v26, %v1055_v8  ;;  %v929_v33 = vpop.f32.mrb[63].mxu0  ;;  %v1057_v43 = vpop.f32.mrb[63].mxu1 }
 0x17a   : > { %1154 = vst.msk [vmem:[%s1995_s15 + $0xf0] sm:$0xff] %vm1123_vm1, %v1089_v9  ;;  %1186 = vst.msk [vmem:[%s1995_s15 + $0x1f0] sm:$0xff] %vm1123_vm1, %v1121_v11  ;;  %v1090_v62 = vmax.f32 %v928_v41, 0.0  ;;  %v1122_v5 = vmax.f32 %v1056_v42, 0.0 }
 0x17c   : > { %1155 = vst.msk [vmem:[%s1995_s15 + $0xf8] sm:$0xff] %vm1123_vm1, %v1090_v62  ;;  %1187 = vst.msk [vmem:[%s1995_s15 + $0x1f8] sm:$0xff] %vm1123_vm1, %v1122_v5 }
 0x17d PF: > { %s13_s12 = sadd.s32 1, %s1405_s12  }
 0x17e   : > { %p10_p4 = scmp.ge.s32.totalorder %s13_s12, 6  }
 0x180   :  { %12 = sbr.rel (!%p10_p4) target bundleno = 1 (0x1), region = 62 }

// kernel: shake_resnet_forward.15
= control target key start
LH: loop header
LB: loop body
LE: loop exit
PB: predicated region body
PF: predicated region fallthrough
CT: control target
= control target key end

     0   :  { %s2406_s15 = smov 0   ;;  %s3037_s0 = inlined_call_operand.vmem [shape: bf16[2048,288], index: 0, kind: input, shape index: {}]   ;;  %s3038_s1 = inlined_call_operand.vmem [shape: bf16[288,16], index: 1, kind: input, shape index: {}]   ;;  %s3039_s2 = inlined_call_operand.vmem [shape: f32[1,16], index: 2, kind: input, shape index: {}]   ;;  %s3040_s3 = inlined_call_operand.vmem [shape: f32[2048,16], index: 3, kind: input, shape index: {}]   ;;  %s3041_s4 = inlined_call_operand.vmem [shape: f32[2048,16], index: 4, kind: output, shape index: {}]  }
   0x1 LB: > { %s1922_s16 = sadd.s32 4294967295, %s2378_s15   ;;  %p1926_p0 = scmp.ge.s32.totalorder %s2378_s15, 1  ;;  %s2378_s15 = sphi %s2406_s15, %s14_s15  }
   0x2   : > { %p175_p1 = scmp.lt.s32.totalorder %s2378_s15, 5 }
   0x4   : > { %p176_p2 = pnand %p1926_p0, %p175_p1 }
   0x5   : > { %v2226_v0 = vld [vmem:[%s3038_s1] sm:$0xff] (!%p176_p2)   ;;  %v2380_v1 = vmov (!%p176_p2), 0   ;;  %s1927_s19 = sshll.u32 (!%p176_p2), %s1922_s16, 6  ;;  %v2227_v2 = vld [vmem:[%s3038_s1 + $0x8] sm:$0xff] (!%p176_p2)   ;;  %v2228_v3 = vld [vmem:[%s3038_s1 + $0x10] sm:$0xff] (!%p176_p2)   ;;  %vm986_vm0 = vcmask (!%p176_p2), 261120  }
   0x6   : > { %179 = sbr.rel (%p176_p2) target bundleno = 475 (0x1db), region = 36  ;;  %1083 = vmatprep.subr.bf16.mxu0 (!%p176_p2), %v2380_v1  ;;  %2184 = vmatprep.subr.bf16.mxu1 (!%p176_p2), %v2380_v1  ;;  %p208_p3 = scmp.lt.s32.totalorder (!%p176_p2), %s1927_s19, 255  ;;  %v2229_v4 = vld [vmem:[%s3038_s1 + $0x18] sm:$0xff] (!%p176_p2)   ;;  %v2230_v5 = vld [vmem:[%s3038_s1 + $0x20] sm:$0xff] (!%p176_p2)   ;;  %v2231_v7 = vld [vmem:[%s3038_s1 + $0x28] sm:$0xff] (!%p176_p2)   ;;  %vm1789_vm1 = vcmask (!%p176_p2), 130048  }
   0x7   : > { %1084 = vmatpush1.bf16.msra.mxu0 (!%p176_p2), %v2226_v0  ;;  %2200 = vmatpush1.bf16.msra.mxu1 (!%p176_p2), %v2226_v0  ;;  %v2232_v9 = vld [vmem:[%s3038_s1 + $0x30] sm:$0xff] (!%p176_p2)   ;;  %v2233_v10 = vld [vmem:[%s3038_s1 + $0x38] sm:$0xff] (!%p176_p2)   ;;  %v2234_v11 = vld [vmem:[%s3038_s1 + $0x40] sm:$0xff] (!%p176_p2)  }
   0x8   : > { %1085 = vmatprep.subr.bf16.mxu0 (!%p176_p2), %v2380_v1  ;;  %2185 = vmatprep.subr.bf16.mxu1 (!%p176_p2), %v2380_v1  ;;  %v2235_v12 = vld [vmem:[%s3038_s1 + $0x48] sm:$0xff] (!%p176_p2)   ;;  %v2236_v13 = vld [vmem:[%s3038_s1 + $0x50] sm:$0xff] (!%p176_p2)   ;;  %v2237_v14 = vld [vmem:[%s3038_s1 + $0x58] sm:$0xff] (!%p176_p2)  }
   0x9   : > { %v2238_v15 = vld [vmem:[%s3038_s1 + $0x60] sm:$0xff] (!%p176_p2)   ;;  %v2239_v16 = vld [vmem:[%s3038_s1 + $0x68] sm:$0xff] (!%p176_p2)   ;;  %v2240_v17 = vld [vmem:[%s3038_s1 + $0x70] sm:$0xff] (!%p176_p2)  }
   0xa   : > { %v2241_v18 = vld [vmem:[%s3038_s1 + $0x78] sm:$0xff] (!%p176_p2)   ;;  %v2248_v19 = vld [vmem:[%s3038_s1 + $0x80] sm:$0xff] (!%p176_p2)   ;;  %v2273_v24 = vld [vmem:[%s3038_s1 + $0x88] sm:$0xff] (!%p176_p2)  }
   0xb   : > { %1086 = vmatpush1.bf16.msra.mxu0 (!%p176_p2), %v2227_v2  ;;  %2201 = vmatpush1.bf16.msra.mxu1 (!%p176_p2), %v2227_v2 }
   0xc   : > { %1087 = vmatprep.subr.bf16.mxu0 (!%p176_p2), %v2380_v1  ;;  %2186 = vmatprep.subr.bf16.mxu1 (!%p176_p2), %v2380_v1 }
   0xd   : > { %s3043_s19 = smov (!%p208_p3, %s1927_s19), 255 }
   0xe   : > { %s2216_s26 = smul.u32 12, %s3043_s19 }
   0xf   : > { %1088 = vmatpush1.bf16.msra.mxu0 %v2228_v3  ;;  %2202 = vmatpush1.bf16.msra.mxu1 %v2228_v3 }
  0x10   : > { %1089 = vmatprep.subr.bf16.mxu0 %v2380_v1  ;;  %2187 = vmatprep.subr.bf16.mxu1 %v2380_v1  ;;  %s2443_s5 = scalar_lea.vmem %s3037_s0, %s2216_s26 }
  0x11   : > { %v2244_v6 = vld [vmem:[%s2443_s5 + $0x4] ss:$12 sps:$4 sm:$0xff]   ;;  %v2242_v20 = vld [vmem:[%s2443_s5] ss:$12 sps:$4 sm:$0xff]   ;;  %v2249_v22 = vld [vmem:[%s2443_s5 + $0x1c] ss:$12 sps:$4 sm:$0xff]  }
  0x12   : > { %v2247_v8 = vld [vmem:[%s2443_s5 + $0x244] ss:$12 sps:$4 sm:$0xff]   ;;  %1115 = vmatprep.mubr.bf16.mxu0 %v2244_v6  ;;  %v2245_v21 = vld [vmem:[%s2443_s5 + $0x240] ss:$12 sps:$4 sm:$0xff]   ;;  %v2251_v23 = vld [vmem:[%s2443_s5 + $0x25c] ss:$12 sps:$4 sm:$0xff]  }
  0x13   : > { %1090 = vmatpush1.bf16.msra.mxu0 %v2229_v4  ;;  %2203 = vmatpush1.bf16.msra.mxu1 %v2229_v4  ;;  %v2253_v25 = vld [vmem:[%s2443_s5 + $0x18] ss:$12 sps:$4 sm:$0xff]   ;;  %v2255_v27 = vld [vmem:[%s2443_s5 + $0x34] ss:$12 sps:$4 sm:$0xff]   ;;  %v2259_v29 = vld [vmem:[%s2443_s5 + $0x30] ss:$12 sps:$4 sm:$0xff]  }
  0x14   : > { %1091 = vmatprep.subr.bf16.mxu0 %v2380_v1  ;;  %2188 = vmatprep.subr.bf16.mxu1 %v2380_v1  ;;  %v2254_v26 = vld [vmem:[%s2443_s5 + $0x258] ss:$12 sps:$4 sm:$0xff]   ;;  %v2257_v28 = vld [vmem:[%s2443_s5 + $0x274] ss:$12 sps:$4 sm:$0xff]   ;;  %v2260_v30 = vld [vmem:[%s2443_s5 + $0x270] ss:$12 sps:$4 sm:$0xff]  }
  0x15   : > { %1307 = vmatprep.mubr.bf16.mxu1 %v2247_v8  ;;  %v2261_v31 = vld [vmem:[%s2443_s5 + $0x4c] ss:$12 sps:$4 sm:$0xff]   ;;  %v2265_v33 = vld [vmem:[%s2443_s5 + $0x48] ss:$12 sps:$4 sm:$0xff]   ;;  %v2267_v35 = vld [vmem:[%s2443_s5 + $0x64] ss:$12 sps:$4 sm:$0xff]  }
  0x16   : > { %v2263_v32 = vld [vmem:[%s2443_s5 + $0x28c] ss:$12 sps:$4 sm:$0xff]   ;;  %v2266_v34 = vld [vmem:[%s2443_s5 + $0x288] ss:$12 sps:$4 sm:$0xff]   ;;  %v2269_v36 = vld [vmem:[%s2443_s5 + $0x2a4] ss:$12 sps:$4 sm:$0xff]  }
  0x17   : > { %1092 = vmatpush1.bf16.msra.mxu0 %v2230_v5  ;;  %2204 = vmatpush1.bf16.msra.mxu1 %v2230_v5  ;;  %v2271_v37 = vld [vmem:[%s2443_s5 + $0x60] ss:$12 sps:$4 sm:$0xff]   ;;  %v2274_v39 = vld [vmem:[%s2443_s5 + $0x7c] ss:$12 sps:$4 sm:$0xff]   ;;  %v2278_v41 = vld [vmem:[%s2443_s5 + $0x78] ss:$12 sps:$4 sm:$0xff]  }
  0x18   : > { %1093 = vmatprep.subr.bf16.mxu0 %v2380_v1  ;;  %2189 = vmatprep.subr.bf16.mxu1 %v2380_v1  ;;  %v2272_v38 = vld [vmem:[%s2443_s5 + $0x2a0] ss:$12 sps:$4 sm:$0xff]   ;;  %v2276_v40 = vld [vmem:[%s2443_s5 + $0x2bc] ss:$12 sps:$4 sm:$0xff]   ;;  %v2279_v42 = vld [vmem:[%s2443_s5 + $0x2b8] ss:$12 sps:$4 sm:$0xff]  }
  0x19   : > { %v2280_v43 = vld [vmem:[%s2443_s5 + $0x94] ss:$12 sps:$4 sm:$0xff]   ;;  %v2284_v45 = vld [vmem:[%s2443_s5 + $0x90] ss:$12 sps:$4 sm:$0xff]   ;;  %v2286_v47 = vld [vmem:[%s2443_s5 + $0xac] ss:$12 sps:$4 sm:$0xff]  }
  0x1a   : > { %v2282_v44 = vld [vmem:[%s2443_s5 + $0x2d4] ss:$12 sps:$4 sm:$0xff]   ;;  %v2285_v46 = vld [vmem:[%s2443_s5 + $0x2d0] ss:$12 sps:$4 sm:$0xff]   ;;  %v2288_v48 = vld [vmem:[%s2443_s5 + $0x2ec] ss:$12 sps:$4 sm:$0xff]  }
  0x1b   : > { %1094 = vmatpush1.bf16.msra.mxu0 %v2231_v7  ;;  %2205 = vmatpush1.bf16.msra.mxu1 %v2231_v7  ;;  %v2290_v49 = vld [vmem:[%s2443_s5 + $0xa8] ss:$12 sps:$4 sm:$0xff]   ;;  %v2292_v51 = vld [vmem:[%s2443_s5 + $0xc4] ss:$12 sps:$4 sm:$0xff]   ;;  %v2295_v53 = vld [vmem:[%s2443_s5 + $0xc0] ss:$12 sps:$4 sm:$0xff]  }
  0x1c   : > { %1095 = vmatprep.subr.bf16.mxu0 %v2380_v1  ;;  %2190 = vmatprep.subr.bf16.mxu1 %v2380_v1  ;;  %v2291_v50 = vld [vmem:[%s2443_s5 + $0x2e8] ss:$12 sps:$4 sm:$0xff]   ;;  %v2296_v54 = vld [vmem:[%s2443_s5 + $0x20] ss:$12 sps:$4 sm:$0xff]   ;;  %v2299_v56 = vld [vmem:[%s2443_s5 + $0x38] ss:$12 sps:$4 sm:$0xff]  }
  0x1d   : > { %v2294_v52 = vld [vmem:[%s2443_s5 + $0x8] ss:$12 sps:$4 sm:$0xff]   ;;  %v2300_v57 = vld [vmem:[%s2443_s5 + $0xd8] ss:$12 sps:$4 sm:$0xff]   ;;  %v2301_v58 = vld [vmem:[%s2443_s5 + $0x50] ss:$12 sps:$4 sm:$0xff]  }
  0x1e   : > { %v2297_v55 = vld [vmem:[%s2443_s5 + $0xdc] ss:$12 sps:$4 sm:$0xff]   ;;  %v2302_v59 = vld [vmem:[%s2443_s5 + $0xf4] ss:$12 sps:$4 sm:$0xff]   ;;  %v2307_v63 = vld [vmem:[%s2443_s5 + $0x10c] ss:$12 sps:$4 sm:$0xff]  }
  0x1f   : > { %1096 = vmatpush1.bf16.msra.mxu0 %v2232_v9  ;;  %2206 = vmatpush1.bf16.msra.mxu1 %v2232_v9  ;;  %v2304_v60 = vld [vmem:[%s2443_s5 + $0x68] ss:$12 sps:$4 sm:$0xff]   ;;  %v2305_v61 = vld [vmem:[%s2443_s5 + $0xf0] ss:$12 sps:$4 sm:$0xff]   ;;  %v2306_v62 = vld [vmem:[%s2443_s5 + $0x80] ss:$12 sps:$4 sm:$0xff]  }
  0x20   : > { %1097 = vmatprep.subr.bf16.mxu0 %v2380_v1  ;;  %2191 = vmatprep.subr.bf16.mxu1 %v2380_v1  ;;  %v2309_v0 = vld [vmem:[%s2443_s5 + $0x98] ss:$12 sps:$4 sm:$0xff]   ;;  %v2311_v2 = vld [vmem:[%s2443_s5 + $0xb0] ss:$12 sps:$4 sm:$0xff]   ;;  %v2314_v4 = vld [vmem:[%s2443_s5 + $0xc8] ss:$12 sps:$4 sm:$0xff]  }
  0x21   : > { %v2312_v3 = vld [vmem:[%s2443_s5 + $0x124] ss:$12 sps:$4 sm:$0xff]   ;;  %v2315_v5 = vld [vmem:[%s2443_s5 + $0x120] ss:$12 sps:$4 sm:$0xff]   ;;  %v2317_v7 = vld [vmem:[%s2443_s5 + $0x13c] ss:$12 sps:$4 sm:$0xff]  }
  0x22   : > { %v2316_v6 = vld [vmem:[%s2443_s5 + $0xe0] ss:$12 sps:$4 sm:$0xff]   ;;  %v2319_v8 = vld [vmem:[%s2443_s5 + $0xf8] ss:$12 sps:$4 sm:$0xff]  }
  0x23   : > { %1098 = vmatpush1.bf16.msra.mxu0 %v2233_v10  ;;  %2207 = vmatpush1.bf16.msra.mxu1 %v2233_v10  ;;  %v2320_v9 = vld [vmem:[%s2443_s5 + $0x138] ss:$12 sps:$4 sm:$0xff]   ;;  %v2321_v10 = vld [vmem:[%s2443_s5 + $0x110] ss:$12 sps:$4 sm:$0xff]  }
  0x24   : > { %1099 = vmatprep.subr.bf16.mxu0 %v2380_v1  ;;  %2192 = vmatprep.subr.bf16.mxu1 %v2380_v1 }
  0x27   : > { %1100 = vmatpush1.bf16.msra.mxu0 %v2234_v11  ;;  %2208 = vmatpush1.bf16.msra.mxu1 %v2234_v11  ;;  %v2322_v11 = vld [vmem:[%s2443_s5 + $0x154] ss:$12 sps:$4 sm:$0xff]  }
  0x28   : > { %1101 = vmatprep.subr.bf16.mxu0 %v2380_v1  ;;  %2193 = vmatprep.subr.bf16.mxu1 %v2380_v1 }
  0x2b   : > { %1102 = vmatpush1.bf16.msra.mxu0 %v2235_v12  ;;  %2209 = vmatpush1.bf16.msra.mxu1 %v2235_v12  ;;  %v2324_v12 = vld [vmem:[%s2443_s5 + $0x128] ss:$12 sps:$4 sm:$0xff]  }
  0x2c   : > { %1103 = vmatprep.subr.bf16.mxu0 %v2380_v1  ;;  %2194 = vmatprep.subr.bf16.mxu1 %v2380_v1 }
  0x2f   : > { %1104 = vmatpush1.bf16.msra.mxu0 %v2236_v13  ;;  %2210 = vmatpush1.bf16.msra.mxu1 %v2236_v13  ;;  %v2325_v13 = vld [vmem:[%s2443_s5 + $0x150] ss:$12 sps:$4 sm:$0xff]  }
  0x30   : > { %1105 = vmatprep.subr.bf16.mxu0 %v2380_v1  ;;  %2195 = vmatprep.subr.bf16.mxu1 %v2380_v1 }
  0x33   : > { %1106 = vmatpush1.bf16.msra.mxu0 %v2237_v14  ;;  %2211 = vmatpush1.bf16.msra.mxu1 %v2237_v14  ;;  %v2326_v14 = vld [vmem:[%s2443_s5 + $0x140] ss:$12 sps:$4 sm:$0xff]  }
  0x34   : > { %1107 = vmatprep.subr.bf16.mxu0 %v2380_v1  ;;  %2196 = vmatprep.subr.bf16.mxu1 %v2380_v1 }
  0x37   : > { %1108 = vmatpush1.bf16.msra.mxu0 %v2238_v15  ;;  %2212 = vmatpush1.bf16.msra.mxu1 %v2238_v15  ;;  %v2327_v15 = vld [vmem:[%s2443_s5 + $0x16c] ss:$12 sps:$4 sm:$0xff]  }
  0x38   : > { %1109 = vmatprep.subr.bf16.mxu0 %v2380_v1  ;;  %2197 = vmatprep.subr.bf16.mxu1 %v2380_v1 }
  0x3b   : > { %1110 = vmatpush1.bf16.msra.mxu0 %v2239_v16  ;;  %2213 = vmatpush1.bf16.msra.mxu1 %v2239_v16  ;;  %v2329_v16 = vld [vmem:[%s2443_s5 + $0x158] ss:$12 sps:$4 sm:$0xff]  }
  0x3c   : > { %1111 = vmatprep.subr.bf16.mxu0 %v2380_v1  ;;  %2198 = vmatprep.subr.bf16.mxu1 %v2380_v1 }
  0x3f   : > { %1112 = vmatpush1.bf16.msra.mxu0 %v2240_v17  ;;  %2214 = vmatpush1.bf16.msra.mxu1 %v2240_v17  ;;  %v2330_v17 = vld [vmem:[%s2443_s5 + $0x168] ss:$12 sps:$4 sm:$0xff]  }
  0x40   : > { %1113 = vmatprep.subr.bf16.mxu0 %v2380_v1  ;;  %2199 = vmatprep.subr.bf16.mxu1 %v2380_v1  ;;  %v2310_v1 = vld [vmem:[%s2443_s5 + $0x108] ss:$12 sps:$4 sm:$0xff]  }
  0x43   : > { %1114 = vmatpush1.bf16.msra.mxu0 %v2241_v18  ;;  %2215 = vmatpush1.bf16.msra.mxu1 %v2241_v18  ;;  %v2331_v18 = vld [vmem:[%s2443_s5 + $0x170] ss:$12 sps:$4 sm:$0xff]  }
  0x44   : > { %2116 = vmatprep.subr.bf16.mxu1 %v2248_v19 }
  0x46   : > { %1116 = vmatmul.mubr.bf16.vlgmr.msra.gmra.mrb[0].mxu0 %v2242_v20  ;;  %1308 = vmatmul.mubr.bf16.vlgmr.msra.gmra.mrb[0].mxu1 %v2245_v21  ;;  %v2334_v20 = vld [vmem:[%s2443_s5 + $0x188] ss:$12 sps:$4 sm:$0xff]   ;;  %v2335_v21 = vld [vmem:[%s2443_s5 + $0x180] ss:$12 sps:$4 sm:$0xff]  }
  0x47   : > { %2117 = vmatpush3.bf16.msra.mxu1 %v2248_v19  ;;  %1123 = vmatprep.mubr.bf16.mxu0 %v2249_v22  ;;  %v2332_v19 = vld [vmem:[%s2443_s5 + $0x184] ss:$12 sps:$4 sm:$0xff]   ;;  %v2336_v22 = vld [vmem:[%s2443_s5 + $0x1a0] ss:$12 sps:$4 sm:$0xff]  }
  0x48   : > { %1315 = vmatprep.mubr.bf16.mxu1 %v2251_v23  ;;  %2118 = vmatprep.subr.bf16.mxu1 %v2273_v24  ;;  %v2337_v23 = vld [vmem:[%s2443_s5 + $0x19c] ss:$12 sps:$4 sm:$0xff]  }
  0x4b   : > { %2119 = vmatpush3.bf16.msra.mxu1 %v2273_v24  ;;  %v2339_v24 = vld [vmem:[%s2443_s5 + $0x1b8] ss:$12 sps:$4 sm:$0xff]  }
  0x4e   : > { %1124 = vmatmul.mubr.bf16.gmra.mrb[4].mxu0 %v2253_v25  ;;  %1316 = vmatmul.mubr.bf16.gmra.mrb[4].mxu1 %v2254_v26  ;;  %v2340_v25 = vld [vmem:[%s2443_s5 + $0x198] ss:$12 sps:$4 sm:$0xff]   ;;  %v2341_v26 = vld [vmem:[%s2443_s5 + $0x1d0] ss:$12 sps:$4 sm:$0xff]  }
  0x4f   : > { %1131 = vmatprep.mubr.bf16.mxu0 %v2255_v27  ;;  %1323 = vmatprep.mubr.bf16.mxu1 %v2257_v28  ;;  %v2342_v27 = vld [vmem:[%s2443_s5 + $0x1b4] ss:$12 sps:$4 sm:$0xff]  }
  0x50   : > { %v2344_v28 = vld [vmem:[%s2443_s5 + $0x1e8] ss:$12 sps:$4 sm:$0xff]  }
  0x56   : > { %1132 = vmatmul.mubr.bf16.gmra.mrb[8].mxu0 %v2259_v29  ;;  %1324 = vmatmul.mubr.bf16.gmra.mrb[8].mxu1 %v2260_v30  ;;  %v2345_v29 = vld [vmem:[%s2443_s5 + $0x1b0] ss:$12 sps:$4 sm:$0xff]   ;;  %v2346_v30 = vld [vmem:[%s2443_s5 + $0x200] ss:$12 sps:$4 sm:$0xff]  }
  0x57   : > { %1139 = vmatprep.mubr.bf16.mxu0 %v2261_v31  ;;  %1331 = vmatprep.mubr.bf16.mxu1 %v2263_v32  ;;  %v2347_v31 = vld [vmem:[%s2443_s5 + $0x1cc] ss:$12 sps:$4 sm:$0xff]  }
  0x58   : > { %v2349_v32 = vld [vmem:[%s2443_s5 + $0x218] ss:$12 sps:$4 sm:$0xff]  }
  0x5e   : > { %1140 = vmatmul.mubr.bf16.gmra.mrb[12].mxu0 %v2265_v33  ;;  %1332 = vmatmul.mubr.bf16.gmra.mrb[12].mxu1 %v2266_v34  ;;  %v2350_v33 = vld [vmem:[%s2443_s5 + $0x1c8] ss:$12 sps:$4 sm:$0xff]   ;;  %v2351_v34 = vld [vmem:[%s2443_s5 + $0x230] ss:$12 sps:$4 sm:$0xff]  }
  0x5f   : > { %1147 = vmatprep.mubr.bf16.mxu0 %v2267_v35  ;;  %1339 = vmatprep.mubr.bf16.mxu1 %v2269_v36  ;;  %v2352_v35 = vld [vmem:[%s2443_s5 + $0x1e4] ss:$12 sps:$4 sm:$0xff]   ;;  %v2354_v36 = vld [vmem:[%s2443_s5 + $0x248] ss:$12 sps:$4 sm:$0xff]  }
  0x66   : > { %1148 = vmatmul.mubr.bf16.gmra.mrb[16].mxu0 %v2271_v37  ;;  %1340 = vmatmul.mubr.bf16.gmra.mrb[16].mxu1 %v2272_v38  ;;  %v2355_v37 = vld [vmem:[%s2443_s5 + $0x1e0] ss:$12 sps:$4 sm:$0xff]  }
  0x67   : > { %1155 = vmatprep.mubr.bf16.mxu0 %v2274_v39  ;;  %1347 = vmatprep.mubr.bf16.mxu1 %v2276_v40  ;;  %v2356_v38 = vld [vmem:[%s2443_s5 + $0x260] ss:$12 sps:$4 sm:$0xff]   ;;  %v2357_v39 = vld [vmem:[%s2443_s5 + $0x1fc] ss:$12 sps:$4 sm:$0xff]   ;;  %v2359_v40 = vld [vmem:[%s2443_s5 + $0x278] ss:$12 sps:$4 sm:$0xff]  }
  0x6e   : > { %1156 = vmatmul.mubr.bf16.gmra.mrb[20].mxu0 %v2278_v41  ;;  %1348 = vmatmul.mubr.bf16.gmra.mrb[20].mxu1 %v2279_v42  ;;  %v2360_v41 = vld [vmem:[%s2443_s5 + $0x1f8] ss:$12 sps:$4 sm:$0xff]   ;;  %v2361_v42 = vld [vmem:[%s2443_s5 + $0x290] ss:$12 sps:$4 sm:$0xff]  }
  0x6f   : > { %1163 = vmatprep.mubr.bf16.mxu0 %v2280_v43  ;;  %1355 = vmatprep.mubr.bf16.mxu1 %v2282_v44  ;;  %v2362_v43 = vld [vmem:[%s2443_s5 + $0x214] ss:$12 sps:$4 sm:$0xff]  }
  0x70   : > { %v2364_v44 = vld [vmem:[%s2443_s5 + $0x2a8] ss:$12 sps:$4 sm:$0xff]  }
  0x76   : > { %1164 = vmatmul.mubr.bf16.gmra.mrb[24].mxu0 %v2284_v45  ;;  %1356 = vmatmul.mubr.bf16.gmra.mrb[24].mxu1 %v2285_v46  ;;  %v2365_v45 = vld [vmem:[%s2443_s5 + $0x210] ss:$12 sps:$4 sm:$0xff]   ;;  %v2366_v46 = vld [vmem:[%s2443_s5 + $0x2c0] ss:$12 sps:$4 sm:$0xff]  }
  0x77   : > { %1171 = vmatprep.mubr.bf16.mxu0 %v2286_v47  ;;  %1363 = vmatprep.mubr.bf16.mxu1 %v2288_v48  ;;  %v2367_v47 = vld [vmem:[%s2443_s5 + $0x22c] ss:$12 sps:$4 sm:$0xff]  }
  0x78   : > { %v2369_v48 = vld [vmem:[%s2443_s5 + $0x2d8] ss:$12 sps:$4 sm:$0xff]  }
  0x7e   : > { %1172 = vmatmul.mubr.bf16.gmra.mrb[28].mxu0 %v2290_v49  ;;  %1364 = vmatmul.mubr.bf16.gmra.mrb[28].mxu1 %v2291_v50  ;;  %v2370_v49 = vld [vmem:[%s2443_s5 + $0x228] ss:$12 sps:$4 sm:$0xff]   ;;  %v2371_v50 = vld [vmem:[%s2443_s5 + $0x2f0] ss:$12 sps:$4 sm:$0xff]   ;;  %s1930_s5 = sshll.u32 %s3043_s19, 3 }
  0x7f   : > { %1179 = vmatprep.mubr.bf16.mxu0 %v2292_v51  ;;  %2120 = vmatprep.mubr.msk.bf16.mxu1 %vm986_vm0, %v2294_v52  ;;  %s2705_s13 = scalar_lea.vmem %s3040_s3, %s1930_s5  ;;  %s2720_s16 = scalar_lea.vmem %s3041_s4, %s1930_s5 }
  0x86   : > { %1180 = vmatmul.mubr.bf16.gmra.mrb[32].mxu0 %v2295_v53  ;;  %2121 = vmatmul.mubr.msk.bf16.vlgmr.msra.gmra.mrb[32].mxu1 %vm986_vm0, %v2296_v54 }
  0x87   : > { %1187 = vmatprep.mubr.bf16.mxu0 %v2297_v55  ;;  %2124 = vmatprep.mubr.msk.bf16.mxu1 %vm986_vm0, %v2299_v56 }
  0x8e   : > { %1188 = vmatmul.mubr.bf16.gmra.mrb[36].mxu0 %v2300_v57  ;;  %2125 = vmatmul.mubr.msk.bf16.gmra.mrb[36].mxu1 %vm986_vm0, %v2301_v58 }
  0x8f   : > { %1195 = vmatprep.mubr.bf16.mxu0 %v2302_v59  ;;  %2128 = vmatprep.mubr.msk.bf16.mxu1 %vm986_vm0, %v2304_v60 }
  0x96   : > { %1196 = vmatmul.mubr.bf16.gmra.mrb[40].mxu0 %v2305_v61  ;;  %2129 = vmatmul.mubr.msk.bf16.gmra.mrb[40].mxu1 %vm986_vm0, %v2306_v62 }
  0x97   : > { %1203 = vmatprep.mubr.bf16.mxu0 %v2307_v63  ;;  %2132 = vmatprep.mubr.msk.bf16.mxu1 %vm986_vm0, %v2309_v0 }
  0x9e   : > { %1204 = vmatmul.mubr.bf16.gmra.mrb[44].mxu0 %v2310_v1  ;;  %2133 = vmatmul.mubr.msk.bf16.gmra.mrb[44].mxu1 %vm986_vm0, %v2311_v2 }
  0x9f   : > { %1211 = vmatprep.mubr.bf16.mxu0 %v2312_v3  ;;  %2136 = vmatprep.mubr.msk.bf16.mxu1 %vm986_vm0, %v2314_v4 }
  0xa6   : > { %1212 = vmatmul.mubr.bf16.gmra.mrb[48].mxu0 %v2315_v5  ;;  %2137 = vmatmul.mubr.msk.bf16.gmra.mrb[48].mxu1 %vm986_vm0, %v2316_v6 }
  0xa7   : > { %1219 = vmatprep.mubr.bf16.mxu0 %v2317_v7  ;;  %2140 = vmatprep.mubr.msk.bf16.mxu1 %vm986_vm0, %v2319_v8 }
  0xae   : > { %1220 = vmatmul.mubr.bf16.gmra.mrb[52].mxu0 %v2320_v9  ;;  %2141 = vmatmul.mubr.msk.bf16.gmra.mrb[52].mxu1 %vm986_vm0, %v2321_v10 }
  0xaf   : > { %1227 = vmatprep.mubr.bf16.mxu0 %v2322_v11  ;;  %2144 = vmatprep.mubr.msk.bf16.mxu1 %vm986_vm0, %v2324_v12 }
  0xb6   : > { %1228 = vmatmul.mubr.bf16.gmra.mrb[56].mxu0 %v2325_v13  ;;  %2145 = vmatmul.mubr.msk.bf16.gmra.mrb[56].mxu1 %vm986_vm0, %v2326_v14 }
  0xb7   : > { %1235 = vmatprep.mubr.bf16.mxu0 %v2327_v15  ;;  %2148 = vmatprep.mubr.msk.bf16.mxu1 %vm986_vm0, %v2329_v16 }
  0xbe   : > { %1236 = vmatmul.mubr.bf16.gmra.mrb[60].mxu0 %v2330_v17  ;;  %2149 = vmatmul.mubr.msk.bf16.gmra.mrb[60].mxu1 %vm986_vm0, %v2331_v18 }
  0xbf   : > { %1243 = vmatprep.mubr.bf16.mxu0 %v2332_v19  ;;  %2152 = vmatprep.mubr.msk.bf16.mxu1 %vm986_vm0, %v2334_v20 }
  0xc6   : > { %1244 = vmatmul.mubr.bf16.gmra.mrb[64].mxu0 %v2335_v21  ;;  %2153 = vmatmul.mubr.msk.bf16.gmra.mrb[64].mxu1 %vm986_vm0, %v2336_v22 }
  0xc7   : > { %1251 = vmatprep.mubr.bf16.mxu0 %v2337_v23  ;;  %2156 = vmatprep.mubr.msk.bf16.mxu1 %vm986_vm0, %v2339_v24 }
  0xce   : > { %1252 = vmatmul.mubr.bf16.gmra.mrb[68].mxu0 %v2340_v25  ;;  %2157 = vmatmul.mubr.msk.bf16.gmra.mrb[68].mxu1 %vm986_vm0, %v2341_v26 }
  0xcf   : > { %1259 = vmatprep.mubr.bf16.mxu0 %v2342_v27  ;;  %2160 = vmatprep.mubr.msk.bf16.mxu1 %vm986_vm0, %v2344_v28 }
  0xd6   : > { %1260 = vmatmul.mubr.bf16.gmra.mrb[72].mxu0 %v2345_v29  ;;  %2161 = vmatmul.mubr.msk.bf16.gmra.mrb[72].mxu1 %vm986_vm0, %v2346_v30 }
  0xd7   : > { %1267 = vmatprep.mubr.bf16.mxu0 %v2347_v31  ;;  %2164 = vmatprep.mubr.msk.bf16.mxu1 %vm986_vm0, %v2349_v32 }
  0xde   : > { %1268 = vmatmul.mubr.bf16.gmra.mrb[76].mxu0 %v2350_v33  ;;  %2165 = vmatmul.mubr.msk.bf16.gmra.mrb[76].mxu1 %vm986_vm0, %v2351_v34 }
  0xdf   : > { %1275 = vmatprep.mubr.bf16.mxu0 %v2352_v35  ;;  %2168 = vmatprep.mubr.msk.bf16.mxu1 %vm986_vm0, %v2354_v36 }
  0xe6   : > { %1276 = vmatmul.mubr.bf16.gmra.mrb[80].mxu0 %v2355_v37  ;;  %2169 = vmatmul.mubr.msk.bf16.gmra.mrb[80].mxu1 %vm986_vm0, %v2356_v38 }
  0xe7   : > { %1283 = vmatprep.mubr.bf16.mxu0 %v2357_v39  ;;  %2172 = vmatprep.mubr.msk.bf16.mxu1 %vm986_vm0, %v2359_v40 }
  0xee   : > { %1284 = vmatmul.mubr.bf16.gmra.mrb[84].mxu0 %v2360_v41  ;;  %2173 = vmatmul.mubr.msk.bf16.gmra.mrb[84].mxu1 %vm986_vm0, %v2361_v42 }
  0xef   : > { %1291 = vmatprep.mubr.bf16.mxu0 %v2362_v43  ;;  %2176 = vmatprep.mubr.msk.bf16.mxu1 %vm986_vm0, %v2364_v44 }
  0xf6   : > { %1292 = vmatmul.mubr.bf16.gmra.mrb[88].mxu0 %v2365_v45  ;;  %2177 = vmatmul.mubr.msk.bf16.gmra.mrb[88].mxu1 %vm986_vm0, %v2366_v46 }
  0xf7   : > { %1299 = vmatprep.mubr.bf16.mxu0 %v2367_v47  ;;  %2180 = vmatprep.mubr.msk.bf16.mxu1 %vm986_vm0, %v2369_v48 }
  0xfe   : > { %1300 = vmatmul.mubr.bf16.gmra.mrb[92].mxu0 %v2370_v49  ;;  %2181 = vmatmul.mubr.msk.bf16.gmra.mrb[92].mxu1 %vm986_vm0, %v2371_v50 }
 0x119   : > { %v2636_v51 = vpop.f32.mrb[0].mxu0  ;;  %v2638_v52 = vpop.f32.mrb[0].mxu1 }
 0x11a   : > { %v1119_v53 = vpop.f32.mrb[1].mxu0  ;;  %v1311_v54 = vpop.f32.mrb[1].mxu1 }
 0x11b   : > { %v2640_v55 = vpop.f32.mrb[2].mxu0  ;;  %v2642_v56 = vpop.f32.mrb[2].mxu1  ;;  %v2700_v53 = vld [vmem:[%s3039_s2] ss:$0 sm:$0xff] }
 0x11c   : > { %v1122_v57 = vpop.f32.mrb[3].mxu0  ;;  %v1314_v58 = vpop.f32.mrb[3].mxu1 }
 0x11d   : > { %v1118_v57 = vadd.f32 %v2700_v53, %v2636_v51 }
 0x121   : > { %v1125_v59 = vpop.f32.mrb[4].mxu0  ;;  %v2644_v60 = vpop.f32.mrb[4].mxu1 }
 0x122   : > { %v1127_v61 = vpop.f32.mrb[5].mxu0  ;;  %v1319_v62 = vpop.f32.mrb[5].mxu1  ;;  %v1126_v54 = vadd.f32 %v2700_v53, %v1125_v59 }
 0x123   : > { %v1128_v63 = vpop.f32.mrb[6].mxu0  ;;  %v2646_v0 = vpop.f32.mrb[6].mxu1  ;;  %v1663_v62 = vld [vmem:[%s2705_s13 + $0x10] sm:$0xff] }
 0x124   : > { %v1130_v1 = vpop.f32.mrb[7].mxu0  ;;  %v1322_v2 = vpop.f32.mrb[7].mxu1 }
 0x125   : > { %v1129_v1 = vadd.f32 %v2700_v53, %v1128_v63 }
 0x129   : > { %v2648_v3 = vpop.f32.mrb[8].mxu0  ;;  %v2650_v4 = vpop.f32.mrb[8].mxu1 }
 0x12a   : > { %v1135_v5 = vpop.f32.mrb[9].mxu0  ;;  %v1327_v6 = vpop.f32.mrb[9].mxu1 }
 0x12b   : > { %v2652_v7 = vpop.f32.mrb[10].mxu0  ;;  %v2654_v8 = vpop.f32.mrb[10].mxu1 }
 0x12c   : > { %v1138_v9 = vpop.f32.mrb[11].mxu0  ;;  %v1330_v10 = vpop.f32.mrb[11].mxu1 }
 0x12d   : > { %v1661_v9 = vld [vmem:[%s2705_s13] sm:$0xff]  ;;  %v1121_v10 = vadd.f32 %v2700_v53, %v2640_v55 }
 0x131   : > { %v2656_v11 = vpop.f32.mrb[12].mxu0  ;;  %v2658_v12 = vpop.f32.mrb[12].mxu1 }
 0x132   : > { %v1143_v13 = vpop.f32.mrb[13].mxu0  ;;  %v1335_v14 = vpop.f32.mrb[13].mxu1 }
 0x133   : > { %v2660_v15 = vpop.f32.mrb[14].mxu0  ;;  %v2662_v16 = vpop.f32.mrb[14].mxu1  ;;  %v1664_v13 = vld [vmem:[%s2705_s13 + $0x18] sm:$0xff] }
 0x134   : > { %v1146_v17 = vpop.f32.mrb[15].mxu0  ;;  %v1338_v18 = vpop.f32.mrb[15].mxu1 }
 0x139   : > { %v2664_v19 = vpop.f32.mrb[16].mxu0  ;;  %v2666_v20 = vpop.f32.mrb[16].mxu1 }
 0x13a   : > { %v1151_v21 = vpop.f32.mrb[17].mxu0  ;;  %v1343_v22 = vpop.f32.mrb[17].mxu1 }
 0x13b   : > { %v2668_v23 = vpop.f32.mrb[18].mxu0  ;;  %v2670_v24 = vpop.f32.mrb[18].mxu1  ;;  %v1662_v21 = vld [vmem:[%s2705_s13 + $0x8] sm:$0xff] }
 0x13c   : > { %v1154_v25 = vpop.f32.mrb[19].mxu0  ;;  %v1346_v26 = vpop.f32.mrb[19].mxu1 }
 0x141   : > { %v2672_v27 = vpop.f32.mrb[20].mxu0  ;;  %v2674_v28 = vpop.f32.mrb[20].mxu1 }
 0x142   : > { %v1159_v29 = vpop.f32.mrb[21].mxu0  ;;  %v1351_v30 = vpop.f32.mrb[21].mxu1 }
 0x143   : > { %v2676_v31 = vpop.f32.mrb[22].mxu0  ;;  %v2678_v32 = vpop.f32.mrb[22].mxu1  ;;  %v1142_v30 = vadd.f32 %v2700_v53, %v2656_v11 }
 0x144   : > { %v1162_v33 = vpop.f32.mrb[23].mxu0  ;;  %v1354_v34 = vpop.f32.mrb[23].mxu1 }
 0x145   : > { %v1134_v33 = vadd.f32 %v2700_v53, %v2648_v3 }
 0x149   : > { %v2680_v35 = vpop.f32.mrb[24].mxu0  ;;  %v2682_v36 = vpop.f32.mrb[24].mxu1 }
 0x14a   : > { %v1167_v37 = vpop.f32.mrb[25].mxu0  ;;  %v1359_v38 = vpop.f32.mrb[25].mxu1 }
 0x14b   : > { %v2684_v39 = vpop.f32.mrb[26].mxu0  ;;  %v2686_v40 = vpop.f32.mrb[26].mxu1  ;;  %v1667_v38 = vld [vmem:[%s2705_s13 + $0x30] sm:$0xff] }
 0x14c   : > { %v1170_v41 = vpop.f32.mrb[27].mxu0  ;;  %v1362_v42 = vpop.f32.mrb[27].mxu1 }
 0x14d   : > { %v1145_v41 = vadd.f32 %v2700_v53, %v2660_v15 }
 0x151   : > { %v2688_v43 = vpop.f32.mrb[28].mxu0  ;;  %v2690_v44 = vpop.f32.mrb[28].mxu1 }
 0x152   : > { %v1175_v45 = vpop.f32.mrb[29].mxu0  ;;  %v1367_v46 = vpop.f32.mrb[29].mxu1 }
 0x153   : > { %v2692_v47 = vpop.f32.mrb[30].mxu0  ;;  %v2694_v48 = vpop.f32.mrb[30].mxu1  ;;  %v1665_v46 = vld [vmem:[%s2705_s13 + $0x20] sm:$0xff] }
 0x154   : > { %v1178_v49 = vpop.f32.mrb[31].mxu0  ;;  %v1370_v50 = vpop.f32.mrb[31].mxu1 }
 0x155   : > { %v1137_v49 = vadd.f32 %v2700_v53, %v2652_v7 }
 0x159   : > { %v2710_v58 = vpop.f32.mrb[32].mxu0  ;;  %v2122_v61 = vpop.f32.mrb[32].mxu1 }
 0x15a   : > { %v1415_v2 = vadd.f32 %v2122_v61, %v1126_v54  ;;  %v1183_v5 = vpop.f32.mrb[33].mxu0  ;;  %v1406_v6 = vpop.f32.mrb[33].mxu1 }
 0x15b   : > { %v1407_v51 = vadd.f32 %v1406_v6, %v1118_v57  ;;  %v2722_v59 = vpop.f32.mrb[34].mxu0  ;;  %v2123_v63 = vpop.f32.mrb[34].mxu1  ;;  %v1668_v57 = vld [vmem:[%s2705_s13 + $0x38] sm:$0xff] }
 0x15c   : > { %v1727_v14 = vadd.f32 %v1663_v62, %v1415_v2  ;;  %v1418_v17 = vadd.f32 %v2123_v63, %v1129_v1  ;;  %v1186_v18 = vpop.f32.mrb[35].mxu0  ;;  %v1409_v55 = vpop.f32.mrb[35].mxu1  ;;  %v1666_v2 = vld [vmem:[%s2705_s13 + $0x28] sm:$0xff] }
 0x15d   : > { %v1725_v22 = vadd.f32 %v1661_v9, %v1407_v51  ;;  %v1410_v25 = vadd.f32 %v1409_v55, %v1121_v10  ;;  %v1158_v10 = vadd.f32 %v2700_v53, %v2672_v27  ;;  %v1150_v51 = vadd.f32 %v2700_v53, %v2664_v19 }
 0x15e   : > { %1792 = vst.msk [vmem:[%s2720_s16 + $0x10] sm:$0xff] %vm1789_vm1, %v1727_v14  ;;  %v1728_v26 = vadd.f32 %v1664_v13, %v1418_v17  ;;  %v1671_v14 = vld [vmem:[%s2705_s13 + $0x50] sm:$0xff]  ;;  %v1161_v17 = vadd.f32 %v2700_v53, %v2676_v31 }
 0x15f   : > { %1790 = vst.msk [vmem:[%s2720_s16] sm:$0xff] %vm1789_vm1, %v1725_v22  ;;  %v1726_v29 = vadd.f32 %v1662_v21, %v1410_v25  ;;  %v1669_v21 = vld [vmem:[%s2705_s13 + $0x40] sm:$0xff]  ;;  %v1153_v22 = vadd.f32 %v2700_v53, %v2668_v23 }
 0x160   : > { %1793 = vst.msk [vmem:[%s2720_s16 + $0x18] sm:$0xff] %vm1789_vm1, %v1728_v26 }
 0x161   : > { %1791 = vst.msk [vmem:[%s2720_s16 + $0x8] sm:$0xff] %vm1789_vm1, %v1726_v29  ;;  %v2738_v34 = vpop.f32.mrb[36].mxu0  ;;  %v2126_v37 = vpop.f32.mrb[36].mxu1  ;;  %v1672_v29 = vld [vmem:[%s2705_s13 + $0x58] sm:$0xff] }
 0x162   : > { %v1431_v42 = vadd.f32 %v2126_v37, %v1142_v30  ;;  %v1191_v45 = vpop.f32.mrb[37].mxu0  ;;  %v1422_v11 = vpop.f32.mrb[37].mxu1 }
 0x163   : > { %v1423_v3 = vadd.f32 %v1422_v11, %v1134_v33  ;;  %v2746_v50 = vpop.f32.mrb[38].mxu0  ;;  %v2127_v54 = vpop.f32.mrb[38].mxu1  ;;  %v1174_v11 = vadd.f32 %v2700_v53, %v2688_v43  ;;  %v1673_v43 = vld [vmem:[%s2705_s13 + $0x60] sm:$0xff] }
 0x164   : > { %v1731_v61 = vadd.f32 %v1667_v38, %v1431_v42  ;;  %v1434_v62 = vadd.f32 %v2127_v54, %v1145_v41  ;;  %v1194_v15 = vpop.f32.mrb[39].mxu0  ;;  %v1425_v1 = vpop.f32.mrb[39].mxu1  ;;  %v1670_v38 = vld [vmem:[%s2705_s13 + $0x48] sm:$0xff]  ;;  %v1675_v54 = vld [vmem:[%s2705_s13 + $0x70] sm:$0xff] }
 0x165   : > { %v1729_v5 = vadd.f32 %v1665_v46, %v1423_v3  ;;  %v1426_v6 = vadd.f32 %v1425_v1, %v1137_v49  ;;  %v1166_v46 = vadd.f32 %v2700_v53, %v2680_v35  ;;  %v1169_v1 = vadd.f32 %v2700_v53, %v2684_v39 }
 0x166   : > { %1796 = vst.msk [vmem:[%s2720_s16 + $0x30] sm:$0xff] %vm1789_vm1, %v1731_v61  ;;  %v1732_v9 = vadd.f32 %v1668_v57, %v1434_v62  ;;  %v1177_v57 = vadd.f32 %v2700_v53, %v2692_v47 }
 0x167   : > { %1794 = vst.msk [vmem:[%s2720_s16 + $0x20] sm:$0xff] %vm1789_vm1, %v1729_v5  ;;  %v1730_v7 = vadd.f32 %v1666_v2, %v1426_v6  ;;  %v1676_v6 = vld [vmem:[%s2705_s13 + $0x78] sm:$0xff] }
 0x168   : > { %1797 = vst.msk [vmem:[%s2720_s16 + $0x38] sm:$0xff] %vm1789_vm1, %v1732_v9 }
 0x169   : > { %1795 = vst.msk [vmem:[%s2720_s16 + $0x28] sm:$0xff] %vm1789_vm1, %v1730_v7  ;;  %v2762_v63 = vpop.f32.mrb[40].mxu0  ;;  %v2130_v13 = vpop.f32.mrb[40].mxu1 }
 0x16a   : > { %v1447_v18 = vadd.f32 %v2130_v13, %v1158_v10  ;;  %v1199_v55 = vpop.f32.mrb[41].mxu0  ;;  %v1438_v27 = vpop.f32.mrb[41].mxu1 }
 0x16b   : > { %v1439_v19 = vadd.f32 %v1438_v27, %v1150_v51  ;;  %v2770_v25 = vpop.f32.mrb[42].mxu0  ;;  %v2131_v26 = vpop.f32.mrb[42].mxu1  ;;  %v1674_v51 = vld [vmem:[%s2705_s13 + $0x68] sm:$0xff]  ;;  %v1182_v55 = vadd.f32 %v2700_v53, %v2710_v58 }
 0x16c   : > { %v1735_v30 = vadd.f32 %v1671_v14, %v1447_v18  ;;  %v1450_v33 = vadd.f32 %v2131_v26, %v1161_v17  ;;  %v1202_v31 = vpop.f32.mrb[43].mxu0  ;;  %v1441_v37 = vpop.f32.mrb[43].mxu1  ;;  %v1190_v18 = vadd.f32 %v2700_v53, %v2738_v34  ;;  %v1677_v34 = vld [vmem:[%s2705_s13 + $0x80] sm:$0xff] }
 0x16d   : > { %v1733_v41 = vadd.f32 %v1669_v21, %v1439_v19  ;;  %v1442_v42 = vadd.f32 %v1441_v37, %v1153_v22  ;;  %v1679_v22 = vld [vmem:[%s2705_s13 + $0x90] sm:$0xff]  ;;  %v1193_v19 = vadd.f32 %v2700_v53, %v2746_v50 }
 0x16e   : > { %1800 = vst.msk [vmem:[%s2720_s16 + $0x50] sm:$0xff] %vm1789_vm1, %v1735_v30  ;;  %v1736_v45 = vadd.f32 %v1672_v29, %v1450_v33  ;;  %v1185_v33 = vadd.f32 %v2700_v53, %v2722_v59 }
 0x16f   : > { %1798 = vst.msk [vmem:[%s2720_s16 + $0x40] sm:$0xff] %vm1789_vm1, %v1733_v41  ;;  %v1734_v23 = vadd.f32 %v1670_v38, %v1442_v42  ;;  %v1680_v38 = vld [vmem:[%s2705_s13 + $0x98] sm:$0xff] }
 0x170   : > { %1801 = vst.msk [vmem:[%s2720_s16 + $0x58] sm:$0xff] %vm1789_vm1, %v1736_v45 }
 0x171   : > { %1799 = vst.msk [vmem:[%s2720_s16 + $0x48] sm:$0xff] %vm1789_vm1, %v1734_v23  ;;  %v1205_v49 = vpop.f32.mrb[44].mxu0  ;;  %v2134_v3 = vpop.f32.mrb[44].mxu1  ;;  %v1678_v23 = vld [vmem:[%s2705_s13 + $0x88] sm:$0xff] }
 0x172   : > { %v1463_v61 = vadd.f32 %v2134_v3, %v1174_v11  ;;  %v1207_v62 = vpop.f32.mrb[45].mxu0  ;;  %v1454_v15 = vpop.f32.mrb[45].mxu1 }
 0x173   : > { %v1455_v2 = vadd.f32 %v1454_v15, %v1166_v46  ;;  %v1208_v35 = vpop.f32.mrb[46].mxu0  ;;  %v2135_v5 = vpop.f32.mrb[46].mxu1  ;;  %v1683_v15 = vld [vmem:[%s2705_s13 + $0xb0] sm:$0xff] }
 0x174   : > { %v1739_v9 = vadd.f32 %v1675_v54, %v1463_v61  ;;  %v1466_v7 = vadd.f32 %v2135_v5, %v1177_v57  ;;  %v1210_v10 = vpop.f32.mrb[47].mxu0  ;;  %v1457_v47 = vpop.f32.mrb[47].mxu1  ;;  %v1206_v54 = vadd.f32 %v2700_v53, %v1205_v49  ;;  %v1198_v57 = vadd.f32 %v2700_v53, %v2762_v63  ;;  %v1681_v49 = vld [vmem:[%s2705_s13 + $0xa0] sm:$0xff] }
 0x175   : > { %v1737_v13 = vadd.f32 %v1673_v43, %v1455_v2  ;;  %v1458_v14 = vadd.f32 %v1457_v47, %v1169_v1  ;;  %v1209_v43 = vadd.f32 %v2700_v53, %v1208_v35  ;;  %v1684_v10 = vld [vmem:[%s2705_s13 + $0xb8] sm:$0xff] }
 0x176   : > { %1804 = vst.msk [vmem:[%s2720_s16 + $0x70] sm:$0xff] %vm1789_vm1, %v1739_v9  ;;  %v1740_v17 = vadd.f32 %v1676_v6, %v1466_v7  ;;  %v1201_v6 = vadd.f32 %v2700_v53, %v2770_v25 }
 0x177   : > { %1802 = vst.msk [vmem:[%s2720_s16 + $0x60] sm:$0xff] %vm1789_vm1, %v1737_v13  ;;  %v1738_v39 = vadd.f32 %v1674_v51, %v1458_v14  ;;  %v1682_v14 = vld [vmem:[%s2705_s13 + $0xa8] sm:$0xff] }
 0x178   : > { %1805 = vst.msk [vmem:[%s2720_s16 + $0x78] sm:$0xff] %vm1789_vm1, %v1740_v17 }
 0x179   : > { %1803 = vst.msk [vmem:[%s2720_s16 + $0x68] sm:$0xff] %vm1789_vm1, %v1738_v39  ;;  %v1213_v27 = vpop.f32.mrb[48].mxu0  ;;  %v2138_v21 = vpop.f32.mrb[48].mxu1 }
 0x17a   : > { %v1479_v26 = vadd.f32 %v2138_v21, %v1190_v18  ;;  %v1215_v29 = vpop.f32.mrb[49].mxu0  ;;  %v1470_v30 = vpop.f32.mrb[49].mxu1  ;;  %v1214_v21 = vadd.f32 %v2700_v53, %v1213_v27 }
 0x17b   : > { %v1471_v31 = vadd.f32 %v1470_v30, %v1182_v55  ;;  %v1216_v58 = vpop.f32.mrb[50].mxu0  ;;  %v2139_v37 = vpop.f32.mrb[50].mxu1 }
 0x17c   : > { %v1743_v41 = vadd.f32 %v1679_v22, %v1479_v26  ;;  %v1482_v42 = vadd.f32 %v2139_v37, %v1193_v19  ;;  %v1218_v45 = vpop.f32.mrb[51].mxu0  ;;  %v1473_v50 = vpop.f32.mrb[51].mxu1  ;;  %v1687_v26 = vld [vmem:[%s2705_s13 + $0xd0] sm:$0xff]  ;;  %v1217_v37 = vadd.f32 %v2700_v53, %v1216_v58 }
 0x17d   : > { %v1741_v11 = vadd.f32 %v1677_v34, %v1471_v31  ;;  %v1474_v46 = vadd.f32 %v1473_v50, %v1185_v33  ;;  %v1685_v31 = vld [vmem:[%s2705_s13 + $0xc0] sm:$0xff] }
 0x17e   : > { %1808 = vst.msk [vmem:[%s2720_s16 + $0x90] sm:$0xff] %vm1789_vm1, %v1743_v41  ;;  %v1744_v3 = vadd.f32 %v1680_v38, %v1482_v42  ;;  %v1688_v42 = vld [vmem:[%s2705_s13 + $0xd8] sm:$0xff] }
 0x17f   : > { %1806 = vst.msk [vmem:[%s2720_s16 + $0x80] sm:$0xff] %vm1789_vm1, %v1741_v11  ;;  %v1742_v59 = vadd.f32 %v1678_v23, %v1474_v46  ;;  %v1686_v46 = vld [vmem:[%s2705_s13 + $0xc8] sm:$0xff] }
 0x180   : > { %1809 = vst.msk [vmem:[%s2720_s16 + $0x98] sm:$0xff] %vm1789_vm1, %v1744_v3 }
 0x181   : > { %1807 = vst.msk [vmem:[%s2720_s16 + $0x88] sm:$0xff] %vm1789_vm1, %v1742_v59  ;;  %v1221_v61 = vpop.f32.mrb[52].mxu0  ;;  %v2142_v62 = vpop.f32.mrb[52].mxu1 }
 0x182   : > { %v1495_v1 = vadd.f32 %v2142_v62, %v1206_v54  ;;  %v1223_v2 = vpop.f32.mrb[53].mxu0  ;;  %v1486_v5 = vpop.f32.mrb[53].mxu1  ;;  %v1222_v55 = vadd.f32 %v2700_v53, %v1221_v61 }
 0x183   : > { %v1487_v9 = vadd.f32 %v1486_v5, %v1198_v57  ;;  %v1224_v63 = vpop.f32.mrb[54].mxu0  ;;  %v2143_v7 = vpop.f32.mrb[54].mxu1  ;;  %v1689_v2 = vld [vmem:[%s2705_s13 + $0xe0] sm:$0xff] }
 0x184   : > { %v1747_v47 = vadd.f32 %v1683_v15, %v1495_v1  ;;  %v1498_v51 = vadd.f32 %v2143_v7, %v1209_v43  ;;  %v1226_v13 = vpop.f32.mrb[55].mxu0  ;;  %v1489_v35 = vpop.f32.mrb[55].mxu1  ;;  %v1225_v29 = vadd.f32 %v2700_v53, %v1224_v63 }
 0x185   : > { %v1745_v17 = vadd.f32 %v1681_v49, %v1487_v9  ;;  %v1490_v39 = vadd.f32 %v1489_v35, %v1201_v6  ;;  %v1691_v49 = vld [vmem:[%s2705_s13 + $0xf0] sm:$0xff]  ;;  %v1690_v13 = vld [vmem:[%s2705_s13 + $0xe8] sm:$0xff] }
 0x186   : > { %1812 = vst.msk [vmem:[%s2720_s16 + $0xb0] sm:$0xff] %vm1789_vm1, %v1747_v47  ;;  %v1748_v18 = vadd.f32 %v1684_v10, %v1498_v51 }
 0x187   : > { %1810 = vst.msk [vmem:[%s2720_s16 + $0xa0] sm:$0xff] %vm1789_vm1, %v1745_v17  ;;  %v1746_v25 = vadd.f32 %v1682_v14, %v1490_v39  ;;  %v1692_v14 = vld [vmem:[%s2705_s13 + $0xf8] sm:$0xff] }
 0x188   : > { %1813 = vst.msk [vmem:[%s2720_s16 + $0xb8] sm:$0xff] %vm1789_vm1, %v1748_v18 }
 0x189   : > { %1811 = vst.msk [vmem:[%s2720_s16 + $0xa8] sm:$0xff] %vm1789_vm1, %v1746_v25  ;;  %v1229_v22 = vpop.f32.mrb[56].mxu0  ;;  %v2146_v19 = vpop.f32.mrb[56].mxu1 }
 0x18a   : > { %v1511_v30 = vadd.f32 %v2146_v19, %v1222_v55  ;;  %v1231_v34 = vpop.f32.mrb[57].mxu0  ;;  %v1502_v33 = vpop.f32.mrb[57].mxu1  ;;  %v1230_v57 = vadd.f32 %v2700_v53, %v1229_v22 }
 0x18b   : > { %v1503_v38 = vadd.f32 %v1502_v33, %v1214_v21  ;;  %v1232_v41 = vpop.f32.mrb[58].mxu0  ;;  %v2147_v27 = vpop.f32.mrb[58].mxu1 }
 0x18c   : > { %v1751_v45 = vadd.f32 %v1687_v26, %v1511_v30  ;;  %v1514_v50 = vadd.f32 %v2147_v27, %v1225_v29  ;;  %v1234_v23 = vpop.f32.mrb[59].mxu0  ;;  %v1505_v11 = vpop.f32.mrb[59].mxu1  ;;  %v1233_v5 = vadd.f32 %v2700_v53, %v1232_v41  ;;  %v1693_v30 = vld [vmem:[%s2705_s13 + $0x100] sm:$0xff]  ;;  %v1694_v27 = vld [vmem:[%s2705_s13 + $0x108] sm:$0xff] }
 0x18d   : > { %v1749_v3 = vadd.f32 %v1685_v31, %v1503_v38  ;;  %v1506_v59 = vadd.f32 %v1505_v11, %v1217_v37 }
 0x18e   : > { %1816 = vst.msk [vmem:[%s2720_s16 + $0xd0] sm:$0xff] %vm1789_vm1, %v1751_v45  ;;  %v1752_v54 = vadd.f32 %v1688_v42, %v1514_v50 }
 0x18f   : > { %1814 = vst.msk [vmem:[%s2720_s16 + $0xc0] sm:$0xff] %vm1789_vm1, %v1749_v3  ;;  %v1750_v58 = vadd.f32 %v1686_v46, %v1506_v59 }
 0x190   : > { %1817 = vst.msk [vmem:[%s2720_s16 + $0xd8] sm:$0xff] %vm1789_vm1, %v1752_v54  ;;  %v1695_v54 = vld [vmem:[%s2705_s13 + $0x110] sm:$0xff] }
 0x191   : > { %1815 = vst.msk [vmem:[%s2720_s16 + $0xc8] sm:$0xff] %vm1789_vm1, %v1750_v58  ;;  %v1237_v61 = vpop.f32.mrb[60].mxu0  ;;  %v2150_v62 = vpop.f32.mrb[60].mxu1 }
 0x192   : > { %v1238_v15 = vadd.f32 %v2700_v53, %v1237_v61  ;;  %v1239_v43 = vpop.f32.mrb[61].mxu0  ;;  %v1518_v1 = vpop.f32.mrb[61].mxu1 }
 0x193   : > { %v1519_v6 = vadd.f32 %v1518_v1, %v1230_v57  ;;  %v1240_v9 = vpop.f32.mrb[62].mxu0  ;;  %v2151_v63 = vpop.f32.mrb[62].mxu1  ;;  %v1696_v1 = vld [vmem:[%s2705_s13 + $0x118] sm:$0xff] }
 0x194   : > { %v1527_v7 = vadd.f32 %v2150_v62, %v1238_v15  ;;  %v1241_v10 = vadd.f32 %v2700_v53, %v1240_v9  ;;  %v1242_v47 = vpop.f32.mrb[63].mxu0  ;;  %v1521_v51 = vpop.f32.mrb[63].mxu1 }
 0x195   : > { %v1753_v35 = vadd.f32 %v1689_v2, %v1519_v6  ;;  %v1522_v17 = vadd.f32 %v1521_v51, %v1233_v5  ;;  %v1697_v47 = vld [vmem:[%s2705_s13 + $0x120] sm:$0xff] }
 0x196   : > { %v1755_v39 = vadd.f32 %v1691_v49, %v1527_v7  ;;  %v1530_v18 = vadd.f32 %v2151_v63, %v1241_v10 }
 0x197   : > { %1818 = vst.msk [vmem:[%s2720_s16 + $0xe0] sm:$0xff] %vm1789_vm1, %v1753_v35  ;;  %v1754_v25 = vadd.f32 %v1690_v13, %v1522_v17 }
 0x198   : > { %1820 = vst.msk [vmem:[%s2720_s16 + $0xf0] sm:$0xff] %vm1789_vm1, %v1755_v39  ;;  %v1756_v55 = vadd.f32 %v1692_v14, %v1530_v18  ;;  %v1698_v18 = vld [vmem:[%s2705_s13 + $0x128] sm:$0xff] }
 0x199   : > { %1819 = vst.msk [vmem:[%s2720_s16 + $0xe8] sm:$0xff] %vm1789_vm1, %v1754_v25  ;;  %v1245_v21 = vpop.f32.mrb[64].mxu0  ;;  %v2154_v22 = vpop.f32.mrb[64].mxu1 }
 0x19a   : > { %1821 = vst.msk [vmem:[%s2720_s16 + $0xf8] sm:$0xff] %vm1789_vm1, %v1756_v55  ;;  %v1246_v19 = vadd.f32 %v2700_v53, %v1245_v21  ;;  %v1247_v26 = vpop.f32.mrb[65].mxu0  ;;  %v1534_v29 = vpop.f32.mrb[65].mxu1 }
 0x19b   : > { %v1248_v34 = vpop.f32.mrb[66].mxu0  ;;  %v2155_v33 = vpop.f32.mrb[66].mxu1 }
 0x19c   : > { %v1535_v31 = vadd.f32 %v1534_v29, %v1246_v19  ;;  %v1249_v37 = vadd.f32 %v2700_v53, %v1248_v34  ;;  %v1250_v38 = vpop.f32.mrb[67].mxu0  ;;  %v1537_v41 = vpop.f32.mrb[67].mxu1  ;;  %v1699_v34 = vld [vmem:[%s2705_s13 + $0x130] sm:$0xff] }
 0x19e   : > { %v1757_v42 = vadd.f32 %v1693_v30, %v1535_v31  ;;  %v1538_v45 = vadd.f32 %v1537_v41, %v1249_v37 }
 0x1a0   : > { %1822 = vst.msk [vmem:[%s2720_s16 + $0x100] sm:$0xff] %vm1789_vm1, %v1757_v42  ;;  %v1758_v50 = vadd.f32 %v1694_v27, %v1538_v45  ;;  %v1700_v42 = vld [vmem:[%s2705_s13 + $0x138] sm:$0xff] }
 0x1a1   : > { %v1253_v23 = vpop.f32.mrb[68].mxu0  ;;  %v2158_v11 = vpop.f32.mrb[68].mxu1 }
 0x1a2   : > { %1823 = vst.msk [vmem:[%s2720_s16 + $0x108] sm:$0xff] %vm1789_vm1, %v1758_v50  ;;  %v1254_v46 = vadd.f32 %v2700_v53, %v1253_v23  ;;  %v1255_v3 = vpop.f32.mrb[69].mxu0  ;;  %v1550_v59 = vpop.f32.mrb[69].mxu1  ;;  %v1318_v23 = vadd.f32 %v2700_v53, %v2644_v60 }
 0x1a3   : > { %v1256_v58 = vpop.f32.mrb[70].mxu0  ;;  %v2159_v57 = vpop.f32.mrb[70].mxu1  ;;  %v1310_v3 = vadd.f32 %v2700_v53, %v2638_v52  ;;  %v1313_v52 = vadd.f32 %v2700_v53, %v2642_v56  ;;  %v1702_v56 = vld [vmem:[%s2705_s13 + $0x148] sm:$0xff] }
 0x1a4   : > { %v1543_v61 = vadd.f32 %v2154_v22, %v1254_v46  ;;  %v1257_v62 = vadd.f32 %v2700_v53, %v1256_v58  ;;  %v1258_v15 = vpop.f32.mrb[71].mxu0  ;;  %v1553_v43 = vpop.f32.mrb[71].mxu1  ;;  %v1321_v58 = vadd.f32 %v2700_v53, %v2646_v0  ;;  %v1712_v0 = vld [vmem:[%s2705_s13 + $0x198] sm:$0xff] }
 0x1a5   : > { %v1709_v15 = vld [vmem:[%s2705_s13 + $0x180] sm:$0xff] }
 0x1a6   : > { %v1759_v2 = vadd.f32 %v1695_v54, %v1543_v61  ;;  %v1546_v5 = vadd.f32 %v2155_v33, %v1257_v62  ;;  %v1711_v54 = vld [vmem:[%s2705_s13 + $0x190] sm:$0xff] }
 0x1a8   : > { %1824 = vst.msk [vmem:[%s2720_s16 + $0x110] sm:$0xff] %vm1789_vm1, %v1759_v2  ;;  %v1760_v49 = vadd.f32 %v1696_v1, %v1546_v5 }
 0x1a9   : > { %v1261_v6 = vpop.f32.mrb[72].mxu0  ;;  %v2886_v9 = vpop.f32.mrb[72].mxu1 }
 0x1aa   : > { %1825 = vst.msk [vmem:[%s2720_s16 + $0x118] sm:$0xff] %vm1789_vm1, %v1760_v49  ;;  %v1262_v63 = vadd.f32 %v2700_v53, %v1261_v6  ;;  %v1263_v7 = vpop.f32.mrb[73].mxu0  ;;  %v1566_v10 = vpop.f32.mrb[73].mxu1 }
 0x1ab   : > { %v1264_v51 = vpop.f32.mrb[74].mxu0  ;;  %v2892_v13 = vpop.f32.mrb[74].mxu1 }
 0x1ac   : > { %v1551_v35 = vadd.f32 %v1550_v59, %v1262_v63  ;;  %v1265_v14 = vadd.f32 %v2700_v53, %v1264_v51  ;;  %v1266_v17 = vpop.f32.mrb[75].mxu0  ;;  %v1569_v39 = vpop.f32.mrb[75].mxu1 }
 0x1ae   : > { %v1761_v25 = vadd.f32 %v1697_v47, %v1551_v35  ;;  %v1554_v55 = vadd.f32 %v1553_v43, %v1265_v14  ;;  %v1701_v43 = vld [vmem:[%s2705_s13 + $0x140] sm:$0xff]  ;;  %v1710_v35 = vld [vmem:[%s2705_s13 + $0x188] sm:$0xff] }
 0x1b0   : > { %1826 = vst.msk [vmem:[%s2720_s16 + $0x120] sm:$0xff] %vm1789_vm1, %v1761_v25  ;;  %v1762_v21 = vadd.f32 %v1698_v18, %v1554_v55 }
 0x1b1   : > { %v1269_v22 = vpop.f32.mrb[76].mxu0  ;;  %v2898_v19 = vpop.f32.mrb[76].mxu1 }
 0x1b2   : > { %1827 = vst.msk [vmem:[%s2720_s16 + $0x128] sm:$0xff] %vm1789_vm1, %v1762_v21  ;;  %v1270_v26 = vadd.f32 %v2700_v53, %v1269_v22  ;;  %v1271_v29 = vpop.f32.mrb[77].mxu0  ;;  %v2903_v30 = vpop.f32.mrb[77].mxu1  ;;  %v1334_v21 = vadd.f32 %v2700_v53, %v2658_v12 }
 0x1b3   : > { %v1272_v33 = vpop.f32.mrb[78].mxu0  ;;  %v2906_v31 = vpop.f32.mrb[78].mxu1 }
 0x1b4   : > { %v1559_v37 = vadd.f32 %v2158_v11, %v1270_v26  ;;  %v1273_v38 = vadd.f32 %v2700_v53, %v1272_v33  ;;  %v1274_v41 = vpop.f32.mrb[79].mxu0  ;;  %v2909_v27 = vpop.f32.mrb[79].mxu1  ;;  %v1326_v26 = vadd.f32 %v2700_v53, %v2650_v4  ;;  %v1337_v33 = vadd.f32 %v2700_v53, %v2662_v16  ;;  %v1716_v16 = vld [vmem:[%s2705_s13 + $0x1b8] sm:$0xff] }
 0x1b5   : > { %v1329_v4 = vadd.f32 %v2700_v53, %v2654_v8 }
 0x1b6   : > { %v1763_v45 = vadd.f32 %v1699_v34, %v1559_v37  ;;  %v1562_v50 = vadd.f32 %v2159_v57, %v1273_v38  ;;  %v1715_v34 = vld [vmem:[%s2705_s13 + $0x1b0] sm:$0xff] }
 0x1b8   : > { %1828 = vst.msk [vmem:[%s2720_s16 + $0x130] sm:$0xff] %vm1789_vm1, %v1763_v45  ;;  %v1764_v46 = vadd.f32 %v1700_v42, %v1562_v50  ;;  %v1713_v42 = vld [vmem:[%s2705_s13 + $0x1a0] sm:$0xff]  ;;  %v1703_v45 = vld [vmem:[%s2705_s13 + $0x150] sm:$0xff] }
 0x1b9   : > { %v1277_v11 = vpop.f32.mrb[80].mxu0  ;;  %v2170_v59 = vpop.f32.mrb[80].mxu1 }
 0x1ba   : > { %1829 = vst.msk [vmem:[%s2720_s16 + $0x138] sm:$0xff] %vm1789_vm1, %v1764_v46  ;;  %v1278_v57 = vadd.f32 %v2700_v53, %v1277_v11  ;;  %v1607_v61 = vadd.f32 %v2170_v59, %v1318_v23  ;;  %v1279_v60 = vpop.f32.mrb[81].mxu0  ;;  %v1598_v62 = vpop.f32.mrb[81].mxu1 }
 0x1bb   : > { %v1599_v1 = vadd.f32 %v1598_v62, %v1310_v3  ;;  %v1280_v2 = vpop.f32.mrb[82].mxu0  ;;  %v2171_v5 = vpop.f32.mrb[82].mxu1  ;;  %v1704_v60 = vld [vmem:[%s2705_s13 + $0x158] sm:$0xff] }
 0x1bc   : > { %v1567_v49 = vadd.f32 %v1566_v10, %v1278_v57  ;;  %v1775_v6 = vadd.f32 %v1711_v54, %v1607_v61  ;;  %v1281_v63 = vadd.f32 %v2700_v53, %v1280_v2  ;;  %v1610_v7 = vadd.f32 %v2171_v5, %v1321_v58  ;;  %v1282_v47 = vpop.f32.mrb[83].mxu0  ;;  %v1601_v51 = vpop.f32.mrb[83].mxu1  ;;  %v1714_v61 = vld [vmem:[%s2705_s13 + $0x1a8] sm:$0xff] }
 0x1bd   : > { %v1773_v14 = vadd.f32 %v1709_v15, %v1599_v1  ;;  %v1602_v17 = vadd.f32 %v1601_v51, %v1313_v52  ;;  %v1350_v1 = vadd.f32 %v2700_v53, %v2674_v28  ;;  %v1342_v5 = vadd.f32 %v2700_v53, %v2666_v20  ;;  %v1717_v51 = vld [vmem:[%s2705_s13 + $0x1c0] sm:$0xff] }
 0x1be   : > { %v1765_v18 = vadd.f32 %v1701_v43, %v1567_v49  ;;  %1840 = vst.msk [vmem:[%s2720_s16 + $0x190] sm:$0xff] %vm1789_vm1, %v1775_v6  ;;  %v1570_v25 = vadd.f32 %v1569_v39, %v1281_v63  ;;  %v1776_v10 = vadd.f32 %v1712_v0, %v1610_v7  ;;  %v1719_v49 = vld [vmem:[%s2705_s13 + $0x1d0] sm:$0xff]  ;;  %v1353_v6 = vadd.f32 %v2700_v53, %v2678_v32  ;;  %v1720_v32 = vld [vmem:[%s2705_s13 + $0x1d8] sm:$0xff] }
 0x1bf   : > { %1838 = vst.msk [vmem:[%s2720_s16 + $0x180] sm:$0xff] %vm1789_vm1, %v1773_v14  ;;  %v1774_v55 = vadd.f32 %v1710_v35, %v1602_v17  ;;  %v1345_v20 = vadd.f32 %v2700_v53, %v2670_v24  ;;  %v1705_v35 = vld [vmem:[%s2705_s13 + $0x160] sm:$0xff] }
 0x1c0   : > { %1830 = vst.msk [vmem:[%s2720_s16 + $0x140] sm:$0xff] %vm1789_vm1, %v1765_v18  ;;  %v1766_v22 = vadd.f32 %v1702_v56, %v1570_v25  ;;  %1841 = vst.msk [vmem:[%s2720_s16 + $0x198] sm:$0xff] %vm1789_vm1, %v1776_v10 }
 0x1c1   : > { %1839 = vst.msk [vmem:[%s2720_s16 + $0x188] sm:$0xff] %vm1789_vm1, %v1774_v55  ;;  %v1285_v39 = vpop.f32.mrb[84].mxu0  ;;  %v2174_v29 = vpop.f32.mrb[84].mxu1 }
 0x1c2   : > { %1831 = vst.msk [vmem:[%s2720_s16 + $0x148] sm:$0xff] %vm1789_vm1, %v1766_v22  ;;  %v1286_v12 = vadd.f32 %v2700_v53, %v1285_v39  ;;  %v1623_v37 = vadd.f32 %v2174_v29, %v1334_v21  ;;  %v1287_v38 = vpop.f32.mrb[85].mxu0  ;;  %v1614_v41 = vpop.f32.mrb[85].mxu1  ;;  %v1706_v39 = vld [vmem:[%s2705_s13 + $0x168] sm:$0xff] }
 0x1c3   : > { %v1615_v50 = vadd.f32 %v1614_v41, %v1326_v26  ;;  %v1288_v23 = vpop.f32.mrb[86].mxu0  ;;  %v2175_v46 = vpop.f32.mrb[86].mxu1  ;;  %v1718_v26 = vld [vmem:[%s2705_s13 + $0x1c8] sm:$0xff]  ;;  %v1358_v41 = vadd.f32 %v2700_v53, %v2682_v36  ;;  %v1361_v36 = vadd.f32 %v2700_v53, %v2686_v40 }
 0x1c4   : > { %v1575_v3 = vadd.f32 %v2886_v9, %v1286_v12  ;;  %v1779_v11 = vadd.f32 %v1715_v34, %v1623_v37  ;;  %v1289_v59 = vadd.f32 %v2700_v53, %v1288_v23  ;;  %v1626_v54 = vadd.f32 %v2175_v46, %v1337_v33  ;;  %v1290_v58 = vpop.f32.mrb[87].mxu0  ;;  %v1617_v57 = vpop.f32.mrb[87].mxu1  ;;  %v1722_v40 = vld [vmem:[%s2705_s13 + $0x1e8] sm:$0xff] }
 0x1c5   : > { %v1777_v8 = vadd.f32 %v1713_v42, %v1615_v50  ;;  %v1618_v62 = vadd.f32 %v1617_v57, %v1329_v4  ;;  %v1366_v37 = vadd.f32 %v2700_v53, %v2690_v44  ;;  %v1723_v4 = vld [vmem:[%s2705_s13 + $0x1f0] sm:$0xff] }
 0x1c6   : > { %v1767_v15 = vadd.f32 %v1703_v45, %v1575_v3  ;;  %1844 = vst.msk [vmem:[%s2720_s16 + $0x1b0] sm:$0xff] %vm1789_vm1, %v1779_v11  ;;  %v1578_v9 = vadd.f32 %v2892_v13, %v1289_v59  ;;  %v1780_v52 = vadd.f32 %v1716_v16, %v1626_v54  ;;  %v1369_v45 = vadd.f32 %v2700_v53, %v2694_v48  ;;  %v1721_v16 = vld [vmem:[%s2705_s13 + $0x1e0] sm:$0xff]  ;;  %v1707_v3 = vld [vmem:[%s2705_s13 + $0x170] sm:$0xff]  ;;  %v1724_v48 = vld [vmem:[%s2705_s13 + $0x1f8] sm:$0xff] }
 0x1c7   : > { %1842 = vst.msk [vmem:[%s2720_s16 + $0x1a0] sm:$0xff] %vm1789_vm1, %v1777_v8  ;;  %v1778_v43 = vadd.f32 %v1714_v61, %v1618_v62 }
 0x1c8   : > { %1832 = vst.msk [vmem:[%s2720_s16 + $0x150] sm:$0xff] %vm1789_vm1, %v1767_v15  ;;  %v1768_v2 = vadd.f32 %v1704_v60, %v1578_v9  ;;  %1845 = vst.msk [vmem:[%s2720_s16 + $0x1b8] sm:$0xff] %vm1789_vm1, %v1780_v52  ;;  %v1708_v9 = vld [vmem:[%s2705_s13 + $0x178] sm:$0xff] }
 0x1c9   : > { %1843 = vst.msk [vmem:[%s2720_s16 + $0x1a8] sm:$0xff] %vm1789_vm1, %v1778_v43  ;;  %v1293_v13 = vpop.f32.mrb[88].mxu0  ;;  %v2178_v0 = vpop.f32.mrb[88].mxu1 }
 0x1ca   : > { %1833 = vst.msk [vmem:[%s2720_s16 + $0x158] sm:$0xff] %vm1789_vm1, %v1768_v2  ;;  %v1294_v28 = vadd.f32 %v2700_v53, %v1293_v13  ;;  %v1639_v63 = vadd.f32 %v2178_v0, %v1350_v1  ;;  %v1295_v7 = vpop.f32.mrb[89].mxu0  ;;  %v1630_v47 = vpop.f32.mrb[89].mxu1 }
 0x1cb   : > { %v1631_v14 = vadd.f32 %v1630_v47, %v1342_v5  ;;  %v1296_v56 = vpop.f32.mrb[90].mxu0  ;;  %v2179_v17 = vpop.f32.mrb[90].mxu1 }
 0x1cc   : > { %v1583_v18 = vadd.f32 %v2903_v30, %v1294_v28  ;;  %v1783_v25 = vadd.f32 %v1719_v49, %v1639_v63  ;;  %v1297_v10 = vadd.f32 %v2700_v53, %v1296_v56  ;;  %v1642_v55 = vadd.f32 %v2179_v17, %v1353_v6  ;;  %v1298_v21 = vpop.f32.mrb[91].mxu0  ;;  %v1633_v22 = vpop.f32.mrb[91].mxu1 }
 0x1cd   : > { %v1781_v24 = vadd.f32 %v1717_v51, %v1631_v14  ;;  %v1634_v29 = vadd.f32 %v1633_v22, %v1345_v20 }
 0x1ce   : > { %v1769_v34 = vadd.f32 %v1705_v35, %v1583_v18  ;;  %1848 = vst.msk [vmem:[%s2720_s16 + $0x1d0] sm:$0xff] %vm1789_vm1, %v1783_v25  ;;  %v1586_v30 = vadd.f32 %v2909_v27, %v1297_v10  ;;  %v1784_v33 = vadd.f32 %v1720_v32, %v1642_v55 }
 0x1cf   : > { %1846 = vst.msk [vmem:[%s2720_s16 + $0x1c0] sm:$0xff] %vm1789_vm1, %v1781_v24  ;;  %v1782_v12 = vadd.f32 %v1718_v26, %v1634_v29 }
 0x1d0   : > { %1834 = vst.msk [vmem:[%s2720_s16 + $0x160] sm:$0xff] %vm1789_vm1, %v1769_v34  ;;  %v1770_v38 = vadd.f32 %v1706_v39, %v1586_v30  ;;  %1849 = vst.msk [vmem:[%s2720_s16 + $0x1d8] sm:$0xff] %vm1789_vm1, %v1784_v33 }
 0x1d1   : > { %1847 = vst.msk [vmem:[%s2720_s16 + $0x1c8] sm:$0xff] %vm1789_vm1, %v1782_v12  ;;  %v1301_v27 = vpop.f32.mrb[92].mxu0  ;;  %v2182_v42 = vpop.f32.mrb[92].mxu1 }
 0x1d2   : > { %1835 = vst.msk [vmem:[%s2720_s16 + $0x168] sm:$0xff] %vm1789_vm1, %v1770_v38  ;;  %v1302_v44 = vadd.f32 %v2700_v53, %v1301_v27  ;;  %v1655_v50 = vadd.f32 %v2182_v42, %v1366_v37  ;;  %v1303_v23 = vpop.f32.mrb[93].mxu0  ;;  %v1646_v46 = vpop.f32.mrb[93].mxu1 }
 0x1d3   : > { %v1647_v11 = vadd.f32 %v1646_v46, %v1358_v41  ;;  %v1304_v59 = vpop.f32.mrb[94].mxu0  ;;  %v2183_v54 = vpop.f32.mrb[94].mxu1 }
 0x1d4   : > { %v1591_v58 = vadd.f32 %v2898_v19, %v1302_v44  ;;  %v1787_v57 = vadd.f32 %v1723_v4, %v1655_v50  ;;  %v1305_v61 = vadd.f32 %v2700_v53, %v1304_v59  ;;  %v1658_v8 = vadd.f32 %v2183_v54, %v1369_v45  ;;  %v1306_v60 = vpop.f32.mrb[95].mxu0  ;;  %v1649_v62 = vpop.f32.mrb[95].mxu1 }
 0x1d5   : > { %v1785_v15 = vadd.f32 %v1721_v16, %v1647_v11  ;;  %v1650_v52 = vadd.f32 %v1649_v62, %v1361_v36 }
 0x1d6   : > { %v1771_v43 = vadd.f32 %v1707_v3, %v1591_v58  ;;  %1852 = vst.msk [vmem:[%s2720_s16 + $0x1f0] sm:$0xff] %vm1789_vm1, %v1787_v57  ;;  %v1594_v1 = vadd.f32 %v2906_v31, %v1305_v61  ;;  %v1788_v19 = vadd.f32 %v1724_v48, %v1658_v8 }
 0x1d7   : > { %1850 = vst.msk [vmem:[%s2720_s16 + $0x1e0] sm:$0xff] %vm1789_vm1, %v1785_v15  ;;  %v1786_v2 = vadd.f32 %v1722_v40, %v1650_v52 }
 0x1d8   : > { %1836 = vst.msk [vmem:[%s2720_s16 + $0x170] sm:$0xff] %vm1789_vm1, %v1771_v43  ;;  %v1772_v53 = vadd.f32 %v1708_v9, %v1594_v1  ;;  %1853 = vst.msk [vmem:[%s2720_s16 + $0x1f8] sm:$0xff] %vm1789_vm1, %v1788_v19 }
 0x1d9   : > { %1851 = vst.msk [vmem:[%s2720_s16 + $0x1e8] sm:$0xff] %vm1789_vm1, %v1786_v2 }
 0x1da   : > { %1837 = vst.msk [vmem:[%s2720_s16 + $0x178] sm:$0xff] %vm1789_vm1, %v1772_v53 }
 0x1db PF: > { %s14_s15 = sadd.s32 1, %s2378_s15  }
 0x1dc   : > { %p11_p4 = scmp.ge.s32.totalorder %s14_s15, 6  }
 0x1de   :  { %13 = sbr.rel (!%p11_p4) target bundleno = 1 (0x1), region = 69 }

// kernel: shake_resnet_forward.17
= control target key start
LH: loop header
LB: loop body
LE: loop exit
PB: predicated region body
PF: predicated region fallthrough
CT: control target
= control target key end

     0   :  { %v2177_v4 = vmov 0   ;;  %vm445_vm0 = vcmask 130048   ;;  %s2178_s9 = smov 16   ;;  %vm1775_vm1 = vcmask 261120   ;;  %s3436_s3 = inlined_call_operand.vmem [shape: bf16[16,16], index: 3, kind: input, shape index: {}]   ;;  %s3437_s1 = inlined_call_operand.vmem [shape: bf16[512,16], index: 1, kind: input, shape index: {}]   ;;  %s3438_s2 = inlined_call_operand.vmem [shape: bf16[16,16], index: 2, kind: input, shape index: {}]   ;;  %s3439_s0 = inlined_call_operand.vmem [shape: bf16[512,16], index: 0, kind: input, shape index: {}]   ;;  %s3440_s4 = inlined_call_operand.vmem [shape: f32[1,32], index: 4, kind: input, shape index: {}]   ;;  %s3441_s5 = inlined_call_operand.vmem [shape: f32[512,32], index: 5, kind: output, shape index: {}]  }
   0x1   :  { %v2175_v0 = vld [vmem:[%s3436_s3] sm:$0xff]   ;;  %v151_v3 = vld [vmem:[%s3437_s1 + $0x8] sm:$0xf]  ;;  %v152_v7 = vld [vmem:[%s3437_s1 + $0xc] sm:$0xf] }
   0x2   :  { %v149_v1 = vld [vmem:[%s3437_s1] sm:$0xf]  ;;  %v150_v2 = vld [vmem:[%s3437_s1 + $0x4] sm:$0xf]  ;;  %2107 = vmatprep.subr.bf16.mxu1 %v2175_v0  ;;  %v215_v8 = vmax.bf16 %v2177_v4, %v151_v3  ;;  %v153_v9 = vld [vmem:[%s3437_s1 + $0x10] sm:$0xf]  ;;  %v216_v11 = vmax.bf16 %v2177_v4, %v152_v7 }
   0x3   :  { %v213_v5 = vmax.bf16 %v2177_v4, %v149_v1  ;;  %v214_v6 = vmax.bf16 %v2177_v4, %v150_v2  ;;  %v154_v10 = vld [vmem:[%s3437_s1 + $0x14] sm:$0xf]  ;;  %2108 = vmatpush3.bf16.msra.mxu1 %v2175_v0  ;;  %v217_v12 = vmax.bf16 %v2177_v4, %v153_v9  ;;  %v155_v15 = vld [vmem:[%s3437_s1 + $0x18] sm:$0xf]  ;;  %v156_v16 = vld [vmem:[%s3437_s1 + $0x1c] sm:$0xf] }
   0x4   :  { %v218_v13 = vmax.bf16 %v2177_v4, %v154_v10  ;;  %v1910_v17 = vcombine.low %v215_v8, %v216_v11  ;;  %v157_v19 = vld [vmem:[%s3437_s1 + $0x20] sm:$0xf]  ;;  %v158_v20 = vld [vmem:[%s3437_s1 + $0x24] sm:$0xf]  ;;  %v219_v21 = vmax.bf16 %v2177_v4, %v155_v15  ;;  %v220_v22 = vmax.bf16 %v2177_v4, %v156_v16  ;;  %v159_v27 = vld [vmem:[%s3437_s1 + $0x28] sm:$0xf] }
   0x5   :  { %v1909_v14 = vcombine.low %v213_v5, %v214_v6  ;;  %v221_v23 = vmax.bf16 %v2177_v4, %v157_v19  ;;  %v222_v24 = vmax.bf16 %v2177_v4, %v158_v20  ;;  %v160_v28 = vld [vmem:[%s3437_s1 + $0x2c] sm:$0xf]  ;;  %v161_v29 = vld [vmem:[%s3437_s1 + $0x30] sm:$0xf]  ;;  %v162_v30 = vld [vmem:[%s3437_s1 + $0x34] sm:$0xf]  ;;  %v223_v31 = vmax.bf16 %v2177_v4, %v159_v27 }
   0x6   :  { %v1911_v18 = vcombine.low %v217_v12, %v218_v13  ;;  %v1912_v25 = vcombine.low %v219_v21, %v220_v22  ;;  %v224_v32 = vmax.bf16 %v2177_v4, %v160_v28  ;;  %v225_v33 = vmax.bf16 %v2177_v4, %v161_v29  ;;  %v163_v36 = vld [vmem:[%s3437_s1 + $0x38] sm:$0xf]  ;;  %v164_v38 = vld [vmem:[%s3437_s1 + $0x3c] sm:$0xf]  ;;  %v2176_v39 = vld [vmem:[%s3438_s2] sm:$0xff]  }
   0x7   :  { %2109 = vmatprep.mubr.msk.bf16.mxu1 %vm445_vm0, %v1909_v14  ;;  %v1913_v26 = vcombine.low %v221_v23, %v222_v24  ;;  %v226_v34 = vmax.bf16 %v2177_v4, %v162_v30  ;;  %v165_v40 = vld [vmem:[%s3437_s1 + $0x40] sm:$0xf]  ;;  %v166_v41 = vld [vmem:[%s3437_s1 + $0x44] sm:$0xf]  ;;  %2041 = vmatprep.subr.bf16.mxu0 %v2176_v39  ;;  %v23_v44 = vld [vmem:[%s3439_s0 + $0x8] sm:$0xf]  ;;  %v227_v45 = vmax.bf16 %v2177_v4, %v163_v36 }
   0x8   :  { %2110 = vmatmul.mubr.msk.bf16.vlgmr.msra.gmra.mrb[0].mxu1 %vm445_vm0, %v1910_v17  ;;  %v1914_v35 = vcombine.low %v223_v31, %v224_v32  ;;  %v21_v42 = vld [vmem:[%s3439_s0] sm:$0xf]  ;;  %v22_v43 = vld [vmem:[%s3439_s0 + $0x4] sm:$0xf]  ;;  %v228_v46 = vmax.bf16 %v2177_v4, %v164_v38  ;;  %2042 = vmatpush3.bf16.msra.mxu0 %v2176_v39  ;;  %v24_v47 = vld [vmem:[%s3439_s0 + $0xc] sm:$0xf]  ;;  %v229_v48 = vmax.bf16 %v2177_v4, %v165_v40 }
   0x9   :  { %2113 = vmatprep.mubr.msk.bf16.mxu1 %vm445_vm0, %v1911_v18  ;;  %v1915_v37 = vcombine.low %v225_v33, %v226_v34  ;;  %v230_v49 = vmax.bf16 %v2177_v4, %v166_v41  ;;  %v85_v50 = vmax.bf16 %v2177_v4, %v21_v42  ;;  %v25_v51 = vld [vmem:[%s3439_s0 + $0x10] sm:$0xf]  ;;  %v86_v52 = vmax.bf16 %v2177_v4, %v22_v43  ;;  %v26_v55 = vld [vmem:[%s3439_s0 + $0x14] sm:$0xf]  ;;  %v167_v57 = vld [vmem:[%s3437_s1 + $0x48] sm:$0xf] }
   0xa   :  { %v87_v53 = vmax.bf16 %v2177_v4, %v23_v44  ;;  %v88_v54 = vmax.bf16 %v2177_v4, %v24_v47  ;;  %v1916_v56 = vcombine.low %v227_v45, %v228_v46  ;;  %v89_v60 = vmax.bf16 %v2177_v4, %v25_v51  ;;  %v27_v61 = vld [vmem:[%s3439_s0 + $0x18] sm:$0xf]  ;;  %v28_v62 = vld [vmem:[%s3439_s0 + $0x1c] sm:$0xf]  ;;  %v168_v0 = vld [vmem:[%s3437_s1 + $0x4c] sm:$0xf] }
   0xb   :  { %v1844_v58 = vcombine.low %v85_v50, %v86_v52  ;;  %v1917_v63 = vcombine.low %v229_v48, %v230_v49  ;;  %v90_v1 = vmax.bf16 %v2177_v4, %v26_v55  ;;  %v29_v2 = vld [vmem:[%s3439_s0 + $0x20] sm:$0xf]  ;;  %v30_v3 = vld [vmem:[%s3439_s0 + $0x24] sm:$0xf]  ;;  %v169_v5 = vld [vmem:[%s3437_s1 + $0x50] sm:$0xf]  ;;  %v91_v8 = vmax.bf16 %v2177_v4, %v27_v61 }
   0xc   :  { %v1845_v59 = vcombine.low %v87_v53, %v88_v54  ;;  %v170_v6 = vld [vmem:[%s3437_s1 + $0x54] sm:$0xf]  ;;  %v92_v9 = vmax.bf16 %v2177_v4, %v28_v62  ;;  %v231_v10 = vmax.bf16 %v2177_v4, %v167_v57  ;;  %v232_v11 = vmax.bf16 %v2177_v4, %v168_v0  ;;  %v171_v18 = vld [vmem:[%s3437_s1 + $0x58] sm:$0xf]  ;;  %v31_v20 = vld [vmem:[%s3439_s0 + $0x28] sm:$0xf] }
   0xd   :  { %2043 = vmatprep.mubr.msk.bf16.mxu0 %vm445_vm0, %v1844_v58  ;;  %v1846_v7 = vcombine.low %v89_v60, %v90_v1  ;;  %v93_v12 = vmax.bf16 %v2177_v4, %v29_v2  ;;  %v94_v13 = vmax.bf16 %v2177_v4, %v30_v3  ;;  %v233_v14 = vmax.bf16 %v2177_v4, %v169_v5  ;;  %v32_v21 = vld [vmem:[%s3439_s0 + $0x2c] sm:$0xf]  ;;  %v172_v23 = vld [vmem:[%s3437_s1 + $0x5c] sm:$0xf]  ;;  %v33_v24 = vld [vmem:[%s3439_s0 + $0x30] sm:$0xf] }
   0xe   :  { %2044 = vmatmul.mubr.msk.bf16.vlgmr.msra.gmra.mrb[0].mxu0 %vm445_vm0, %v1845_v59  ;;  %v234_v15 = vmax.bf16 %v2177_v4, %v170_v6  ;;  %v1847_v16 = vcombine.low %v91_v8, %v92_v9  ;;  %v1918_v17 = vcombine.low %v231_v10, %v232_v11  ;;  %v174_v27 = vld [vmem:[%s3437_s1 + $0x64] sm:$0xf]  ;;  %v235_v28 = vmax.bf16 %v2177_v4, %v171_v18  ;;  %v175_v38 = vld [vmem:[%s3437_s1 + $0x68] sm:$0xf]  ;;  %v35_v40 = vld [vmem:[%s3439_s0 + $0x38] sm:$0xf] }
   0xf   :  { %2047 = vmatprep.mubr.msk.bf16.mxu0 %vm445_vm0, %v1846_v7  ;;  %v1848_v19 = vcombine.low %v93_v12, %v94_v13  ;;  %v95_v29 = vmax.bf16 %v2177_v4, %v31_v20  ;;  %v96_v30 = vmax.bf16 %v2177_v4, %v32_v21  ;;  %v236_v31 = vmax.bf16 %v2177_v4, %v172_v23  ;;  %v36_v41 = vld [vmem:[%s3439_s0 + $0x3c] sm:$0xf]  ;;  %v176_v43 = vld [vmem:[%s3437_s1 + $0x6c] sm:$0xf]  ;;  %v37_v44 = vld [vmem:[%s3439_s0 + $0x40] sm:$0xf] }
  0x10   :  { %2114 = vmatmul.mubr.msk.bf16.gmra.mrb[4].mxu1 %vm445_vm0, %v1912_v25  ;;  %v1919_v22 = vcombine.low %v233_v14, %v234_v15  ;;  %v34_v25 = vld [vmem:[%s3439_s0 + $0x34] sm:$0xf]  ;;  %v97_v32 = vmax.bf16 %v2177_v4, %v33_v24  ;;  %v38_v45 = vld [vmem:[%s3439_s0 + $0x44] sm:$0xf]  ;;  %v177_v46 = vld [vmem:[%s3437_s1 + $0x70] sm:$0xf]  ;;  %v239_v48 = vmax.bf16 %v2177_v4, %v175_v38  ;;  %v99_v49 = vmax.bf16 %v2177_v4, %v35_v40 }
  0x11   :  { %2117 = vmatprep.mubr.msk.bf16.mxu1 %vm445_vm0, %v1913_v26  ;;  %v173_v26 = vld [vmem:[%s3437_s1 + $0x60] sm:$0xf]  ;;  %v98_v33 = vmax.bf16 %v2177_v4, %v34_v25  ;;  %v1849_v36 = vcombine.low %v95_v29, %v96_v30  ;;  %v178_v47 = vld [vmem:[%s3437_s1 + $0x74] sm:$0xf]  ;;  %v100_v50 = vmax.bf16 %v2177_v4, %v36_v41  ;;  %v240_v51 = vmax.bf16 %v2177_v4, %v176_v43  ;;  %v179_v58 = vld [vmem:[%s3437_s1 + $0x78] sm:$0xf] }
  0x12   :  { %v237_v34 = vmax.bf16 %v2177_v4, %v173_v26  ;;  %v101_v52 = vmax.bf16 %v2177_v4, %v37_v44  ;;  %v102_v53 = vmax.bf16 %v2177_v4, %v38_v45  ;;  %v241_v54 = vmax.bf16 %v2177_v4, %v177_v46  ;;  %v39_v60 = vld [vmem:[%s3439_s0 + $0x48] sm:$0xf]  ;;  %v40_v61 = vld [vmem:[%s3439_s0 + $0x4c] sm:$0xf]  ;;  %v41_v0 = vld [vmem:[%s3439_s0 + $0x50] sm:$0xf] }
  0x13   :  { %v1850_v39 = vcombine.low %v97_v32, %v98_v33  ;;  %v242_v55 = vmax.bf16 %v2177_v4, %v178_v47  ;;  %v1922_v57 = vcombine.low %v239_v48, %v240_v51  ;;  %v42_v1 = vld [vmem:[%s3439_s0 + $0x54] sm:$0xf]  ;;  %v181_v2 = vld [vmem:[%s3437_s1 + $0x80] sm:$0xf]  ;;  %v182_v3 = vld [vmem:[%s3437_s1 + $0x84] sm:$0xf]  ;;  %v243_v5 = vmax.bf16 %v2177_v4, %v179_v58 }
  0x14   :  { %v1852_v59 = vcombine.low %v101_v52, %v102_v53  ;;  %v103_v6 = vmax.bf16 %v2177_v4, %v39_v60  ;;  %v104_v7 = vmax.bf16 %v2177_v4, %v40_v61  ;;  %v105_v9 = vmax.bf16 %v2177_v4, %v41_v0  ;;  %v183_v15 = vld [vmem:[%s3437_s1 + $0x88] sm:$0xf]  ;;  %v44_v18 = vld [vmem:[%s3439_s0 + $0x5c] sm:$0xf]  ;;  %v184_v20 = vld [vmem:[%s3437_s1 + $0x8c] sm:$0xf] }
  0x15   :  { %v1923_v62 = vcombine.low %v241_v54, %v242_v55  ;;  %v106_v10 = vmax.bf16 %v2177_v4, %v42_v1  ;;  %v245_v11 = vmax.bf16 %v2177_v4, %v181_v2  ;;  %v246_v12 = vmax.bf16 %v2177_v4, %v182_v3  ;;  %v45_v21 = vld [vmem:[%s3439_s0 + $0x60] sm:$0xf]  ;;  %v185_v23 = vld [vmem:[%s3437_s1 + $0x90] sm:$0xf]  ;;  %v186_v24 = vld [vmem:[%s3437_s1 + $0x94] sm:$0xf] }
  0x16   :  { %2048 = vmatmul.mubr.msk.bf16.gmra.mrb[4].mxu0 %vm445_vm0, %v1847_v16  ;;  %v1853_v13 = vcombine.low %v103_v6, %v104_v7  ;;  %v247_v25 = vmax.bf16 %v2177_v4, %v183_v15  ;;  %v109_v29 = vmax.bf16 %v2177_v4, %v45_v21  ;;  %v250_v32 = vmax.bf16 %v2177_v4, %v186_v24  ;;  %v48_v38 = vld [vmem:[%s3439_s0 + $0x6c] sm:$0xf]  ;;  %v188_v40 = vld [vmem:[%s3437_s1 + $0x9c] sm:$0xf]  ;;  %v49_v41 = vld [vmem:[%s3439_s0 + $0x70] sm:$0xf] }
  0x17   :  { %2051 = vmatprep.mubr.msk.bf16.mxu0 %vm445_vm0, %v1848_v19  ;;  %v1854_v16 = vcombine.low %v105_v9, %v106_v10  ;;  %v1925_v19 = vcombine.low %v245_v11, %v246_v12  ;;  %v189_v43 = vld [vmem:[%s3437_s1 + $0xa0] sm:$0xf]  ;;  %v190_v44 = vld [vmem:[%s3437_s1 + $0xa4] sm:$0xf]  ;;  %v112_v47 = vmax.bf16 %v2177_v4, %v48_v38  ;;  %v252_v48 = vmax.bf16 %v2177_v4, %v188_v40  ;;  %v191_v55 = vld [vmem:[%s3437_s1 + $0xa8] sm:$0xf] }
  0x18   :  { %2118 = vmatmul.mubr.msk.bf16.gmra.mrb[8].mxu1 %vm445_vm0, %v1914_v35  ;;  %v238_v35 = vmax.bf16 %v2177_v4, %v174_v27  ;;  %v108_v27 = vmax.bf16 %v2177_v4, %v44_v18  ;;  %v253_v51 = vmax.bf16 %v2177_v4, %v189_v43  ;;  %v254_v52 = vmax.bf16 %v2177_v4, %v190_v44  ;;  %v52_v58 = vld [vmem:[%s3439_s0 + $0x7c] sm:$0xf]  ;;  %v192_v60 = vld [vmem:[%s3437_s1 + $0xac] sm:$0xf]  ;;  %v53_v61 = vld [vmem:[%s3439_s0 + $0x80] sm:$0xf] }
  0x19   :  { %2121 = vmatprep.mubr.msk.bf16.mxu1 %vm445_vm0, %v1915_v37  ;;  %v1920_v37 = vcombine.low %v235_v28, %v236_v31  ;;  %v248_v28 = vmax.bf16 %v2177_v4, %v184_v20  ;;  %v249_v31 = vmax.bf16 %v2177_v4, %v185_v23  ;;  %v194_v0 = vld [vmem:[%s3437_s1 + $0xb4] sm:$0xf]  ;;  %v255_v1 = vmax.bf16 %v2177_v4, %v191_v55  ;;  %v195_v12 = vld [vmem:[%s3437_s1 + $0xb8] sm:$0xf]  ;;  %v56_v15 = vld [vmem:[%s3439_s0 + $0x8c] sm:$0xf] }
  0x1a   :  { %v1921_v42 = vcombine.low %v237_v34, %v238_v35  ;;  %v187_v35 = vld [vmem:[%s3437_s1 + $0x98] sm:$0xf]  ;;  %v116_v3 = vmax.bf16 %v2177_v4, %v52_v58  ;;  %v117_v6 = vmax.bf16 %v2177_v4, %v53_v61  ;;  %v258_v9 = vmax.bf16 %v2177_v4, %v194_v0  ;;  %v57_v18 = vld [vmem:[%s3439_s0 + $0x90] sm:$0xf]  ;;  %v197_v20 = vld [vmem:[%s3437_s1 + $0xc0] sm:$0xf] }
  0x1b   :  { %v1926_v34 = vcombine.low %v247_v25, %v248_v28  ;;  %v251_v45 = vmax.bf16 %v2177_v4, %v187_v35  ;;  %v198_v21 = vld [vmem:[%s3437_s1 + $0xc4] sm:$0xf]  ;;  %v120_v24 = vmax.bf16 %v2177_v4, %v56_v15  ;;  %v261_v28 = vmax.bf16 %v2177_v4, %v197_v20  ;;  %v60_v35 = vld [vmem:[%s3439_s0 + $0x9c] sm:$0xf]  ;;  %v61_v38 = vld [vmem:[%s3439_s0 + $0xa0] sm:$0xf] }
  0x1c   :  { %v201_v40 = vld [vmem:[%s3437_s1 + $0xd0] sm:$0xf]  ;;  %v124_v44 = vmax.bf16 %v2177_v4, %v60_v35  ;;  %v64_v55 = vld [vmem:[%s3439_s0 + $0xac] sm:$0xf]  ;;  %v206_v61 = vld [vmem:[%s3437_s1 + $0xe4] sm:$0xf] }
  0x1d   :  { %v1928_v54 = vcombine.low %v251_v45, %v252_v48  ;;  %v265_v48 = vmax.bf16 %v2177_v4, %v201_v40  ;;  %v65_v58 = vld [vmem:[%s3439_s0 + $0xb0] sm:$0xf]  ;;  %v128_v0 = vmax.bf16 %v2177_v4, %v64_v55  ;;  %v69_v15 = vld [vmem:[%s3439_s0 + $0xc0] sm:$0xf] }
  0x1e   :  { %2052 = vmatmul.mubr.msk.bf16.gmra.mrb[8].mxu0 %vm445_vm0, %v1849_v36  ;;  %v73_v35 = vld [vmem:[%s3439_s0 + $0xd0] sm:$0xf] }
  0x1f   :  { %2055 = vmatprep.mubr.msk.bf16.mxu0 %vm445_vm0, %v1850_v39  ;;  %v1927_v39 = vcombine.low %v249_v31, %v250_v32  ;;  %v199_v32 = vld [vmem:[%s3437_s1 + $0xc8] sm:$0xf] }
  0x20   :  { %2122 = vmatmul.mubr.msk.bf16.gmra.mrb[12].mxu1 %vm445_vm0, %v1916_v56  ;;  %v1851_v56 = vcombine.low %v99_v49, %v100_v50  ;;  %v113_v49 = vmax.bf16 %v2177_v4, %v49_v41  ;;  %v202_v41 = vld [vmem:[%s3437_s1 + $0xd4] sm:$0xf] }
  0x21   :  { %2125 = vmatprep.mubr.msk.bf16.mxu1 %vm445_vm0, %v1917_v63  ;;  %v180_v63 = vld [vmem:[%s3437_s1 + $0x7c] sm:$0xf] }
  0x22   :  { %v244_v8 = vmax.bf16 %v2177_v4, %v180_v63  ;;  %v193_v63 = vld [vmem:[%s3437_s1 + $0xb0] sm:$0xf] }
  0x24   :  { %v1924_v14 = vcombine.low %v243_v5, %v244_v8  ;;  %v256_v5 = vmax.bf16 %v2177_v4, %v192_v60  ;;  %v257_v8 = vmax.bf16 %v2177_v4, %v193_v63  ;;  %v205_v60 = vld [vmem:[%s3437_s1 + $0xe0] sm:$0xf] }
  0x26   :  { %2056 = vmatmul.mubr.msk.bf16.gmra.mrb[12].mxu0 %vm445_vm0, %v1851_v56  ;;  %v1930_v11 = vcombine.low %v255_v1, %v256_v5  ;;  %v269_v5 = vmax.bf16 %v2177_v4, %v205_v60 }
  0x27   :  { %2059 = vmatprep.mubr.msk.bf16.mxu0 %vm445_vm0, %v1852_v59  ;;  %v1929_v59 = vcombine.low %v253_v51, %v254_v52  ;;  %v203_v52 = vld [vmem:[%s3437_s1 + $0xd8] sm:$0xf] }
  0x28   :  { %2126 = vmatmul.mubr.msk.bf16.gmra.mrb[16].mxu1 %vm445_vm0, %v1918_v17  ;;  %v43_v17 = vld [vmem:[%s3439_s0 + $0x58] sm:$0xf] }
  0x29   :  { %2129 = vmatprep.mubr.msk.bf16.mxu1 %vm445_vm0, %v1919_v22  ;;  %v46_v22 = vld [vmem:[%s3439_s0 + $0x64] sm:$0xf]  ;;  %v107_v26 = vmax.bf16 %v2177_v4, %v43_v17  ;;  %v196_v17 = vld [vmem:[%s3437_s1 + $0xbc] sm:$0xf] }
  0x2a   :  { %v110_v30 = vmax.bf16 %v2177_v4, %v46_v22  ;;  %v259_v22 = vmax.bf16 %v2177_v4, %v195_v12  ;;  %v260_v25 = vmax.bf16 %v2177_v4, %v196_v17  ;;  %v68_v12 = vld [vmem:[%s3439_s0 + $0xbc] sm:$0xf]  ;;  %v209_v17 = vld [vmem:[%s3437_s1 + $0xf0] sm:$0xf] }
  0x2b   :  { %v1855_v33 = vcombine.low %v107_v26, %v108_v27  ;;  %v121_v26 = vmax.bf16 %v2177_v4, %v57_v18  ;;  %v210_v18 = vld [vmem:[%s3437_s1 + $0xf4] sm:$0xf] }
  0x2c   :  { %v1856_v36 = vcombine.low %v109_v29, %v110_v30  ;;  %v262_v29 = vmax.bf16 %v2177_v4, %v198_v21  ;;  %v1932_v31 = vcombine.low %v259_v22, %v260_v25  ;;  %v132_v21 = vmax.bf16 %v2177_v4, %v68_v12 }
  0x2d   :  { %v273_v25 = vmax.bf16 %v2177_v4, %v209_v17 }
  0x2e   :  { %2060 = vmatmul.mubr.msk.bf16.gmra.mrb[16].mxu0 %vm445_vm0, %v1853_v13 }
  0x2f   :  { %2063 = vmatprep.mubr.msk.bf16.mxu0 %vm445_vm0, %v1854_v16  ;;  %v1931_v16 = vcombine.low %v257_v8, %v258_v9  ;;  %v207_v9 = vld [vmem:[%s3437_s1 + $0xe8] sm:$0xf] }
  0x30   :  { %2130 = vmatmul.mubr.msk.bf16.gmra.mrb[20].mxu1 %vm445_vm0, %v1920_v37  ;;  %v47_v37 = vld [vmem:[%s3439_s0 + $0x68] sm:$0xf] }
  0x31   :  { %2133 = vmatprep.mubr.msk.bf16.mxu1 %vm445_vm0, %v1921_v42  ;;  %v50_v42 = vld [vmem:[%s3439_s0 + $0x74] sm:$0xf]  ;;  %v111_v46 = vmax.bf16 %v2177_v4, %v47_v37  ;;  %v200_v37 = vld [vmem:[%s3437_s1 + $0xcc] sm:$0xf] }
  0x32   :  { %v114_v50 = vmax.bf16 %v2177_v4, %v50_v42  ;;  %v263_v42 = vmax.bf16 %v2177_v4, %v199_v32  ;;  %v264_v45 = vmax.bf16 %v2177_v4, %v200_v37  ;;  %v72_v32 = vld [vmem:[%s3439_s0 + $0xcc] sm:$0xf] }
  0x33   :  { %v1857_v53 = vcombine.low %v111_v46, %v112_v47  ;;  %v125_v46 = vmax.bf16 %v2177_v4, %v61_v38 }
  0x34   :  { %v1858_v56 = vcombine.low %v113_v49, %v114_v50  ;;  %v266_v49 = vmax.bf16 %v2177_v4, %v202_v41  ;;  %v1934_v51 = vcombine.low %v263_v42, %v264_v45  ;;  %v137_v41 = vmax.bf16 %v2177_v4, %v73_v35 }
  0x36   :  { %2064 = vmatmul.mubr.msk.bf16.gmra.mrb[20].mxu0 %vm445_vm0, %v1855_v33 }
  0x37   :  { %2067 = vmatprep.mubr.msk.bf16.mxu0 %vm445_vm0, %v1856_v36  ;;  %v1933_v36 = vcombine.low %v261_v28, %v262_v29  ;;  %v211_v29 = vld [vmem:[%s3437_s1 + $0xf8] sm:$0xf] }
  0x38   :  { %2134 = vmatmul.mubr.msk.bf16.gmra.mrb[24].mxu1 %vm445_vm0, %v1922_v57  ;;  %v51_v57 = vld [vmem:[%s3439_s0 + $0x78] sm:$0xf]  ;;  %v275_v37 = vmax.bf16 %v2177_v4, %v211_v29 }
  0x39   :  { %2137 = vmatprep.mubr.msk.bf16.mxu1 %vm445_vm0, %v1923_v62  ;;  %v54_v62 = vld [vmem:[%s3439_s0 + $0x84] sm:$0xf]  ;;  %v115_v2 = vmax.bf16 %v2177_v4, %v51_v57  ;;  %v204_v57 = vld [vmem:[%s3437_s1 + $0xdc] sm:$0xf] }
  0x3a   :  { %v118_v7 = vmax.bf16 %v2177_v4, %v54_v62  ;;  %v267_v62 = vmax.bf16 %v2177_v4, %v203_v52  ;;  %v268_v1 = vmax.bf16 %v2177_v4, %v204_v57  ;;  %v80_v57 = vld [vmem:[%s3439_s0 + $0xec] sm:$0xf] }
  0x3b   :  { %v1859_v10 = vcombine.low %v115_v2, %v116_v3  ;;  %v129_v2 = vmax.bf16 %v2177_v4, %v65_v58  ;;  %v81_v58 = vld [vmem:[%s3439_s0 + $0xf0] sm:$0xf] }
  0x3c   :  { %v1860_v13 = vcombine.low %v117_v6, %v118_v7  ;;  %v270_v6 = vmax.bf16 %v2177_v4, %v206_v61  ;;  %v1936_v8 = vcombine.low %v267_v62, %v268_v1  ;;  %v144_v61 = vmax.bf16 %v2177_v4, %v80_v57 }
  0x3d   :  { %v145_v62 = vmax.bf16 %v2177_v4, %v81_v58 }
  0x3e   :  { %2068 = vmatmul.mubr.msk.bf16.gmra.mrb[24].mxu0 %vm445_vm0, %v1857_v53 }
  0x3f   :  { %2071 = vmatprep.mubr.msk.bf16.mxu0 %vm445_vm0, %v1858_v56  ;;  %v1935_v56 = vcombine.low %v265_v48, %v266_v49  ;;  %v77_v48 = vld [vmem:[%s3439_s0 + $0xe0] sm:$0xf]  ;;  %v78_v49 = vld [vmem:[%s3439_s0 + $0xe4] sm:$0xf] }
  0x40   :  { %2138 = vmatmul.mubr.msk.bf16.gmra.mrb[28].mxu1 %vm445_vm0, %v1924_v14  ;;  %v55_v14 = vld [vmem:[%s3439_s0 + $0x88] sm:$0xf]  ;;  %v141_v52 = vmax.bf16 %v2177_v4, %v77_v48 }
  0x41   :  { %2141 = vmatprep.mubr.msk.bf16.mxu1 %vm445_vm0, %v1925_v19  ;;  %v58_v19 = vld [vmem:[%s3439_s0 + $0x94] sm:$0xf]  ;;  %v119_v23 = vmax.bf16 %v2177_v4, %v55_v14  ;;  %v208_v14 = vld [vmem:[%s3437_s1 + $0xec] sm:$0xf] }
  0x42   :  { %v122_v27 = vmax.bf16 %v2177_v4, %v58_v19  ;;  %v271_v19 = vmax.bf16 %v2177_v4, %v207_v9  ;;  %v272_v22 = vmax.bf16 %v2177_v4, %v208_v14 }
  0x43   :  { %v1861_v30 = vcombine.low %v119_v23, %v120_v24  ;;  %v133_v23 = vmax.bf16 %v2177_v4, %v69_v15 }
  0x44   :  { %v1862_v33 = vcombine.low %v121_v26, %v122_v27  ;;  %v274_v26 = vmax.bf16 %v2177_v4, %v210_v18  ;;  %v1938_v28 = vcombine.low %v271_v19, %v272_v22 }
  0x46   :  { %2072 = vmatmul.mubr.msk.bf16.gmra.mrb[28].mxu0 %vm445_vm0, %v1859_v10 }
  0x47   :  { %2075 = vmatprep.mubr.msk.bf16.mxu0 %vm445_vm0, %v1860_v13  ;;  %v1937_v13 = vcombine.low %v269_v5, %v270_v6 }
  0x48   :  { %2142 = vmatmul.mubr.msk.bf16.gmra.mrb[32].mxu1 %vm445_vm0, %v1926_v34  ;;  %v59_v34 = vld [vmem:[%s3439_s0 + $0x98] sm:$0xf] }
  0x49   :  { %2145 = vmatprep.mubr.msk.bf16.mxu1 %vm445_vm0, %v1927_v39  ;;  %v62_v39 = vld [vmem:[%s3439_s0 + $0xa4] sm:$0xf]  ;;  %v123_v43 = vmax.bf16 %v2177_v4, %v59_v34  ;;  %v212_v34 = vld [vmem:[%s3437_s1 + $0xfc] sm:$0xf] }
  0x4a   :  { %v126_v47 = vmax.bf16 %v2177_v4, %v62_v39  ;;  %v136_v39 = vmax.bf16 %v2177_v4, %v72_v32  ;;  %v276_v40 = vmax.bf16 %v2177_v4, %v212_v34 }
  0x4b   :  { %v1863_v50 = vcombine.low %v123_v43, %v124_v44 }
  0x4c   :  { %v1864_v53 = vcombine.low %v125_v46, %v126_v47  ;;  %v1940_v44 = vcombine.low %v275_v37, %v276_v40  ;;  %v75_v46 = vld [vmem:[%s3439_s0 + $0xd8] sm:$0xf]  ;;  %v76_v47 = vld [vmem:[%s3439_s0 + $0xdc] sm:$0xf] }
  0x4e   :  { %2076 = vmatmul.mubr.msk.bf16.gmra.mrb[32].mxu0 %vm445_vm0, %v1861_v30 }
  0x4f   :  { %2079 = vmatprep.mubr.msk.bf16.mxu0 %vm445_vm0, %v1862_v33  ;;  %v1939_v33 = vcombine.low %v273_v25, %v274_v26 }
  0x50   :  { %2146 = vmatmul.mubr.msk.bf16.gmra.mrb[36].mxu1 %vm445_vm0, %v1928_v54  ;;  %v63_v54 = vld [vmem:[%s3439_s0 + $0xa8] sm:$0xf] }
  0x51   :  { %2149 = vmatprep.mubr.msk.bf16.mxu1 %vm445_vm0, %v1929_v59  ;;  %v66_v59 = vld [vmem:[%s3439_s0 + $0xb4] sm:$0xf]  ;;  %v127_v63 = vmax.bf16 %v2177_v4, %v63_v54 }
  0x52   :  { %v130_v3 = vmax.bf16 %v2177_v4, %v66_v59  ;;  %v82_v59 = vld [vmem:[%s3439_s0 + $0xf4] sm:$0xf] }
  0x53   :  { %v1865_v7 = vcombine.low %v127_v63, %v128_v0  ;;  %v146_v63 = vmax.bf16 %v2177_v4, %v82_v59 }
  0x54   :  { %v1866_v10 = vcombine.low %v129_v2, %v130_v3  ;;  %v83_v2 = vld [vmem:[%s3439_s0 + $0xf8] sm:$0xf]  ;;  %v84_v3 = vld [vmem:[%s3439_s0 + $0xfc] sm:$0xf] }
  0x55   :  { %v1874_v1 = vcombine.low %v145_v62, %v146_v63  ;;  %v147_v5 = vmax.bf16 %v2177_v4, %v83_v2  ;;  %v148_v6 = vmax.bf16 %v2177_v4, %v84_v3 }
  0x56   :  { %2080 = vmatmul.mubr.msk.bf16.gmra.mrb[36].mxu0 %vm445_vm0, %v1863_v50  ;;  %v139_v50 = vmax.bf16 %v2177_v4, %v75_v46 }
  0x57   :  { %2083 = vmatprep.mubr.msk.bf16.mxu0 %vm445_vm0, %v1864_v53  ;;  %v142_v53 = vmax.bf16 %v2177_v4, %v78_v49 }
  0x58   :  { %2150 = vmatmul.mubr.msk.bf16.gmra.mrb[40].mxu1 %vm445_vm0, %v1930_v11  ;;  %v67_v11 = vld [vmem:[%s3439_s0 + $0xb8] sm:$0xf] }
  0x59   :  { %2153 = vmatprep.mubr.msk.bf16.mxu1 %vm445_vm0, %v1931_v16  ;;  %v70_v16 = vld [vmem:[%s3439_s0 + $0xc4] sm:$0xf]  ;;  %v131_v20 = vmax.bf16 %v2177_v4, %v67_v11  ;;  %v1872_v55 = vcombine.low %v141_v52, %v142_v53 }
  0x5a   :  { %v134_v24 = vmax.bf16 %v2177_v4, %v70_v16 }
  0x5b   :  { %v1867_v27 = vcombine.low %v131_v20, %v132_v21 }
  0x5c   :  { %v1868_v30 = vcombine.low %v133_v23, %v134_v24 }
  0x5e   :  { %2084 = vmatmul.mubr.msk.bf16.gmra.mrb[40].mxu0 %vm445_vm0, %v1865_v7  ;;  %v1875_v7 = vcombine.low %v147_v5, %v148_v6 }
  0x5f   :  { %2087 = vmatprep.mubr.msk.bf16.mxu0 %vm445_vm0, %v1866_v10 }
  0x60   :  { %2154 = vmatmul.mubr.msk.bf16.gmra.mrb[44].mxu1 %vm445_vm0, %v1932_v31  ;;  %v71_v31 = vld [vmem:[%s3439_s0 + $0xc8] sm:$0xf] }
  0x61   :  { %2157 = vmatprep.mubr.msk.bf16.mxu1 %vm445_vm0, %v1933_v36  ;;  %v74_v36 = vld [vmem:[%s3439_s0 + $0xd4] sm:$0xf]  ;;  %v135_v38 = vmax.bf16 %v2177_v4, %v71_v31 }
  0x62   :  { %v138_v42 = vmax.bf16 %v2177_v4, %v74_v36 }
  0x63   :  { %v1869_v43 = vcombine.low %v135_v38, %v136_v39 }
  0x64   :  { %v1870_v45 = vcombine.low %v137_v41, %v138_v42 }
  0x66   :  { %2088 = vmatmul.mubr.msk.bf16.gmra.mrb[44].mxu0 %vm445_vm0, %v1867_v27 }
  0x67   :  { %2091 = vmatprep.mubr.msk.bf16.mxu0 %vm445_vm0, %v1868_v30 }
  0x68   :  { %2158 = vmatmul.mubr.msk.bf16.gmra.mrb[48].mxu1 %vm445_vm0, %v1934_v51  ;;  %v140_v51 = vmax.bf16 %v2177_v4, %v76_v47 }
  0x69   :  { %2161 = vmatprep.mubr.msk.bf16.mxu1 %vm445_vm0, %v1935_v56  ;;  %v79_v56 = vld [vmem:[%s3439_s0 + $0xe8] sm:$0xf] }
  0x6a   :  { %v1871_v54 = vcombine.low %v139_v50, %v140_v51  ;;  %v143_v60 = vmax.bf16 %v2177_v4, %v79_v56 }
  0x6c   :  { %v1873_v0 = vcombine.low %v143_v60, %v144_v61 }
  0x6e   :  { %2092 = vmatmul.mubr.msk.bf16.gmra.mrb[48].mxu0 %vm445_vm0, %v1869_v43 }
  0x6f   :  { %2095 = vmatprep.mubr.msk.bf16.mxu0 %vm445_vm0, %v1870_v45 }
  0x70   :  { %2162 = vmatmul.mubr.msk.bf16.gmra.mrb[52].mxu1 %vm445_vm0, %v1936_v8 }
  0x71   :  { %2165 = vmatprep.mubr.msk.bf16.mxu1 %vm445_vm0, %v1937_v13 }
  0x76   :  { %2096 = vmatmul.mubr.msk.bf16.gmra.mrb[52].mxu0 %vm445_vm0, %v1871_v54 }
  0x77   :  { %2099 = vmatprep.mubr.msk.bf16.mxu0 %vm445_vm0, %v1872_v55 }
  0x78   :  { %2166 = vmatmul.mubr.msk.bf16.gmra.mrb[56].mxu1 %vm445_vm0, %v1938_v28 }
  0x79   :  { %2169 = vmatprep.mubr.msk.bf16.mxu1 %vm445_vm0, %v1939_v33 }
  0x7e   :  { %2100 = vmatmul.mubr.msk.bf16.gmra.mrb[56].mxu0 %vm445_vm0, %v1873_v0 }
  0x7f   :  { %2103 = vmatprep.mubr.msk.bf16.mxu0 %vm445_vm0, %v1874_v1 }
  0x80   :  { %2170 = vmatmul.mubr.msk.bf16.gmra.mrb[60].mxu1 %vm445_vm0, %v1940_v44 }
  0x86   :  { %2104 = vmatmul.mubr.msk.bf16.gmra.mrb[60].mxu0 %vm445_vm0, %v1875_v7 }
  0xdb   :  { %v2111_v8 = vpop.f32.mrb[0].mxu1 }
  0xdc   :  { %1452 = vrot.lane.b32.xlu1 %v2111_v8, %s2178_s9  ;;  %v1129_v9 = vpop.f32.mrb[1].mxu1 }
  0xdd   :  { %1448 = vrot.lane.b32.xlu0 %v1129_v9, %s2178_s9  ;;  %v2112_v10 = vpop.f32.mrb[2].mxu1 }
  0xde   :  { %v1132_v11 = vpop.f32.mrb[3].mxu1 }
  0xe0   :  { %1454 = vrot.lane.b32.xlu1 %v2112_v10, %s2178_s9 }
  0xe1   :  { %1450 = vrot.lane.b32.xlu0 %v1132_v11, %s2178_s9  ;;  %v2803_v19 = vpop.f32.mrb[0].mxu0 }
  0xe2   :  { %v2805_v21 = vpop.f32.mrb[1].mxu0 }
  0xe3   :  { %v2115_v12 = vpop.f32.mrb[4].mxu1  ;;  %v2807_v23 = vpop.f32.mrb[2].mxu0 }
  0xe4   :  { %v1145_v4 = vpop.f32.mrb[5].mxu1  ;;  %v2810_v25 = vpop.f32.mrb[3].mxu0 }
  0xe5   :  { %1460 = vrot.lane.b32.xlu0 %v2115_v12, %s2178_s9  ;;  %v2116_v13 = vpop.f32.mrb[6].mxu1 }
  0xe6   :  { %1462 = vrot.lane.b32.xlu1 %v2116_v13, %s2178_s9  ;;  %v1148_v14 = vpop.f32.mrb[7].mxu1 }
  0xe9   :  { %1456 = vrot.lane.b32.xlu0 %v1145_v4, %s2178_s9  ;;  %v2815_v27 = vpop.f32.mrb[4].mxu0 }
  0xea   :  { %1458 = vrot.lane.b32.xlu1 %v1148_v14, %s2178_s9  ;;  %v2817_v29 = vpop.f32.mrb[5].mxu0 }
  0xeb   :  { %v2119_v15 = vpop.f32.mrb[8].mxu1  ;;  %v2819_v31 = vpop.f32.mrb[6].mxu0 }
  0xec   :  { %v1161_v16 = vpop.f32.mrb[9].mxu1  ;;  %v2822_v33 = vpop.f32.mrb[7].mxu0 }
  0xed   :  { %1468 = vrot.lane.b32.xlu0 %v2119_v15, %s2178_s9  ;;  %v2120_v17 = vpop.f32.mrb[10].mxu1 }
  0xee   :  { %1470 = vrot.lane.b32.xlu1 %v2120_v17, %s2178_s9  ;;  %v1164_v18 = vpop.f32.mrb[11].mxu1 }
  0xf1   :  { %1464 = vrot.lane.b32.xlu0 %v1161_v16, %s2178_s9  ;;  %v2827_v35 = vpop.f32.mrb[8].mxu0 }
  0xf2   :  { %1466 = vrot.lane.b32.xlu1 %v1164_v18, %s2178_s9  ;;  %v2829_v37 = vpop.f32.mrb[9].mxu0 }
  0xf3   :  { %v2123_v20 = vpop.f32.mrb[12].mxu1  ;;  %v2831_v39 = vpop.f32.mrb[10].mxu0 }
  0xf4   :  { %v1177_v22 = vpop.f32.mrb[13].mxu1  ;;  %v2834_v41 = vpop.f32.mrb[11].mxu0 }
  0xf5   :  { %1476 = vrot.lane.b32.xlu0 %v2123_v20, %s2178_s9  ;;  %v2124_v24 = vpop.f32.mrb[14].mxu1 }
  0xf6   :  { %1478 = vrot.lane.b32.xlu1 %v2124_v24, %s2178_s9  ;;  %v1180_v26 = vpop.f32.mrb[15].mxu1 }
  0xf9   :  { %1472 = vrot.lane.b32.xlu0 %v1177_v22, %s2178_s9  ;;  %v2839_v43 = vpop.f32.mrb[12].mxu0 }
  0xfa   :  { %1474 = vrot.lane.b32.xlu1 %v1180_v26, %s2178_s9  ;;  %v2841_v45 = vpop.f32.mrb[13].mxu0 }
  0xfb   :  { %v2127_v28 = vpop.f32.mrb[16].mxu1  ;;  %v2843_v47 = vpop.f32.mrb[14].mxu0 }
  0xfc   :  { %v1193_v30 = vpop.f32.mrb[17].mxu1  ;;  %v2846_v49 = vpop.f32.mrb[15].mxu0 }
  0xfd   :  { %1484 = vrot.lane.b32.xlu0 %v2127_v28, %s2178_s9  ;;  %v2128_v32 = vpop.f32.mrb[18].mxu1 }
  0xfe   :  { %1486 = vrot.lane.b32.xlu1 %v2128_v32, %s2178_s9  ;;  %v1196_v34 = vpop.f32.mrb[19].mxu1 }
 0x101   :  { %1480 = vrot.lane.b32.xlu0 %v1193_v30, %s2178_s9  ;;  %v2851_v51 = vpop.f32.mrb[16].mxu0 }
 0x102   :  { %1482 = vrot.lane.b32.xlu1 %v1196_v34, %s2178_s9  ;;  %v2853_v53 = vpop.f32.mrb[17].mxu0 }
 0x103   :  { %v2131_v36 = vpop.f32.mrb[20].mxu1  ;;  %v2855_v55 = vpop.f32.mrb[18].mxu0 }
 0x104   :  { %v1209_v38 = vpop.f32.mrb[21].mxu1  ;;  %v2858_v57 = vpop.f32.mrb[19].mxu0 }
 0x105   :  { %1492 = vrot.lane.b32.xlu0 %v2131_v36, %s2178_s9  ;;  %v2132_v40 = vpop.f32.mrb[22].mxu1 }
 0x106   :  { %1494 = vrot.lane.b32.xlu1 %v2132_v40, %s2178_s9  ;;  %v1212_v42 = vpop.f32.mrb[23].mxu1 }
 0x109   :  { %1488 = vrot.lane.b32.xlu0 %v1209_v38, %s2178_s9  ;;  %v2863_v59 = vpop.f32.mrb[20].mxu0 }
 0x10a   :  { %1490 = vrot.lane.b32.xlu1 %v1212_v42, %s2178_s9  ;;  %v2865_v61 = vpop.f32.mrb[21].mxu0 }
 0x10b   :  { %v2135_v44 = vpop.f32.mrb[24].mxu1  ;;  %v2867_v63 = vpop.f32.mrb[22].mxu0 }
 0x10c   :  { %v1225_v46 = vpop.f32.mrb[25].mxu1  ;;  %v2870_v1 = vpop.f32.mrb[23].mxu0 }
 0x10d   :  { %1500 = vrot.lane.b32.xlu0 %v2135_v44, %s2178_s9  ;;  %v2136_v48 = vpop.f32.mrb[26].mxu1 }
 0x10e   :  { %1502 = vrot.lane.b32.xlu1 %v2136_v48, %s2178_s9  ;;  %v1228_v50 = vpop.f32.mrb[27].mxu1 }
 0x111   :  { %1496 = vrot.lane.b32.xlu0 %v1225_v46, %s2178_s9  ;;  %v2875_v3 = vpop.f32.mrb[24].mxu0 }
 0x112   :  { %1498 = vrot.lane.b32.xlu1 %v1228_v50, %s2178_s9  ;;  %v2877_v6 = vpop.f32.mrb[25].mxu0 }
 0x113   :  { %v2139_v52 = vpop.f32.mrb[28].mxu1  ;;  %v2879_v8 = vpop.f32.mrb[26].mxu0 }
 0x114   :  { %v1241_v54 = vpop.f32.mrb[29].mxu1  ;;  %v2882_v10 = vpop.f32.mrb[27].mxu0 }
 0x115   :  { %1508 = vrot.lane.b32.xlu0 %v2139_v52, %s2178_s9  ;;  %v2140_v56 = vpop.f32.mrb[30].mxu1 }
 0x116   :  { %1510 = vrot.lane.b32.xlu1 %v2140_v56, %s2178_s9  ;;  %v1244_v58 = vpop.f32.mrb[31].mxu1 }
 0x119   :  { %1504 = vrot.lane.b32.xlu0 %v1241_v54, %s2178_s9  ;;  %v2887_v12 = vpop.f32.mrb[28].mxu0 }
 0x11a   :  { %1506 = vrot.lane.b32.xlu1 %v1244_v58, %s2178_s9  ;;  %v2889_v13 = vpop.f32.mrb[29].mxu0 }
 0x11b   :  { %v2143_v60 = vpop.f32.mrb[32].mxu1  ;;  %v2891_v15 = vpop.f32.mrb[30].mxu0 }
 0x11c   :  { %v1257_v62 = vpop.f32.mrb[33].mxu1  ;;  %v2894_v17 = vpop.f32.mrb[31].mxu0 }
 0x11d   :  { %1516 = vrot.lane.b32.xlu0 %v2143_v60, %s2178_s9  ;;  %v2144_v0 = vpop.f32.mrb[34].mxu1 }
 0x11e   :  { %1518 = vrot.lane.b32.xlu1 %v2144_v0, %s2178_s9  ;;  %v1260_v2 = vpop.f32.mrb[35].mxu1 }
 0x121   :  { %1512 = vrot.lane.b32.xlu0 %v1257_v62, %s2178_s9  ;;  %v2899_v20 = vpop.f32.mrb[32].mxu0 }
 0x122   :  { %1514 = vrot.lane.b32.xlu1 %v1260_v2, %s2178_s9  ;;  %v2901_v24 = vpop.f32.mrb[33].mxu0 }
 0x123   :  { %v2147_v5 = vpop.f32.mrb[36].mxu1  ;;  %v2903_v28 = vpop.f32.mrb[34].mxu0 }
 0x124   :  { %v1273_v7 = vpop.f32.mrb[37].mxu1  ;;  %v2906_v32 = vpop.f32.mrb[35].mxu0 }
 0x125   :  { %1524 = vrot.lane.b32.xlu0 %v2147_v5, %s2178_s9  ;;  %v2148_v9 = vpop.f32.mrb[38].mxu1 }
 0x126   :  { %1526 = vrot.lane.b32.xlu1 %v2148_v9, %s2178_s9  ;;  %v1276_v11 = vpop.f32.mrb[39].mxu1 }
 0x129   :  { %1520 = vrot.lane.b32.xlu0 %v1273_v7, %s2178_s9  ;;  %v2911_v36 = vpop.f32.mrb[36].mxu0 }
 0x12a   :  { %1522 = vrot.lane.b32.xlu1 %v1276_v11, %s2178_s9  ;;  %v2913_v40 = vpop.f32.mrb[37].mxu0 }
 0x12b   :  { %v2151_v4 = vpop.f32.mrb[40].mxu1  ;;  %v2915_v44 = vpop.f32.mrb[38].mxu0 }
 0x12c   :  { %v1289_v14 = vpop.f32.mrb[41].mxu1  ;;  %v2918_v48 = vpop.f32.mrb[39].mxu0 }
 0x12d   :  { %1532 = vrot.lane.b32.xlu0 %v2151_v4, %s2178_s9  ;;  %v2152_v16 = vpop.f32.mrb[42].mxu1 }
 0x12e   :  { %1534 = vrot.lane.b32.xlu1 %v2152_v16, %s2178_s9  ;;  %v1292_v18 = vpop.f32.mrb[43].mxu1  ;;  %v2945_v16 = vld [vmem:[%s3440_s4] ss:$0 sm:$0xff] }
 0x131   :  { %1528 = vrot.lane.b32.xlu0 %v1289_v14, %s2178_s9  ;;  %v2923_v52 = vpop.f32.mrb[40].mxu0 }
 0x132   :  { %1530 = vrot.lane.b32.xlu1 %v1292_v18, %s2178_s9  ;;  %v2925_v56 = vpop.f32.mrb[41].mxu0 }
 0x133   :  { %v2155_v22 = vpop.f32.mrb[44].mxu1  ;;  %v2927_v60 = vpop.f32.mrb[42].mxu0 }
 0x134   :  { %v1305_v26 = vpop.f32.mrb[45].mxu1  ;;  %v2930_v0 = vpop.f32.mrb[43].mxu0 }
 0x135   :  { %1540 = vrot.lane.b32.xlu0 %v2155_v22, %s2178_s9  ;;  %v2156_v30 = vpop.f32.mrb[46].mxu1 }
 0x136   :  { %1542 = vrot.lane.b32.xlu1 %v2156_v30, %s2178_s9  ;;  %v1308_v34 = vpop.f32.mrb[47].mxu1 }
 0x139   :  { %1536 = vrot.lane.b32.xlu0 %v1305_v26, %s2178_s9  ;;  %v2935_v5 = vpop.f32.mrb[44].mxu0 }
 0x13a   :  { %1538 = vrot.lane.b32.xlu1 %v1308_v34, %s2178_s9  ;;  %v2937_v9 = vpop.f32.mrb[45].mxu0 }
 0x13b   :  { %v2159_v38 = vpop.f32.mrb[48].mxu1  ;;  %v2939_v4 = vpop.f32.mrb[46].mxu0 }
 0x13c   :  { %v1321_v42 = vpop.f32.mrb[49].mxu1  ;;  %v2947_v18 = vpop.f32.mrb[47].mxu0 }
 0x13d   :  { %1548 = vrot.lane.b32.xlu0 %v2159_v38, %s2178_s9  ;;  %v2160_v46 = vpop.f32.mrb[50].mxu1 }
 0x13e   :  { %1550 = vrot.lane.b32.xlu1 %v2160_v46, %s2178_s9  ;;  %v1324_v50 = vpop.f32.mrb[51].mxu1 }
 0x141   :  { %1544 = vrot.lane.b32.xlu0 %v1321_v42, %s2178_s9 }
 0x142   :  { %1546 = vrot.lane.b32.xlu1 %v1324_v50, %s2178_s9 }
 0x143   :  { %v2163_v54 = vpop.f32.mrb[52].mxu1 }
 0x144   :  { %v1337_v58 = vpop.f32.mrb[53].mxu1 }
 0x145   :  { %1556 = vrot.lane.b32.xlu0 %v2163_v54, %s2178_s9  ;;  %v2164_v62 = vpop.f32.mrb[54].mxu1 }
 0x146   :  { %1558 = vrot.lane.b32.xlu1 %v2164_v62, %s2178_s9  ;;  %v1340_v2 = vpop.f32.mrb[55].mxu1 }
 0x149   :  { %1552 = vrot.lane.b32.xlu0 %v1337_v58, %s2178_s9 }
 0x14a   :  { %1554 = vrot.lane.b32.xlu1 %v1340_v2, %s2178_s9 }
 0x14b   :  { %v2167_v7 = vpop.f32.mrb[56].mxu1 }
 0x14c   :  { %v1353_v11 = vpop.f32.mrb[57].mxu1 }
 0x14d   :  { %1564 = vrot.lane.b32.xlu0 %v2167_v7, %s2178_s9  ;;  %v2168_v14 = vpop.f32.mrb[58].mxu1 }
 0x14e   :  { %v1453_v22 = vpop.permute.xlu1 %1452  ;;  %1566 = vrot.lane.b32.xlu1 %v2168_v14, %s2178_s9  ;;  %v1356_v26 = vpop.f32.mrb[59].mxu1 }
 0x14f   :  { %v1642_v30 = vsel %vm445_vm0, %v2803_v19, %v1453_v22  ;;  %v1449_v34 = vpop.permute.xlu0 %1448  ;;  %v2962_v19 = vpop.f32.mrb[48].mxu0 }
 0x150   :  { %v1713_v38 = vadd.f32 %v2945_v16, %v1642_v30  ;;  %v1640_v42 = vsel %vm445_vm0, %v2805_v21, %v1449_v34 }
 0x151   :  { %v1711_v46 = vadd.f32 %v2945_v16, %v1640_v42  ;;  %1560 = vrot.lane.b32.xlu0 %v1353_v11, %s2178_s9  ;;  %v2973_v11 = vpop.f32.mrb[49].mxu0 }
 0x152   :  { %1778 = vst.msk [vmem:[%s3441_s5 + $0x10] sm:$0xff] %vm1775_vm1, %v1713_v38  ;;  %v1455_v50 = vpop.permute.xlu1 %1454  ;;  %1562 = vrot.lane.b32.xlu1 %v1356_v26, %s2178_s9  ;;  %v2977_v26 = vpop.f32.mrb[50].mxu0 }
 0x153   :  { %1776 = vst.msk [vmem:[%s3441_s5] sm:$0xff] %vm1775_vm1, %v1711_v46  ;;  %v1643_v21 = vsel %vm445_vm0, %v2807_v23, %v1455_v50  ;;  %v1451_v54 = vpop.permute.xlu0 %1450  ;;  %v2171_v58 = vpop.f32.mrb[60].mxu1 }
 0x154   :  { %v1714_v62 = vadd.f32 %v2945_v16, %v1643_v21  ;;  %v1641_v2 = vsel %vm445_vm0, %v2810_v25, %v1451_v54  ;;  %v1369_v7 = vpop.f32.mrb[61].mxu1  ;;  %v2983_v30 = vpop.f32.mrb[51].mxu0 }
 0x155   :  { %v1712_v14 = vadd.f32 %v2945_v16, %v1641_v2  ;;  %1568 = vrot.lane.b32.xlu0 %v1369_v7, %s2178_s9  ;;  %v2172_v22 = vpop.f32.mrb[62].mxu1  ;;  %v2997_v21 = vpop.f32.mrb[52].mxu0 }
 0x156   :  { %1779 = vst.msk [vmem:[%s3441_s5 + $0x18] sm:$0xff] %vm1775_vm1, %v1714_v62  ;;  %v1372_v23 = vpop.f32.mrb[63].mxu1 }
 0x157   :  { %1777 = vst.msk [vmem:[%s3441_s5 + $0x8] sm:$0xff] %vm1775_vm1, %v1712_v14  ;;  %v1461_v25 = vpop.permute.xlu0 %1460  ;;  %1570 = vrot.lane.b32.xlu1 %v1372_v23, %s2178_s9 }
 0x158   :  { %v1646_v34 = vsel %vm445_vm0, %v2815_v27, %v1461_v25  ;;  %v1463_v38 = vpop.permute.xlu1 %1462  ;;  %v3004_v27 = vpop.f32.mrb[53].mxu0 }
 0x159   :  { %v1717_v42 = vadd.f32 %v2945_v16, %v1646_v34  ;;  %v1647_v46 = vsel %vm445_vm0, %v2819_v31, %v1463_v38  ;;  %1572 = vrot.lane.b32.xlu0 %v2171_v58, %s2178_s9  ;;  %v3012_v62 = vpop.f32.mrb[54].mxu0 }
 0x15a   :  { %v1718_v50 = vadd.f32 %v2945_v16, %v1647_v46  ;;  %v3017_v14 = vpop.f32.mrb[55].mxu0 }
 0x15b   :  { %1782 = vst.msk [vmem:[%s3441_s5 + $0x30] sm:$0xff] %vm1775_vm1, %v1717_v42  ;;  %v1457_v54 = vpop.permute.xlu0 %1456  ;;  %1574 = vrot.lane.b32.xlu1 %v2172_v22, %s2178_s9  ;;  %v3034_v42 = vpop.f32.mrb[56].mxu0 }
 0x15c   :  { %1783 = vst.msk [vmem:[%s3441_s5 + $0x38] sm:$0xff] %vm1775_vm1, %v1718_v50  ;;  %v1644_v31 = vsel %vm445_vm0, %v2817_v29, %v1457_v54  ;;  %v1459_v58 = vpop.permute.xlu1 %1458  ;;  %v3040_v50 = vpop.f32.mrb[57].mxu0 }
 0x15d   :  { %v1715_v2 = vadd.f32 %v2945_v16, %v1644_v31  ;;  %v1645_v7 = vsel %vm445_vm0, %v2822_v33, %v1459_v58  ;;  %v3048_v54 = vpop.f32.mrb[58].mxu0 }
 0x15e   :  { %v1716_v22 = vadd.f32 %v2945_v16, %v1645_v7 }
 0x15f   :  { %1780 = vst.msk [vmem:[%s3441_s5 + $0x20] sm:$0xff] %vm1775_vm1, %v1715_v2  ;;  %v1469_v23 = vpop.permute.xlu0 %1468  ;;  %v3053_v2 = vpop.f32.mrb[59].mxu0 }
 0x160   :  { %1781 = vst.msk [vmem:[%s3441_s5 + $0x28] sm:$0xff] %vm1775_vm1, %v1716_v22  ;;  %v1650_v29 = vsel %vm445_vm0, %v2827_v35, %v1469_v23  ;;  %v1471_v25 = vpop.permute.xlu1 %1470 }
 0x161   :  { %v1721_v33 = vadd.f32 %v2945_v16, %v1650_v29  ;;  %v1651_v34 = vsel %vm445_vm0, %v2831_v39, %v1471_v25 }
 0x162   :  { %v1722_v38 = vadd.f32 %v2945_v16, %v1651_v34 }
 0x163   :  { %1786 = vst.msk [vmem:[%s3441_s5 + $0x50] sm:$0xff] %vm1775_vm1, %v1721_v33  ;;  %v1465_v46 = vpop.permute.xlu0 %1464  ;;  %v3070_v33 = vpop.f32.mrb[60].mxu0 }
 0x164   :  { %1787 = vst.msk [vmem:[%s3441_s5 + $0x58] sm:$0xff] %vm1775_vm1, %v1722_v38  ;;  %v1648_v35 = vsel %vm445_vm0, %v2829_v37, %v1465_v46  ;;  %v1467_v39 = vpop.permute.xlu1 %1466  ;;  %v3076_v38 = vpop.f32.mrb[61].mxu0 }
 0x165   :  { %v1719_v31 = vadd.f32 %v2945_v16, %v1648_v35  ;;  %v1649_v58 = vsel %vm445_vm0, %v2834_v41, %v1467_v39  ;;  %v3084_v46 = vpop.f32.mrb[62].mxu0 }
 0x166   :  { %v1720_v7 = vadd.f32 %v2945_v16, %v1649_v58 }
 0x167   :  { %1784 = vst.msk [vmem:[%s3441_s5 + $0x40] sm:$0xff] %vm1775_vm1, %v1719_v31  ;;  %v1477_v22 = vpop.permute.xlu0 %1476  ;;  %v3089_v31 = vpop.f32.mrb[63].mxu0 }
 0x168   :  { %1785 = vst.msk [vmem:[%s3441_s5 + $0x48] sm:$0xff] %vm1775_vm1, %v1720_v7  ;;  %v1654_v37 = vsel %vm445_vm0, %v2839_v43, %v1477_v22  ;;  %v1479_v23 = vpop.permute.xlu1 %1478 }
 0x169   :  { %v1725_v41 = vadd.f32 %v2945_v16, %v1654_v37  ;;  %v1655_v29 = vsel %vm445_vm0, %v2843_v47, %v1479_v23 }
 0x16a   :  { %v1726_v25 = vadd.f32 %v2945_v16, %v1655_v29 }
 0x16b   :  { %1790 = vst.msk [vmem:[%s3441_s5 + $0x70] sm:$0xff] %vm1775_vm1, %v1725_v41  ;;  %v1473_v34 = vpop.permute.xlu0 %1472 }
 0x16c   :  { %1791 = vst.msk [vmem:[%s3441_s5 + $0x78] sm:$0xff] %vm1775_vm1, %v1726_v25  ;;  %v1652_v43 = vsel %vm445_vm0, %v2841_v45, %v1473_v34  ;;  %v1475_v47 = vpop.permute.xlu1 %1474 }
 0x16d   :  { %v1723_v35 = vadd.f32 %v2945_v16, %v1652_v43  ;;  %v1653_v39 = vsel %vm445_vm0, %v2846_v49, %v1475_v47 }
 0x16e   :  { %v1724_v58 = vadd.f32 %v2945_v16, %v1653_v39 }
 0x16f   :  { %1788 = vst.msk [vmem:[%s3441_s5 + $0x60] sm:$0xff] %vm1775_vm1, %v1723_v35  ;;  %v1485_v7 = vpop.permute.xlu0 %1484 }
 0x170   :  { %1789 = vst.msk [vmem:[%s3441_s5 + $0x68] sm:$0xff] %vm1775_vm1, %v1724_v58  ;;  %v1658_v45 = vsel %vm445_vm0, %v2851_v51, %v1485_v7  ;;  %v1487_v22 = vpop.permute.xlu1 %1486 }
 0x171   :  { %v1729_v49 = vadd.f32 %v2945_v16, %v1658_v45  ;;  %v1659_v37 = vsel %vm445_vm0, %v2855_v55, %v1487_v22 }
 0x172   :  { %v1730_v23 = vadd.f32 %v2945_v16, %v1659_v37 }
 0x173   :  { %1794 = vst.msk [vmem:[%s3441_s5 + $0x90] sm:$0xff] %vm1775_vm1, %v1729_v49  ;;  %v1481_v41 = vpop.permute.xlu0 %1480 }
 0x174   :  { %1795 = vst.msk [vmem:[%s3441_s5 + $0x98] sm:$0xff] %vm1775_vm1, %v1730_v23  ;;  %v1656_v51 = vsel %vm445_vm0, %v2853_v53, %v1481_v41  ;;  %v1483_v29 = vpop.permute.xlu1 %1482 }
 0x175   :  { %v1727_v25 = vadd.f32 %v2945_v16, %v1656_v51  ;;  %v1657_v55 = vsel %vm445_vm0, %v2858_v57, %v1483_v29 }
 0x176   :  { %v1728_v34 = vadd.f32 %v2945_v16, %v1657_v55 }
 0x177   :  { %1792 = vst.msk [vmem:[%s3441_s5 + $0x80] sm:$0xff] %vm1775_vm1, %v1727_v25  ;;  %v1493_v43 = vpop.permute.xlu0 %1492 }
 0x178   :  { %1793 = vst.msk [vmem:[%s3441_s5 + $0x88] sm:$0xff] %vm1775_vm1, %v1728_v34  ;;  %v1662_v53 = vsel %vm445_vm0, %v2863_v59, %v1493_v43  ;;  %v1495_v47 = vpop.permute.xlu1 %1494 }
 0x179   :  { %v1733_v35 = vadd.f32 %v2945_v16, %v1662_v53  ;;  %v1663_v57 = vsel %vm445_vm0, %v2867_v63, %v1495_v47 }
 0x17a   :  { %v1734_v39 = vadd.f32 %v2945_v16, %v1663_v57 }
 0x17b   :  { %1798 = vst.msk [vmem:[%s3441_s5 + $0xb0] sm:$0xff] %vm1775_vm1, %v1733_v35  ;;  %v1489_v58 = vpop.permute.xlu0 %1488 }
 0x17c   :  { %1799 = vst.msk [vmem:[%s3441_s5 + $0xb8] sm:$0xff] %vm1775_vm1, %v1734_v39  ;;  %v1660_v59 = vsel %vm445_vm0, %v2865_v61, %v1489_v58  ;;  %v1491_v7 = vpop.permute.xlu1 %1490 }
 0x17d   :  { %v1731_v45 = vadd.f32 %v2945_v16, %v1660_v59  ;;  %v1661_v63 = vsel %vm445_vm0, %v2870_v1, %v1491_v7 }
 0x17e   :  { %v1732_v22 = vadd.f32 %v2945_v16, %v1661_v63 }
 0x17f   :  { %1796 = vst.msk [vmem:[%s3441_s5 + $0xa0] sm:$0xff] %vm1775_vm1, %v1731_v45  ;;  %v1501_v49 = vpop.permute.xlu0 %1500 }
 0x180   :  { %1797 = vst.msk [vmem:[%s3441_s5 + $0xa8] sm:$0xff] %vm1775_vm1, %v1732_v22  ;;  %v1666_v61 = vsel %vm445_vm0, %v2875_v3, %v1501_v49  ;;  %v1503_v37 = vpop.permute.xlu1 %1502 }
 0x181   :  { %v1737_v23 = vadd.f32 %v2945_v16, %v1666_v61  ;;  %v1667_v1 = vsel %vm445_vm0, %v2879_v8, %v1503_v37 }
 0x182   :  { %v1738_v41 = vadd.f32 %v2945_v16, %v1667_v1 }
 0x183   :  { %1802 = vst.msk [vmem:[%s3441_s5 + $0xd0] sm:$0xff] %vm1775_vm1, %v1737_v23  ;;  %v1497_v51 = vpop.permute.xlu0 %1496 }
 0x184   :  { %1803 = vst.msk [vmem:[%s3441_s5 + $0xd8] sm:$0xff] %vm1775_vm1, %v1738_v41  ;;  %v1664_v3 = vsel %vm445_vm0, %v2877_v6, %v1497_v51  ;;  %v1499_v29 = vpop.permute.xlu1 %1498 }
 0x185   :  { %v1735_v25 = vadd.f32 %v2945_v16, %v1664_v3  ;;  %v1665_v8 = vsel %vm445_vm0, %v2882_v10, %v1499_v29 }
 0x186   :  { %v1736_v55 = vadd.f32 %v2945_v16, %v1665_v8 }
 0x187   :  { %1800 = vst.msk [vmem:[%s3441_s5 + $0xc0] sm:$0xff] %vm1775_vm1, %v1735_v25  ;;  %v1509_v34 = vpop.permute.xlu0 %1508 }
 0x188   :  { %1801 = vst.msk [vmem:[%s3441_s5 + $0xc8] sm:$0xff] %vm1775_vm1, %v1736_v55  ;;  %v1670_v6 = vsel %vm445_vm0, %v2887_v12, %v1509_v34  ;;  %v1511_v43 = vpop.permute.xlu1 %1510 }
 0x189   :  { %v1741_v53 = vadd.f32 %v2945_v16, %v1670_v6  ;;  %v1671_v10 = vsel %vm445_vm0, %v2891_v15, %v1511_v43 }
 0x18a   :  { %v1742_v47 = vadd.f32 %v2945_v16, %v1671_v10 }
 0x18b   :  { %1806 = vst.msk [vmem:[%s3441_s5 + $0xf0] sm:$0xff] %vm1775_vm1, %v1741_v53  ;;  %v1505_v35 = vpop.permute.xlu0 %1504 }
 0x18c   :  { %1807 = vst.msk [vmem:[%s3441_s5 + $0xf8] sm:$0xff] %vm1775_vm1, %v1742_v47  ;;  %v1668_v12 = vsel %vm445_vm0, %v2889_v13, %v1505_v35  ;;  %v1507_v57 = vpop.permute.xlu1 %1506 }
 0x18d   :  { %v1739_v39 = vadd.f32 %v2945_v16, %v1668_v12  ;;  %v1669_v15 = vsel %vm445_vm0, %v2894_v17, %v1507_v57 }
 0x18e   :  { %v1740_v58 = vadd.f32 %v2945_v16, %v1669_v15 }
 0x18f   :  { %1804 = vst.msk [vmem:[%s3441_s5 + $0xe0] sm:$0xff] %vm1775_vm1, %v1739_v39  ;;  %v1517_v59 = vpop.permute.xlu0 %1516 }
 0x190   :  { %1805 = vst.msk [vmem:[%s3441_s5 + $0xe8] sm:$0xff] %vm1775_vm1, %v1740_v58  ;;  %v1674_v13 = vsel %vm445_vm0, %v2899_v20, %v1517_v59  ;;  %v1519_v7 = vpop.permute.xlu1 %1518 }
 0x191   :  { %v1745_v45 = vadd.f32 %v2945_v16, %v1674_v13  ;;  %v1675_v17 = vsel %vm445_vm0, %v2903_v28, %v1519_v7 }
 0x192   :  { %v1746_v63 = vadd.f32 %v2945_v16, %v1675_v17 }
 0x193   :  { %1810 = vst.msk [vmem:[%s3441_s5 + $0x110] sm:$0xff] %vm1775_vm1, %v1745_v45  ;;  %v1513_v22 = vpop.permute.xlu0 %1512 }
 0x194   :  { %1811 = vst.msk [vmem:[%s3441_s5 + $0x118] sm:$0xff] %vm1775_vm1, %v1746_v63  ;;  %v1672_v20 = vsel %vm445_vm0, %v2901_v24, %v1513_v22  ;;  %v1515_v49 = vpop.permute.xlu1 %1514 }
 0x195   :  { %v1743_v61 = vadd.f32 %v2945_v16, %v1672_v20  ;;  %v1673_v28 = vsel %vm445_vm0, %v2906_v32, %v1515_v49 }
 0x196   :  { %v1744_v37 = vadd.f32 %v2945_v16, %v1673_v28 }
 0x197   :  { %1808 = vst.msk [vmem:[%s3441_s5 + $0x100] sm:$0xff] %vm1775_vm1, %v1743_v61  ;;  %v1525_v23 = vpop.permute.xlu0 %1524 }
 0x198   :  { %1809 = vst.msk [vmem:[%s3441_s5 + $0x108] sm:$0xff] %vm1775_vm1, %v1744_v37  ;;  %v1678_v24 = vsel %vm445_vm0, %v2911_v36, %v1525_v23  ;;  %v1527_v1 = vpop.permute.xlu1 %1526 }
 0x199   :  { %v1749_v41 = vadd.f32 %v2945_v16, %v1678_v24  ;;  %v1679_v32 = vsel %vm445_vm0, %v2915_v44, %v1527_v1 }
 0x19a   :  { %v1750_v51 = vadd.f32 %v2945_v16, %v1679_v32 }
 0x19b   :  { %1814 = vst.msk [vmem:[%s3441_s5 + $0x130] sm:$0xff] %vm1775_vm1, %v1749_v41  ;;  %v1521_v3 = vpop.permute.xlu0 %1520 }
 0x19c   :  { %1815 = vst.msk [vmem:[%s3441_s5 + $0x138] sm:$0xff] %vm1775_vm1, %v1750_v51  ;;  %v1676_v36 = vsel %vm445_vm0, %v2913_v40, %v1521_v3  ;;  %v1523_v29 = vpop.permute.xlu1 %1522 }
 0x19d   :  { %v1747_v25 = vadd.f32 %v2945_v16, %v1676_v36  ;;  %v1677_v44 = vsel %vm445_vm0, %v2918_v48, %v1523_v29 }
 0x19e   :  { %v1748_v8 = vadd.f32 %v2945_v16, %v1677_v44 }
 0x19f   :  { %1812 = vst.msk [vmem:[%s3441_s5 + $0x120] sm:$0xff] %vm1775_vm1, %v1747_v25  ;;  %v1533_v55 = vpop.permute.xlu0 %1532 }
 0x1a0   :  { %1813 = vst.msk [vmem:[%s3441_s5 + $0x128] sm:$0xff] %vm1775_vm1, %v1748_v8  ;;  %v1682_v40 = vsel %vm445_vm0, %v2923_v52, %v1533_v55  ;;  %v1535_v34 = vpop.permute.xlu1 %1534 }
 0x1a1   :  { %v1753_v6 = vadd.f32 %v2945_v16, %v1682_v40  ;;  %v1683_v48 = vsel %vm445_vm0, %v2927_v60, %v1535_v34 }
 0x1a2   :  { %v1754_v43 = vadd.f32 %v2945_v16, %v1683_v48 }
 0x1a3   :  { %1818 = vst.msk [vmem:[%s3441_s5 + $0x150] sm:$0xff] %vm1775_vm1, %v1753_v6  ;;  %v1529_v53 = vpop.permute.xlu0 %1528 }
 0x1a4   :  { %1819 = vst.msk [vmem:[%s3441_s5 + $0x158] sm:$0xff] %vm1775_vm1, %v1754_v43  ;;  %v1680_v52 = vsel %vm445_vm0, %v2925_v56, %v1529_v53  ;;  %v1531_v10 = vpop.permute.xlu1 %1530 }
 0x1a5   :  { %v1751_v47 = vadd.f32 %v2945_v16, %v1680_v52  ;;  %v1681_v60 = vsel %vm445_vm0, %v2930_v0, %v1531_v10 }
 0x1a6   :  { %v1752_v35 = vadd.f32 %v2945_v16, %v1681_v60 }
 0x1a7   :  { %1816 = vst.msk [vmem:[%s3441_s5 + $0x140] sm:$0xff] %vm1775_vm1, %v1751_v47  ;;  %v1541_v12 = vpop.permute.xlu0 %1540 }
 0x1a8   :  { %1817 = vst.msk [vmem:[%s3441_s5 + $0x148] sm:$0xff] %vm1775_vm1, %v1752_v35  ;;  %v1686_v56 = vsel %vm445_vm0, %v2935_v5, %v1541_v12  ;;  %v1543_v57 = vpop.permute.xlu1 %1542 }
 0x1a9   :  { %v1757_v39 = vadd.f32 %v2945_v16, %v1686_v56  ;;  %v1687_v0 = vsel %vm445_vm0, %v2939_v4, %v1543_v57 }
 0x1aa   :  { %v1758_v15 = vadd.f32 %v2945_v16, %v1687_v0 }
 0x1ab   :  { %1822 = vst.msk [vmem:[%s3441_s5 + $0x170] sm:$0xff] %vm1775_vm1, %v1757_v39  ;;  %v1537_v58 = vpop.permute.xlu0 %1536 }
 0x1ac   :  { %1823 = vst.msk [vmem:[%s3441_s5 + $0x178] sm:$0xff] %vm1775_vm1, %v1758_v15  ;;  %v1684_v5 = vsel %vm445_vm0, %v2937_v9, %v1537_v58  ;;  %v1539_v59 = vpop.permute.xlu1 %1538 }
 0x1ad   :  { %v1755_v13 = vadd.f32 %v2945_v16, %v1684_v5  ;;  %v1685_v4 = vsel %vm445_vm0, %v2947_v18, %v1539_v59 }
 0x1ae   :  { %v1756_v7 = vadd.f32 %v2945_v16, %v1685_v4 }
 0x1af   :  { %1820 = vst.msk [vmem:[%s3441_s5 + $0x160] sm:$0xff] %vm1775_vm1, %v1755_v13  ;;  %v1549_v45 = vpop.permute.xlu0 %1548 }
 0x1b0   :  { %1821 = vst.msk [vmem:[%s3441_s5 + $0x168] sm:$0xff] %vm1775_vm1, %v1756_v7  ;;  %v1690_v9 = vsel %vm445_vm0, %v2962_v19, %v1549_v45  ;;  %v1551_v17 = vpop.permute.xlu1 %1550 }
 0x1b1   :  { %v1761_v63 = vadd.f32 %v2945_v16, %v1690_v9  ;;  %v1691_v18 = vsel %vm445_vm0, %v2977_v26, %v1551_v17 }
 0x1b2   :  { %v1762_v22 = vadd.f32 %v2945_v16, %v1691_v18 }
 0x1b3   :  { %1826 = vst.msk [vmem:[%s3441_s5 + $0x190] sm:$0xff] %vm1775_vm1, %v1761_v63  ;;  %v1545_v20 = vpop.permute.xlu0 %1544 }
 0x1b4   :  { %1827 = vst.msk [vmem:[%s3441_s5 + $0x198] sm:$0xff] %vm1775_vm1, %v1762_v22  ;;  %v1688_v19 = vsel %vm445_vm0, %v2973_v11, %v1545_v20  ;;  %v1547_v49 = vpop.permute.xlu1 %1546 }
 0x1b5   :  { %v1759_v61 = vadd.f32 %v2945_v16, %v1688_v19  ;;  %v1689_v26 = vsel %vm445_vm0, %v2983_v30, %v1547_v49 }
 0x1b6   :  { %v1760_v28 = vadd.f32 %v2945_v16, %v1689_v26 }
 0x1b7   :  { %1824 = vst.msk [vmem:[%s3441_s5 + $0x180] sm:$0xff] %vm1775_vm1, %v1759_v61  ;;  %v1557_v37 = vpop.permute.xlu0 %1556 }
 0x1b8   :  { %1825 = vst.msk [vmem:[%s3441_s5 + $0x188] sm:$0xff] %vm1775_vm1, %v1760_v28  ;;  %v1694_v11 = vsel %vm445_vm0, %v2997_v21, %v1557_v37  ;;  %v1559_v23 = vpop.permute.xlu1 %1558 }
 0x1b9   :  { %v1765_v24 = vadd.f32 %v2945_v16, %v1694_v11  ;;  %v1695_v30 = vsel %vm445_vm0, %v3012_v62, %v1559_v23 }
 0x1ba   :  { %v1766_v1 = vadd.f32 %v2945_v16, %v1695_v30 }
 0x1bb   :  { %1830 = vst.msk [vmem:[%s3441_s5 + $0x1b0] sm:$0xff] %vm1775_vm1, %v1765_v24  ;;  %v1553_v41 = vpop.permute.xlu0 %1552 }
 0x1bc   :  { %1831 = vst.msk [vmem:[%s3441_s5 + $0x1b8] sm:$0xff] %vm1775_vm1, %v1766_v1  ;;  %v1692_v21 = vsel %vm445_vm0, %v3004_v27, %v1553_v41  ;;  %v1555_v32 = vpop.permute.xlu1 %1554 }
 0x1bd   :  { %v1763_v51 = vadd.f32 %v2945_v16, %v1692_v21  ;;  %v1693_v62 = vsel %vm445_vm0, %v3017_v14, %v1555_v32 }
 0x1be   :  { %v1764_v3 = vadd.f32 %v2945_v16, %v1693_v62 }
 0x1bf   :  { %1828 = vst.msk [vmem:[%s3441_s5 + $0x1a0] sm:$0xff] %vm1775_vm1, %v1763_v51  ;;  %v1565_v36 = vpop.permute.xlu0 %1564 }
 0x1c0   :  { %1829 = vst.msk [vmem:[%s3441_s5 + $0x1a8] sm:$0xff] %vm1775_vm1, %v1764_v3  ;;  %v1698_v27 = vsel %vm445_vm0, %v3034_v42, %v1565_v36  ;;  %v1567_v29 = vpop.permute.xlu1 %1566 }
 0x1c1   :  { %v1769_v25 = vadd.f32 %v2945_v16, %v1698_v27  ;;  %v1699_v14 = vsel %vm445_vm0, %v3048_v54, %v1567_v29 }
 0x1c2   :  { %v1770_v44 = vadd.f32 %v2945_v16, %v1699_v14 }
 0x1c3   :  { %1834 = vst.msk [vmem:[%s3441_s5 + $0x1d0] sm:$0xff] %vm1775_vm1, %v1769_v25  ;;  %v1561_v8 = vpop.permute.xlu0 %1560 }
 0x1c4   :  { %1835 = vst.msk [vmem:[%s3441_s5 + $0x1d8] sm:$0xff] %vm1775_vm1, %v1770_v44  ;;  %v1696_v42 = vsel %vm445_vm0, %v3040_v50, %v1561_v8  ;;  %v1563_v55 = vpop.permute.xlu1 %1562 }
 0x1c5   :  { %v1767_v40 = vadd.f32 %v2945_v16, %v1696_v42  ;;  %v1697_v54 = vsel %vm445_vm0, %v3053_v2, %v1563_v55 }
 0x1c6   :  { %v1768_v34 = vadd.f32 %v2945_v16, %v1697_v54 }
 0x1c7   :  { %1832 = vst.msk [vmem:[%s3441_s5 + $0x1c0] sm:$0xff] %vm1775_vm1, %v1767_v40  ;;  %v1569_v6 = vpop.permute.xlu0 %1568 }
 0x1c8   :  { %1833 = vst.msk [vmem:[%s3441_s5 + $0x1c8] sm:$0xff] %vm1775_vm1, %v1768_v34  ;;  %v1700_v50 = vsel %vm445_vm0, %v3076_v38, %v1569_v6 }
 0x1c9   :  { %v1771_v48 = vadd.f32 %v2945_v16, %v1700_v50  ;;  %v1571_v43 = vpop.permute.xlu1 %1570 }
 0x1ca   :  { %v1701_v2 = vsel %vm445_vm0, %v3089_v31, %v1571_v43 }
 0x1cb   :  { %1836 = vst.msk [vmem:[%s3441_s5 + $0x1e0] sm:$0xff] %vm1775_vm1, %v1771_v48  ;;  %v1772_v53 = vadd.f32 %v2945_v16, %v1701_v2  ;;  %v1573_v52 = vpop.permute.xlu0 %1572 }
 0x1cc   :  { %v1702_v10 = vsel %vm445_vm0, %v3070_v33, %v1573_v52 }
 0x1cd   :  { %1837 = vst.msk [vmem:[%s3441_s5 + $0x1e8] sm:$0xff] %vm1775_vm1, %v1772_v53  ;;  %v1773_v38 = vadd.f32 %v2945_v16, %v1702_v10  ;;  %v1575_v47 = vpop.permute.xlu1 %1574 }
 0x1ce   :  { %v1703_v31 = vsel %vm445_vm0, %v3084_v46, %v1575_v47 }
 0x1cf   :  { %1838 = vst.msk [vmem:[%s3441_s5 + $0x1f0] sm:$0xff] %vm1775_vm1, %v1773_v38  ;;  %v1774_v60 = vadd.f32 %v2945_v16, %v1703_v31 }
 0x1d1   :  { %1839 = vst.msk [vmem:[%s3441_s5 + $0x1f8] sm:$0xff] %vm1775_vm1, %v1774_v60 }

// kernel: shake_resnet_forward.16
= control target key start
LH: loop header
LB: loop body
LE: loop exit
PB: predicated region body
PF: predicated region fallthrough
CT: control target
= control target key end

     0   :  { %v1163_v0 = vmov 0   ;;  %vm510_vm0 = vcmask 130048   ;;  %vm960_vm1 = vcmask 523264   ;;  %s2174_s1 = inlined_call_operand.vmem [shape: bf16[144,64], index: 1, kind: input, shape index: {}]   ;;  %s2175_s0 = inlined_call_operand.vmem [shape: bf16[512,144], index: 0, kind: input, shape index: {}]   ;;  %s2176_s2 = inlined_call_operand.vmem [shape: f32[1,64], index: 2, kind: input, shape index: {}]   ;;  %s2177_s3 = inlined_call_operand.vmem [shape: f32[512,64], index: 3, kind: output, shape index: {}]  }
   0x1   :  { %607 = vmatprep.subr.bf16.mxu0 %v1163_v0  ;;  %1135 = vmatprep.subr.bf16.mxu1 %v1163_v0  ;;  %v1154_v1 = vld [vmem:[%s2174_s1] sm:$0xff]   ;;  %v1155_v2 = vld [vmem:[%s2174_s1 + $0x8] sm:$0xff]   ;;  %v1156_v3 = vld [vmem:[%s2174_s1 + $0x10] sm:$0xff]  }
   0x2   :  { %608 = vmatpush1.bf16.msra.mxu0 %v1154_v1  ;;  %1144 = vmatpush1.bf16.msra.mxu1 %v1154_v1  ;;  %v15_v4 = vld [vmem:[%s2175_s0] sm:$0xff]  ;;  %v16_v5 = vld [vmem:[%s2175_s0 + $0x8] sm:$0xff]  ;;  %v1157_v7 = vld [vmem:[%s2174_s1 + $0x18] sm:$0xff]  }
   0x3   :  { %609 = vmatprep.subr.bf16.mxu0 %v1163_v0  ;;  %1136 = vmatprep.subr.bf16.mxu1 %v1163_v0  ;;  %v47_v6 = vld [vmem:[%s2175_s0 + $0x100] sm:$0xff]  ;;  %v1212_v8 = vmax.bf16 %v1163_v0, %v15_v4  ;;  %v1215_v9 = vmax.bf16 %v1163_v0, %v16_v5  ;;  %v48_v10 = vld [vmem:[%s2175_s0 + $0x108] sm:$0xff]  ;;  %v17_v16 = vld [vmem:[%s2175_s0 + $0x10] sm:$0xff] }
   0x4   :  { %v1221_v11 = vmax.bf16 %v1163_v0, %v47_v6  ;;  %v1226_v12 = vmax.bf16 %v1163_v0, %v48_v10  ;;  %v1158_v15 = vld [vmem:[%s2174_s1 + $0x20] sm:$0xff]   ;;  %v18_v17 = vld [vmem:[%s2175_s0 + $0x18] sm:$0xff]  ;;  %v49_v18 = vld [vmem:[%s2175_s0 + $0x110] sm:$0xff]  ;;  %v1260_v22 = vmax.bf16 %v1163_v0, %v17_v16 }
   0x5   :  { %v1031_v13 = vcombine.high %v1212_v8, %v1215_v9  ;;  %v50_v19 = vld [vmem:[%s2175_s0 + $0x118] sm:$0xff]  ;;  %v1159_v20 = vld [vmem:[%s2174_s1 + $0x28] sm:$0xff]   ;;  %v19_v21 = vld [vmem:[%s2175_s0 + $0x20] sm:$0xff]  ;;  %v1263_v23 = vmax.bf16 %v1163_v0, %v18_v17  ;;  %v1266_v24 = vmax.bf16 %v1163_v0, %v49_v18  ;;  %v1030_v30 = vcombine.low %v1212_v8, %v1215_v9 }
   0x6   :  { %610 = vmatpush1.bf16.msra.mxu0 %v1155_v2  ;;  %1145 = vmatpush1.bf16.msra.mxu1 %v1155_v2  ;;  %v1063_v14 = vcombine.high %v1221_v11, %v1226_v12  ;;  %v1269_v25 = vmax.bf16 %v1163_v0, %v50_v19  ;;  %v20_v26 = vld [vmem:[%s2175_s0 + $0x28] sm:$0xff]  ;;  %v51_v27 = vld [vmem:[%s2175_s0 + $0x120] sm:$0xff]  ;;  %v1160_v29 = vld [vmem:[%s2174_s1 + $0x30] sm:$0xff]   ;;  %v1286_v31 = vmax.bf16 %v1163_v0, %v19_v21 }
   0x7   :  { %611 = vmatprep.subr.bf16.mxu0 %v1163_v0  ;;  %1137 = vmatprep.subr.bf16.mxu1 %v1163_v0  ;;  %v52_v28 = vld [vmem:[%s2175_s0 + $0x128] sm:$0xff]  ;;  %v29_v32 = vld [vmem:[%s2175_s0 + $0x70] sm:$0xff]  ;;  %v30_v33 = vld [vmem:[%s2175_s0 + $0x78] sm:$0xff]  ;;  %v1300_v35 = vmax.bf16 %v1163_v0, %v20_v26  ;;  %v1303_v36 = vmax.bf16 %v1163_v0, %v51_v27  ;;  %v1062_v41 = vcombine.low %v1221_v11, %v1226_v12 }
   0x8   :  { %1103 = vmatprep.mubr.msk.bf16.mxu0 %vm510_vm0, %v1031_v13  ;;  %1119 = vmatprep.mubr.msk.bf16.mxu1 %vm510_vm0, %v1063_v14  ;;  %v61_v34 = vld [vmem:[%s2175_s0 + $0x170] sm:$0xff]  ;;  %v1306_v37 = vmax.bf16 %v1163_v0, %v52_v28  ;;  %v22_v39 = vld [vmem:[%s2175_s0 + $0x38] sm:$0xff]  ;;  %v1033_v42 = vcombine.high %v1260_v22, %v1263_v23  ;;  %v1065_v43 = vcombine.high %v1266_v24, %v1269_v25  ;;  %v31_v50 = vld [vmem:[%s2175_s0 + $0x80] sm:$0xff] }
   0x9   :  { %v21_v38 = vld [vmem:[%s2175_s0 + $0x30] sm:$0xff]  ;;  %v62_v40 = vld [vmem:[%s2175_s0 + $0x178] sm:$0xff]  ;;  %v1032_v44 = vcombine.low %v1260_v22, %v1263_v23  ;;  %v1064_v46 = vcombine.low %v1266_v24, %v1269_v25  ;;  %v1331_v47 = vmax.bf16 %v1163_v0, %v29_v32  ;;  %v1334_v48 = vmax.bf16 %v1163_v0, %v30_v33  ;;  %v32_v51 = vld [vmem:[%s2175_s0 + $0x88] sm:$0xff] }
   0xa   :  { %612 = vmatpush1.bf16.msra.mxu0 %v1156_v3  ;;  %1146 = vmatpush1.bf16.msra.mxu1 %v1156_v3  ;;  %v1161_v45 = vld [vmem:[%s2174_s1 + $0x38] sm:$0xff]   ;;  %v1337_v49 = vmax.bf16 %v1163_v0, %v61_v34  ;;  %v1346_v52 = vmax.bf16 %v1163_v0, %v21_v38  ;;  %v1349_v53 = vmax.bf16 %v1163_v0, %v22_v39  ;;  %v63_v55 = vld [vmem:[%s2175_s0 + $0x180] sm:$0xff]  ;;  %v64_v56 = vld [vmem:[%s2175_s0 + $0x188] sm:$0xff] }
   0xb   :  { %613 = vmatprep.subr.bf16.mxu0 %v1163_v0  ;;  %1138 = vmatprep.subr.bf16.mxu1 %v1163_v0  ;;  %v1352_v54 = vmax.bf16 %v1163_v0, %v62_v40  ;;  %v33_v57 = vld [vmem:[%s2175_s0 + $0x90] sm:$0xff]  ;;  %v1035_v58 = vcombine.high %v1286_v31, %v1300_v35  ;;  %v1067_v59 = vcombine.high %v1303_v36, %v1306_v37  ;;  %v34_v61 = vld [vmem:[%s2175_s0 + $0x98] sm:$0xff]  ;;  %v1162_v5 = vld [vmem:[%s2174_s1 + $0x40] sm:$0xff]  }
   0xc   :  { %v1045_v60 = vcombine.high %v1331_v47, %v1334_v48  ;;  %v65_v62 = vld [vmem:[%s2175_s0 + $0x190] sm:$0xff]  ;;  %v66_v63 = vld [vmem:[%s2175_s0 + $0x198] sm:$0xff]  ;;  %v1044_v2 = vcombine.low %v1331_v47, %v1334_v48  ;;  %v1387_v4 = vmax.bf16 %v1163_v0, %v31_v50  ;;  %v1393_v6 = vmax.bf16 %v1163_v0, %v32_v51  ;;  %v35_v17 = vld [vmem:[%s2175_s0 + $0xa0] sm:$0xff] }
   0xd   :  { %v1077_v1 = vcombine.high %v1337_v49, %v1352_v54  ;;  %v1076_v3 = vcombine.low %v1337_v49, %v1352_v54  ;;  %v1399_v10 = vmax.bf16 %v1163_v0, %v64_v56  ;;  %v1402_v13 = vmax.bf16 %v1163_v0, %v33_v57  ;;  %v36_v18 = vld [vmem:[%s2175_s0 + $0xa8] sm:$0xff]  ;;  %v67_v19 = vld [vmem:[%s2175_s0 + $0x1a0] sm:$0xff]  ;;  %v37_v28 = vld [vmem:[%s2175_s0 + $0xb0] sm:$0xff] }
   0xe   :  { %614 = vmatpush1.bf16.msra.mxu0 %v1157_v7  ;;  %1147 = vmatpush1.bf16.msra.mxu1 %v1157_v7  ;;  %v1396_v7 = vmax.bf16 %v1163_v0, %v63_v55  ;;  %v1405_v14 = vmax.bf16 %v1163_v0, %v34_v61  ;;  %v1411_v16 = vmax.bf16 %v1163_v0, %v66_v63  ;;  %v68_v27 = vld [vmem:[%s2175_s0 + $0x1a8] sm:$0xff]  ;;  %v69_v39 = vld [vmem:[%s2175_s0 + $0x1b0] sm:$0xff]  ;;  %v70_v40 = vld [vmem:[%s2175_s0 + $0x1b8] sm:$0xff] }
   0xf   :  { %615 = vmatprep.subr.bf16.mxu0 %v1163_v0  ;;  %1139 = vmatprep.subr.bf16.mxu1 %v1163_v0  ;;  %v1456_v50 = vmax.bf16 %v1163_v0, %v35_v17  ;;  %v1459_v51 = vmax.bf16 %v1163_v0, %v36_v18  ;;  %v1462_v55 = vmax.bf16 %v1163_v0, %v67_v19  ;;  %v40_v63 = vld [vmem:[%s2175_s0 + $0xc8] sm:$0xff]  ;;  %v73_v38 = vld [vmem:[%s2175_s0 + $0x1d0] sm:$0xff]  ;;  %v74_v17 = vld [vmem:[%s2175_s0 + $0x1d8] sm:$0xff] }
  0x10   :  { %v1465_v56 = vmax.bf16 %v1163_v0, %v68_v27  ;;  %v1468_v57 = vmax.bf16 %v1163_v0, %v37_v28  ;;  %v1484_v18 = vmax.bf16 %v1163_v0, %v69_v39  ;;  %v1487_v19 = vmax.bf16 %v1163_v0, %v70_v40  ;;  %v71_v27 = vld [vmem:[%s2175_s0 + $0x1c0] sm:$0xff]  ;;  %v72_v28 = vld [vmem:[%s2175_s0 + $0x1c8] sm:$0xff]  ;;  %v46_v40 = vld [vmem:[%s2175_s0 + $0xf8] sm:$0xff] }
  0x11   :  { %v1537_v8 = vmax.bf16 %v1163_v0, %v40_v63  ;;  %v1540_v9 = vmax.bf16 %v1163_v0, %v71_v27  ;;  %v1543_v11 = vmax.bf16 %v1163_v0, %v72_v28  ;;  %v43_v12 = vld [vmem:[%s2175_s0 + $0xe0] sm:$0xff]  ;;  %v76_v27 = vld [vmem:[%s2175_s0 + $0x1e8] sm:$0xff]  ;;  %v45_v28 = vld [vmem:[%s2175_s0 + $0xf0] sm:$0xff]  ;;  %v1034_v25 = vcombine.low %v1286_v31, %v1300_v35 }
  0x12   :  { %616 = vmatpush1.bf16.msra.mxu0 %v1158_v15  ;;  %1148 = vmatpush1.bf16.msra.mxu1 %v1158_v15  ;;  %v1408_v15 = vmax.bf16 %v1163_v0, %v65_v62  ;;  %v39_v62 = vld [vmem:[%s2175_s0 + $0xc0] sm:$0xff]  ;;  %v1598_v33 = vmax.bf16 %v1163_v0, %v43_v12  ;;  %v54_v34 = vld [vmem:[%s2175_s0 + $0x138] sm:$0xff]  ;;  %v1616_v12 = vmax.bf16 %v1163_v0, %v45_v28  ;;  %v56_v31 = vld [vmem:[%s2175_s0 + $0x148] sm:$0xff] }
  0x13   :  { %617 = vmatprep.subr.bf16.mxu0 %v1163_v0  ;;  %1140 = vmatprep.subr.bf16.mxu1 %v1163_v0  ;;  %v1526_v39 = vmax.bf16 %v1163_v0, %v39_v62  ;;  %v1561_v62 = vmax.bf16 %v1163_v0, %v74_v17  ;;  %v75_v63 = vld [vmem:[%s2175_s0 + $0x1e0] sm:$0xff]  ;;  %v53_v17 = vld [vmem:[%s2175_s0 + $0x130] sm:$0xff]  ;;  %v118_v23 = vmax.bf16 %v1163_v0, %v54_v34  ;;  %v24_v34 = vld [vmem:[%s2175_s0 + $0x48] sm:$0xff] }
  0x14   :  { %v1604_v26 = vmax.bf16 %v1163_v0, %v75_v63  ;;  %v117_v22 = vmax.bf16 %v1163_v0, %v53_v17  ;;  %v55_v17 = vld [vmem:[%s2175_s0 + $0x140] sm:$0xff]  ;;  %v120_v24 = vmax.bf16 %v1163_v0, %v56_v31  ;;  %v2181_v47 = vcombine.low %v1396_v7, %v1399_v10 }
  0x15   :  { %v2182_v48 = vcombine.high %v1402_v13, %v1405_v14  ;;  %v2183_v49 = vcombine.high %v1408_v15, %v1411_v16  ;;  %v2184_v54 = vcombine.low %v1402_v13, %v1405_v14  ;;  %v2191_v13 = vcombine.high %v1484_v18, %v1487_v19 }
  0x16   :  { %618 = vmatpush1.bf16.msra.mxu0 %v1159_v20  ;;  %1149 = vmatpush1.bf16.msra.mxu1 %v1159_v20 }
  0x17   :  { %619 = vmatprep.subr.bf16.mxu0 %v1163_v0  ;;  %1141 = vmatprep.subr.bf16.mxu1 %v1163_v0 }
  0x1a   :  { %620 = vmatpush1.bf16.msra.mxu0 %v1160_v29  ;;  %1150 = vmatpush1.bf16.msra.mxu1 %v1160_v29  ;;  %v38_v29 = vld [vmem:[%s2175_s0 + $0xb8] sm:$0xff] }
  0x1b   :  { %621 = vmatprep.subr.bf16.mxu0 %v1163_v0  ;;  %1142 = vmatprep.subr.bf16.mxu1 %v1163_v0  ;;  %v1471_v61 = vmax.bf16 %v1163_v0, %v38_v29  ;;  %v41_v29 = vld [vmem:[%s2175_s0 + $0xd0] sm:$0xff] }
  0x1d   :  { %v2192_v14 = vcombine.low %v1468_v57, %v1471_v61 }
  0x1e   :  { %622 = vmatpush1.bf16.msra.mxu0 %v1161_v45  ;;  %1151 = vmatpush1.bf16.msra.mxu1 %v1161_v45  ;;  %v42_v45 = vld [vmem:[%s2175_s0 + $0xd8] sm:$0xff] }
  0x1f   :  { %623 = vmatprep.subr.bf16.mxu0 %v1163_v0  ;;  %1143 = vmatprep.subr.bf16.mxu1 %v1163_v0 }
  0x22   :  { %624 = vmatpush1.bf16.msra.mxu0 %v1162_v5  ;;  %1152 = vmatpush1.bf16.msra.mxu1 %v1162_v5  ;;  %v77_v5 = vld [vmem:[%s2175_s0 + $0x1f0] sm:$0xff] }
  0x23   :  { %v1622_v63 = vmax.bf16 %v1163_v0, %v77_v5 }
  0x25   :  { %640 = vmatmul.mubr.bf16.vlgmr.msra.gmra.mrb[0].mxu0 %v1030_v30  ;;  %768 = vmatmul.mubr.bf16.vlgmr.msra.gmra.mrb[0].mxu1 %v1062_v41  ;;  %v44_v30 = vld [vmem:[%s2175_s0 + $0xe8] sm:$0xff]  ;;  %v1552_v41 = vmax.bf16 %v1163_v0, %v41_v29 }
  0x26   :  { %1104 = vmatprep.mubr.msk.bf16.mxu0 %vm510_vm0, %v1033_v42  ;;  %1120 = vmatprep.mubr.msk.bf16.mxu1 %vm510_vm0, %v1065_v43  ;;  %v1555_v42 = vmax.bf16 %v1163_v0, %v42_v45  ;;  %v1558_v43 = vmax.bf16 %v1163_v0, %v73_v38  ;;  %v78_v45 = vld [vmem:[%s2175_s0 + $0x1f8] sm:$0xff]  ;;  %v1601_v32 = vmax.bf16 %v1163_v0, %v44_v30 }
  0x27   :  { %v1607_v38 = vmax.bf16 %v1163_v0, %v76_v27  ;;  %v1619_v30 = vmax.bf16 %v1163_v0, %v46_v40  ;;  %v1625_v27 = vmax.bf16 %v1163_v0, %v78_v45  ;;  %v1036_v45 = vcombine.low %v1346_v52, %v1349_v53 }
  0x28   :  { %v1059_v29 = vcombine.high %v1598_v33, %v1601_v32  ;;  %v1058_v20 = vcombine.low %v1598_v33, %v1601_v32  ;;  %v1068_v40 = vcombine.low %v117_v22, %v118_v23 }
  0x29   :  { %v1091_v21 = vcombine.high %v1604_v26, %v1607_v38 }
  0x2d   :  { %648 = vmatmul.mubr.bf16.gmra.mrb[4].mxu0 %v1032_v44  ;;  %776 = vmatmul.mubr.bf16.gmra.mrb[4].mxu1 %v1064_v46  ;;  %v1066_v44 = vcombine.low %v1303_v36, %v1306_v37  ;;  %v1037_v46 = vcombine.high %v1346_v52, %v1349_v53  ;;  %v88_v36 = vmax.bf16 %v1163_v0, %v24_v34 }
  0x2e   :  { %1105 = vmatprep.mubr.msk.bf16.mxu0 %vm510_vm0, %v1035_v58  ;;  %1121 = vmatprep.mubr.msk.bf16.mxu1 %vm510_vm0, %v1067_v59  ;;  %v1069_v58 = vcombine.high %v117_v22, %v118_v23  ;;  %v23_v59 = vld [vmem:[%s2175_s0 + $0x40] sm:$0xff]  ;;  %v119_v37 = vmax.bf16 %v1163_v0, %v55_v17 }
  0x2f   :  { %v87_v35 = vmax.bf16 %v1163_v0, %v23_v59 }
  0x30   :  { %v1071_v28 = vcombine.high %v119_v37, %v120_v24  ;;  %v1070_v34 = vcombine.low %v119_v37, %v120_v24 }
  0x31   :  { %v1039_v5 = vcombine.high %v87_v35, %v88_v36  ;;  %v1038_v59 = vcombine.low %v87_v35, %v88_v36 }
  0x35   :  { %656 = vmatmul.mubr.bf16.gmra.mrb[8].mxu0 %v1034_v25  ;;  %784 = vmatmul.mubr.bf16.gmra.mrb[8].mxu1 %v1066_v44  ;;  %v25_v25 = vld [vmem:[%s2175_s0 + $0x50] sm:$0xff]  ;;  %v26_v44 = vld [vmem:[%s2175_s0 + $0x58] sm:$0xff] }
  0x36   :  { %1106 = vmatprep.mubr.msk.bf16.mxu0 %vm510_vm0, %v1037_v46  ;;  %1122 = vmatprep.mubr.msk.bf16.mxu1 %vm510_vm0, %v1069_v58  ;;  %v57_v46 = vld [vmem:[%s2175_s0 + $0x150] sm:$0xff]  ;;  %v58_v58 = vld [vmem:[%s2175_s0 + $0x158] sm:$0xff]  ;;  %v89_v52 = vmax.bf16 %v1163_v0, %v25_v25  ;;  %v90_v53 = vmax.bf16 %v1163_v0, %v26_v44 }
  0x37   :  { %v121_v22 = vmax.bf16 %v1163_v0, %v57_v46  ;;  %v122_v23 = vmax.bf16 %v1163_v0, %v58_v58 }
  0x38   :  { %v1041_v17 = vcombine.high %v89_v52, %v90_v53  ;;  %v1040_v25 = vcombine.low %v89_v52, %v90_v53 }
  0x39   :  { %v1073_v31 = vcombine.high %v121_v22, %v122_v23  ;;  %v1072_v44 = vcombine.low %v121_v22, %v122_v23 }
  0x3d   :  { %664 = vmatmul.mubr.bf16.gmra.mrb[12].mxu0 %v1036_v45  ;;  %792 = vmatmul.mubr.bf16.gmra.mrb[12].mxu1 %v1068_v40  ;;  %v27_v40 = vld [vmem:[%s2175_s0 + $0x60] sm:$0xff]  ;;  %v60_v45 = vld [vmem:[%s2175_s0 + $0x168] sm:$0xff] }
  0x3e   :  { %1107 = vmatprep.mubr.msk.bf16.mxu0 %vm510_vm0, %v1039_v5  ;;  %1123 = vmatprep.mubr.msk.bf16.mxu1 %vm510_vm0, %v1071_v28  ;;  %v28_v5 = vld [vmem:[%s2175_s0 + $0x68] sm:$0xff]  ;;  %v59_v28 = vld [vmem:[%s2175_s0 + $0x160] sm:$0xff]  ;;  %v91_v24 = vmax.bf16 %v1163_v0, %v27_v40  ;;  %v124_v37 = vmax.bf16 %v1163_v0, %v60_v45 }
  0x3f   :  { %v92_v35 = vmax.bf16 %v1163_v0, %v28_v5  ;;  %v123_v36 = vmax.bf16 %v1163_v0, %v59_v28  ;;  %v2178_v0 = vcombine.high %v1387_v4, %v1393_v6 }
  0x41   :  { %v1043_v46 = vcombine.high %v91_v24, %v92_v35  ;;  %v1075_v58 = vcombine.high %v123_v36, %v124_v37 }
  0x45   :  { %672 = vmatmul.mubr.bf16.gmra.mrb[16].mxu0 %v1038_v59  ;;  %800 = vmatmul.mubr.bf16.gmra.mrb[16].mxu1 %v1070_v34  ;;  %v1042_v59 = vcombine.low %v91_v24, %v92_v35  ;;  %v1074_v34 = vcombine.low %v123_v36, %v124_v37 }
  0x46   :  { %1108 = vmatprep.mubr.msk.bf16.mxu0 %vm510_vm0, %v1041_v17  ;;  %1124 = vmatprep.mubr.msk.bf16.mxu1 %vm510_vm0, %v1073_v31 }
  0x4d   :  { %680 = vmatmul.mubr.bf16.gmra.mrb[20].mxu0 %v1040_v25  ;;  %808 = vmatmul.mubr.bf16.gmra.mrb[20].mxu1 %v1072_v44 }
  0x4e   :  { %1109 = vmatprep.mubr.msk.bf16.mxu0 %vm510_vm0, %v1043_v46  ;;  %1125 = vmatprep.mubr.msk.bf16.mxu1 %vm510_vm0, %v1075_v58 }
  0x55   :  { %688 = vmatmul.mubr.bf16.gmra.mrb[24].mxu0 %v1042_v59  ;;  %816 = vmatmul.mubr.bf16.gmra.mrb[24].mxu1 %v1074_v34 }
  0x56   :  { %1110 = vmatprep.mubr.msk.bf16.mxu0 %vm510_vm0, %v1045_v60  ;;  %1126 = vmatprep.mubr.msk.bf16.mxu1 %vm510_vm0, %v1077_v1  ;;  %v2179_v60 = vcombine.high %v1396_v7, %v1399_v10  ;;  %v2180_v1 = vcombine.low %v1387_v4, %v1393_v6  ;;  %v2187_v4 = vcombine.high %v1462_v55, %v1465_v56 }
  0x57   :  { %v2188_v6 = vcombine.low %v1456_v50, %v1459_v51  ;;  %v2189_v7 = vcombine.low %v1462_v55, %v1465_v56  ;;  %v2190_v10 = vcombine.high %v1468_v57, %v1471_v61  ;;  %v2197_v55 = vcombine.low %v1540_v9, %v1543_v11 }
  0x58   :  { %v2198_v56 = vcombine.high %v1552_v41, %v1555_v42  ;;  %v2199_v57 = vcombine.high %v1558_v43, %v1561_v62  ;;  %v2200_v61 = vcombine.low %v1552_v41, %v1555_v42 }
  0x5d   :  { %696 = vmatmul.mubr.bf16.gmra.mrb[28].mxu0 %v1044_v2  ;;  %824 = vmatmul.mubr.bf16.gmra.mrb[28].mxu1 %v1076_v3  ;;  %v2185_v2 = vcombine.low %v1408_v15, %v1411_v16  ;;  %v2186_v3 = vcombine.high %v1456_v50, %v1459_v51  ;;  %v2193_v15 = vcombine.low %v1484_v18, %v1487_v19 }
  0x5e   :  { %1111 = vmatprep.mubr.msk.bf16.mxu0 %vm510_vm0, %v2178_v0  ;;  %1127 = vmatprep.mubr.msk.bf16.mxu1 %vm510_vm0, %v2179_v60  ;;  %v2194_v16 = vcombine.high %v1526_v39, %v1537_v8  ;;  %v2195_v50 = vcombine.high %v1540_v9, %v1543_v11  ;;  %v2196_v51 = vcombine.low %v1526_v39, %v1537_v8 }
  0x5f   :  { %v2201_v18 = vcombine.low %v1558_v43, %v1561_v62  ;;  %v2202_v19 = vcombine.low %v1604_v26, %v1607_v38  ;;  %v2203_v39 = vcombine.high %v1616_v12, %v1619_v30  ;;  %v2204_v8 = vcombine.high %v1622_v63, %v1625_v27  ;;  %v1852_v26 = vld [vmem:[%s2176_s2] ss:$0 sm:$0xff] }
  0x65   :  { %704 = vmatmul.mubr.bf16.gmra.mrb[32].mxu0 %v2180_v1  ;;  %832 = vmatmul.mubr.bf16.gmra.mrb[32].mxu1 %v2181_v47 }
  0x66   :  { %1112 = vmatprep.mubr.msk.bf16.mxu0 %vm510_vm0, %v2182_v48  ;;  %1128 = vmatprep.mubr.msk.bf16.mxu1 %vm510_vm0, %v2183_v49 }
  0x6d   :  { %712 = vmatmul.mubr.bf16.gmra.mrb[36].mxu0 %v2184_v54  ;;  %840 = vmatmul.mubr.bf16.gmra.mrb[36].mxu1 %v2185_v2 }
  0x6e   :  { %1113 = vmatprep.mubr.msk.bf16.mxu0 %vm510_vm0, %v2186_v3  ;;  %1129 = vmatprep.mubr.msk.bf16.mxu1 %vm510_vm0, %v2187_v4 }
  0x75   :  { %720 = vmatmul.mubr.bf16.gmra.mrb[40].mxu0 %v2188_v6  ;;  %848 = vmatmul.mubr.bf16.gmra.mrb[40].mxu1 %v2189_v7 }
  0x76   :  { %1114 = vmatprep.mubr.msk.bf16.mxu0 %vm510_vm0, %v2190_v10  ;;  %1130 = vmatprep.mubr.msk.bf16.mxu1 %vm510_vm0, %v2191_v13 }
  0x7d   :  { %728 = vmatmul.mubr.bf16.gmra.mrb[44].mxu0 %v2192_v14  ;;  %856 = vmatmul.mubr.bf16.gmra.mrb[44].mxu1 %v2193_v15 }
  0x7e   :  { %1115 = vmatprep.mubr.msk.bf16.mxu0 %vm510_vm0, %v2194_v16  ;;  %1131 = vmatprep.mubr.msk.bf16.mxu1 %vm510_vm0, %v2195_v50 }
  0x85   :  { %736 = vmatmul.mubr.bf16.gmra.mrb[48].mxu0 %v2196_v51  ;;  %864 = vmatmul.mubr.bf16.gmra.mrb[48].mxu1 %v2197_v55 }
  0x86   :  { %1116 = vmatprep.mubr.msk.bf16.mxu0 %vm510_vm0, %v2198_v56  ;;  %1132 = vmatprep.mubr.msk.bf16.mxu1 %vm510_vm0, %v2199_v57 }
  0x8d   :  { %744 = vmatmul.mubr.bf16.gmra.mrb[52].mxu0 %v2200_v61  ;;  %872 = vmatmul.mubr.bf16.gmra.mrb[52].mxu1 %v2201_v18 }
  0x8e   :  { %1117 = vmatprep.mubr.msk.bf16.mxu0 %vm510_vm0, %v1059_v29  ;;  %1133 = vmatprep.mubr.msk.bf16.mxu1 %vm510_vm0, %v1091_v21  ;;  %v2205_v21 = vcombine.low %v1616_v12, %v1619_v30 }
  0x95   :  { %752 = vmatmul.mubr.bf16.gmra.mrb[56].mxu0 %v1058_v20  ;;  %880 = vmatmul.mubr.bf16.gmra.mrb[56].mxu1 %v2202_v19  ;;  %v2206_v20 = vcombine.low %v1622_v63, %v1625_v27 }
  0x96   :  { %1118 = vmatprep.mubr.msk.bf16.mxu0 %vm510_vm0, %v2203_v39  ;;  %1134 = vmatprep.mubr.msk.bf16.mxu1 %vm510_vm0, %v2204_v8 }
  0x9d   :  { %760 = vmatmul.mubr.bf16.gmra.mrb[60].mxu0 %v2205_v21  ;;  %888 = vmatmul.mubr.bf16.gmra.mrb[60].mxu1 %v2206_v20 }
  0xf8   :  { %v641_v32 = vpop.f32.mrb[0].mxu0  ;;  %v769_v33 = vpop.f32.mrb[0].mxu1 }
  0xf9   :  { %v642_v9 = vadd.f32 %v1852_v26, %v641_v32  ;;  %v770_v11 = vadd.f32 %v1852_v26, %v769_v33  ;;  %v643_v41 = vpop.f32.mrb[1].mxu0  ;;  %v771_v42 = vpop.f32.mrb[1].mxu1 }
  0xfa   :  { %v644_v43 = vpop.f32.mrb[2].mxu0  ;;  %v772_v62 = vpop.f32.mrb[2].mxu1 }
  0xfb   :  { %v896_v38 = vmax.f32 %v642_v9, 0.0  ;;  %v928_v29 = vmax.f32 %v770_v11, 0.0  ;;  %v645_v12 = vadd.f32 %v1852_v26, %v644_v43  ;;  %v773_v30 = vadd.f32 %v1852_v26, %v772_v62  ;;  %v646_v63 = vpop.f32.mrb[3].mxu0  ;;  %v774_v27 = vpop.f32.mrb[3].mxu1 }
  0xfd   :  { %961 = vst.msk [vmem:[%s2177_s3] sm:$0xff] %vm960_vm1, %v896_v38  ;;  %993 = vst.msk [vmem:[%s2177_s3 + $0x100] sm:$0xff] %vm960_vm1, %v928_v29  ;;  %v897_v52 = vmax.f32 %v645_v12, 0.0  ;;  %v929_v53 = vmax.f32 %v773_v30, 0.0 }
  0xff   :  { %962 = vst.msk [vmem:[%s2177_s3 + $0x8] sm:$0xff] %vm960_vm1, %v897_v52  ;;  %994 = vst.msk [vmem:[%s2177_s3 + $0x108] sm:$0xff] %vm960_vm1, %v929_v53 }
 0x100   :  { %v649_v22 = vpop.f32.mrb[4].mxu0  ;;  %v777_v23 = vpop.f32.mrb[4].mxu1 }
 0x101   :  { %v650_v17 = vadd.f32 %v1852_v26, %v649_v22  ;;  %v778_v31 = vadd.f32 %v1852_v26, %v777_v23  ;;  %v651_v40 = vpop.f32.mrb[5].mxu0  ;;  %v779_v5 = vpop.f32.mrb[5].mxu1 }
 0x102   :  { %v652_v28 = vpop.f32.mrb[6].mxu0  ;;  %v780_v45 = vpop.f32.mrb[6].mxu1 }
 0x103   :  { %v898_v24 = vmax.f32 %v650_v17, 0.0  ;;  %v930_v35 = vmax.f32 %v778_v31, 0.0  ;;  %v653_v36 = vadd.f32 %v1852_v26, %v652_v28  ;;  %v781_v37 = vadd.f32 %v1852_v26, %v780_v45  ;;  %v654_v25 = vpop.f32.mrb[7].mxu0  ;;  %v782_v44 = vpop.f32.mrb[7].mxu1 }
 0x105   :  { %963 = vst.msk [vmem:[%s2177_s3 + $0x10] sm:$0xff] %vm960_vm1, %v898_v24  ;;  %995 = vst.msk [vmem:[%s2177_s3 + $0x110] sm:$0xff] %vm960_vm1, %v930_v35  ;;  %v899_v46 = vmax.f32 %v653_v36, 0.0  ;;  %v931_v58 = vmax.f32 %v781_v37, 0.0 }
 0x107   :  { %964 = vst.msk [vmem:[%s2177_s3 + $0x18] sm:$0xff] %vm960_vm1, %v899_v46  ;;  %996 = vst.msk [vmem:[%s2177_s3 + $0x118] sm:$0xff] %vm960_vm1, %v931_v58 }
 0x108   :  { %v657_v59 = vpop.f32.mrb[8].mxu0  ;;  %v785_v34 = vpop.f32.mrb[8].mxu1 }
 0x109   :  { %v658_v0 = vadd.f32 %v1852_v26, %v657_v59  ;;  %v786_v60 = vadd.f32 %v1852_v26, %v785_v34  ;;  %v659_v1 = vpop.f32.mrb[9].mxu0  ;;  %v787_v47 = vpop.f32.mrb[9].mxu1 }
 0x10a   :  { %v660_v48 = vpop.f32.mrb[10].mxu0  ;;  %v788_v49 = vpop.f32.mrb[10].mxu1 }
 0x10b   :  { %v900_v54 = vmax.f32 %v658_v0, 0.0  ;;  %v932_v2 = vmax.f32 %v786_v60, 0.0  ;;  %v661_v3 = vadd.f32 %v1852_v26, %v660_v48  ;;  %v789_v4 = vadd.f32 %v1852_v26, %v788_v49  ;;  %v662_v6 = vpop.f32.mrb[11].mxu0  ;;  %v790_v7 = vpop.f32.mrb[11].mxu1 }
 0x10d   :  { %965 = vst.msk [vmem:[%s2177_s3 + $0x20] sm:$0xff] %vm960_vm1, %v900_v54  ;;  %997 = vst.msk [vmem:[%s2177_s3 + $0x120] sm:$0xff] %vm960_vm1, %v932_v2  ;;  %v901_v10 = vmax.f32 %v661_v3, 0.0  ;;  %v933_v13 = vmax.f32 %v789_v4, 0.0 }
 0x10f   :  { %966 = vst.msk [vmem:[%s2177_s3 + $0x28] sm:$0xff] %vm960_vm1, %v901_v10  ;;  %998 = vst.msk [vmem:[%s2177_s3 + $0x128] sm:$0xff] %vm960_vm1, %v933_v13 }
 0x110   :  { %v665_v14 = vpop.f32.mrb[12].mxu0  ;;  %v793_v15 = vpop.f32.mrb[12].mxu1 }
 0x111   :  { %v666_v16 = vadd.f32 %v1852_v26, %v665_v14  ;;  %v794_v50 = vadd.f32 %v1852_v26, %v793_v15  ;;  %v667_v51 = vpop.f32.mrb[13].mxu0  ;;  %v795_v55 = vpop.f32.mrb[13].mxu1 }
 0x112   :  { %v668_v56 = vpop.f32.mrb[14].mxu0  ;;  %v796_v57 = vpop.f32.mrb[14].mxu1 }
 0x113   :  { %v902_v61 = vmax.f32 %v666_v16, 0.0  ;;  %v934_v18 = vmax.f32 %v794_v50, 0.0  ;;  %v669_v19 = vadd.f32 %v1852_v26, %v668_v56  ;;  %v797_v39 = vadd.f32 %v1852_v26, %v796_v57  ;;  %v670_v8 = vpop.f32.mrb[15].mxu0  ;;  %v798_v21 = vpop.f32.mrb[15].mxu1 }
 0x115   :  { %967 = vst.msk [vmem:[%s2177_s3 + $0x30] sm:$0xff] %vm960_vm1, %v902_v61  ;;  %999 = vst.msk [vmem:[%s2177_s3 + $0x130] sm:$0xff] %vm960_vm1, %v934_v18  ;;  %v903_v20 = vmax.f32 %v669_v19, 0.0  ;;  %v935_v32 = vmax.f32 %v797_v39, 0.0 }
 0x117   :  { %968 = vst.msk [vmem:[%s2177_s3 + $0x38] sm:$0xff] %vm960_vm1, %v903_v20  ;;  %1000 = vst.msk [vmem:[%s2177_s3 + $0x138] sm:$0xff] %vm960_vm1, %v935_v32 }
 0x118   :  { %v673_v33 = vpop.f32.mrb[16].mxu0  ;;  %v801_v9 = vpop.f32.mrb[16].mxu1 }
 0x119   :  { %v674_v11 = vadd.f32 %v1852_v26, %v673_v33  ;;  %v802_v41 = vadd.f32 %v1852_v26, %v801_v9  ;;  %v675_v42 = vpop.f32.mrb[17].mxu0  ;;  %v803_v43 = vpop.f32.mrb[17].mxu1 }
 0x11a   :  { %v676_v62 = vpop.f32.mrb[18].mxu0  ;;  %v804_v38 = vpop.f32.mrb[18].mxu1 }
 0x11b   :  { %v904_v29 = vmax.f32 %v674_v11, 0.0  ;;  %v936_v12 = vmax.f32 %v802_v41, 0.0  ;;  %v677_v30 = vadd.f32 %v1852_v26, %v676_v62  ;;  %v805_v63 = vadd.f32 %v1852_v26, %v804_v38  ;;  %v678_v27 = vpop.f32.mrb[19].mxu0  ;;  %v806_v52 = vpop.f32.mrb[19].mxu1 }
 0x11d   :  { %969 = vst.msk [vmem:[%s2177_s3 + $0x40] sm:$0xff] %vm960_vm1, %v904_v29  ;;  %1001 = vst.msk [vmem:[%s2177_s3 + $0x140] sm:$0xff] %vm960_vm1, %v936_v12  ;;  %v905_v53 = vmax.f32 %v677_v30, 0.0  ;;  %v937_v22 = vmax.f32 %v805_v63, 0.0 }
 0x11f   :  { %970 = vst.msk [vmem:[%s2177_s3 + $0x48] sm:$0xff] %vm960_vm1, %v905_v53  ;;  %1002 = vst.msk [vmem:[%s2177_s3 + $0x148] sm:$0xff] %vm960_vm1, %v937_v22 }
 0x120   :  { %v681_v23 = vpop.f32.mrb[20].mxu0  ;;  %v809_v17 = vpop.f32.mrb[20].mxu1 }
 0x121   :  { %v682_v31 = vadd.f32 %v1852_v26, %v681_v23  ;;  %v810_v40 = vadd.f32 %v1852_v26, %v809_v17  ;;  %v683_v5 = vpop.f32.mrb[21].mxu0  ;;  %v811_v28 = vpop.f32.mrb[21].mxu1 }
 0x122   :  { %v684_v45 = vpop.f32.mrb[22].mxu0  ;;  %v812_v24 = vpop.f32.mrb[22].mxu1 }
 0x123   :  { %v906_v35 = vmax.f32 %v682_v31, 0.0  ;;  %v938_v36 = vmax.f32 %v810_v40, 0.0  ;;  %v685_v37 = vadd.f32 %v1852_v26, %v684_v45  ;;  %v813_v25 = vadd.f32 %v1852_v26, %v812_v24  ;;  %v686_v44 = vpop.f32.mrb[23].mxu0  ;;  %v814_v46 = vpop.f32.mrb[23].mxu1 }
 0x125   :  { %971 = vst.msk [vmem:[%s2177_s3 + $0x50] sm:$0xff] %vm960_vm1, %v906_v35  ;;  %1003 = vst.msk [vmem:[%s2177_s3 + $0x150] sm:$0xff] %vm960_vm1, %v938_v36  ;;  %v907_v58 = vmax.f32 %v685_v37, 0.0  ;;  %v939_v59 = vmax.f32 %v813_v25, 0.0 }
 0x127   :  { %972 = vst.msk [vmem:[%s2177_s3 + $0x58] sm:$0xff] %vm960_vm1, %v907_v58  ;;  %1004 = vst.msk [vmem:[%s2177_s3 + $0x158] sm:$0xff] %vm960_vm1, %v939_v59 }
 0x128   :  { %v689_v34 = vpop.f32.mrb[24].mxu0  ;;  %v817_v0 = vpop.f32.mrb[24].mxu1 }
 0x129   :  { %v690_v60 = vadd.f32 %v1852_v26, %v689_v34  ;;  %v818_v1 = vadd.f32 %v1852_v26, %v817_v0  ;;  %v691_v47 = vpop.f32.mrb[25].mxu0  ;;  %v819_v48 = vpop.f32.mrb[25].mxu1 }
 0x12a   :  { %v692_v49 = vpop.f32.mrb[26].mxu0  ;;  %v820_v54 = vpop.f32.mrb[26].mxu1 }
 0x12b   :  { %v908_v2 = vmax.f32 %v690_v60, 0.0  ;;  %v940_v3 = vmax.f32 %v818_v1, 0.0  ;;  %v693_v4 = vadd.f32 %v1852_v26, %v692_v49  ;;  %v821_v6 = vadd.f32 %v1852_v26, %v820_v54  ;;  %v694_v7 = vpop.f32.mrb[27].mxu0  ;;  %v822_v10 = vpop.f32.mrb[27].mxu1 }
 0x12d   :  { %973 = vst.msk [vmem:[%s2177_s3 + $0x60] sm:$0xff] %vm960_vm1, %v908_v2  ;;  %1005 = vst.msk [vmem:[%s2177_s3 + $0x160] sm:$0xff] %vm960_vm1, %v940_v3  ;;  %v909_v13 = vmax.f32 %v693_v4, 0.0  ;;  %v941_v14 = vmax.f32 %v821_v6, 0.0 }
 0x12f   :  { %974 = vst.msk [vmem:[%s2177_s3 + $0x68] sm:$0xff] %vm960_vm1, %v909_v13  ;;  %1006 = vst.msk [vmem:[%s2177_s3 + $0x168] sm:$0xff] %vm960_vm1, %v941_v14 }
 0x130   :  { %v697_v15 = vpop.f32.mrb[28].mxu0  ;;  %v825_v16 = vpop.f32.mrb[28].mxu1 }
 0x131   :  { %v698_v50 = vadd.f32 %v1852_v26, %v697_v15  ;;  %v826_v51 = vadd.f32 %v1852_v26, %v825_v16  ;;  %v699_v55 = vpop.f32.mrb[29].mxu0  ;;  %v827_v56 = vpop.f32.mrb[29].mxu1 }
 0x132   :  { %v700_v57 = vpop.f32.mrb[30].mxu0  ;;  %v828_v61 = vpop.f32.mrb[30].mxu1 }
 0x133   :  { %v910_v18 = vmax.f32 %v698_v50, 0.0  ;;  %v942_v19 = vmax.f32 %v826_v51, 0.0  ;;  %v701_v39 = vadd.f32 %v1852_v26, %v700_v57  ;;  %v829_v8 = vadd.f32 %v1852_v26, %v828_v61  ;;  %v702_v21 = vpop.f32.mrb[31].mxu0  ;;  %v830_v20 = vpop.f32.mrb[31].mxu1 }
 0x135   :  { %975 = vst.msk [vmem:[%s2177_s3 + $0x70] sm:$0xff] %vm960_vm1, %v910_v18  ;;  %1007 = vst.msk [vmem:[%s2177_s3 + $0x170] sm:$0xff] %vm960_vm1, %v942_v19  ;;  %v911_v32 = vmax.f32 %v701_v39, 0.0  ;;  %v943_v33 = vmax.f32 %v829_v8, 0.0 }
 0x137   :  { %976 = vst.msk [vmem:[%s2177_s3 + $0x78] sm:$0xff] %vm960_vm1, %v911_v32  ;;  %1008 = vst.msk [vmem:[%s2177_s3 + $0x178] sm:$0xff] %vm960_vm1, %v943_v33 }
 0x138   :  { %v705_v9 = vpop.f32.mrb[32].mxu0  ;;  %v833_v11 = vpop.f32.mrb[32].mxu1 }
 0x139   :  { %v706_v41 = vadd.f32 %v1852_v26, %v705_v9  ;;  %v834_v42 = vadd.f32 %v1852_v26, %v833_v11  ;;  %v707_v43 = vpop.f32.mrb[33].mxu0  ;;  %v835_v62 = vpop.f32.mrb[33].mxu1 }
 0x13a   :  { %v708_v38 = vpop.f32.mrb[34].mxu0  ;;  %v836_v29 = vpop.f32.mrb[34].mxu1 }
 0x13b   :  { %v912_v12 = vmax.f32 %v706_v41, 0.0  ;;  %v944_v30 = vmax.f32 %v834_v42, 0.0  ;;  %v709_v63 = vadd.f32 %v1852_v26, %v708_v38  ;;  %v837_v27 = vadd.f32 %v1852_v26, %v836_v29  ;;  %v710_v52 = vpop.f32.mrb[35].mxu0  ;;  %v838_v53 = vpop.f32.mrb[35].mxu1 }
 0x13d   :  { %977 = vst.msk [vmem:[%s2177_s3 + $0x80] sm:$0xff] %vm960_vm1, %v912_v12  ;;  %1009 = vst.msk [vmem:[%s2177_s3 + $0x180] sm:$0xff] %vm960_vm1, %v944_v30  ;;  %v913_v22 = vmax.f32 %v709_v63, 0.0  ;;  %v945_v23 = vmax.f32 %v837_v27, 0.0 }
 0x13f   :  { %978 = vst.msk [vmem:[%s2177_s3 + $0x88] sm:$0xff] %vm960_vm1, %v913_v22  ;;  %1010 = vst.msk [vmem:[%s2177_s3 + $0x188] sm:$0xff] %vm960_vm1, %v945_v23 }
 0x140   :  { %v713_v17 = vpop.f32.mrb[36].mxu0  ;;  %v841_v31 = vpop.f32.mrb[36].mxu1 }
 0x141   :  { %v714_v40 = vadd.f32 %v1852_v26, %v713_v17  ;;  %v842_v5 = vadd.f32 %v1852_v26, %v841_v31  ;;  %v715_v28 = vpop.f32.mrb[37].mxu0  ;;  %v843_v45 = vpop.f32.mrb[37].mxu1 }
 0x142   :  { %v716_v24 = vpop.f32.mrb[38].mxu0  ;;  %v844_v35 = vpop.f32.mrb[38].mxu1 }
 0x143   :  { %v914_v36 = vmax.f32 %v714_v40, 0.0  ;;  %v946_v37 = vmax.f32 %v842_v5, 0.0  ;;  %v717_v25 = vadd.f32 %v1852_v26, %v716_v24  ;;  %v845_v44 = vadd.f32 %v1852_v26, %v844_v35  ;;  %v718_v46 = vpop.f32.mrb[39].mxu0  ;;  %v846_v58 = vpop.f32.mrb[39].mxu1 }
 0x145   :  { %979 = vst.msk [vmem:[%s2177_s3 + $0x90] sm:$0xff] %vm960_vm1, %v914_v36  ;;  %1011 = vst.msk [vmem:[%s2177_s3 + $0x190] sm:$0xff] %vm960_vm1, %v946_v37  ;;  %v915_v59 = vmax.f32 %v717_v25, 0.0  ;;  %v947_v34 = vmax.f32 %v845_v44, 0.0 }
 0x147   :  { %980 = vst.msk [vmem:[%s2177_s3 + $0x98] sm:$0xff] %vm960_vm1, %v915_v59  ;;  %1012 = vst.msk [vmem:[%s2177_s3 + $0x198] sm:$0xff] %vm960_vm1, %v947_v34 }
 0x148   :  { %v721_v0 = vpop.f32.mrb[40].mxu0  ;;  %v849_v60 = vpop.f32.mrb[40].mxu1 }
 0x149   :  { %v722_v1 = vadd.f32 %v1852_v26, %v721_v0  ;;  %v850_v47 = vadd.f32 %v1852_v26, %v849_v60  ;;  %v723_v48 = vpop.f32.mrb[41].mxu0  ;;  %v851_v49 = vpop.f32.mrb[41].mxu1 }
 0x14a   :  { %v724_v54 = vpop.f32.mrb[42].mxu0  ;;  %v852_v2 = vpop.f32.mrb[42].mxu1 }
 0x14b   :  { %v916_v3 = vmax.f32 %v722_v1, 0.0  ;;  %v948_v4 = vmax.f32 %v850_v47, 0.0  ;;  %v725_v6 = vadd.f32 %v1852_v26, %v724_v54  ;;  %v853_v7 = vadd.f32 %v1852_v26, %v852_v2  ;;  %v726_v10 = vpop.f32.mrb[43].mxu0  ;;  %v854_v13 = vpop.f32.mrb[43].mxu1 }
 0x14d   :  { %981 = vst.msk [vmem:[%s2177_s3 + $0xa0] sm:$0xff] %vm960_vm1, %v916_v3  ;;  %1013 = vst.msk [vmem:[%s2177_s3 + $0x1a0] sm:$0xff] %vm960_vm1, %v948_v4  ;;  %v917_v14 = vmax.f32 %v725_v6, 0.0  ;;  %v949_v15 = vmax.f32 %v853_v7, 0.0 }
 0x14f   :  { %982 = vst.msk [vmem:[%s2177_s3 + $0xa8] sm:$0xff] %vm960_vm1, %v917_v14  ;;  %1014 = vst.msk [vmem:[%s2177_s3 + $0x1a8] sm:$0xff] %vm960_vm1, %v949_v15 }
 0x150   :  { %v729_v16 = vpop.f32.mrb[44].mxu0  ;;  %v857_v50 = vpop.f32.mrb[44].mxu1 }
 0x151   :  { %v730_v51 = vadd.f32 %v1852_v26, %v729_v16  ;;  %v858_v55 = vadd.f32 %v1852_v26, %v857_v50  ;;  %v731_v56 = vpop.f32.mrb[45].mxu0  ;;  %v859_v57 = vpop.f32.mrb[45].mxu1 }
 0x152   :  { %v732_v61 = vpop.f32.mrb[46].mxu0  ;;  %v860_v18 = vpop.f32.mrb[46].mxu1 }
 0x153   :  { %v918_v19 = vmax.f32 %v730_v51, 0.0  ;;  %v950_v39 = vmax.f32 %v858_v55, 0.0  ;;  %v733_v8 = vadd.f32 %v1852_v26, %v732_v61  ;;  %v861_v21 = vadd.f32 %v1852_v26, %v860_v18  ;;  %v734_v20 = vpop.f32.mrb[47].mxu0  ;;  %v862_v32 = vpop.f32.mrb[47].mxu1 }
 0x155   :  { %983 = vst.msk [vmem:[%s2177_s3 + $0xb0] sm:$0xff] %vm960_vm1, %v918_v19  ;;  %1015 = vst.msk [vmem:[%s2177_s3 + $0x1b0] sm:$0xff] %vm960_vm1, %v950_v39  ;;  %v919_v33 = vmax.f32 %v733_v8, 0.0  ;;  %v951_v9 = vmax.f32 %v861_v21, 0.0 }
 0x157   :  { %984 = vst.msk [vmem:[%s2177_s3 + $0xb8] sm:$0xff] %vm960_vm1, %v919_v33  ;;  %1016 = vst.msk [vmem:[%s2177_s3 + $0x1b8] sm:$0xff] %vm960_vm1, %v951_v9 }
 0x158   :  { %v737_v11 = vpop.f32.mrb[48].mxu0  ;;  %v865_v41 = vpop.f32.mrb[48].mxu1 }
 0x159   :  { %v738_v42 = vadd.f32 %v1852_v26, %v737_v11  ;;  %v866_v43 = vadd.f32 %v1852_v26, %v865_v41  ;;  %v739_v62 = vpop.f32.mrb[49].mxu0  ;;  %v867_v38 = vpop.f32.mrb[49].mxu1 }
 0x15a   :  { %v740_v29 = vpop.f32.mrb[50].mxu0  ;;  %v868_v12 = vpop.f32.mrb[50].mxu1 }
 0x15b   :  { %v920_v30 = vmax.f32 %v738_v42, 0.0  ;;  %v952_v63 = vmax.f32 %v866_v43, 0.0  ;;  %v741_v27 = vadd.f32 %v1852_v26, %v740_v29  ;;  %v869_v52 = vadd.f32 %v1852_v26, %v868_v12  ;;  %v742_v53 = vpop.f32.mrb[51].mxu0  ;;  %v870_v22 = vpop.f32.mrb[51].mxu1 }
 0x15d   :  { %985 = vst.msk [vmem:[%s2177_s3 + $0xc0] sm:$0xff] %vm960_vm1, %v920_v30  ;;  %1017 = vst.msk [vmem:[%s2177_s3 + $0x1c0] sm:$0xff] %vm960_vm1, %v952_v63  ;;  %v921_v23 = vmax.f32 %v741_v27, 0.0  ;;  %v953_v17 = vmax.f32 %v869_v52, 0.0 }
 0x15f   :  { %986 = vst.msk [vmem:[%s2177_s3 + $0xc8] sm:$0xff] %vm960_vm1, %v921_v23  ;;  %1018 = vst.msk [vmem:[%s2177_s3 + $0x1c8] sm:$0xff] %vm960_vm1, %v953_v17 }
 0x160   :  { %v745_v31 = vpop.f32.mrb[52].mxu0  ;;  %v873_v40 = vpop.f32.mrb[52].mxu1 }
 0x161   :  { %v746_v5 = vadd.f32 %v1852_v26, %v745_v31  ;;  %v874_v28 = vadd.f32 %v1852_v26, %v873_v40  ;;  %v747_v45 = vpop.f32.mrb[53].mxu0  ;;  %v875_v24 = vpop.f32.mrb[53].mxu1 }
 0x162   :  { %v748_v35 = vpop.f32.mrb[54].mxu0  ;;  %v876_v36 = vpop.f32.mrb[54].mxu1 }
 0x163   :  { %v922_v37 = vmax.f32 %v746_v5, 0.0  ;;  %v954_v25 = vmax.f32 %v874_v28, 0.0  ;;  %v749_v44 = vadd.f32 %v1852_v26, %v748_v35  ;;  %v877_v46 = vadd.f32 %v1852_v26, %v876_v36  ;;  %v750_v58 = vpop.f32.mrb[55].mxu0  ;;  %v878_v59 = vpop.f32.mrb[55].mxu1 }
 0x165   :  { %987 = vst.msk [vmem:[%s2177_s3 + $0xd0] sm:$0xff] %vm960_vm1, %v922_v37  ;;  %1019 = vst.msk [vmem:[%s2177_s3 + $0x1d0] sm:$0xff] %vm960_vm1, %v954_v25  ;;  %v923_v34 = vmax.f32 %v749_v44, 0.0  ;;  %v955_v0 = vmax.f32 %v877_v46, 0.0 }
 0x167   :  { %988 = vst.msk [vmem:[%s2177_s3 + $0xd8] sm:$0xff] %vm960_vm1, %v923_v34  ;;  %1020 = vst.msk [vmem:[%s2177_s3 + $0x1d8] sm:$0xff] %vm960_vm1, %v955_v0 }
 0x168   :  { %v753_v60 = vpop.f32.mrb[56].mxu0  ;;  %v881_v1 = vpop.f32.mrb[56].mxu1 }
 0x169   :  { %v754_v47 = vadd.f32 %v1852_v26, %v753_v60  ;;  %v882_v48 = vadd.f32 %v1852_v26, %v881_v1  ;;  %v755_v49 = vpop.f32.mrb[57].mxu0  ;;  %v883_v54 = vpop.f32.mrb[57].mxu1 }
 0x16a   :  { %v756_v2 = vpop.f32.mrb[58].mxu0  ;;  %v884_v3 = vpop.f32.mrb[58].mxu1 }
 0x16b   :  { %v924_v4 = vmax.f32 %v754_v47, 0.0  ;;  %v956_v6 = vmax.f32 %v882_v48, 0.0  ;;  %v757_v7 = vadd.f32 %v1852_v26, %v756_v2  ;;  %v885_v10 = vadd.f32 %v1852_v26, %v884_v3  ;;  %v758_v13 = vpop.f32.mrb[59].mxu0  ;;  %v886_v14 = vpop.f32.mrb[59].mxu1 }
 0x16d   :  { %989 = vst.msk [vmem:[%s2177_s3 + $0xe0] sm:$0xff] %vm960_vm1, %v924_v4  ;;  %1021 = vst.msk [vmem:[%s2177_s3 + $0x1e0] sm:$0xff] %vm960_vm1, %v956_v6  ;;  %v925_v15 = vmax.f32 %v757_v7, 0.0  ;;  %v957_v16 = vmax.f32 %v885_v10, 0.0 }
 0x16f   :  { %990 = vst.msk [vmem:[%s2177_s3 + $0xe8] sm:$0xff] %vm960_vm1, %v925_v15  ;;  %1022 = vst.msk [vmem:[%s2177_s3 + $0x1e8] sm:$0xff] %vm960_vm1, %v957_v16 }
 0x170   :  { %v761_v50 = vpop.f32.mrb[60].mxu0  ;;  %v889_v51 = vpop.f32.mrb[60].mxu1 }
 0x171   :  { %v762_v55 = vadd.f32 %v1852_v26, %v761_v50  ;;  %v890_v56 = vadd.f32 %v1852_v26, %v889_v51  ;;  %v763_v57 = vpop.f32.mrb[61].mxu0  ;;  %v891_v61 = vpop.f32.mrb[61].mxu1 }
 0x172   :  { %v764_v18 = vpop.f32.mrb[62].mxu0  ;;  %v892_v19 = vpop.f32.mrb[62].mxu1 }
 0x173   :  { %v926_v39 = vmax.f32 %v762_v55, 0.0  ;;  %v958_v8 = vmax.f32 %v890_v56, 0.0  ;;  %v765_v21 = vadd.f32 %v1852_v26, %v764_v18  ;;  %v893_v20 = vadd.f32 %v1852_v26, %v892_v19  ;;  %v766_v32 = vpop.f32.mrb[63].mxu0  ;;  %v894_v33 = vpop.f32.mrb[63].mxu1 }
 0x175   :  { %991 = vst.msk [vmem:[%s2177_s3 + $0xf0] sm:$0xff] %vm960_vm1, %v926_v39  ;;  %1023 = vst.msk [vmem:[%s2177_s3 + $0x1f0] sm:$0xff] %vm960_vm1, %v958_v8  ;;  %v927_v9 = vmax.f32 %v765_v21, 0.0  ;;  %v959_v11 = vmax.f32 %v893_v20, 0.0 }
 0x177   :  { %992 = vst.msk [vmem:[%s2177_s3 + $0xf8] sm:$0xff] %vm960_vm1, %v927_v9  ;;  %1024 = vst.msk [vmem:[%s2177_s3 + $0x1f8] sm:$0xff] %vm960_vm1, %v959_v11 }

// kernel: shake_resnet_forward.18
= control target key start
LH: loop header
LB: loop body
LE: loop exit
PB: predicated region body
PF: predicated region fallthrough
CT: control target
= control target key end

     0   :  { %v3241_v0 = vmov 0   ;;  %vm1305_vm0 = vcmask 523264   ;;  %vm2397_vm1 = vcmask 261120   ;;  %s4761_s1 = inlined_call_operand.vmem [shape: bf16[576,32], index: 1, kind: input, shape index: {}]   ;;  %s4762_s0 = inlined_call_operand.vmem [shape: bf16[512,576], index: 0, kind: input, shape index: {}]   ;;  %s4763_s2 = inlined_call_operand.vmem [shape: f32[1,32], index: 2, kind: input, shape index: {}]   ;;  %s4764_s3 = inlined_call_operand.vmem [shape: f32[512,32], index: 3, kind: input, shape index: {}]   ;;  %s4765_s4 = inlined_call_operand.vmem [shape: f32[512,32], index: 4, kind: output, shape index: {}]  }
   0x1   :  { %1402 = vmatprep.subr.bf16.mxu0 %v3241_v0  ;;  %2803 = vmatprep.subr.bf16.mxu1 %v3241_v0  ;;  %v2980_v1 = vld [vmem:[%s4761_s1] sm:$0xff]   ;;  %v2981_v2 = vld [vmem:[%s4761_s1 + $0x8] sm:$0xff]   ;;  %v2982_v3 = vld [vmem:[%s4761_s1 + $0x10] sm:$0xff]  }
   0x2   :  { %1403 = vmatpush1.bf16.msra.mxu0 %v2980_v1  ;;  %2819 = vmatpush1.bf16.msra.mxu1 %v2980_v1  ;;  %v2983_v4 = vld [vmem:[%s4761_s1 + $0x18] sm:$0xff]   ;;  %v2984_v5 = vld [vmem:[%s4761_s1 + $0x20] sm:$0xff]   ;;  %v2985_v7 = vld [vmem:[%s4761_s1 + $0x28] sm:$0xff]  }
   0x3   :  { %1404 = vmatprep.subr.bf16.mxu0 %v3241_v0  ;;  %2804 = vmatprep.subr.bf16.mxu1 %v3241_v0  ;;  %v2998_v6 = vld [vmem:[%s4762_s0 + $0x4] ss:$20 sps:$4 sm:$0xff]   ;;  %v2986_v9 = vld [vmem:[%s4761_s1 + $0x30] sm:$0xff]   ;;  %v2989_v12 = vld [vmem:[%s4761_s1 + $0x48] sm:$0xff]  }
   0x4   :  { %v3001_v8 = vld [vmem:[%s4762_s0 + $0x144] ss:$20 sps:$4 sm:$0xff]   ;;  %1434 = vmatprep.mubr.bf16.mxu0 %v2998_v6  ;;  %v2990_v13 = vld [vmem:[%s4761_s1 + $0x50] sm:$0xff]   ;;  %v2993_v16 = vld [vmem:[%s4761_s1 + $0x68] sm:$0xff]  }
   0x5   :  { %1498 = vmatprep.mubr.bf16.mxu1 %v3001_v8  ;;  %v2987_v10 = vld [vmem:[%s4761_s1 + $0x38] sm:$0xff]   ;;  %v2988_v11 = vld [vmem:[%s4761_s1 + $0x40] sm:$0xff]   ;;  %v2994_v17 = vld [vmem:[%s4761_s1 + $0x70] sm:$0xff]  }
   0x6   :  { %1405 = vmatpush1.bf16.msra.mxu0 %v2981_v2  ;;  %2820 = vmatpush1.bf16.msra.mxu1 %v2981_v2  ;;  %v2991_v14 = vld [vmem:[%s4761_s1 + $0x58] sm:$0xff]   ;;  %v2992_v15 = vld [vmem:[%s4761_s1 + $0x60] sm:$0xff]   ;;  %v3052_v25 = vld [vmem:[%s4761_s1 + $0x108] sm:$0xff]  }
   0x7   :  { %1406 = vmatprep.subr.bf16.mxu0 %v3241_v0  ;;  %2805 = vmatprep.subr.bf16.mxu1 %v3241_v0  ;;  %v2995_v18 = vld [vmem:[%s4761_s1 + $0x78] sm:$0xff]   ;;  %v3003_v19 = vld [vmem:[%s4761_s1 + $0x100] sm:$0xff]   ;;  %v3004_v26 = vld [vmem:[%s4761_s1 + $0x88] sm:$0xff]  }
   0x8   :  { %v2996_v20 = vld [vmem:[%s4762_s0] ss:$20 sps:$4 sm:$0xff]   ;;  %v3009_v27 = vld [vmem:[%s4762_s0 + $0x28] ss:$20 sps:$4 sm:$0xff]   ;;  %v3017_v34 = vld [vmem:[%s4762_s0 + $0x50] ss:$20 sps:$4 sm:$0xff]  }
   0x9   :  { %v2999_v21 = vld [vmem:[%s4762_s0 + $0x140] ss:$20 sps:$4 sm:$0xff]   ;;  %v3010_v28 = vld [vmem:[%s4762_s0 + $0x168] ss:$20 sps:$4 sm:$0xff]   ;;  %v3018_v35 = vld [vmem:[%s4762_s0 + $0x190] ss:$20 sps:$4 sm:$0xff]  }
   0xa   :  { %1407 = vmatpush1.bf16.msra.mxu0 %v2982_v3  ;;  %2821 = vmatpush1.bf16.msra.mxu1 %v2982_v3  ;;  %v3002_v22 = vld [vmem:[%s4761_s1 + $0x80] sm:$0xff]   ;;  %v3011_v29 = vld [vmem:[%s4761_s1 + $0x90] sm:$0xff]   ;;  %v3012_v33 = vld [vmem:[%s4761_s1 + $0x98] sm:$0xff]  }
   0xb   :  { %1408 = vmatprep.subr.bf16.mxu0 %v3241_v0  ;;  %2806 = vmatprep.subr.bf16.mxu1 %v3241_v0  ;;  %v3005_v23 = vld [vmem:[%s4762_s0 + $0x2c] ss:$20 sps:$4 sm:$0xff]   ;;  %v3092_v30 = vld [vmem:[%s4761_s1 + $0x110] sm:$0xff]   ;;  %v3029_v43 = vld [vmem:[%s4762_s0 + $0xa4] ss:$20 sps:$4 sm:$0xff]  }
   0xc   :  { %v3007_v24 = vld [vmem:[%s4762_s0 + $0x16c] ss:$20 sps:$4 sm:$0xff]   ;;  %v3013_v31 = vld [vmem:[%s4762_s0 + $0x54] ss:$20 sps:$4 sm:$0xff]   ;;  %v3021_v37 = vld [vmem:[%s4762_s0 + $0x7c] ss:$20 sps:$4 sm:$0xff]  }
   0xd   :  { %v3015_v32 = vld [vmem:[%s4762_s0 + $0x194] ss:$20 sps:$4 sm:$0xff]   ;;  %v3019_v36 = vld [vmem:[%s4761_s1 + $0xa0] sm:$0xff]   ;;  %v3023_v38 = vld [vmem:[%s4762_s0 + $0x1bc] ss:$20 sps:$4 sm:$0xff]  }
   0xe   :  { %1409 = vmatpush1.bf16.msra.mxu0 %v2983_v4  ;;  %2822 = vmatpush1.bf16.msra.mxu1 %v2983_v4  ;;  %v3020_v39 = vld [vmem:[%s4761_s1 + $0xa8] sm:$0xff]   ;;  %v3027_v42 = vld [vmem:[%s4761_s1 + $0xb0] sm:$0xff]   ;;  %v3129_v44 = vld [vmem:[%s4761_s1 + $0x118] sm:$0xff]  }
   0xf   :  { %1410 = vmatprep.subr.bf16.mxu0 %v3241_v0  ;;  %2807 = vmatprep.subr.bf16.mxu1 %v3241_v0  ;;  %v3025_v40 = vld [vmem:[%s4762_s0 + $0x78] ss:$20 sps:$4 sm:$0xff]   ;;  %v3033_v47 = vld [vmem:[%s4762_s0 + $0xa0] ss:$20 sps:$4 sm:$0xff]   ;;  %v3041_v53 = vld [vmem:[%s4762_s0 + $0xc8] ss:$20 sps:$4 sm:$0xff]  }
  0x10   :  { %v3026_v41 = vld [vmem:[%s4762_s0 + $0x1b8] ss:$20 sps:$4 sm:$0xff]   ;;  %v3034_v48 = vld [vmem:[%s4762_s0 + $0x1e0] ss:$20 sps:$4 sm:$0xff]   ;;  %v3042_v54 = vld [vmem:[%s4762_s0 + $0x208] ss:$20 sps:$4 sm:$0xff]  }
  0x11   :  { %v3031_v45 = vld [vmem:[%s4762_s0 + $0x1e4] ss:$20 sps:$4 sm:$0xff]   ;;  %v3037_v50 = vld [vmem:[%s4762_s0 + $0xcc] ss:$20 sps:$4 sm:$0xff]   ;;  %v3043_v55 = vld [vmem:[%s4761_s1 + $0xd0] sm:$0xff]  }
  0x12   :  { %1411 = vmatpush1.bf16.msra.mxu0 %v2984_v5  ;;  %2823 = vmatpush1.bf16.msra.mxu1 %v2984_v5  ;;  %v3028_v46 = vld [vmem:[%s4761_s1 + $0xb8] sm:$0xff]   ;;  %v3035_v49 = vld [vmem:[%s4761_s1 + $0xc0] sm:$0xff]   ;;  %v3036_v52 = vld [vmem:[%s4761_s1 + $0xc8] sm:$0xff]  }
  0x13   :  { %1412 = vmatprep.subr.bf16.mxu0 %v3241_v0  ;;  %2808 = vmatprep.subr.bf16.mxu1 %v3241_v0  ;;  %v3039_v51 = vld [vmem:[%s4762_s0 + $0x20c] ss:$20 sps:$4 sm:$0xff]   ;;  %v3045_v56 = vld [vmem:[%s4762_s0 + $0xf4] ss:$20 sps:$4 sm:$0xff]   ;;  %v3044_v58 = vld [vmem:[%s4761_s1 + $0xd8] sm:$0xff]  }
  0x14   :  { %v3047_v57 = vld [vmem:[%s4762_s0 + $0x234] ss:$20 sps:$4 sm:$0xff]   ;;  %v3049_v59 = vld [vmem:[%s4762_s0 + $0xf0] ss:$20 sps:$4 sm:$0xff]   ;;  %v3058_v2 = vld [vmem:[%s4762_s0 + $0x118] ss:$20 sps:$4 sm:$0xff]  }
  0x15   :  { %v3050_v60 = vld [vmem:[%s4762_s0 + $0x230] ss:$20 sps:$4 sm:$0xff]   ;;  %v3053_v1 = vld [vmem:[%s4761_s1 + $0xe8] sm:$0xff]  }
  0x16   :  { %1413 = vmatpush1.bf16.msra.mxu0 %v2985_v7  ;;  %2824 = vmatpush1.bf16.msra.mxu1 %v2985_v7  ;;  %v3051_v61 = vld [vmem:[%s4761_s1 + $0xe0] sm:$0xff]   ;;  %v3054_v62 = vld [vmem:[%s4762_s0 + $0x11c] ss:$20 sps:$4 sm:$0xff]   ;;  %v3059_v3 = vld [vmem:[%s4762_s0 + $0x258] ss:$20 sps:$4 sm:$0xff]  }
  0x17   :  { %1414 = vmatprep.subr.bf16.mxu0 %v3241_v0  ;;  %2809 = vmatprep.subr.bf16.mxu1 %v3241_v0  ;;  %v3056_v63 = vld [vmem:[%s4762_s0 + $0x25c] ss:$20 sps:$4 sm:$0xff]   ;;  %v3062_v5 = vld [vmem:[%s4762_s0 + $0x284] ss:$20 sps:$4 sm:$0xff]   ;;  %v3066_v6 = vld [vmem:[%s4762_s0 + $0xc] ss:$20 sps:$4 sm:$0xff]  }
  0x18   :  { %v3060_v4 = vld [vmem:[%s4761_s1 + $0xf0] sm:$0xff]   ;;  %v3061_v7 = vld [vmem:[%s4761_s1 + $0xf8] sm:$0xff]  }
  0x19   :  { %v3064_v8 = vld [vmem:[%s4762_s0 + $0x8] ss:$20 sps:$4 sm:$0xff]  }
  0x1a   :  { %1415 = vmatpush1.bf16.msra.mxu0 %v2986_v9  ;;  %2825 = vmatpush1.bf16.msra.mxu1 %v2986_v9  ;;  %v3067_v9 = vld [vmem:[%s4762_s0 + $0x280] ss:$20 sps:$4 sm:$0xff]  }
  0x1b   :  { %1416 = vmatprep.subr.bf16.mxu0 %v3241_v0  ;;  %2810 = vmatprep.subr.bf16.mxu1 %v3241_v0 }
  0x1e   :  { %1417 = vmatpush1.bf16.msra.mxu0 %v2987_v10  ;;  %2826 = vmatpush1.bf16.msra.mxu1 %v2987_v10  ;;  %v3068_v10 = vld [vmem:[%s4762_s0 + $0x2ac] ss:$20 sps:$4 sm:$0xff]  }
  0x1f   :  { %1418 = vmatprep.subr.bf16.mxu0 %v3241_v0  ;;  %2811 = vmatprep.subr.bf16.mxu1 %v3241_v0 }
  0x22   :  { %1419 = vmatpush1.bf16.msra.mxu0 %v2988_v11  ;;  %2827 = vmatpush1.bf16.msra.mxu1 %v2988_v11  ;;  %v3070_v11 = vld [vmem:[%s4762_s0 + $0x34] ss:$20 sps:$4 sm:$0xff]  }
  0x23   :  { %1420 = vmatprep.subr.bf16.mxu0 %v3241_v0  ;;  %2812 = vmatprep.subr.bf16.mxu1 %v3241_v0 }
  0x26   :  { %1421 = vmatpush1.bf16.msra.mxu0 %v2989_v12  ;;  %2828 = vmatpush1.bf16.msra.mxu1 %v2989_v12  ;;  %v3073_v12 = vld [vmem:[%s4762_s0 + $0x30] ss:$20 sps:$4 sm:$0xff]  }
  0x27   :  { %1422 = vmatprep.subr.bf16.mxu0 %v3241_v0  ;;  %2813 = vmatprep.subr.bf16.mxu1 %v3241_v0 }
  0x2a   :  { %1423 = vmatpush1.bf16.msra.mxu0 %v2990_v13  ;;  %2829 = vmatpush1.bf16.msra.mxu1 %v2990_v13  ;;  %v3074_v13 = vld [vmem:[%s4762_s0 + $0x2d4] ss:$20 sps:$4 sm:$0xff]  }
  0x2b   :  { %1424 = vmatprep.subr.bf16.mxu0 %v3241_v0  ;;  %2814 = vmatprep.subr.bf16.mxu1 %v3241_v0 }
  0x2e   :  { %1425 = vmatpush1.bf16.msra.mxu0 %v2991_v14  ;;  %2830 = vmatpush1.bf16.msra.mxu1 %v2991_v14  ;;  %v3076_v14 = vld [vmem:[%s4762_s0 + $0x5c] ss:$20 sps:$4 sm:$0xff]  }
  0x2f   :  { %1426 = vmatprep.subr.bf16.mxu0 %v3241_v0  ;;  %2815 = vmatprep.subr.bf16.mxu1 %v3241_v0 }
  0x32   :  { %1427 = vmatpush1.bf16.msra.mxu0 %v2992_v15  ;;  %2831 = vmatpush1.bf16.msra.mxu1 %v2992_v15  ;;  %v3078_v15 = vld [vmem:[%s4762_s0 + $0x2d0] ss:$20 sps:$4 sm:$0xff]  }
  0x33   :  { %1428 = vmatprep.subr.bf16.mxu0 %v3241_v0  ;;  %2816 = vmatprep.subr.bf16.mxu1 %v3241_v0 }
  0x36   :  { %1429 = vmatpush1.bf16.msra.mxu0 %v2993_v16  ;;  %2832 = vmatpush1.bf16.msra.mxu1 %v2993_v16  ;;  %v3079_v16 = vld [vmem:[%s4762_s0 + $0x58] ss:$20 sps:$4 sm:$0xff]  }
  0x37   :  { %1430 = vmatprep.subr.bf16.mxu0 %v3241_v0  ;;  %2817 = vmatprep.subr.bf16.mxu1 %v3241_v0 }
  0x3a   :  { %1431 = vmatpush1.bf16.msra.mxu0 %v2994_v17  ;;  %2833 = vmatpush1.bf16.msra.mxu1 %v2994_v17  ;;  %v3080_v17 = vld [vmem:[%s4762_s0 + $0x2fc] ss:$20 sps:$4 sm:$0xff]  }
  0x3b   :  { %1432 = vmatprep.subr.bf16.mxu0 %v3241_v0  ;;  %2818 = vmatprep.subr.bf16.mxu1 %v3241_v0 }
  0x3e   :  { %1433 = vmatpush1.bf16.msra.mxu0 %v2995_v18  ;;  %2834 = vmatpush1.bf16.msra.mxu1 %v2995_v18  ;;  %v3082_v18 = vld [vmem:[%s4762_s0 + $0x84] ss:$20 sps:$4 sm:$0xff]  }
  0x3f   :  { %1691 = vmatprep.subr.bf16.mxu0 %v3241_v0  ;;  %2731 = vmatprep.subr.bf16.mxu1 %v3003_v19 }
  0x41   :  { %1435 = vmatmul.mubr.bf16.vlgmr.msra.gmra.mrb[0].mxu0 %v2996_v20  ;;  %1499 = vmatmul.mubr.bf16.vlgmr.msra.gmra.mrb[0].mxu1 %v2999_v21  ;;  %v3085_v20 = vld [vmem:[%s4762_s0 + $0x80] ss:$20 sps:$4 sm:$0xff]   ;;  %v3086_v21 = vld [vmem:[%s4762_s0 + $0x324] ss:$20 sps:$4 sm:$0xff]  }
  0x42   :  { %1692 = vmatpush1.bf16.msra.mxu0 %v3002_v22  ;;  %2732 = vmatpush3.bf16.msra.mxu1 %v3003_v19  ;;  %v3084_v19 = vld [vmem:[%s4762_s0 + $0x2f8] ss:$20 sps:$4 sm:$0xff]  }
  0x43   :  { %1693 = vmatprep.subr.bf16.mxu0 %v3241_v0  ;;  %1442 = vmatprep.mubr.bf16.mxu0 %v3005_v23  ;;  %v3088_v22 = vld [vmem:[%s4762_s0 + $0xac] ss:$20 sps:$4 sm:$0xff]  }
  0x44   :  { %1506 = vmatprep.mubr.bf16.mxu1 %v3007_v24  ;;  %2733 = vmatprep.subr.bf16.mxu1 %v3052_v25  ;;  %v3090_v23 = vld [vmem:[%s4762_s0 + $0x320] ss:$20 sps:$4 sm:$0xff]   ;;  %v3091_v24 = vld [vmem:[%s4762_s0 + $0xa8] ss:$20 sps:$4 sm:$0xff]  }
  0x46   :  { %1694 = vmatpush1.bf16.msra.mxu0 %v3004_v26  ;;  %2734 = vmatpush3.bf16.msra.mxu1 %v3052_v25  ;;  %v3093_v25 = vld [vmem:[%s4762_s0 + $0x34c] ss:$20 sps:$4 sm:$0xff]   ;;  %v3095_v26 = vld [vmem:[%s4762_s0 + $0xd4] ss:$20 sps:$4 sm:$0xff]  }
  0x47   :  { %1695 = vmatprep.subr.bf16.mxu0 %v3241_v0  ;;  %2735 = vmatprep.subr.bf16.mxu1 %v3092_v30 }
  0x49   :  { %1443 = vmatmul.mubr.bf16.gmra.mrb[4].mxu0 %v3009_v27  ;;  %1507 = vmatmul.mubr.bf16.gmra.mrb[4].mxu1 %v3010_v28  ;;  %v3097_v27 = vld [vmem:[%s4762_s0 + $0x348] ss:$20 sps:$4 sm:$0xff]   ;;  %v3098_v28 = vld [vmem:[%s4762_s0 + $0xd0] ss:$20 sps:$4 sm:$0xff]  }
  0x4a   :  { %1696 = vmatpush1.bf16.msra.mxu0 %v3011_v29  ;;  %1450 = vmatprep.mubr.bf16.mxu0 %v3013_v31  ;;  %v3099_v29 = vld [vmem:[%s4762_s0 + $0x374] ss:$20 sps:$4 sm:$0xff]   ;;  %v3103_v31 = vld [vmem:[%s4762_s0 + $0x370] ss:$20 sps:$4 sm:$0xff]  }
  0x4b   :  { %1697 = vmatprep.subr.bf16.mxu0 %v3241_v0  ;;  %1514 = vmatprep.mubr.bf16.mxu1 %v3015_v32  ;;  %v3104_v32 = vld [vmem:[%s4762_s0 + $0xf8] ss:$20 sps:$4 sm:$0xff]  }
  0x4c   :  { %2736 = vmatpush3.bf16.msra.mxu1 %v3092_v30  ;;  %v3101_v30 = vld [vmem:[%s4762_s0 + $0xfc] ss:$20 sps:$4 sm:$0xff]  }
  0x4d   :  { %2737 = vmatprep.subr.bf16.mxu1 %v3129_v44 }
  0x4e   :  { %1698 = vmatpush1.bf16.msra.mxu0 %v3012_v33  ;;  %v3105_v33 = vld [vmem:[%s4762_s0 + $0x39c] ss:$20 sps:$4 sm:$0xff]  }
  0x4f   :  { %1699 = vmatprep.subr.bf16.mxu0 %v3241_v0 }
  0x50   :  { %2738 = vmatpush3.bf16.msra.mxu1 %v3129_v44  ;;  %v3122_v44 = vld [vmem:[%s4762_s0 + $0x170] ss:$20 sps:$4 sm:$0xff]  }
  0x51   :  { %1451 = vmatmul.mubr.bf16.gmra.mrb[8].mxu0 %v3017_v34  ;;  %1515 = vmatmul.mubr.bf16.gmra.mrb[8].mxu1 %v3018_v35  ;;  %v3107_v34 = vld [vmem:[%s4762_s0 + $0x124] ss:$20 sps:$4 sm:$0xff]  }
  0x52   :  { %1700 = vmatpush1.bf16.msra.mxu0 %v3019_v36  ;;  %1458 = vmatprep.mubr.bf16.mxu0 %v3021_v37  ;;  %v3109_v35 = vld [vmem:[%s4762_s0 + $0x398] ss:$20 sps:$4 sm:$0xff]   ;;  %v3110_v36 = vld [vmem:[%s4762_s0 + $0x120] ss:$20 sps:$4 sm:$0xff]  }
  0x53   :  { %1701 = vmatprep.subr.bf16.mxu0 %v3241_v0  ;;  %1522 = vmatprep.mubr.bf16.mxu1 %v3023_v38  ;;  %v3111_v37 = vld [vmem:[%s4762_s0 + $0x3c4] ss:$20 sps:$4 sm:$0xff]   ;;  %v3113_v38 = vld [vmem:[%s4762_s0 + $0x14c] ss:$20 sps:$4 sm:$0xff]  }
  0x56   :  { %1702 = vmatpush1.bf16.msra.mxu0 %v3020_v39  ;;  %v3115_v39 = vld [vmem:[%s4762_s0 + $0x3c0] ss:$20 sps:$4 sm:$0xff]  }
  0x57   :  { %1703 = vmatprep.subr.bf16.mxu0 %v3241_v0 }
  0x59   :  { %1459 = vmatmul.mubr.bf16.gmra.mrb[12].mxu0 %v3025_v40  ;;  %1523 = vmatmul.mubr.bf16.gmra.mrb[12].mxu1 %v3026_v41  ;;  %v3116_v40 = vld [vmem:[%s4762_s0 + $0x148] ss:$20 sps:$4 sm:$0xff]   ;;  %v3117_v41 = vld [vmem:[%s4762_s0 + $0x3ec] ss:$20 sps:$4 sm:$0xff]  }
  0x5a   :  { %1704 = vmatpush1.bf16.msra.mxu0 %v3027_v42  ;;  %1466 = vmatprep.mubr.bf16.mxu0 %v3029_v43  ;;  %v3119_v42 = vld [vmem:[%s4762_s0 + $0x174] ss:$20 sps:$4 sm:$0xff]  }
  0x5b   :  { %1705 = vmatprep.subr.bf16.mxu0 %v3241_v0  ;;  %1530 = vmatprep.mubr.bf16.mxu1 %v3031_v45  ;;  %v3121_v43 = vld [vmem:[%s4762_s0 + $0x3e8] ss:$20 sps:$4 sm:$0xff]  }
  0x5c   :  { %v3123_v45 = vld [vmem:[%s4762_s0 + $0x414] ss:$20 sps:$4 sm:$0xff]  }
  0x5e   :  { %1706 = vmatpush1.bf16.msra.mxu0 %v3028_v46  ;;  %v3125_v46 = vld [vmem:[%s4762_s0 + $0x19c] ss:$20 sps:$4 sm:$0xff]  }
  0x5f   :  { %1707 = vmatprep.subr.bf16.mxu0 %v3241_v0 }
  0x61   :  { %1467 = vmatmul.mubr.bf16.gmra.mrb[16].mxu0 %v3033_v47  ;;  %1531 = vmatmul.mubr.bf16.gmra.mrb[16].mxu1 %v3034_v48  ;;  %v3127_v47 = vld [vmem:[%s4762_s0 + $0x410] ss:$20 sps:$4 sm:$0xff]   ;;  %v3128_v48 = vld [vmem:[%s4762_s0 + $0x198] ss:$20 sps:$4 sm:$0xff]  }
  0x62   :  { %1708 = vmatpush1.bf16.msra.mxu0 %v3035_v49  ;;  %1474 = vmatprep.mubr.bf16.mxu0 %v3037_v50  ;;  %v3130_v49 = vld [vmem:[%s4762_s0 + $0x43c] ss:$20 sps:$4 sm:$0xff]   ;;  %v3132_v50 = vld [vmem:[%s4762_s0 + $0x1c4] ss:$20 sps:$4 sm:$0xff]  }
  0x63   :  { %1709 = vmatprep.subr.bf16.mxu0 %v3241_v0  ;;  %1538 = vmatprep.mubr.bf16.mxu1 %v3039_v51  ;;  %v3134_v51 = vld [vmem:[%s4762_s0 + $0x438] ss:$20 sps:$4 sm:$0xff]  }
  0x66   :  { %1710 = vmatpush1.bf16.msra.mxu0 %v3036_v52  ;;  %v3135_v52 = vld [vmem:[%s4762_s0 + $0x1c0] ss:$20 sps:$4 sm:$0xff]  }
  0x67   :  { %1711 = vmatprep.subr.bf16.mxu0 %v3241_v0 }
  0x69   :  { %1475 = vmatmul.mubr.bf16.gmra.mrb[20].mxu0 %v3041_v53  ;;  %1539 = vmatmul.mubr.bf16.gmra.mrb[20].mxu1 %v3042_v54  ;;  %v3136_v53 = vld [vmem:[%s4762_s0 + $0x464] ss:$20 sps:$4 sm:$0xff]   ;;  %v3138_v54 = vld [vmem:[%s4762_s0 + $0x1ec] ss:$20 sps:$4 sm:$0xff]  }
  0x6a   :  { %1712 = vmatpush1.bf16.msra.mxu0 %v3043_v55  ;;  %1482 = vmatprep.mubr.bf16.mxu0 %v3045_v56  ;;  %v3140_v55 = vld [vmem:[%s4762_s0 + $0x460] ss:$20 sps:$4 sm:$0xff]   ;;  %v3141_v56 = vld [vmem:[%s4762_s0 + $0x1e8] ss:$20 sps:$4 sm:$0xff]  }
  0x6b   :  { %1713 = vmatprep.subr.bf16.mxu0 %v3241_v0  ;;  %1546 = vmatprep.mubr.bf16.mxu1 %v3047_v57  ;;  %v3142_v57 = vld [vmem:[%s4762_s0 + $0x48c] ss:$20 sps:$4 sm:$0xff]  }
  0x6e   :  { %1714 = vmatpush1.bf16.msra.mxu0 %v3044_v58  ;;  %v3144_v58 = vld [vmem:[%s4762_s0 + $0x214] ss:$20 sps:$4 sm:$0xff]  }
  0x6f   :  { %1715 = vmatprep.subr.bf16.mxu0 %v3241_v0 }
  0x71   :  { %1483 = vmatmul.mubr.bf16.gmra.mrb[24].mxu0 %v3049_v59  ;;  %1547 = vmatmul.mubr.bf16.gmra.mrb[24].mxu1 %v3050_v60  ;;  %v3146_v59 = vld [vmem:[%s4762_s0 + $0x488] ss:$20 sps:$4 sm:$0xff]   ;;  %v3147_v60 = vld [vmem:[%s4762_s0 + $0x210] ss:$20 sps:$4 sm:$0xff]  }
  0x72   :  { %1716 = vmatpush1.bf16.msra.mxu0 %v3051_v61  ;;  %1490 = vmatprep.mubr.bf16.mxu0 %v3054_v62  ;;  %v3148_v61 = vld [vmem:[%s4762_s0 + $0x4b4] ss:$20 sps:$4 sm:$0xff]   ;;  %v3150_v62 = vld [vmem:[%s4762_s0 + $0x23c] ss:$20 sps:$4 sm:$0xff]  }
  0x73   :  { %1717 = vmatprep.subr.bf16.mxu0 %v3241_v0  ;;  %1554 = vmatprep.mubr.bf16.mxu1 %v3056_v63  ;;  %v3152_v63 = vld [vmem:[%s4762_s0 + $0x4b0] ss:$20 sps:$4 sm:$0xff]  }
  0x76   :  { %1718 = vmatpush1.bf16.msra.mxu0 %v3053_v1  ;;  %v3153_v1 = vld [vmem:[%s4762_s0 + $0x238] ss:$20 sps:$4 sm:$0xff]  }
  0x77   :  { %1719 = vmatprep.subr.bf16.mxu0 %v3241_v0 }
  0x79   :  { %1491 = vmatmul.mubr.bf16.gmra.mrb[28].mxu0 %v3058_v2  ;;  %1555 = vmatmul.mubr.bf16.gmra.mrb[28].mxu1 %v3059_v3  ;;  %v3154_v2 = vld [vmem:[%s4762_s0 + $0x4dc] ss:$20 sps:$4 sm:$0xff]   ;;  %v3156_v3 = vld [vmem:[%s4762_s0 + $0x264] ss:$20 sps:$4 sm:$0xff]  }
  0x7a   :  { %1720 = vmatpush1.bf16.msra.mxu0 %v3060_v4  ;;  %1562 = vmatprep.mubr.bf16.mxu1 %v3062_v5  ;;  %v3158_v4 = vld [vmem:[%s4762_s0 + $0x4d8] ss:$20 sps:$4 sm:$0xff]   ;;  %v3159_v5 = vld [vmem:[%s4762_s0 + $0x260] ss:$20 sps:$4 sm:$0xff]  }
  0x7b   :  { %1721 = vmatprep.subr.bf16.mxu0 %v3241_v0  ;;  %1723 = vmatprep.mubr.bf16.mxu0 %v3066_v6  ;;  %v3072_v0 = vld [vmem:[%s4762_s0 + $0x2a8] ss:$20 sps:$4 sm:$0xff]   ;;  %v3160_v6 = vld [vmem:[%s4762_s0 + $0x28c] ss:$20 sps:$4 sm:$0xff]  }
  0x7e   :  { %1722 = vmatpush1.bf16.msra.mxu0 %v3061_v7  ;;  %v3162_v7 = vld [vmem:[%s4762_s0 + $0x10] ss:$20 sps:$4 sm:$0xff]  }
  0x81   :  { %1563 = vmatmul.mubr.bf16.gmra.mrb[32].mxu1 %v3067_v9  ;;  %1724 = vmatmul.mubr.bf16.vlgmr.msra.gmra.mrb[0].mxu0 %v3064_v8  ;;  %v3163_v8 = vld [vmem:[%s4762_s0 + $0x288] ss:$20 sps:$4 sm:$0xff]   ;;  %v3164_v9 = vld [vmem:[%s4762_s0 + $0x38] ss:$20 sps:$4 sm:$0xff]  }
  0x82   :  { %1570 = vmatprep.mubr.bf16.mxu1 %v3068_v10  ;;  %1731 = vmatprep.mubr.bf16.mxu0 %v3070_v11  ;;  %v3165_v10 = vld [vmem:[%s4762_s0 + $0x2b4] ss:$20 sps:$4 sm:$0xff]  }
  0x83   :  { %v3167_v11 = vld [vmem:[%s4762_s0 + $0x60] ss:$20 sps:$4 sm:$0xff]  }
  0x89   :  { %1571 = vmatmul.mubr.bf16.gmra.mrb[36].mxu1 %v3072_v0  ;;  %1732 = vmatmul.mubr.bf16.gmra.mrb[4].mxu0 %v3073_v12  ;;  %v3168_v0 = vld [vmem:[%s4762_s0 + $0x2b0] ss:$20 sps:$4 sm:$0xff]   ;;  %v3169_v12 = vld [vmem:[%s4762_s0 + $0x88] ss:$20 sps:$4 sm:$0xff]  }
  0x8a   :  { %1578 = vmatprep.mubr.bf16.mxu1 %v3074_v13  ;;  %1739 = vmatprep.mubr.bf16.mxu0 %v3076_v14  ;;  %v3170_v13 = vld [vmem:[%s4762_s0 + $0x2dc] ss:$20 sps:$4 sm:$0xff]  }
  0x8b   :  { %v3172_v14 = vld [vmem:[%s4762_s0 + $0xb0] ss:$20 sps:$4 sm:$0xff]  }
  0x91   :  { %1579 = vmatmul.mubr.bf16.gmra.mrb[40].mxu1 %v3078_v15  ;;  %1740 = vmatmul.mubr.bf16.gmra.mrb[8].mxu0 %v3079_v16  ;;  %v3173_v15 = vld [vmem:[%s4762_s0 + $0x2d8] ss:$20 sps:$4 sm:$0xff]  }
  0x92   :  { %1586 = vmatprep.mubr.bf16.mxu1 %v3080_v17  ;;  %1747 = vmatprep.mubr.bf16.mxu0 %v3082_v18  ;;  %v3174_v16 = vld [vmem:[%s4762_s0 + $0xd8] ss:$20 sps:$4 sm:$0xff]   ;;  %v3177_v18 = vld [vmem:[%s4762_s0 + $0x100] ss:$20 sps:$4 sm:$0xff]  }
  0x93   :  { %v3175_v17 = vld [vmem:[%s4762_s0 + $0x304] ss:$20 sps:$4 sm:$0xff]  }
  0x99   :  { %1587 = vmatmul.mubr.bf16.gmra.mrb[44].mxu1 %v3084_v19  ;;  %1748 = vmatmul.mubr.bf16.gmra.mrb[12].mxu0 %v3085_v20 }
  0x9a   :  { %1594 = vmatprep.mubr.bf16.mxu1 %v3086_v21  ;;  %1755 = vmatprep.mubr.bf16.mxu0 %v3088_v22  ;;  %v3178_v21 = vld [vmem:[%s4762_s0 + $0x300] ss:$20 sps:$4 sm:$0xff]   ;;  %v3179_v22 = vld [vmem:[%s4762_s0 + $0x128] ss:$20 sps:$4 sm:$0xff]  }
  0xa1   :  { %1595 = vmatmul.mubr.bf16.gmra.mrb[48].mxu1 %v3090_v23  ;;  %1756 = vmatmul.mubr.bf16.gmra.mrb[16].mxu0 %v3091_v24  ;;  %v3180_v24 = vld [vmem:[%s4762_s0 + $0x32c] ss:$20 sps:$4 sm:$0xff]  }
  0xa2   :  { %1602 = vmatprep.mubr.bf16.mxu1 %v3093_v25  ;;  %1763 = vmatprep.mubr.bf16.mxu0 %v3095_v26  ;;  %v3182_v25 = vld [vmem:[%s4762_s0 + $0x150] ss:$20 sps:$4 sm:$0xff]  }
  0xa9   :  { %1603 = vmatmul.mubr.bf16.gmra.mrb[52].mxu1 %v3097_v27  ;;  %1764 = vmatmul.mubr.bf16.gmra.mrb[20].mxu0 %v3098_v28 }
  0xaa   :  { %1610 = vmatprep.mubr.bf16.mxu1 %v3099_v29  ;;  %1771 = vmatprep.mubr.bf16.mxu0 %v3101_v30  ;;  %v3183_v29 = vld [vmem:[%s4762_s0 + $0x328] ss:$20 sps:$4 sm:$0xff]   ;;  %v3184_v30 = vld [vmem:[%s4762_s0 + $0x178] ss:$20 sps:$4 sm:$0xff]  }
  0xb1   :  { %1611 = vmatmul.mubr.bf16.gmra.mrb[56].mxu1 %v3103_v31  ;;  %1772 = vmatmul.mubr.bf16.gmra.mrb[24].mxu0 %v3104_v32  ;;  %v3185_v32 = vld [vmem:[%s4762_s0 + $0x354] ss:$20 sps:$4 sm:$0xff]  }
  0xb2   :  { %1618 = vmatprep.mubr.bf16.mxu1 %v3105_v33  ;;  %1779 = vmatprep.mubr.bf16.mxu0 %v3107_v34  ;;  %v3187_v33 = vld [vmem:[%s4762_s0 + $0x1a0] ss:$20 sps:$4 sm:$0xff]  }
  0xb9   :  { %1619 = vmatmul.mubr.bf16.gmra.mrb[60].mxu1 %v3109_v35  ;;  %1780 = vmatmul.mubr.bf16.gmra.mrb[28].mxu0 %v3110_v36 }
  0xba   :  { %1626 = vmatprep.mubr.bf16.mxu1 %v3111_v37  ;;  %1787 = vmatprep.mubr.bf16.mxu0 %v3113_v38  ;;  %v3188_v37 = vld [vmem:[%s4762_s0 + $0x350] ss:$20 sps:$4 sm:$0xff]   ;;  %v3189_v38 = vld [vmem:[%s4762_s0 + $0x1c8] ss:$20 sps:$4 sm:$0xff]  }
  0xc1   :  { %1627 = vmatmul.mubr.bf16.gmra.mrb[64].mxu1 %v3115_v39  ;;  %1788 = vmatmul.mubr.bf16.gmra.mrb[32].mxu0 %v3116_v40  ;;  %v3190_v40 = vld [vmem:[%s4762_s0 + $0x37c] ss:$20 sps:$4 sm:$0xff]  }
  0xc2   :  { %1634 = vmatprep.mubr.bf16.mxu1 %v3117_v41  ;;  %1795 = vmatprep.mubr.bf16.mxu0 %v3119_v42  ;;  %v3192_v41 = vld [vmem:[%s4762_s0 + $0x1f0] ss:$20 sps:$4 sm:$0xff]  }
  0xc9   :  { %1635 = vmatmul.mubr.bf16.gmra.mrb[68].mxu1 %v3121_v43  ;;  %1796 = vmatmul.mubr.bf16.gmra.mrb[36].mxu0 %v3122_v44 }
  0xca   :  { %1642 = vmatprep.mubr.bf16.mxu1 %v3123_v45  ;;  %1803 = vmatprep.mubr.bf16.mxu0 %v3125_v46  ;;  %v3193_v45 = vld [vmem:[%s4762_s0 + $0x378] ss:$20 sps:$4 sm:$0xff]  }
  0xcb   :  { %v3194_v46 = vld [vmem:[%s4762_s0 + $0x218] ss:$20 sps:$4 sm:$0xff]  }
  0xd1   :  { %1643 = vmatmul.mubr.bf16.gmra.mrb[72].mxu1 %v3127_v47  ;;  %1804 = vmatmul.mubr.bf16.gmra.mrb[40].mxu0 %v3128_v48  ;;  %v3195_v48 = vld [vmem:[%s4762_s0 + $0x3a4] ss:$20 sps:$4 sm:$0xff]  }
  0xd2   :  { %1650 = vmatprep.mubr.bf16.mxu1 %v3130_v49  ;;  %1811 = vmatprep.mubr.bf16.mxu0 %v3132_v50  ;;  %v3197_v49 = vld [vmem:[%s4762_s0 + $0x240] ss:$20 sps:$4 sm:$0xff]  }
  0xd9   :  { %1651 = vmatmul.mubr.bf16.gmra.mrb[76].mxu1 %v3134_v51  ;;  %1812 = vmatmul.mubr.bf16.gmra.mrb[44].mxu0 %v3135_v52 }
  0xda   :  { %1658 = vmatprep.mubr.bf16.mxu1 %v3136_v53  ;;  %1819 = vmatprep.mubr.bf16.mxu0 %v3138_v54  ;;  %v3198_v53 = vld [vmem:[%s4762_s0 + $0x3a0] ss:$20 sps:$4 sm:$0xff]   ;;  %v3199_v54 = vld [vmem:[%s4762_s0 + $0x268] ss:$20 sps:$4 sm:$0xff]  }
  0xe1   :  { %1659 = vmatmul.mubr.bf16.gmra.mrb[80].mxu1 %v3140_v55  ;;  %1820 = vmatmul.mubr.bf16.gmra.mrb[48].mxu0 %v3141_v56  ;;  %v3200_v56 = vld [vmem:[%s4762_s0 + $0x3cc] ss:$20 sps:$4 sm:$0xff]  }
  0xe2   :  { %1666 = vmatprep.mubr.bf16.mxu1 %v3142_v57  ;;  %1827 = vmatprep.mubr.bf16.mxu0 %v3144_v58  ;;  %v3202_v57 = vld [vmem:[%s4762_s0 + $0x290] ss:$20 sps:$4 sm:$0xff]  }
  0xe9   :  { %1667 = vmatmul.mubr.bf16.gmra.mrb[84].mxu1 %v3146_v59  ;;  %1828 = vmatmul.mubr.bf16.gmra.mrb[52].mxu0 %v3147_v60 }
  0xea   :  { %1674 = vmatprep.mubr.bf16.mxu1 %v3148_v61  ;;  %1835 = vmatprep.mubr.bf16.mxu0 %v3150_v62  ;;  %v3203_v61 = vld [vmem:[%s4762_s0 + $0x3c8] ss:$20 sps:$4 sm:$0xff]   ;;  %v3204_v62 = vld [vmem:[%s4762_s0 + $0x2b8] ss:$20 sps:$4 sm:$0xff]  }
  0xf1   :  { %1675 = vmatmul.mubr.bf16.gmra.mrb[88].mxu1 %v3152_v63  ;;  %1836 = vmatmul.mubr.bf16.gmra.mrb[56].mxu0 %v3153_v1  ;;  %v3205_v1 = vld [vmem:[%s4762_s0 + $0x3f4] ss:$20 sps:$4 sm:$0xff]  }
  0xf2   :  { %1682 = vmatprep.mubr.bf16.mxu1 %v3154_v2  ;;  %1843 = vmatprep.mubr.bf16.mxu0 %v3156_v3  ;;  %v3207_v2 = vld [vmem:[%s4762_s0 + $0x2e0] ss:$20 sps:$4 sm:$0xff]  }
  0xf9   :  { %1683 = vmatmul.mubr.bf16.gmra.mrb[92].mxu1 %v3158_v4  ;;  %1844 = vmatmul.mubr.bf16.gmra.mrb[60].mxu0 %v3159_v5 }
  0xfa   :  { %1851 = vmatprep.mubr.bf16.mxu0 %v3160_v6  ;;  %2739 = vmatprep.mubr.msk.bf16.mxu1 %vm1305_vm0, %v3162_v7  ;;  %v3208_v6 = vld [vmem:[%s4762_s0 + $0x3f0] ss:$20 sps:$4 sm:$0xff]   ;;  %v3209_v7 = vld [vmem:[%s4762_s0 + $0x308] ss:$20 sps:$4 sm:$0xff]  }
 0x101   :  { %1852 = vmatmul.mubr.bf16.gmra.mrb[64].mxu0 %v3163_v8  ;;  %2740 = vmatmul.mubr.msk.bf16.vlgmr.msra.gmra.mrb[96].mxu1 %vm1305_vm0, %v3164_v9  ;;  %v3210_v9 = vld [vmem:[%s4762_s0 + $0x41c] ss:$20 sps:$4 sm:$0xff]  }
 0x102   :  { %1859 = vmatprep.mubr.bf16.mxu0 %v3165_v10  ;;  %2743 = vmatprep.mubr.msk.bf16.mxu1 %vm1305_vm0, %v3167_v11  ;;  %v3212_v10 = vld [vmem:[%s4762_s0 + $0x330] ss:$20 sps:$4 sm:$0xff]  }
 0x109   :  { %1860 = vmatmul.mubr.bf16.gmra.mrb[68].mxu0 %v3168_v0  ;;  %2744 = vmatmul.mubr.msk.bf16.gmra.mrb[100].mxu1 %vm1305_vm0, %v3169_v12 }
 0x10a   :  { %1867 = vmatprep.mubr.bf16.mxu0 %v3170_v13  ;;  %2747 = vmatprep.mubr.msk.bf16.mxu1 %vm1305_vm0, %v3172_v14  ;;  %v3213_v13 = vld [vmem:[%s4762_s0 + $0x418] ss:$20 sps:$4 sm:$0xff]  }
 0x10b   :  { %v3214_v14 = vld [vmem:[%s4762_s0 + $0x358] ss:$20 sps:$4 sm:$0xff]  }
 0x111   :  { %1868 = vmatmul.mubr.bf16.gmra.mrb[72].mxu0 %v3173_v15  ;;  %2748 = vmatmul.mubr.msk.bf16.gmra.mrb[104].mxu1 %vm1305_vm0, %v3174_v16  ;;  %v3215_v16 = vld [vmem:[%s4762_s0 + $0x444] ss:$20 sps:$4 sm:$0xff]  }
 0x112   :  { %1875 = vmatprep.mubr.bf16.mxu0 %v3175_v17  ;;  %2751 = vmatprep.mubr.msk.bf16.mxu1 %vm1305_vm0, %v3177_v18  ;;  %v3217_v17 = vld [vmem:[%s4762_s0 + $0x380] ss:$20 sps:$4 sm:$0xff]  }
 0x114   :  { %v3760_v19 = vpop.f32.mrb[0].mxu1 }
 0x115   :  { %v1502_v20 = vpop.f32.mrb[1].mxu1 }
 0x116   :  { %v3768_v23 = vpop.f32.mrb[2].mxu1 }
 0x117   :  { %v1505_v26 = vpop.f32.mrb[3].mxu1 }
 0x118   :  { %v3219_v26 = vld [vmem:[%s4762_s0 + $0x3a8] ss:$20 sps:$4 sm:$0xff]  }
 0x119   :  { %1876 = vmatmul.mubr.bf16.gmra.mrb[76].mxu0 %v3178_v21  ;;  %2752 = vmatmul.mubr.msk.bf16.gmra.mrb[108].mxu1 %vm1305_vm0, %v3179_v22 }
 0x11a   :  { %1883 = vmatprep.mubr.bf16.mxu0 %v3180_v24  ;;  %2755 = vmatprep.mubr.msk.bf16.mxu1 %vm1305_vm0, %v3182_v25  ;;  %v3218_v25 = vld [vmem:[%s4762_s0 + $0x440] ss:$20 sps:$4 sm:$0xff]  }
 0x11c   :  { %v3778_v27 = vpop.f32.mrb[4].mxu1 }
 0x11d   :  { %v1510_v28 = vpop.f32.mrb[5].mxu1 }
 0x11e   :  { %v3786_v31 = vpop.f32.mrb[6].mxu1 }
 0x11f   :  { %v1513_v34 = vpop.f32.mrb[7].mxu1 }
 0x121   :  { %1884 = vmatmul.mubr.bf16.gmra.mrb[80].mxu0 %v3183_v29  ;;  %2756 = vmatmul.mubr.msk.bf16.gmra.mrb[112].mxu1 %vm1305_vm0, %v3184_v30  ;;  %v3220_v30 = vld [vmem:[%s4762_s0 + $0x46c] ss:$20 sps:$4 sm:$0xff]  }
 0x122   :  { %1891 = vmatprep.mubr.bf16.mxu0 %v3185_v32  ;;  %2759 = vmatprep.mubr.msk.bf16.mxu1 %vm1305_vm0, %v3187_v33  ;;  %v3222_v32 = vld [vmem:[%s4762_s0 + $0x3d0] ss:$20 sps:$4 sm:$0xff]  }
 0x124   :  { %v3796_v35 = vpop.f32.mrb[8].mxu1 }
 0x125   :  { %v1518_v36 = vpop.f32.mrb[9].mxu1 }
 0x126   :  { %v3804_v39 = vpop.f32.mrb[10].mxu1 }
 0x127   :  { %v1521_v42 = vpop.f32.mrb[11].mxu1 }
 0x128   :  { %v3224_v42 = vld [vmem:[%s4762_s0 + $0x3f8] ss:$20 sps:$4 sm:$0xff]  }
 0x129   :  { %1892 = vmatmul.mubr.bf16.gmra.mrb[84].mxu0 %v3188_v37  ;;  %2760 = vmatmul.mubr.msk.bf16.gmra.mrb[116].mxu1 %vm1305_vm0, %v3189_v38 }
 0x12a   :  { %1899 = vmatprep.mubr.bf16.mxu0 %v3190_v40  ;;  %2763 = vmatprep.mubr.msk.bf16.mxu1 %vm1305_vm0, %v3192_v41  ;;  %v3223_v41 = vld [vmem:[%s4762_s0 + $0x468] ss:$20 sps:$4 sm:$0xff]  }
 0x12c   :  { %v3814_v43 = vpop.f32.mrb[12].mxu1 }
 0x12d   :  { %v1526_v44 = vpop.f32.mrb[13].mxu1 }
 0x12e   :  { %v3822_v47 = vpop.f32.mrb[14].mxu1 }
 0x12f   :  { %v1529_v50 = vpop.f32.mrb[15].mxu1 }
 0x131   :  { %1900 = vmatmul.mubr.bf16.gmra.mrb[88].mxu0 %v3193_v45  ;;  %2764 = vmatmul.mubr.msk.bf16.gmra.mrb[120].mxu1 %vm1305_vm0, %v3194_v46  ;;  %v3225_v46 = vld [vmem:[%s4762_s0 + $0x494] ss:$20 sps:$4 sm:$0xff]  }
 0x132   :  { %1907 = vmatprep.mubr.bf16.mxu0 %v3195_v48  ;;  %2767 = vmatprep.mubr.msk.bf16.mxu1 %vm1305_vm0, %v3197_v49  ;;  %v3227_v48 = vld [vmem:[%s4762_s0 + $0x420] ss:$20 sps:$4 sm:$0xff]  }
 0x134   :  { %v3832_v51 = vpop.f32.mrb[16].mxu1 }
 0x135   :  { %v1534_v52 = vpop.f32.mrb[17].mxu1 }
 0x136   :  { %v3840_v55 = vpop.f32.mrb[18].mxu1 }
 0x137   :  { %v1537_v58 = vpop.f32.mrb[19].mxu1 }
 0x138   :  { %v3229_v58 = vld [vmem:[%s4762_s0 + $0x448] ss:$20 sps:$4 sm:$0xff]  }
 0x139   :  { %1908 = vmatmul.mubr.bf16.gmra.mrb[92].mxu0 %v3198_v53  ;;  %2768 = vmatmul.mubr.msk.bf16.gmra.mrb[124].mxu1 %vm1305_vm0, %v3199_v54 }
 0x13a   :  { %1915 = vmatprep.mubr.bf16.mxu0 %v3200_v56  ;;  %2771 = vmatprep.mubr.msk.bf16.mxu1 %vm1305_vm0, %v3202_v57  ;;  %v3228_v57 = vld [vmem:[%s4762_s0 + $0x490] ss:$20 sps:$4 sm:$0xff]  }
 0x13c   :  { %v3850_v59 = vpop.f32.mrb[20].mxu1 }
 0x13d   :  { %v1542_v60 = vpop.f32.mrb[21].mxu1 }
 0x13e   :  { %v3858_v63 = vpop.f32.mrb[22].mxu1 }
 0x13f   :  { %v1545_v3 = vpop.f32.mrb[23].mxu1 }
 0x141   :  { %1916 = vmatmul.mubr.bf16.gmra.mrb[96].mxu0 %v3203_v61  ;;  %2772 = vmatmul.mubr.msk.bf16.gmra.mrb[128].mxu1 %vm1305_vm0, %v3204_v62  ;;  %v3230_v62 = vld [vmem:[%s4762_s0 + $0x4bc] ss:$20 sps:$4 sm:$0xff]  }
 0x142   :  { %1923 = vmatprep.mubr.bf16.mxu0 %v3205_v1  ;;  %2775 = vmatprep.mubr.msk.bf16.mxu1 %vm1305_vm0, %v3207_v2  ;;  %v3232_v1 = vld [vmem:[%s4762_s0 + $0x470] ss:$20 sps:$4 sm:$0xff]  }
 0x144   :  { %v3868_v4 = vpop.f32.mrb[24].mxu1 }
 0x145   :  { %v1550_v5 = vpop.f32.mrb[25].mxu1 }
 0x146   :  { %v3876_v8 = vpop.f32.mrb[26].mxu1 }
 0x147   :  { %v1553_v11 = vpop.f32.mrb[27].mxu1 }
 0x148   :  { %v3234_v11 = vld [vmem:[%s4762_s0 + $0x498] ss:$20 sps:$4 sm:$0xff]  }
 0x149   :  { %1924 = vmatmul.mubr.bf16.gmra.mrb[100].mxu0 %v3208_v6  ;;  %2776 = vmatmul.mubr.msk.bf16.gmra.mrb[132].mxu1 %vm1305_vm0, %v3209_v7 }
 0x14a   :  { %1931 = vmatprep.mubr.bf16.mxu0 %v3210_v9  ;;  %2779 = vmatprep.mubr.msk.bf16.mxu1 %vm1305_vm0, %v3212_v10  ;;  %v3233_v10 = vld [vmem:[%s4762_s0 + $0x4b8] ss:$20 sps:$4 sm:$0xff]  }
 0x14c   :  { %v3886_v0 = vpop.f32.mrb[28].mxu1 }
 0x14d   :  { %v1558_v12 = vpop.f32.mrb[29].mxu1 }
 0x14e   :  { %v3894_v15 = vpop.f32.mrb[30].mxu1 }
 0x14f   :  { %v1561_v18 = vpop.f32.mrb[31].mxu1 }
 0x151   :  { %1932 = vmatmul.mubr.bf16.gmra.mrb[104].mxu0 %v3213_v13  ;;  %2780 = vmatmul.mubr.msk.bf16.gmra.mrb[136].mxu1 %vm1305_vm0, %v3214_v14  ;;  %v3235_v14 = vld [vmem:[%s4762_s0 + $0x4e4] ss:$20 sps:$4 sm:$0xff]  }
 0x152   :  { %1939 = vmatprep.mubr.bf16.mxu0 %v3215_v16  ;;  %2783 = vmatprep.mubr.msk.bf16.mxu1 %vm1305_vm0, %v3217_v17  ;;  %v3237_v16 = vld [vmem:[%s4762_s0 + $0x4c0] ss:$20 sps:$4 sm:$0xff]  }
 0x154   :  { %v3904_v20 = vpop.f32.mrb[32].mxu1  ;;  %v3906_v21 = vpop.f32.mrb[0].mxu0 }
 0x155   :  { %v1566_v22 = vpop.f32.mrb[33].mxu1  ;;  %v1727_v24 = vpop.f32.mrb[1].mxu0 }
 0x156   :  { %v3914_v28 = vpop.f32.mrb[34].mxu1  ;;  %v3916_v29 = vpop.f32.mrb[2].mxu0 }
 0x157   :  { %v1569_v33 = vpop.f32.mrb[35].mxu1  ;;  %v1730_v34 = vpop.f32.mrb[3].mxu0 }
 0x159   :  { %1940 = vmatmul.mubr.bf16.gmra.mrb[108].mxu0 %v3218_v25  ;;  %2784 = vmatmul.mubr.msk.bf16.gmra.mrb[140].mxu1 %vm1305_vm0, %v3219_v26 }
 0x15a   :  { %1947 = vmatprep.mubr.bf16.mxu0 %v3220_v30  ;;  %2787 = vmatprep.mubr.msk.bf16.mxu1 %vm1305_vm0, %v3222_v32  ;;  %v3238_v30 = vld [vmem:[%s4762_s0 + $0x4e0] ss:$20 sps:$4 sm:$0xff]   ;;  %v3239_v32 = vld [vmem:[%s4762_s0 + $0x4e8] ss:$20 sps:$4 sm:$0xff]  }
 0x15c   :  { %v3926_v36 = vpop.f32.mrb[36].mxu1  ;;  %v3928_v37 = vpop.f32.mrb[4].mxu0 }
 0x15d   :  { %v1574_v38 = vpop.f32.mrb[37].mxu1  ;;  %v1735_v40 = vpop.f32.mrb[5].mxu0 }
 0x15e   :  { %v3936_v44 = vpop.f32.mrb[38].mxu1  ;;  %v3938_v45 = vpop.f32.mrb[6].mxu0 }
 0x15f   :  { %v1577_v49 = vpop.f32.mrb[39].mxu1  ;;  %v1738_v50 = vpop.f32.mrb[7].mxu0 }
 0x161   :  { %1948 = vmatmul.mubr.bf16.gmra.mrb[112].mxu0 %v3223_v41  ;;  %2788 = vmatmul.mubr.msk.bf16.gmra.mrb[144].mxu1 %vm1305_vm0, %v3224_v42 }
 0x162   :  { %1955 = vmatprep.mubr.bf16.mxu0 %v3225_v46  ;;  %2791 = vmatprep.mubr.msk.bf16.mxu1 %vm1305_vm0, %v3227_v48 }
 0x164   :  { %v3948_v52 = vpop.f32.mrb[40].mxu1  ;;  %v3950_v53 = vpop.f32.mrb[8].mxu0 }
 0x165   :  { %v1582_v54 = vpop.f32.mrb[41].mxu1  ;;  %v1743_v56 = vpop.f32.mrb[9].mxu0 }
 0x166   :  { %v3958_v60 = vpop.f32.mrb[42].mxu1  ;;  %v3960_v61 = vpop.f32.mrb[10].mxu0 }
 0x167   :  { %v1585_v2 = vpop.f32.mrb[43].mxu1  ;;  %v1746_v3 = vpop.f32.mrb[11].mxu0 }
 0x169   :  { %1956 = vmatmul.mubr.bf16.gmra.mrb[116].mxu0 %v3228_v57  ;;  %2792 = vmatmul.mubr.msk.bf16.gmra.mrb[148].mxu1 %vm1305_vm0, %v3229_v58 }
 0x16a   :  { %1963 = vmatprep.mubr.bf16.mxu0 %v3230_v62  ;;  %2795 = vmatprep.mubr.msk.bf16.mxu1 %vm1305_vm0, %v3232_v1 }
 0x16c   :  { %v3970_v5 = vpop.f32.mrb[44].mxu1  ;;  %v3972_v6 = vpop.f32.mrb[12].mxu0 }
 0x16d   :  { %v1590_v7 = vpop.f32.mrb[45].mxu1  ;;  %v1751_v9 = vpop.f32.mrb[13].mxu0 }
 0x16e   :  { %v3980_v12 = vpop.f32.mrb[46].mxu1  ;;  %v3982_v13 = vpop.f32.mrb[14].mxu0 }
 0x16f   :  { %v1593_v17 = vpop.f32.mrb[47].mxu1  ;;  %v1754_v18 = vpop.f32.mrb[15].mxu0 }
 0x171   :  { %1964 = vmatmul.mubr.bf16.gmra.mrb[120].mxu0 %v3233_v10  ;;  %2796 = vmatmul.mubr.msk.bf16.gmra.mrb[152].mxu1 %vm1305_vm0, %v3234_v11 }
 0x172   :  { %1971 = vmatprep.mubr.bf16.mxu0 %v3235_v14  ;;  %2799 = vmatprep.mubr.msk.bf16.mxu1 %vm1305_vm0, %v3237_v16 }
 0x174   :  { %v3992_v22 = vpop.f32.mrb[48].mxu1  ;;  %v3994_v24 = vpop.f32.mrb[16].mxu0 }
 0x175   :  { %v1598_v25 = vpop.f32.mrb[49].mxu1  ;;  %v1759_v26 = vpop.f32.mrb[17].mxu0 }
 0x176   :  { %v4002_v33 = vpop.f32.mrb[50].mxu1  ;;  %v4004_v34 = vpop.f32.mrb[18].mxu0 }
 0x177   :  { %v1601_v38 = vpop.f32.mrb[51].mxu1  ;;  %v1762_v40 = vpop.f32.mrb[19].mxu0 }
 0x179   :  { %1972 = vmatmul.mubr.bf16.gmra.mrb[124].mxu0 %v3238_v30  ;;  %2800 = vmatmul.mubr.msk.bf16.gmra.mrb[156].mxu1 %vm1305_vm0, %v3239_v32  ;;  %v4034_v30 = vld [vmem:[%s4763_s2] ss:$0 sm:$0xff] }
 0x17a   :  { %v1501_v32 = vadd.f32 %v4034_v30, %v3760_v19  ;;  %v1509_v19 = vadd.f32 %v4034_v30, %v3778_v27  ;;  %v1517_v27 = vadd.f32 %v4034_v30, %v3796_v35  ;;  %v1525_v35 = vadd.f32 %v4034_v30, %v3814_v43 }
 0x17b   :  { %v1533_v43 = vadd.f32 %v4034_v30, %v3832_v51  ;;  %v1541_v51 = vadd.f32 %v4034_v30, %v3850_v59  ;;  %v1549_v59 = vadd.f32 %v4034_v30, %v3868_v4  ;;  %v1557_v4 = vadd.f32 %v4034_v30, %v3886_v0 }
 0x17c   :  { %v4007_v41 = vpop.f32.mrb[52].mxu1  ;;  %v4009_v42 = vpop.f32.mrb[20].mxu0  ;;  %v1565_v0 = vadd.f32 %v4034_v30, %v3904_v20 }
 0x17d   :  { %v1606_v46 = vpop.f32.mrb[53].mxu1  ;;  %v1767_v48 = vpop.f32.mrb[21].mxu0 }
 0x17e   :  { %v4011_v49 = vpop.f32.mrb[54].mxu1  ;;  %v4013_v50 = vpop.f32.mrb[22].mxu0  ;;  %v1504_v46 = vadd.f32 %v4034_v30, %v3768_v23  ;;  %v1512_v23 = vadd.f32 %v4034_v30, %v3786_v31  ;;  %v1520_v31 = vadd.f32 %v4034_v30, %v3804_v39  ;;  %v1528_v39 = vadd.f32 %v4034_v30, %v3822_v47 }
 0x17f   :  { %v1609_v54 = vpop.f32.mrb[55].mxu1  ;;  %v1770_v56 = vpop.f32.mrb[23].mxu0  ;;  %v1536_v47 = vadd.f32 %v4034_v30, %v3840_v55  ;;  %v1544_v55 = vadd.f32 %v4034_v30, %v3858_v63  ;;  %v1552_v63 = vadd.f32 %v4034_v30, %v3876_v8  ;;  %v1560_v8 = vadd.f32 %v4034_v30, %v3894_v15 }
 0x180   :  { %v2835_v15 = vadd.f32 %v4034_v30, %v3906_v21  ;;  %v2269_v21 = vld [vmem:[%s4764_s3] sm:$0xff] }
 0x184   :  { %v4015_v57 = vpop.f32.mrb[56].mxu1  ;;  %v4017_v58 = vpop.f32.mrb[24].mxu0 }
 0x185   :  { %v1614_v62 = vpop.f32.mrb[57].mxu1  ;;  %v1775_v1 = vpop.f32.mrb[25].mxu0 }
 0x186   :  { %v4019_v2 = vpop.f32.mrb[58].mxu1  ;;  %v4021_v3 = vpop.f32.mrb[26].mxu0 }
 0x187   :  { %v1617_v7 = vpop.f32.mrb[59].mxu1  ;;  %v1778_v9 = vpop.f32.mrb[27].mxu0 }
 0x18c   :  { %v4023_v10 = vpop.f32.mrb[60].mxu1  ;;  %v4025_v11 = vpop.f32.mrb[28].mxu0 }
 0x18d   :  { %v1622_v14 = vpop.f32.mrb[61].mxu1  ;;  %v1783_v16 = vpop.f32.mrb[29].mxu0 }
 0x18e   :  { %v4027_v17 = vpop.f32.mrb[62].mxu1  ;;  %v4029_v18 = vpop.f32.mrb[30].mxu0 }
 0x18f   :  { %v1625_v25 = vpop.f32.mrb[63].mxu1  ;;  %v1786_v26 = vpop.f32.mrb[31].mxu0 }
 0x194   :  { %v4038_v38 = vpop.f32.mrb[64].mxu1  ;;  %v1789_v40 = vpop.f32.mrb[32].mxu0 }
 0x195   :  { %v4042_v48 = vadd.f32 %v1789_v40, %v1501_v32  ;;  %v1630_v54 = vpop.f32.mrb[65].mxu1  ;;  %v1791_v56 = vpop.f32.mrb[33].mxu0 }
 0x196   :  { %v4044_v62 = vpop.f32.mrb[66].mxu1  ;;  %v1792_v1 = vpop.f32.mrb[34].mxu0 }
 0x197   :  { %4766 = vst [vmem:[#allocation2_spill] sm:$0xff] %v4044_v62  ;;  %v4046_v7 = vadd.f32 %v1792_v1, %v1504_v46  ;;  %v1633_v9 = vpop.f32.mrb[67].mxu1  ;;  %v1794_v14 = vpop.f32.mrb[35].mxu0 }
 0x19c   :  { %v4050_v16 = vpop.f32.mrb[68].mxu1  ;;  %v1797_v25 = vpop.f32.mrb[36].mxu0 }
 0x19d   :  { %4767 = vst [vmem:[#allocation3_spill] sm:$0xff] %v4050_v16  ;;  %v4054_v26 = vadd.f32 %v1797_v25, %v1509_v19  ;;  %v1638_v32 = vpop.f32.mrb[69].mxu1  ;;  %v1799_v40 = vpop.f32.mrb[37].mxu0 }
 0x19e   :  { %v4056_v54 = vpop.f32.mrb[70].mxu1  ;;  %v1800_v56 = vpop.f32.mrb[38].mxu0 }
 0x19f   :  { %4768 = vst [vmem:[#allocation4_spill] sm:$0xff] %v4056_v54  ;;  %v4058_v46 = vadd.f32 %v1800_v56, %v1512_v23  ;;  %v1641_v1 = vpop.f32.mrb[71].mxu1  ;;  %v1802_v9 = vpop.f32.mrb[39].mxu0 }
 0x1a4   :  { %v4062_v14 = vpop.f32.mrb[72].mxu1  ;;  %v1805_v16 = vpop.f32.mrb[40].mxu0 }
 0x1a5   :  { %4769 = vst [vmem:[#allocation5_spill] sm:$0xff] %v4062_v14  ;;  %v4066_v19 = vadd.f32 %v1805_v16, %v1517_v27  ;;  %v1646_v25 = vpop.f32.mrb[73].mxu1  ;;  %v1807_v32 = vpop.f32.mrb[41].mxu0 }
 0x1a6   :  { %v4068_v40 = vpop.f32.mrb[74].mxu1  ;;  %v1808_v54 = vpop.f32.mrb[42].mxu0 }
 0x1a7   :  { %4770 = vst [vmem:[#allocation6_spill] sm:$0xff] %v4068_v40  ;;  %v4070_v23 = vadd.f32 %v1808_v54, %v1520_v31  ;;  %v1649_v56 = vpop.f32.mrb[75].mxu1  ;;  %v1810_v1 = vpop.f32.mrb[43].mxu0 }
 0x1ac   :  { %v4074_v9 = vpop.f32.mrb[76].mxu1  ;;  %v1813_v14 = vpop.f32.mrb[44].mxu0 }
 0x1ad   :  { %4771 = vst [vmem:[#allocation7_spill] sm:$0xff] %v4074_v9  ;;  %v4078_v16 = vadd.f32 %v1813_v14, %v1525_v35  ;;  %v1654_v27 = vpop.f32.mrb[77].mxu1  ;;  %v1815_v25 = vpop.f32.mrb[45].mxu0 }
 0x1ae   :  { %v4080_v32 = vpop.f32.mrb[78].mxu1  ;;  %v1816_v40 = vpop.f32.mrb[46].mxu0 }
 0x1af   :  { %4772 = vst [vmem:[#allocation8_spill] sm:$0xff] %v4080_v32  ;;  %v4082_v54 = vadd.f32 %v1816_v40, %v1528_v39  ;;  %v1657_v31 = vpop.f32.mrb[79].mxu1  ;;  %v1818_v56 = vpop.f32.mrb[47].mxu0 }
 0x1b4   :  { %v4086_v1 = vpop.f32.mrb[80].mxu1  ;;  %v1821_v9 = vpop.f32.mrb[48].mxu0 }
 0x1b5   :  { %4773 = vst [vmem:[#allocation9_spill] sm:$0xff] %v4086_v1  ;;  %v4090_v14 = vadd.f32 %v1821_v9, %v1533_v43  ;;  %v1662_v35 = vpop.f32.mrb[81].mxu1  ;;  %v1823_v27 = vpop.f32.mrb[49].mxu0 }
 0x1b6   :  { %v4092_v25 = vpop.f32.mrb[82].mxu1  ;;  %v1824_v32 = vpop.f32.mrb[50].mxu0 }
 0x1b7   :  { %4774 = vst [vmem:[#allocation10_spill] sm:$0xff] %v4092_v25  ;;  %v4094_v40 = vadd.f32 %v1824_v32, %v1536_v47  ;;  %v1665_v39 = vpop.f32.mrb[83].mxu1  ;;  %v1826_v31 = vpop.f32.mrb[51].mxu0 }
 0x1bc   :  { %v4098_v56 = vpop.f32.mrb[84].mxu1  ;;  %v1829_v1 = vpop.f32.mrb[52].mxu0 }
 0x1bd   :  { %4775 = vst [vmem:[#allocation11_spill] sm:$0xff] %v4098_v56  ;;  %v4102_v9 = vadd.f32 %v1829_v1, %v1541_v51  ;;  %v1670_v43 = vpop.f32.mrb[85].mxu1  ;;  %v1831_v35 = vpop.f32.mrb[53].mxu0 }
 0x1be   :  { %v4104_v27 = vpop.f32.mrb[86].mxu1  ;;  %v1832_v25 = vpop.f32.mrb[54].mxu0 }
 0x1bf   :  { %4776 = vst [vmem:[#allocation12_spill] sm:$0xff] %v4104_v27  ;;  %v4106_v32 = vadd.f32 %v1832_v25, %v1544_v55  ;;  %v1673_v47 = vpop.f32.mrb[87].mxu1  ;;  %v1834_v39 = vpop.f32.mrb[55].mxu0 }
 0x1c4   :  { %v4110_v31 = vpop.f32.mrb[88].mxu1  ;;  %v1837_v56 = vpop.f32.mrb[56].mxu0 }
 0x1c5   :  { %4777 = vst [vmem:[#allocation13_spill] sm:$0xff] %v4110_v31  ;;  %v4114_v1 = vadd.f32 %v1837_v56, %v1549_v59  ;;  %v1678_v51 = vpop.f32.mrb[89].mxu1  ;;  %v1839_v43 = vpop.f32.mrb[57].mxu0 }
 0x1c6   :  { %v4116_v35 = vpop.f32.mrb[90].mxu1  ;;  %v1840_v27 = vpop.f32.mrb[58].mxu0 }
 0x1c7   :  { %4778 = vst [vmem:[#allocation14_spill] sm:$0xff] %v4116_v35  ;;  %v4118_v25 = vadd.f32 %v1840_v27, %v1552_v63  ;;  %v1681_v55 = vpop.f32.mrb[91].mxu1  ;;  %v1842_v47 = vpop.f32.mrb[59].mxu0 }
 0x1c8   :  { %v2837_v47 = vadd.f32 %v4034_v30, %v3928_v37 }
 0x1cc   :  { %v4122_v39 = vpop.f32.mrb[92].mxu1  ;;  %v1845_v31 = vpop.f32.mrb[60].mxu0 }
 0x1cd   :  { %4779 = vst [vmem:[#allocation15_spill] sm:$0xff] %v4122_v39  ;;  %v4126_v56 = vadd.f32 %v1845_v31, %v1557_v4  ;;  %v1686_v59 = vpop.f32.mrb[93].mxu1  ;;  %v1847_v51 = vpop.f32.mrb[61].mxu0 }
 0x1ce   :  { %v4128_v43 = vpop.f32.mrb[94].mxu1  ;;  %v1848_v35 = vpop.f32.mrb[62].mxu0  ;;  %v2271_v59 = vld [vmem:[%s4764_s3 + $0x10] sm:$0xff] }
 0x1cf   :  { %4780 = vst [vmem:[#allocation16_spill] sm:$0xff] %v4128_v43  ;;  %v4130_v27 = vadd.f32 %v1848_v35, %v1560_v8  ;;  %v1689_v63 = vpop.f32.mrb[95].mxu1  ;;  %v1850_v55 = vpop.f32.mrb[63].mxu0  ;;  %v1568_v35 = vadd.f32 %v4034_v30, %v3914_v28  ;;  %v2838_v8 = vadd.f32 %v4034_v30, %v3938_v45  ;;  %v2272_v28 = vld [vmem:[%s4764_s3 + $0x18] sm:$0xff] }
 0x1d0   :  { %v2836_v55 = vadd.f32 %v4034_v30, %v3916_v29 }
 0x1d4   :  { %v1853_v31 = vpop.f32.mrb[64].mxu0  ;;  %v2741_v4 = vpop.f32.mrb[96].mxu1 }
 0x1d5   :  { %v4145_v51 = vadd.f32 %v1853_v31, %v1565_v0  ;;  %v2023_v20 = vadd.f32 %v2837_v47, %v2741_v4  ;;  %v1855_v63 = vpop.f32.mrb[65].mxu0  ;;  %v2014_v37 = vpop.f32.mrb[97].mxu1 }
 0x1d6   :  { %v2015_v43 = vadd.f32 %v2835_v15, %v2014_v37  ;;  %v1856_v39 = vpop.f32.mrb[66].mxu0  ;;  %v2742_v62 = vpop.f32.mrb[98].mxu1  ;;  %v2270_v63 = vld [vmem:[%s4764_s3 + $0x8] sm:$0xff] }
 0x1d7   :  { %4781 = vst [vmem:[#allocation17_spill] sm:$0xff] %v4145_v51  ;;  %v2335_v45 = vadd.f32 %v2271_v59, %v2023_v20  ;;  %v4155_v0 = vadd.f32 %v1856_v39, %v1568_v35  ;;  %v2026_v47 = vadd.f32 %v2838_v8, %v2742_v62  ;;  %v1858_v31 = vpop.f32.mrb[67].mxu0  ;;  %v2017_v4 = vpop.f32.mrb[99].mxu1  ;;  %v1573_v39 = vadd.f32 %v4034_v30, %v3926_v36  ;;  %v2275_v36 = vld [vmem:[%s4764_s3 + $0x30] sm:$0xff] }
 0x1d8   :  { %v2333_v51 = vadd.f32 %v2269_v21, %v2015_v43  ;;  %v2018_v29 = vadd.f32 %v2836_v55, %v2017_v4  ;;  %v2841_v59 = vadd.f32 %v4034_v30, %v3972_v6  ;;  %v2839_v43 = vadd.f32 %v4034_v30, %v3950_v53  ;;  %v2273_v55 = vld [vmem:[%s4764_s3 + $0x20] sm:$0xff] }
 0x1d9   :  { %2400 = vst.msk [vmem:[%s4765_s4 + $0x10] sm:$0xff] %vm2397_vm1, %v2335_v45  ;;  %v2336_v15 = vadd.f32 %v2272_v28, %v2026_v47  ;;  %v1576_v6 = vadd.f32 %v4034_v30, %v3936_v44  ;;  %v2840_v28 = vadd.f32 %v4034_v30, %v3960_v61  ;;  %v2276_v44 = vld [vmem:[%s4764_s3 + $0x38] sm:$0xff] }
 0x1da   :  { %2398 = vst.msk [vmem:[%s4765_s4] sm:$0xff] %vm2397_vm1, %v2333_v51  ;;  %v2334_v62 = vadd.f32 %v2270_v63, %v2018_v29  ;;  %v2842_v51 = vadd.f32 %v4034_v30, %v3982_v13 }
 0x1db   :  { %2401 = vst.msk [vmem:[%s4765_s4 + $0x18] sm:$0xff] %vm2397_vm1, %v2336_v15 }
 0x1dc   :  { %2399 = vst.msk [vmem:[%s4765_s4 + $0x8] sm:$0xff] %vm2397_vm1, %v2334_v62  ;;  %v1861_v35 = vpop.f32.mrb[68].mxu0  ;;  %v2745_v8 = vpop.f32.mrb[100].mxu1  ;;  %v2274_v62 = vld [vmem:[%s4764_s3 + $0x28] sm:$0xff] }
 0x1dd   :  { %v4189_v20 = vadd.f32 %v1861_v35, %v1573_v39  ;;  %v2039_v53 = vadd.f32 %v2841_v59, %v2745_v8  ;;  %v1863_v37 = vpop.f32.mrb[69].mxu0  ;;  %v2030_v21 = vpop.f32.mrb[101].mxu1  ;;  %v1581_v35 = vadd.f32 %v4034_v30, %v3948_v52  ;;  %v2845_v8 = vadd.f32 %v4034_v30, %v4009_v42  ;;  %v2279_v52 = vld [vmem:[%s4764_s3 + $0x50] sm:$0xff] }
 0x1de   :  { %v2031_v45 = vadd.f32 %v2839_v43, %v2030_v21  ;;  %v1864_v47 = vpop.f32.mrb[70].mxu0  ;;  %v2746_v31 = vpop.f32.mrb[102].mxu1  ;;  %v1584_v42 = vadd.f32 %v4034_v30, %v3958_v60  ;;  %v2280_v60 = vld [vmem:[%s4764_s3 + $0x58] sm:$0xff] }
 0x1df   :  { %v2339_v13 = vadd.f32 %v2275_v36, %v2039_v53  ;;  %v4199_v4 = vadd.f32 %v1864_v47, %v1576_v6  ;;  %v2042_v63 = vadd.f32 %v2842_v51, %v2746_v31  ;;  %v1866_v29 = vpop.f32.mrb[71].mxu0  ;;  %v2033_v15 = vpop.f32.mrb[103].mxu1  ;;  %v2843_v36 = vadd.f32 %v4034_v30, %v3994_v24 }
 0x1e0   :  { %v2337_v39 = vadd.f32 %v2273_v55, %v2031_v45  ;;  %v2034_v59 = vadd.f32 %v2840_v28, %v2033_v15  ;;  %v2846_v53 = vadd.f32 %v4034_v30, %v4013_v50  ;;  %v2277_v28 = vld [vmem:[%s4764_s3 + $0x40] sm:$0xff]  ;;  %v2844_v45 = vadd.f32 %v4034_v30, %v4004_v34 }
 0x1e1   :  { %2404 = vst.msk [vmem:[%s4765_s4 + $0x30] sm:$0xff] %vm2397_vm1, %v2339_v13  ;;  %v2340_v61 = vadd.f32 %v2276_v44, %v2042_v63 }
 0x1e2   :  { %2402 = vst.msk [vmem:[%s4765_s4 + $0x20] sm:$0xff] %vm2397_vm1, %v2337_v39  ;;  %v2338_v43 = vadd.f32 %v2274_v62, %v2034_v59  ;;  %v2278_v62 = vld [vmem:[%s4764_s3 + $0x48] sm:$0xff] }
 0x1e3   :  { %2405 = vst.msk [vmem:[%s4765_s4 + $0x38] sm:$0xff] %vm2397_vm1, %v2340_v61 }
 0x1e4   :  { %2403 = vst.msk [vmem:[%s4765_s4 + $0x28] sm:$0xff] %vm2397_vm1, %v2338_v43  ;;  %v1869_v6 = vpop.f32.mrb[72].mxu0  ;;  %v2749_v51 = vpop.f32.mrb[104].mxu1  ;;  %v1589_v43 = vadd.f32 %v4034_v30, %v3970_v5  ;;  %v2283_v5 = vld [vmem:[%s4764_s3 + $0x70] sm:$0xff] }
 0x1e5   :  { %v4233_v37 = vadd.f32 %v1869_v6, %v1581_v35  ;;  %v2055_v24 = vadd.f32 %v2845_v8, %v2749_v51  ;;  %v1871_v21 = vpop.f32.mrb[73].mxu0  ;;  %v2046_v55 = vpop.f32.mrb[105].mxu1  ;;  %v2849_v35 = vadd.f32 %v4034_v30, %v4025_v11  ;;  %v2847_v8 = vadd.f32 %v4034_v30, %v4017_v58 }
 0x1e6   :  { %v2047_v47 = vadd.f32 %v2843_v36, %v2046_v55  ;;  %v1872_v31 = vpop.f32.mrb[74].mxu0  ;;  %v2750_v44 = vpop.f32.mrb[106].mxu1  ;;  %v1592_v11 = vadd.f32 %v4034_v30, %v3980_v12  ;;  %v2850_v51 = vadd.f32 %v4034_v30, %v4029_v18  ;;  %v2848_v21 = vadd.f32 %v4034_v30, %v4021_v3  ;;  %v2284_v12 = vld [vmem:[%s4764_s3 + $0x78] sm:$0xff] }
 0x1e7   :  { %v2343_v50 = vadd.f32 %v2279_v52, %v2055_v24  ;;  %v4243_v13 = vadd.f32 %v1872_v31, %v1584_v42  ;;  %v2058_v63 = vadd.f32 %v2846_v53, %v2750_v44  ;;  %v1874_v29 = vpop.f32.mrb[75].mxu0  ;;  %v2049_v15 = vpop.f32.mrb[107].mxu1  ;;  %v2281_v24 = vld [vmem:[%s4764_s3 + $0x60] sm:$0xff] }
 0x1e8   :  { %v2341_v39 = vadd.f32 %v2277_v28, %v2047_v47  ;;  %v2050_v59 = vadd.f32 %v2844_v45, %v2049_v15 }
 0x1e9   :  { %2408 = vst.msk [vmem:[%s4765_s4 + $0x50] sm:$0xff] %vm2397_vm1, %v2343_v50  ;;  %v2344_v34 = vadd.f32 %v2280_v60, %v2058_v63  ;;  %v2282_v50 = vld [vmem:[%s4764_s3 + $0x68] sm:$0xff] }
 0x1ea   :  { %2406 = vst.msk [vmem:[%s4765_s4 + $0x40] sm:$0xff] %vm2397_vm1, %v2341_v39  ;;  %v2342_v61 = vadd.f32 %v2278_v62, %v2050_v59  ;;  %v1597_v62 = vadd.f32 %v4034_v30, %v3992_v22 }
 0x1eb   :  { %2409 = vst.msk [vmem:[%s4765_s4 + $0x58] sm:$0xff] %vm2397_vm1, %v2344_v34  ;;  %v2287_v34 = vld [vmem:[%s4764_s3 + $0x90] sm:$0xff] }
 0x1ec   :  { %2407 = vst.msk [vmem:[%s4765_s4 + $0x48] sm:$0xff] %vm2397_vm1, %v2342_v61  ;;  %v1877_v36 = vpop.f32.mrb[76].mxu0  ;;  %v2753_v6 = vpop.f32.mrb[108].mxu1  ;;  %v1600_v61 = vadd.f32 %v4034_v30, %v4002_v33 }
 0x1ed   :  { %v4277_v52 = vadd.f32 %v1877_v36, %v1589_v43  ;;  %v2071_v58 = vadd.f32 %v2849_v35, %v2753_v6  ;;  %v1879_v42 = vpop.f32.mrb[77].mxu0  ;;  %v2062_v53 = vpop.f32.mrb[109].mxu1  ;;  %v2285_v36 = vld [vmem:[%s4764_s3 + $0x80] sm:$0xff] }
 0x1ee   :  { %v2063_v55 = vadd.f32 %v2847_v8, %v2062_v53  ;;  %v1880_v28 = vpop.f32.mrb[78].mxu0  ;;  %v2754_v45 = vpop.f32.mrb[110].mxu1 }
 0x1ef   :  { %v2347_v18 = vadd.f32 %v2283_v5, %v2071_v58  ;;  %v4287_v47 = vadd.f32 %v1880_v28, %v1592_v11  ;;  %v2074_v31 = vadd.f32 %v2850_v51, %v2754_v45  ;;  %v1882_v44 = vpop.f32.mrb[79].mxu0  ;;  %v2065_v60 = vpop.f32.mrb[111].mxu1  ;;  %v2288_v51 = vld [vmem:[%s4764_s3 + $0x98] sm:$0xff]  ;;  %v1605_v28 = vadd.f32 %v4034_v30, %v4007_v41 }
 0x1f0   :  { %v2345_v63 = vadd.f32 %v2281_v24, %v2063_v55  ;;  %v2066_v29 = vadd.f32 %v2848_v21, %v2065_v60  ;;  %v2286_v24 = vld [vmem:[%s4764_s3 + $0x88] sm:$0xff] }
 0x1f1   :  { %2412 = vst.msk [vmem:[%s4765_s4 + $0x70] sm:$0xff] %vm2397_vm1, %v2347_v18  ;;  %v2348_v3 = vadd.f32 %v2284_v12, %v2074_v31  ;;  %v2291_v12 = vld [vmem:[%s4764_s3 + $0xb0] sm:$0xff]  ;;  %v1608_v18 = vadd.f32 %v4034_v30, %v4011_v49 }
 0x1f2   :  { %2410 = vst.msk [vmem:[%s4765_s4 + $0x60] sm:$0xff] %vm2397_vm1, %v2345_v63  ;;  %v2346_v15 = vadd.f32 %v2282_v50, %v2066_v29  ;;  %v2289_v50 = vld [vmem:[%s4764_s3 + $0xa0] sm:$0xff] }
 0x1f3   :  { %2413 = vst.msk [vmem:[%s4765_s4 + $0x78] sm:$0xff] %vm2397_vm1, %v2348_v3 }
 0x1f4   :  { %2411 = vst.msk [vmem:[%s4765_s4 + $0x68] sm:$0xff] %vm2397_vm1, %v2346_v15  ;;  %v1885_v39 = vpop.f32.mrb[80].mxu0  ;;  %v2757_v59 = vpop.f32.mrb[112].mxu1  ;;  %v2292_v15 = vld [vmem:[%s4764_s3 + $0xb8] sm:$0xff] }
 0x1f5   :  { %v4315_v22 = vadd.f32 %v1885_v39, %v1597_v62  ;;  %v2087_v43 = vadd.f32 %v2757_v59, %v4054_v26  ;;  %v1887_v35 = vpop.f32.mrb[81].mxu0  ;;  %v2078_v8 = vpop.f32.mrb[113].mxu1 }
 0x1f6   :  { %v2079_v6 = vadd.f32 %v2078_v8, %v4042_v48  ;;  %v1888_v5 = vpop.f32.mrb[82].mxu0  ;;  %v2758_v11 = vpop.f32.mrb[114].mxu1  ;;  %v1613_v35 = vadd.f32 %v4034_v30, %v4015_v57 }
 0x1f7   :  { %v2351_v58 = vadd.f32 %v2287_v34, %v2087_v43  ;;  %v4325_v33 = vadd.f32 %v1888_v5, %v1600_v61  ;;  %v2090_v42 = vadd.f32 %v2758_v11, %v4058_v46  ;;  %v1890_v26 = vpop.f32.mrb[83].mxu0  ;;  %v2081_v53 = vpop.f32.mrb[115].mxu1  ;;  %v2290_v34 = vld [vmem:[%s4764_s3 + $0xa8] sm:$0xff] }
 0x1f8   :  { %v2349_v21 = vadd.f32 %v2285_v36, %v2079_v6  ;;  %v2082_v48 = vadd.f32 %v2081_v53, %v4046_v7  ;;  %v2295_v36 = vld [vmem:[%s4764_s3 + $0xd0] sm:$0xff]  ;;  %v1616_v6 = vadd.f32 %v4034_v30, %v4019_v2 }
 0x1f9   :  { %2416 = vst.msk [vmem:[%s4765_s4 + $0x90] sm:$0xff] %vm2397_vm1, %v2351_v58  ;;  %v2352_v55 = vadd.f32 %v2288_v51, %v2090_v42  ;;  %v2293_v58 = vld [vmem:[%s4764_s3 + $0xc0] sm:$0xff] }
 0x1fa   :  { %2414 = vst.msk [vmem:[%s4765_s4 + $0x80] sm:$0xff] %vm2397_vm1, %v2349_v21  ;;  %v2350_v46 = vadd.f32 %v2286_v24, %v2082_v48  ;;  %v2296_v24 = vld [vmem:[%s4764_s3 + $0xd8] sm:$0xff] }
 0x1fb   :  { %2417 = vst.msk [vmem:[%s4765_s4 + $0x98] sm:$0xff] %vm2397_vm1, %v2352_v55 }
 0x1fc   :  { %2415 = vst.msk [vmem:[%s4765_s4 + $0x88] sm:$0xff] %vm2397_vm1, %v2350_v46  ;;  %v1893_v7 = vpop.f32.mrb[84].mxu0  ;;  %v2761_v45 = vpop.f32.mrb[116].mxu1  ;;  %v2294_v46 = vld [vmem:[%s4764_s3 + $0xc8] sm:$0xff] }
 0x1fd   :  { %v4355_v41 = vadd.f32 %v1893_v7, %v1605_v28  ;;  %v2103_v31 = vadd.f32 %v2761_v45, %v4078_v16  ;;  %v1895_v44 = vpop.f32.mrb[85].mxu0  ;;  %v2094_v60 = vpop.f32.mrb[117].mxu1  ;;  %v1621_v45 = vadd.f32 %v4034_v30, %v4023_v10 }
 0x1fe   :  { %v2095_v63 = vadd.f32 %v2094_v60, %v4066_v19  ;;  %v1896_v29 = vpop.f32.mrb[86].mxu0  ;;  %v2762_v3 = vpop.f32.mrb[118].mxu1 }
 0x1ff   :  { %v2355_v62 = vadd.f32 %v2291_v12, %v2103_v31  ;;  %v4365_v49 = vadd.f32 %v1896_v29, %v1608_v18  ;;  %v2106_v39 = vadd.f32 %v2762_v3, %v4082_v54  ;;  %v1898_v16 = vpop.f32.mrb[87].mxu0  ;;  %v2097_v59 = vpop.f32.mrb[119].mxu1  ;;  %v2299_v18 = vld [vmem:[%s4764_s3 + $0xf0] sm:$0xff]  ;;  %v1624_v31 = vadd.f32 %v4034_v30, %v4027_v17 }
 0x200   :  { %v2353_v61 = vadd.f32 %v2289_v50, %v2095_v63  ;;  %v2098_v19 = vadd.f32 %v2097_v59, %v4070_v23  ;;  %v2297_v63 = vld [vmem:[%s4764_s3 + $0xe0] sm:$0xff] }
 0x201   :  { %2420 = vst.msk [vmem:[%s4765_s4 + $0xb0] sm:$0xff] %vm2397_vm1, %v2355_v62  ;;  %v2356_v43 = vadd.f32 %v2292_v15, %v2106_v39  ;;  %v2300_v62 = vld [vmem:[%s4764_s3 + $0xf8] sm:$0xff] }
 0x202   :  { %2418 = vst.msk [vmem:[%s4765_s4 + $0xa0] sm:$0xff] %vm2397_vm1, %v2353_v61  ;;  %v2354_v54 = vadd.f32 %v2290_v34, %v2098_v19  ;;  %v2298_v34 = vld [vmem:[%s4764_s3 + $0xe8] sm:$0xff] }
 0x203   :  { %2421 = vst.msk [vmem:[%s4765_s4 + $0xb8] sm:$0xff] %vm2397_vm1, %v2356_v43  ;;  %v1629_v43 = vadd.f32 %v4034_v30, %v4038_v38 }
 0x204   :  { %2419 = vst.msk [vmem:[%s4765_s4 + $0xa8] sm:$0xff] %vm2397_vm1, %v2354_v54  ;;  %v1901_v23 = vpop.f32.mrb[88].mxu0  ;;  %v2765_v8 = vpop.f32.mrb[120].mxu1 }
 0x205   :  { %v4395_v57 = vadd.f32 %v1901_v23, %v1613_v35  ;;  %v2119_v5 = vadd.f32 %v2765_v8, %v4102_v9  ;;  %v1903_v11 = vpop.f32.mrb[89].mxu0  ;;  %v2110_v51 = vpop.f32.mrb[121].mxu1  ;;  %v2303_v35 = vld [vmem:[%s4764_s3 + $0x110] sm:$0xff]  ;;  %v4782_v23 = vld [vmem:[#allocation2_spill] sm:$0xff] }
 0x206   :  { %v2111_v42 = vadd.f32 %v2110_v51, %v4090_v14  ;;  %v1904_v26 = vpop.f32.mrb[90].mxu0  ;;  %v2766_v53 = vpop.f32.mrb[122].mxu1  ;;  %v1632_v8 = vadd.f32 %v4034_v30, %v4782_v23  ;;  %v2301_v11 = vld [vmem:[%s4764_s3 + $0x100] sm:$0xff]  ;;  %v4783_v51 = vld [vmem:[#allocation17_spill] sm:$0xff] }
 0x207   :  { %v2359_v21 = vadd.f32 %v2295_v36, %v2119_v5  ;;  %v4405_v2 = vadd.f32 %v1904_v26, %v1616_v6  ;;  %v2122_v48 = vadd.f32 %v2766_v53, %v4106_v32  ;;  %v1906_v9 = vpop.f32.mrb[91].mxu0  ;;  %v2113_v55 = vpop.f32.mrb[123].mxu1  ;;  %v2304_v53 = vld [vmem:[%s4764_s3 + $0x118] sm:$0xff] }
 0x208   :  { %v2357_v28 = vadd.f32 %v2293_v58, %v2111_v42  ;;  %v2114_v14 = vadd.f32 %v2113_v55, %v4094_v40  ;;  %v2302_v55 = vld [vmem:[%s4764_s3 + $0x108] sm:$0xff] }
 0x209   :  { %2424 = vst.msk [vmem:[%s4765_s4 + $0xd0] sm:$0xff] %vm2397_vm1, %v2359_v21  ;;  %v2360_v7 = vadd.f32 %v2296_v24, %v2122_v48 }
 0x20a   :  { %2422 = vst.msk [vmem:[%s4765_s4 + $0xc0] sm:$0xff] %vm2397_vm1, %v2357_v28  ;;  %v2358_v32 = vadd.f32 %v2294_v46, %v2114_v14 }
 0x20b   :  { %2425 = vst.msk [vmem:[%s4765_s4 + $0xd8] sm:$0xff] %vm2397_vm1, %v2360_v7  ;;  %v4784_v7 = vld [vmem:[#allocation3_spill] sm:$0xff] }
 0x20c   :  { %2423 = vst.msk [vmem:[%s4765_s4 + $0xc8] sm:$0xff] %vm2397_vm1, %v2358_v32  ;;  %v1909_v40 = vpop.f32.mrb[92].mxu0  ;;  %v2769_v12 = vpop.f32.mrb[124].mxu1  ;;  %v1637_v32 = vadd.f32 %v4034_v30, %v4784_v7  ;;  %v4789_v7 = vld [vmem:[#allocation8_spill] sm:$0xff] }
 0x20d   :  { %v4435_v10 = vadd.f32 %v1909_v40, %v1621_v45  ;;  %v2135_v44 = vadd.f32 %v2769_v12, %v4126_v56  ;;  %v1911_v60 = vpop.f32.mrb[93].mxu0  ;;  %v2126_v50 = vpop.f32.mrb[125].mxu1  ;;  %v2307_v40 = vld [vmem:[%s4764_s3 + $0x130] sm:$0xff] }
 0x20e   :  { %v2127_v29 = vadd.f32 %v2126_v50, %v4114_v1  ;;  %v1912_v3 = vpop.f32.mrb[94].mxu0  ;;  %v2770_v15 = vpop.f32.mrb[126].mxu1  ;;  %v4785_v12 = vld [vmem:[#allocation4_spill] sm:$0xff] }
 0x20f   :  { %v2363_v39 = vadd.f32 %v2299_v18, %v2135_v44  ;;  %v4445_v17 = vadd.f32 %v1912_v3, %v1624_v31  ;;  %v2138_v16 = vadd.f32 %v2770_v15, %v4130_v27  ;;  %v1914_v56 = vpop.f32.mrb[95].mxu0  ;;  %v2129_v59 = vpop.f32.mrb[127].mxu1  ;;  %v1640_v18 = vadd.f32 %v4034_v30, %v4785_v12 }
 0x210   :  { %v2361_v61 = vadd.f32 %v2297_v63, %v2127_v29  ;;  %v2130_v1 = vadd.f32 %v2129_v59, %v4118_v25  ;;  %v2305_v63 = vld [vmem:[%s4764_s3 + $0x120] sm:$0xff] }
 0x211   :  { %2428 = vst.msk [vmem:[%s4765_s4 + $0xf0] sm:$0xff] %vm2397_vm1, %v2363_v39  ;;  %v2364_v19 = vadd.f32 %v2300_v62, %v2138_v16  ;;  %v2308_v62 = vld [vmem:[%s4764_s3 + $0x138] sm:$0xff] }
 0x212   :  { %2426 = vst.msk [vmem:[%s4765_s4 + $0xe0] sm:$0xff] %vm2397_vm1, %v2361_v61  ;;  %v2362_v27 = vadd.f32 %v2298_v34, %v2130_v1  ;;  %v2306_v34 = vld [vmem:[%s4764_s3 + $0x128] sm:$0xff] }
 0x213   :  { %2429 = vst.msk [vmem:[%s4765_s4 + $0xf8] sm:$0xff] %vm2397_vm1, %v2364_v19  ;;  %v4786_v19 = vld [vmem:[#allocation5_spill] sm:$0xff] }
 0x214   :  { %2427 = vst.msk [vmem:[%s4765_s4 + $0xe8] sm:$0xff] %vm2397_vm1, %v2362_v27  ;;  %v1917_v25 = vpop.f32.mrb[96].mxu0  ;;  %v2773_v54 = vpop.f32.mrb[128].mxu1  ;;  %v1645_v27 = vadd.f32 %v4034_v30, %v4786_v19 }
 0x215   :  { %v4475_v38 = vadd.f32 %v1917_v25, %v1629_v43  ;;  %v2151_v36 = vadd.f32 %v2773_v54, %v4189_v20  ;;  %v1919_v6 = vpop.f32.mrb[97].mxu0  ;;  %v2142_v5 = vpop.f32.mrb[129].mxu1  ;;  %v2311_v25 = vld [vmem:[%s4764_s3 + $0x150] sm:$0xff]  ;;  %v4787_v54 = vld [vmem:[#allocation6_spill] sm:$0xff] }
 0x216   :  { %v2143_v58 = vadd.f32 %v2142_v5, %v4783_v51  ;;  %v1920_v42 = vpop.f32.mrb[98].mxu0  ;;  %v2774_v26 = vpop.f32.mrb[130].mxu1  ;;  %v2309_v5 = vld [vmem:[%s4764_s3 + $0x140] sm:$0xff] }
 0x217   :  { %v2367_v24 = vadd.f32 %v2303_v35, %v2151_v36  ;;  %v4485_v21 = vadd.f32 %v1920_v42, %v1632_v8  ;;  %v2154_v48 = vadd.f32 %v2774_v26, %v4199_v4  ;;  %v1922_v20 = vpop.f32.mrb[99].mxu0  ;;  %v2145_v9 = vpop.f32.mrb[131].mxu1  ;;  %v1648_v35 = vadd.f32 %v4034_v30, %v4787_v54  ;;  %v2312_v42 = vld [vmem:[%s4764_s3 + $0x158] sm:$0xff] }
 0x218   :  { %v2365_v46 = vadd.f32 %v2301_v11, %v2143_v58  ;;  %v2146_v28 = vadd.f32 %v2145_v9, %v4155_v0  ;;  %v2310_v20 = vld [vmem:[%s4764_s3 + $0x148] sm:$0xff] }
 0x219   :  { %2432 = vst.msk [vmem:[%s4765_s4 + $0x110] sm:$0xff] %vm2397_vm1, %v2367_v24  ;;  %v2368_v14 = vadd.f32 %v2304_v53, %v2154_v48 }
 0x21a   :  { %2430 = vst.msk [vmem:[%s4765_s4 + $0x100] sm:$0xff] %vm2397_vm1, %v2365_v46  ;;  %v2366_v4 = vadd.f32 %v2302_v55, %v2146_v28  ;;  %v4788_v46 = vld [vmem:[#allocation7_spill] sm:$0xff] }
 0x21b   :  { %2433 = vst.msk [vmem:[%s4765_s4 + $0x118] sm:$0xff] %vm2397_vm1, %v2368_v14  ;;  %v1653_v28 = vadd.f32 %v4034_v30, %v4788_v46 }
 0x21c   :  { %2431 = vst.msk [vmem:[%s4765_s4 + $0x108] sm:$0xff] %vm2397_vm1, %v2366_v4  ;;  %v1925_v0 = vpop.f32.mrb[100].mxu0  ;;  %v2777_v45 = vpop.f32.mrb[132].mxu1  ;;  %v2315_v4 = vld [vmem:[%s4764_s3 + $0x170] sm:$0xff] }
 0x21d   :  { %v4515_v31 = vadd.f32 %v1925_v0, %v1637_v32  ;;  %v2167_v44 = vadd.f32 %v2777_v45, %v4277_v52  ;;  %v1927_v60 = vpop.f32.mrb[101].mxu0  ;;  %v2158_v50 = vpop.f32.mrb[133].mxu1  ;;  %v1656_v32 = vadd.f32 %v4034_v30, %v4789_v7 }
 0x21e   :  { %v2159_v29 = vadd.f32 %v2158_v50, %v4233_v37  ;;  %v1928_v3 = vpop.f32.mrb[102].mxu0  ;;  %v2778_v15 = vpop.f32.mrb[134].mxu1 }
 0x21f   :  { %v2371_v39 = vadd.f32 %v2307_v40, %v2167_v44  ;;  %v4525_v16 = vadd.f32 %v1928_v3, %v1640_v18  ;;  %v2170_v56 = vadd.f32 %v2778_v15, %v4287_v47  ;;  %v1930_v52 = vpop.f32.mrb[103].mxu0  ;;  %v2161_v59 = vpop.f32.mrb[135].mxu1  ;;  %v2313_v18 = vld [vmem:[%s4764_s3 + $0x160] sm:$0xff] }
 0x220   :  { %v2369_v61 = vadd.f32 %v2305_v63, %v2159_v29  ;;  %v2162_v37 = vadd.f32 %v2161_v59, %v4243_v13  ;;  %v2316_v63 = vld [vmem:[%s4764_s3 + $0x178] sm:$0xff] }
 0x221   :  { %2436 = vst.msk [vmem:[%s4765_s4 + $0x130] sm:$0xff] %vm2397_vm1, %v2371_v39  ;;  %v2372_v1 = vadd.f32 %v2308_v62, %v2170_v56  ;;  %v2314_v39 = vld [vmem:[%s4764_s3 + $0x168] sm:$0xff]  ;;  %v4790_v59 = vld [vmem:[#allocation9_spill] sm:$0xff] }
 0x222   :  { %2434 = vst.msk [vmem:[%s4765_s4 + $0x120] sm:$0xff] %vm2397_vm1, %v2369_v61  ;;  %v2370_v47 = vadd.f32 %v2306_v34, %v2162_v37  ;;  %v1661_v34 = vadd.f32 %v4034_v30, %v4790_v59  ;;  %v2319_v37 = vld [vmem:[%s4764_s3 + $0x190] sm:$0xff]  ;;  %v2325_v59 = vld [vmem:[%s4764_s3 + $0x1c0] sm:$0xff] }
 0x223   :  { %2437 = vst.msk [vmem:[%s4765_s4 + $0x138] sm:$0xff] %vm2397_vm1, %v2372_v1  ;;  %v4791_v1 = vld [vmem:[#allocation10_spill] sm:$0xff] }
 0x224   :  { %2435 = vst.msk [vmem:[%s4765_s4 + $0x128] sm:$0xff] %vm2397_vm1, %v2370_v47  ;;  %v1933_v13 = vpop.f32.mrb[104].mxu0  ;;  %v2781_v43 = vpop.f32.mrb[136].mxu1  ;;  %v1664_v47 = vadd.f32 %v4034_v30, %v4791_v1 }
 0x225   :  { %v4555_v23 = vadd.f32 %v1933_v13, %v1645_v27  ;;  %v2183_v8 = vadd.f32 %v2781_v43, %v4355_v41  ;;  %v1935_v36 = vpop.f32.mrb[105].mxu0  ;;  %v2174_v6 = vpop.f32.mrb[137].mxu1 }
 0x226   :  { %v2175_v11 = vadd.f32 %v2174_v6, %v4315_v22  ;;  %v1936_v51 = vpop.f32.mrb[106].mxu0  ;;  %v2782_v58 = vpop.f32.mrb[138].mxu1  ;;  %v2320_v36 = vld [vmem:[%s4764_s3 + $0x198] sm:$0xff] }
 0x227   :  { %v2375_v26 = vadd.f32 %v2311_v25, %v2183_v8  ;;  %v4565_v53 = vadd.f32 %v1936_v51, %v1648_v35  ;;  %v2186_v24 = vadd.f32 %v2782_v58, %v4365_v49  ;;  %v1938_v41 = vpop.f32.mrb[107].mxu0  ;;  %v2177_v48 = vpop.f32.mrb[139].mxu1  ;;  %v2317_v25 = vld [vmem:[%s4764_s3 + $0x180] sm:$0xff]  ;;  %v2318_v58 = vld [vmem:[%s4764_s3 + $0x188] sm:$0xff] }
 0x228   :  { %v2373_v9 = vadd.f32 %v2309_v5, %v2175_v11  ;;  %v2178_v22 = vadd.f32 %v2177_v48, %v4325_v33 }
 0x229   :  { %2440 = vst.msk [vmem:[%s4765_s4 + $0x150] sm:$0xff] %vm2397_vm1, %v2375_v26  ;;  %v2376_v55 = vadd.f32 %v2312_v42, %v2186_v24  ;;  %v4792_v24 = vld [vmem:[#allocation11_spill] sm:$0xff] }
 0x22a   :  { %2438 = vst.msk [vmem:[%s4765_s4 + $0x140] sm:$0xff] %vm2397_vm1, %v2373_v9  ;;  %v2374_v49 = vadd.f32 %v2310_v20, %v2178_v22  ;;  %v1669_v41 = vadd.f32 %v4034_v30, %v4792_v24  ;;  %v2323_v20 = vld [vmem:[%s4764_s3 + $0x1b0] sm:$0xff] }
 0x22b   :  { %2441 = vst.msk [vmem:[%s4765_s4 + $0x158] sm:$0xff] %vm2397_vm1, %v2376_v55  ;;  %v4793_v9 = vld [vmem:[#allocation12_spill] sm:$0xff] }
 0x22c   :  { %2439 = vst.msk [vmem:[%s4765_s4 + $0x148] sm:$0xff] %vm2397_vm1, %v2374_v49  ;;  %v1941_v33 = vpop.f32.mrb[108].mxu0  ;;  %v2785_v14 = vpop.f32.mrb[140].mxu1  ;;  %v1672_v22 = vadd.f32 %v4034_v30, %v4793_v9 }
 0x22d   :  { %v1942_v0 = vadd.f32 %v1941_v33, %v1653_v28  ;;  %v2199_v45 = vadd.f32 %v2785_v14, %v4435_v10  ;;  %v1943_v40 = vpop.f32.mrb[109].mxu0  ;;  %v2190_v12 = vpop.f32.mrb[141].mxu1  ;;  %v2321_v33 = vld [vmem:[%s4764_s3 + $0x1a0] sm:$0xff] }
 0x22e   :  { %v2191_v44 = vadd.f32 %v2190_v12, %v4395_v57  ;;  %v1944_v60 = vpop.f32.mrb[110].mxu0  ;;  %v2786_v50 = vpop.f32.mrb[142].mxu1 }
 0x22f   :  { %v2379_v29 = vadd.f32 %v2315_v4, %v2199_v45  ;;  %v1945_v3 = vadd.f32 %v1944_v60, %v1656_v32  ;;  %v2202_v15 = vadd.f32 %v2786_v50, %v4445_v17  ;;  %v1946_v62 = vpop.f32.mrb[111].mxu0  ;;  %v2193_v10 = vpop.f32.mrb[143].mxu1  ;;  %v2324_v32 = vld [vmem:[%s4764_s3 + $0x1b8] sm:$0xff] }
 0x230   :  { %v2377_v56 = vadd.f32 %v2313_v18, %v2191_v44  ;;  %v2194_v52 = vadd.f32 %v2193_v10, %v4405_v2  ;;  %v2327_v62 = vld [vmem:[%s4764_s3 + $0x1d0] sm:$0xff]  ;;  %v4795_v10 = vld [vmem:[#allocation14_spill] sm:$0xff] }
 0x231   :  { %2444 = vst.msk [vmem:[%s4765_s4 + $0x170] sm:$0xff] %vm2397_vm1, %v2379_v29  ;;  %v2380_v57 = vadd.f32 %v2316_v63, %v2202_v15  ;;  %v4794_v29 = vld [vmem:[#allocation13_spill] sm:$0xff] }
 0x232   :  { %2442 = vst.msk [vmem:[%s4765_s4 + $0x160] sm:$0xff] %vm2397_vm1, %v2377_v56  ;;  %v2378_v17 = vadd.f32 %v2314_v39, %v2194_v52 }
 0x233   :  { %2445 = vst.msk [vmem:[%s4765_s4 + $0x178] sm:$0xff] %vm2397_vm1, %v2380_v57 }
 0x234   :  { %2443 = vst.msk [vmem:[%s4765_s4 + $0x168] sm:$0xff] %vm2397_vm1, %v2378_v17  ;;  %v1949_v2 = vpop.f32.mrb[112].mxu0  ;;  %v2789_v61 = vpop.f32.mrb[144].mxu1 }
 0x235   :  { %v1950_v19 = vadd.f32 %v1949_v2, %v1661_v34  ;;  %v2215_v27 = vadd.f32 %v2789_v61, %v4515_v31  ;;  %v1951_v13 = vpop.f32.mrb[113].mxu0  ;;  %v2206_v43 = vpop.f32.mrb[145].mxu1 }
 0x236   :  { %v2207_v54 = vadd.f32 %v2206_v43, %v4475_v38  ;;  %v1952_v35 = vpop.f32.mrb[114].mxu0  ;;  %v2790_v8 = vpop.f32.mrb[146].mxu1 }
 0x237   :  { %v2383_v6 = vadd.f32 %v2319_v37, %v2215_v27  ;;  %v4639_v5 = vadd.f32 %v1952_v35, %v1664_v47  ;;  %v2218_v11 = vadd.f32 %v2790_v8, %v4525_v16  ;;  %v1954_v31 = vpop.f32.mrb[115].mxu0  ;;  %v2209_v51 = vpop.f32.mrb[147].mxu1  ;;  %v2328_v37 = vld [vmem:[%s4764_s3 + $0x1d8] sm:$0xff] }
 0x238   :  { %v2381_v42 = vadd.f32 %v2317_v25, %v2207_v54  ;;  %v2210_v38 = vadd.f32 %v2209_v51, %v4485_v21  ;;  %v2326_v25 = vld [vmem:[%s4764_s3 + $0x1c8] sm:$0xff]  ;;  %v4797_v31 = vld [vmem:[#allocation16_spill] sm:$0xff] }
 0x239   :  { %2448 = vst.msk [vmem:[%s4765_s4 + $0x190] sm:$0xff] %vm2397_vm1, %v2383_v6  ;;  %v2384_v26 = vadd.f32 %v2320_v36, %v2218_v11  ;;  %v4796_v36 = vld [vmem:[#allocation15_spill] sm:$0xff] }
 0x23a   :  { %2446 = vst.msk [vmem:[%s4765_s4 + $0x180] sm:$0xff] %vm2397_vm1, %v2381_v42  ;;  %v2382_v16 = vadd.f32 %v2318_v58, %v2210_v38 }
 0x23b   :  { %2449 = vst.msk [vmem:[%s4765_s4 + $0x198] sm:$0xff] %vm2397_vm1, %v2384_v26  ;;  %v2329_v26 = vld [vmem:[%s4764_s3 + $0x1e0] sm:$0xff] }
 0x23c   :  { %2447 = vst.msk [vmem:[%s4765_s4 + $0x188] sm:$0xff] %vm2397_vm1, %v2382_v16  ;;  %v1957_v21 = vpop.f32.mrb[116].mxu0  ;;  %v2793_v48 = vpop.f32.mrb[148].mxu1  ;;  %v2331_v16 = vld [vmem:[%s4764_s3 + $0x1f0] sm:$0xff] }
 0x23d   :  { %v1958_v55 = vadd.f32 %v1957_v21, %v1669_v41  ;;  %v2231_v49 = vadd.f32 %v2793_v48, %v1942_v0  ;;  %v1959_v46 = vpop.f32.mrb[117].mxu0  ;;  %v2222_v28 = vpop.f32.mrb[149].mxu1  ;;  %v2322_v0 = vld [vmem:[%s4764_s3 + $0x1a8] sm:$0xff] }
 0x23e   :  { %v2223_v14 = vadd.f32 %v2222_v28, %v4555_v23  ;;  %v1960_v4 = vpop.f32.mrb[118].mxu0  ;;  %v2794_v7 = vpop.f32.mrb[150].mxu1  ;;  %v2332_v46 = vld [vmem:[%s4764_s3 + $0x1f8] sm:$0xff] }
 0x23f   :  { %v2387_v45 = vadd.f32 %v2323_v20, %v2231_v49  ;;  %v1961_v40 = vadd.f32 %v1960_v4, %v1672_v22  ;;  %v2234_v12 = vadd.f32 %v2794_v7, %v1945_v3  ;;  %v1962_v18 = vpop.f32.mrb[119].mxu0  ;;  %v2225_v44 = vpop.f32.mrb[151].mxu1  ;;  %v1677_v3 = vadd.f32 %v4034_v30, %v4794_v29  ;;  %v3240_v30 = vld [vmem:[%s4763_s2] ss:$0 sm:$0xff] }
 0x240   :  { %v2385_v60 = vadd.f32 %v2321_v33, %v2223_v14  ;;  %v2226_v50 = vadd.f32 %v2225_v44, %v4565_v53  ;;  %v1680_v39 = vadd.f32 %v3240_v30, %v4795_v10  ;;  %v1685_v6 = vadd.f32 %v3240_v30, %v4796_v36 }
 0x241   :  { %2452 = vst.msk [vmem:[%s4765_s4 + $0x1b0] sm:$0xff] %vm2397_vm1, %v2387_v45  ;;  %v2388_v23 = vadd.f32 %v2324_v32, %v2234_v12  ;;  %v1688_v51 = vadd.f32 %v3240_v30, %v4797_v31 }
 0x242   :  { %2450 = vst.msk [vmem:[%s4765_s4 + $0x1a0] sm:$0xff] %vm2397_vm1, %v2385_v60  ;;  %v2386_v63 = vadd.f32 %v2322_v0, %v2226_v50 }
 0x243   :  { %2453 = vst.msk [vmem:[%s4765_s4 + $0x1b8] sm:$0xff] %vm2397_vm1, %v2388_v23 }
 0x244   :  { %2451 = vst.msk [vmem:[%s4765_s4 + $0x1a8] sm:$0xff] %vm2397_vm1, %v2386_v63  ;;  %v1965_v53 = vpop.f32.mrb[120].mxu0  ;;  %v2797_v15 = vpop.f32.mrb[152].mxu1 }
 0x245   :  { %v1966_v56 = vadd.f32 %v1965_v53, %v1677_v3  ;;  %v2247_v52 = vadd.f32 %v2797_v15, %v1958_v55  ;;  %v1967_v57 = vpop.f32.mrb[121].mxu0  ;;  %v2238_v17 = vpop.f32.mrb[153].mxu1  ;;  %v2330_v55 = vld [vmem:[%s4764_s3 + $0x1e8] sm:$0xff] }
 0x246   :  { %v2239_v34 = vadd.f32 %v2238_v17, %v1950_v19  ;;  %v1968_v2 = vpop.f32.mrb[122].mxu0  ;;  %v2798_v61 = vpop.f32.mrb[154].mxu1 }
 0x247   :  { %v2391_v1 = vadd.f32 %v2327_v62, %v2247_v52  ;;  %v1969_v47 = vadd.f32 %v1968_v2, %v1680_v39  ;;  %v2250_v27 = vadd.f32 %v2798_v61, %v1961_v40  ;;  %v1970_v13 = vpop.f32.mrb[123].mxu0  ;;  %v2241_v43 = vpop.f32.mrb[155].mxu1 }
 0x248   :  { %v2389_v54 = vadd.f32 %v2325_v59, %v2239_v34  ;;  %v2242_v35 = vadd.f32 %v2241_v43, %v4639_v5 }
 0x249   :  { %2456 = vst.msk [vmem:[%s4765_s4 + $0x1d0] sm:$0xff] %vm2397_vm1, %v2391_v1  ;;  %v2392_v19 = vadd.f32 %v2328_v37, %v2250_v27 }
 0x24a   :  { %2454 = vst.msk [vmem:[%s4765_s4 + $0x1c0] sm:$0xff] %vm2397_vm1, %v2389_v54  ;;  %v2390_v8 = vadd.f32 %v2326_v25, %v2242_v35 }
 0x24b   :  { %2457 = vst.msk [vmem:[%s4765_s4 + $0x1d8] sm:$0xff] %vm2397_vm1, %v2392_v19 }
 0x24c   :  { %2455 = vst.msk [vmem:[%s4765_s4 + $0x1c8] sm:$0xff] %vm2397_vm1, %v2390_v8  ;;  %v1973_v5 = vpop.f32.mrb[124].mxu0  ;;  %v2801_v11 = vpop.f32.mrb[156].mxu1 }
 0x24d   :  { %v1974_v58 = vadd.f32 %v1973_v5, %v1685_v6  ;;  %v1975_v42 = vpop.f32.mrb[125].mxu0  ;;  %v2254_v38 = vpop.f32.mrb[157].mxu1 }
 0x24e   :  { %v2255_v24 = vadd.f32 %v2254_v38, %v1966_v56  ;;  %v1976_v41 = vpop.f32.mrb[126].mxu0  ;;  %v2802_v21 = vpop.f32.mrb[158].mxu1 }
 0x24f   :  { %v2263_v48 = vadd.f32 %v2801_v11, %v1974_v58  ;;  %v1977_v20 = vadd.f32 %v1976_v41, %v1688_v51  ;;  %v1978_v9 = vpop.f32.mrb[127].mxu0  ;;  %v2257_v22 = vpop.f32.mrb[159].mxu1 }
 0x250   :  { %v2393_v49 = vadd.f32 %v2329_v26, %v2255_v24  ;;  %v2258_v28 = vadd.f32 %v2257_v22, %v1969_v47 }
 0x251   :  { %v2395_v33 = vadd.f32 %v2331_v16, %v2263_v48  ;;  %v2266_v14 = vadd.f32 %v2802_v21, %v1977_v20 }
 0x252   :  { %2458 = vst.msk [vmem:[%s4765_s4 + $0x1e0] sm:$0xff] %vm2397_vm1, %v2393_v49  ;;  %v2394_v4 = vadd.f32 %v2330_v55, %v2258_v28 }
 0x253   :  { %2460 = vst.msk [vmem:[%s4765_s4 + $0x1f0] sm:$0xff] %vm2397_vm1, %v2395_v33  ;;  %v2396_v7 = vadd.f32 %v2332_v46, %v2266_v14 }
 0x254   :  { %2459 = vst.msk [vmem:[%s4765_s4 + $0x1e8] sm:$0xff] %vm2397_vm1, %v2394_v4 }
 0x255   :  { %2461 = vst.msk [vmem:[%s4765_s4 + $0x1f8] sm:$0xff] %vm2397_vm1, %v2396_v7 }

// kernel: shake_resnet_forward.20
= control target key start
LH: loop header
LB: loop body
LE: loop exit
PB: predicated region body
PF: predicated region fallthrough
CT: control target
= control target key end

     0   :  { %v667_v5 = vmov 0   ;;  %vm141_vm0 = vcmask 261120   ;;  %s668_s9 = smov 32   ;;  %vm543_vm1 = vcmask 523264   ;;  %s978_s3 = inlined_call_operand.vmem [shape: bf16[32,32], index: 3, kind: input, shape index: {}]   ;;  %s979_s1 = inlined_call_operand.vmem [shape: bf16[128,32], index: 1, kind: input, shape index: {}]   ;;  %s980_s2 = inlined_call_operand.vmem [shape: bf16[32,32], index: 2, kind: input, shape index: {}]   ;;  %s981_s0 = inlined_call_operand.vmem [shape: bf16[128,32], index: 0, kind: input, shape index: {}]   ;;  %s982_s4 = inlined_call_operand.vmem [shape: f32[1,64], index: 4, kind: input, shape index: {}]   ;;  %s983_s5 = inlined_call_operand.vmem [shape: f32[128,64], index: 5, kind: output, shape index: {}]  }
   0x1   :  { %v663_v0 = vld [vmem:[%s978_s3] sm:$0xff]   ;;  %v664_v1 = vld [vmem:[%s978_s3 + $0x8] sm:$0xff]   ;;  %v57_v10 = vld [vmem:[%s979_s1 + $0x10] sm:$0xf] }
   0x2   :  { %641 = vmatprep.subr.bf16.mxu1 %v663_v0  ;;  %v53_v2 = vld [vmem:[%s979_s1] sm:$0xf]  ;;  %v54_v3 = vld [vmem:[%s979_s1 + $0x4] sm:$0xf]  ;;  %v55_v4 = vld [vmem:[%s979_s1 + $0x8] sm:$0xf]  ;;  %v73_v13 = vmax.bf16 %v667_v5, %v57_v10 }
   0x3   :  { %642 = vmatpush3.bf16.msra.mxu1 %v663_v0  ;;  %v69_v6 = vmax.bf16 %v667_v5, %v53_v2  ;;  %v70_v7 = vmax.bf16 %v667_v5, %v54_v3  ;;  %v56_v8 = vld [vmem:[%s979_s1 + $0xc] sm:$0xf]  ;;  %v71_v9 = vmax.bf16 %v667_v5, %v55_v4  ;;  %v58_v11 = vld [vmem:[%s979_s1 + $0x14] sm:$0xf]  ;;  %v59_v17 = vld [vmem:[%s979_s1 + $0x18] sm:$0xf] }
   0x4   :  { %643 = vmatprep.subr.bf16.mxu1 %v664_v1  ;;  %v72_v12 = vmax.bf16 %v667_v5, %v56_v8  ;;  %v74_v14 = vmax.bf16 %v667_v5, %v58_v11  ;;  %v60_v18 = vld [vmem:[%s979_s1 + $0x1c] sm:$0xf]  ;;  %v61_v19 = vld [vmem:[%s979_s1 + $0x20] sm:$0xf]  ;;  %v62_v21 = vld [vmem:[%s979_s1 + $0x24] sm:$0xf]  ;;  %v75_v23 = vmax.bf16 %v667_v5, %v59_v17 }
   0x5   :  { %v582_v15 = vcombine.low %v69_v6, %v70_v7  ;;  %v665_v22 = vld [vmem:[%s980_s2] sm:$0xff]   ;;  %v76_v24 = vmax.bf16 %v667_v5, %v60_v18  ;;  %v666_v25 = vld [vmem:[%s980_s2 + $0x8] sm:$0xff]   ;;  %v77_v28 = vmax.bf16 %v667_v5, %v61_v19  ;;  %v78_v29 = vmax.bf16 %v667_v5, %v62_v21  ;;  %v25_v33 = vld [vmem:[%s981_s0 + $0x10] sm:$0xf] }
   0x6   :  { %v583_v16 = vcombine.low %v71_v9, %v72_v12  ;;  %v584_v20 = vcombine.low %v73_v13, %v74_v14  ;;  %v21_v26 = vld [vmem:[%s981_s0] sm:$0xf]  ;;  %v22_v27 = vld [vmem:[%s981_s0 + $0x4] sm:$0xf]  ;;  %621 = vmatprep.subr.bf16.mxu0 %v665_v22  ;;  %v23_v31 = vld [vmem:[%s981_s0 + $0x8] sm:$0xf]  ;;  %v41_v38 = vmax.bf16 %v667_v5, %v25_v33 }
   0x7   :  { %644 = vmatpush3.bf16.msra.mxu1 %v664_v1  ;;  %645 = vmatprep.mubr.msk.bf16.mxu1 %vm141_vm0, %v582_v15  ;;  %v37_v30 = vmax.bf16 %v667_v5, %v21_v26  ;;  %v24_v32 = vld [vmem:[%s981_s0 + $0xc] sm:$0xf]  ;;  %v38_v34 = vmax.bf16 %v667_v5, %v22_v27  ;;  %v39_v35 = vmax.bf16 %v667_v5, %v23_v31  ;;  %v26_v37 = vld [vmem:[%s981_s0 + $0x14] sm:$0xf]  ;;  %v63_v42 = vld [vmem:[%s979_s1 + $0x28] sm:$0xf] }
   0x8   :  { %622 = vmatpush3.bf16.msra.mxu0 %v665_v22  ;;  %v40_v36 = vmax.bf16 %v667_v5, %v24_v32  ;;  %v42_v39 = vmax.bf16 %v667_v5, %v26_v37  ;;  %v585_v41 = vcombine.low %v75_v23, %v76_v24  ;;  %v64_v43 = vld [vmem:[%s979_s1 + $0x2c] sm:$0xf]  ;;  %v586_v45 = vcombine.low %v77_v28, %v78_v29  ;;  %v65_v46 = vld [vmem:[%s979_s1 + $0x30] sm:$0xf]  ;;  %v27_v48 = vld [vmem:[%s981_s0 + $0x18] sm:$0xf] }
   0x9   :  { %623 = vmatprep.subr.bf16.mxu0 %v666_v25  ;;  %v564_v40 = vcombine.low %v37_v30, %v38_v34  ;;  %v28_v49 = vld [vmem:[%s981_s0 + $0x1c] sm:$0xf]  ;;  %v66_v50 = vld [vmem:[%s979_s1 + $0x34] sm:$0xf]  ;;  %v29_v51 = vld [vmem:[%s981_s0 + $0x20] sm:$0xf]  ;;  %v79_v53 = vmax.bf16 %v667_v5, %v63_v42  ;;  %v80_v54 = vmax.bf16 %v667_v5, %v64_v43  ;;  %v81_v55 = vmax.bf16 %v667_v5, %v65_v46 }
   0xa   :  { %646 = vmatmul.mubr.msk.bf16.vlgmr.msra.gmra.mrb[0].mxu1 %vm141_vm0, %v583_v16  ;;  %v565_v44 = vcombine.low %v39_v35, %v40_v36  ;;  %v566_v47 = vcombine.low %v41_v38, %v42_v39  ;;  %v30_v52 = vld [vmem:[%s981_s0 + $0x24] sm:$0xf]  ;;  %v43_v56 = vmax.bf16 %v667_v5, %v27_v48  ;;  %v44_v57 = vmax.bf16 %v667_v5, %v28_v49  ;;  %v67_v62 = vld [vmem:[%s979_s1 + $0x38] sm:$0xf]  ;;  %v68_v1 = vld [vmem:[%s979_s1 + $0x3c] sm:$0xf] }
   0xb   :  { %649 = vmatprep.mubr.msk.bf16.mxu1 %vm141_vm0, %v584_v20  ;;  %625 = vmatprep.mubr.msk.bf16.mxu0 %vm141_vm0, %v564_v40  ;;  %v82_v58 = vmax.bf16 %v667_v5, %v66_v50  ;;  %v45_v59 = vmax.bf16 %v667_v5, %v29_v51  ;;  %v46_v60 = vmax.bf16 %v667_v5, %v30_v52  ;;  %v31_v3 = vld [vmem:[%s981_s0 + $0x28] sm:$0xf]  ;;  %v32_v4 = vld [vmem:[%s981_s0 + $0x2c] sm:$0xf]  ;;  %v33_v6 = vld [vmem:[%s981_s0 + $0x30] sm:$0xf] }
   0xc   :  { %624 = vmatpush3.bf16.msra.mxu0 %v666_v25  ;;  %v587_v61 = vcombine.low %v79_v53, %v80_v54  ;;  %v567_v63 = vcombine.low %v43_v56, %v44_v57  ;;  %v34_v7 = vld [vmem:[%s981_s0 + $0x34] sm:$0xf]  ;;  %v83_v8 = vmax.bf16 %v667_v5, %v67_v62  ;;  %v84_v9 = vmax.bf16 %v667_v5, %v68_v1  ;;  %v35_v17 = vld [vmem:[%s981_s0 + $0x38] sm:$0xf]  ;;  %v36_v18 = vld [vmem:[%s981_s0 + $0x3c] sm:$0xf] }
   0xd   :  { %v588_v0 = vcombine.low %v81_v55, %v82_v58  ;;  %v568_v2 = vcombine.low %v45_v59, %v46_v60  ;;  %v47_v10 = vmax.bf16 %v667_v5, %v31_v3  ;;  %v48_v11 = vmax.bf16 %v667_v5, %v32_v4  ;;  %v878_v53 = vld [vmem:[%s982_s4] ss:$0 sm:$0xff] }
   0xe   :  { %v49_v12 = vmax.bf16 %v667_v5, %v33_v6  ;;  %v50_v13 = vmax.bf16 %v667_v5, %v34_v7  ;;  %v589_v14 = vcombine.low %v83_v8, %v84_v9  ;;  %v51_v19 = vmax.bf16 %v667_v5, %v35_v17 }
   0xf   :  { %626 = vmatmul.mubr.msk.bf16.vlgmr.msra.gmra.mrb[0].mxu0 %vm141_vm0, %v565_v44  ;;  %v569_v15 = vcombine.low %v47_v10, %v48_v11  ;;  %v52_v20 = vmax.bf16 %v667_v5, %v36_v18 }
  0x10   :  { %629 = vmatprep.mubr.msk.bf16.mxu0 %vm141_vm0, %v566_v47  ;;  %v570_v16 = vcombine.low %v49_v12, %v50_v13 }
  0x11   :  { %v571_v21 = vcombine.low %v51_v19, %v52_v20 }
  0x12   :  { %650 = vmatmul.mubr.msk.bf16.gmra.mrb[4].mxu1 %vm141_vm0, %v585_v41 }
  0x13   :  { %653 = vmatprep.mubr.msk.bf16.mxu1 %vm141_vm0, %v586_v45 }
  0x17   :  { %630 = vmatmul.mubr.msk.bf16.gmra.mrb[4].mxu0 %vm141_vm0, %v567_v63 }
  0x18   :  { %633 = vmatprep.mubr.msk.bf16.mxu0 %vm141_vm0, %v568_v2 }
  0x1a   :  { %654 = vmatmul.mubr.msk.bf16.gmra.mrb[8].mxu1 %vm141_vm0, %v587_v61 }
  0x1b   :  { %657 = vmatprep.mubr.msk.bf16.mxu1 %vm141_vm0, %v588_v0 }
  0x1f   :  { %634 = vmatmul.mubr.msk.bf16.gmra.mrb[8].mxu0 %vm141_vm0, %v569_v15 }
  0x20   :  { %637 = vmatprep.mubr.msk.bf16.mxu0 %vm141_vm0, %v570_v16 }
  0x22   :  { %658 = vmatmul.mubr.msk.bf16.gmra.mrb[12].mxu1 %vm141_vm0, %v589_v14 }
  0x27   :  { %638 = vmatmul.mubr.msk.bf16.gmra.mrb[12].mxu0 %vm141_vm0, %v571_v21 }
  0xdd   :  { %v647_v22 = vpop.f32.mrb[0].mxu1 }
  0xde   :  { %460 = vrot.lane.b32.xlu1 %v647_v22, %s668_s9  ;;  %v377_v23 = vpop.f32.mrb[1].mxu1 }
  0xdf   :  { %456 = vrot.lane.b32.xlu0 %v377_v23, %s668_s9  ;;  %v648_v24 = vpop.f32.mrb[2].mxu1 }
  0xe0   :  { %v380_v25 = vpop.f32.mrb[3].mxu1 }
  0xe2   :  { %462 = vrot.lane.b32.xlu1 %v648_v24, %s668_s9  ;;  %v627_v5 = vpop.f32.mrb[0].mxu0 }
  0xe3   :  { %458 = vrot.lane.b32.xlu0 %v380_v25, %s668_s9  ;;  %v200_v28 = vpop.f32.mrb[1].mxu0 }
  0xe4   :  { %v628_v30 = vpop.f32.mrb[2].mxu0 }
  0xe5   :  { %v651_v26 = vpop.f32.mrb[4].mxu1  ;;  %v203_v32 = vpop.f32.mrb[3].mxu0 }
  0xe6   :  { %v393_v27 = vpop.f32.mrb[5].mxu1 }
  0xe7   :  { %468 = vrot.lane.b32.xlu0 %v651_v26, %s668_s9  ;;  %v652_v29 = vpop.f32.mrb[6].mxu1 }
  0xe8   :  { %470 = vrot.lane.b32.xlu1 %v652_v29, %s668_s9  ;;  %v396_v31 = vpop.f32.mrb[7].mxu1 }
  0xea   :  { %v631_v34 = vpop.f32.mrb[4].mxu0 }
  0xeb   :  { %464 = vrot.lane.b32.xlu0 %v393_v27, %s668_s9  ;;  %v216_v36 = vpop.f32.mrb[5].mxu0 }
  0xec   :  { %466 = vrot.lane.b32.xlu1 %v396_v31, %s668_s9  ;;  %v632_v38 = vpop.f32.mrb[6].mxu0 }
  0xed   :  { %v655_v33 = vpop.f32.mrb[8].mxu1  ;;  %v219_v40 = vpop.f32.mrb[7].mxu0 }
  0xee   :  { %v409_v35 = vpop.f32.mrb[9].mxu1 }
  0xef   :  { %476 = vrot.lane.b32.xlu0 %v655_v33, %s668_s9  ;;  %v656_v37 = vpop.f32.mrb[10].mxu1 }
  0xf0   :  { %478 = vrot.lane.b32.xlu1 %v656_v37, %s668_s9  ;;  %v412_v39 = vpop.f32.mrb[11].mxu1 }
  0xf2   :  { %v635_v42 = vpop.f32.mrb[8].mxu0 }
  0xf3   :  { %472 = vrot.lane.b32.xlu0 %v409_v35, %s668_s9  ;;  %v232_v44 = vpop.f32.mrb[9].mxu0 }
  0xf4   :  { %474 = vrot.lane.b32.xlu1 %v412_v39, %s668_s9  ;;  %v636_v46 = vpop.f32.mrb[10].mxu0 }
  0xf5   :  { %v659_v41 = vpop.f32.mrb[12].mxu1  ;;  %v235_v48 = vpop.f32.mrb[11].mxu0 }
  0xf6   :  { %v425_v43 = vpop.f32.mrb[13].mxu1 }
  0xf7   :  { %480 = vrot.lane.b32.xlu0 %v425_v43, %s668_s9  ;;  %v660_v45 = vpop.f32.mrb[14].mxu1 }
  0xf8   :  { %v428_v47 = vpop.f32.mrb[15].mxu1 }
  0xf9   :  { %482 = vrot.lane.b32.xlu1 %v428_v47, %s668_s9 }
  0xfa   :  { %v871_v49 = vpop.f32.mrb[12].mxu0 }
  0xfb   :  { %484 = vrot.lane.b32.xlu0 %v659_v41, %s668_s9  ;;  %v248_v50 = vpop.f32.mrb[13].mxu0 }
  0xfc   :  { %v873_v51 = vpop.f32.mrb[14].mxu0 }
  0xfd   :  { %486 = vrot.lane.b32.xlu1 %v660_v45, %s668_s9  ;;  %v251_v52 = vpop.f32.mrb[15].mxu0 }
 0x150   :  { %v461_v54 = vpop.permute.xlu1 %460 }
 0x151   :  { %v506_v55 = vsel %vm141_vm0, %v627_v5, %v461_v54  ;;  %v457_v56 = vpop.permute.xlu0 %456 }
 0x152   :  { %v529_v57 = vadd.f32 %v878_v53, %v506_v55  ;;  %v504_v58 = vsel %vm141_vm0, %v200_v28, %v457_v56 }
 0x153   :  { %v527_v59 = vadd.f32 %v878_v53, %v504_v58 }
 0x154   :  { %546 = vst.msk [vmem:[%s983_s5 + $0x10] sm:$0xff] %vm543_vm1, %v529_v57  ;;  %v463_v60 = vpop.permute.xlu1 %462 }
 0x155   :  { %544 = vst.msk [vmem:[%s983_s5] sm:$0xff] %vm543_vm1, %v527_v59  ;;  %v507_v61 = vsel %vm141_vm0, %v628_v30, %v463_v60  ;;  %v459_v62 = vpop.permute.xlu0 %458 }
 0x156   :  { %v530_v63 = vadd.f32 %v878_v53, %v507_v61  ;;  %v505_v0 = vsel %vm141_vm0, %v203_v32, %v459_v62 }
 0x157   :  { %v528_v1 = vadd.f32 %v878_v53, %v505_v0 }
 0x158   :  { %547 = vst.msk [vmem:[%s983_s5 + $0x18] sm:$0xff] %vm543_vm1, %v530_v63 }
 0x159   :  { %545 = vst.msk [vmem:[%s983_s5 + $0x8] sm:$0xff] %vm543_vm1, %v528_v1  ;;  %v469_v2 = vpop.permute.xlu0 %468 }
 0x15a   :  { %v510_v3 = vsel %vm141_vm0, %v631_v34, %v469_v2  ;;  %v471_v4 = vpop.permute.xlu1 %470 }
 0x15b   :  { %v533_v6 = vadd.f32 %v878_v53, %v510_v3  ;;  %v511_v7 = vsel %vm141_vm0, %v632_v38, %v471_v4 }
 0x15c   :  { %v534_v8 = vadd.f32 %v878_v53, %v511_v7 }
 0x15d   :  { %550 = vst.msk [vmem:[%s983_s5 + $0x30] sm:$0xff] %vm543_vm1, %v533_v6  ;;  %v465_v9 = vpop.permute.xlu0 %464 }
 0x15e   :  { %551 = vst.msk [vmem:[%s983_s5 + $0x38] sm:$0xff] %vm543_vm1, %v534_v8  ;;  %v508_v10 = vsel %vm141_vm0, %v216_v36, %v465_v9  ;;  %v467_v11 = vpop.permute.xlu1 %466 }
 0x15f   :  { %v531_v12 = vadd.f32 %v878_v53, %v508_v10  ;;  %v509_v13 = vsel %vm141_vm0, %v219_v40, %v467_v11 }
 0x160   :  { %v532_v14 = vadd.f32 %v878_v53, %v509_v13 }
 0x161   :  { %548 = vst.msk [vmem:[%s983_s5 + $0x20] sm:$0xff] %vm543_vm1, %v531_v12  ;;  %v477_v15 = vpop.permute.xlu0 %476 }
 0x162   :  { %549 = vst.msk [vmem:[%s983_s5 + $0x28] sm:$0xff] %vm543_vm1, %v532_v14  ;;  %v514_v16 = vsel %vm141_vm0, %v635_v42, %v477_v15  ;;  %v479_v17 = vpop.permute.xlu1 %478 }
 0x163   :  { %v537_v18 = vadd.f32 %v878_v53, %v514_v16  ;;  %v515_v19 = vsel %vm141_vm0, %v636_v46, %v479_v17 }
 0x164   :  { %v538_v20 = vadd.f32 %v878_v53, %v515_v19 }
 0x165   :  { %554 = vst.msk [vmem:[%s983_s5 + $0x50] sm:$0xff] %vm543_vm1, %v537_v18  ;;  %v473_v21 = vpop.permute.xlu0 %472 }
 0x166   :  { %555 = vst.msk [vmem:[%s983_s5 + $0x58] sm:$0xff] %vm543_vm1, %v538_v20  ;;  %v512_v22 = vsel %vm141_vm0, %v232_v44, %v473_v21  ;;  %v475_v23 = vpop.permute.xlu1 %474 }
 0x167   :  { %v535_v24 = vadd.f32 %v878_v53, %v512_v22  ;;  %v513_v25 = vsel %vm141_vm0, %v235_v48, %v475_v23 }
 0x168   :  { %v536_v26 = vadd.f32 %v878_v53, %v513_v25 }
 0x169   :  { %552 = vst.msk [vmem:[%s983_s5 + $0x40] sm:$0xff] %vm543_vm1, %v535_v24  ;;  %v481_v5 = vpop.permute.xlu0 %480 }
 0x16a   :  { %553 = vst.msk [vmem:[%s983_s5 + $0x48] sm:$0xff] %vm543_vm1, %v536_v26  ;;  %v516_v27 = vsel %vm141_vm0, %v248_v50, %v481_v5 }
 0x16b   :  { %v539_v28 = vadd.f32 %v878_v53, %v516_v27  ;;  %v483_v29 = vpop.permute.xlu1 %482 }
 0x16c   :  { %v517_v30 = vsel %vm141_vm0, %v251_v52, %v483_v29 }
 0x16d   :  { %556 = vst.msk [vmem:[%s983_s5 + $0x60] sm:$0xff] %vm543_vm1, %v539_v28  ;;  %v540_v31 = vadd.f32 %v878_v53, %v517_v30  ;;  %v485_v32 = vpop.permute.xlu0 %484 }
 0x16e   :  { %v518_v33 = vsel %vm141_vm0, %v871_v49, %v485_v32 }
 0x16f   :  { %557 = vst.msk [vmem:[%s983_s5 + $0x68] sm:$0xff] %vm543_vm1, %v540_v31  ;;  %v541_v34 = vadd.f32 %v878_v53, %v518_v33  ;;  %v487_v35 = vpop.permute.xlu1 %486 }
 0x170   :  { %v519_v36 = vsel %vm141_vm0, %v873_v51, %v487_v35 }
 0x171   :  { %558 = vst.msk [vmem:[%s983_s5 + $0x70] sm:$0xff] %vm543_vm1, %v541_v34  ;;  %v542_v37 = vadd.f32 %v878_v53, %v519_v36 }
 0x173   :  { %559 = vst.msk [vmem:[%s983_s5 + $0x78] sm:$0xff] %vm543_vm1, %v542_v37 }

// kernel: shake_resnet_forward.19
= control target key start
LH: loop header
LB: loop body
LE: loop exit
PB: predicated region body
PF: predicated region fallthrough
CT: control target
= control target key end

     0   :  { %v785_v14 = vmov 0   ;;  %vm350_vm0 = vcmask 261120   ;;  %s1077_s1 = inlined_call_operand.vmem [shape: bf16[288,128], index: 1, kind: input, shape index: {}]   ;;  %s1078_s0 = inlined_call_operand.vmem [shape: bf16[128,288], index: 0, kind: input, shape index: {}]   ;;  %s1079_s2 = inlined_call_operand.vmem [shape: f32[1,128], index: 2, kind: input, shape index: {}]   ;;  %s1080_s3 = inlined_call_operand.vmem [shape: f32[128,128], index: 3, kind: output, shape index: {}]  }
   0x1   :  { %v767_v0 = vld [vmem:[%s1077_s1 + $0x40] sm:$0xff]   ;;  %v769_v2 = vld [vmem:[%s1077_s1 + $0x48] sm:$0xff]   ;;  %v771_v4 = vld [vmem:[%s1077_s1 + $0x50] sm:$0xff]  }
   0x2   :  { %v768_v1 = vld [vmem:[%s1077_s1] sm:$0xff]   ;;  %656 = vmatprep.subr.bf16.mxu0 %v767_v0  ;;  %750 = vmatprep.subr.bf16.mxu1 %v767_v0  ;;  %v770_v3 = vld [vmem:[%s1077_s1 + $0x8] sm:$0xff]   ;;  %v772_v5 = vld [vmem:[%s1077_s1 + $0x10] sm:$0xff]  }
   0x3   :  { %657 = vmatpush3.bf16.msra.mxu0 %v768_v1  ;;  %758 = vmatpush3.bf16.msra.mxu1 %v768_v1  ;;  %v773_v6 = vld [vmem:[%s1077_s1 + $0x58] sm:$0xff]   ;;  %v775_v8 = vld [vmem:[%s1077_s1 + $0x60] sm:$0xff]   ;;  %v777_v10 = vld [vmem:[%s1077_s1 + $0x68] sm:$0xff]  }
   0x4   :  { %658 = vmatprep.subr.bf16.mxu0 %v769_v2  ;;  %751 = vmatprep.subr.bf16.mxu1 %v769_v2  ;;  %v774_v7 = vld [vmem:[%s1077_s1 + $0x18] sm:$0xff]   ;;  %v776_v9 = vld [vmem:[%s1077_s1 + $0x20] sm:$0xff]   ;;  %v17_v12 = vld [vmem:[%s1078_s0 + $0xc] sm:$0xff] }
   0x5   :  { %v15_v11 = vld [vmem:[%s1078_s0] sm:$0xff]  ;;  %v39_v13 = vld [vmem:[%s1078_s0 + $0x90] sm:$0xff]  ;;  %v49_v16 = vmax.bf16 %v785_v14, %v17_v12  ;;  %v778_v20 = vld [vmem:[%s1077_s1 + $0x28] sm:$0xff]  }
   0x6   :  { %v47_v15 = vmax.bf16 %v785_v14, %v15_v11  ;;  %v41_v17 = vld [vmem:[%s1078_s0 + $0x9c] sm:$0xff]  ;;  %v71_v18 = vmax.bf16 %v785_v14, %v39_v13  ;;  %v779_v22 = vld [vmem:[%s1077_s1 + $0x70] sm:$0xff]   ;;  %v21_v27 = vld [vmem:[%s1078_s0 + $0x24] sm:$0xff] }
   0x7   :  { %659 = vmatpush3.bf16.msra.mxu0 %v770_v3  ;;  %759 = vmatpush3.bf16.msra.mxu1 %v770_v3  ;;  %v73_v19 = vmax.bf16 %v785_v14, %v41_v17  ;;  %v780_v24 = vld [vmem:[%s1077_s1 + $0x30] sm:$0xff]   ;;  %v781_v25 = vld [vmem:[%s1077_s1 + $0x78] sm:$0xff]   ;;  %v43_v28 = vld [vmem:[%s1078_s0 + $0xa8] sm:$0xff]  ;;  %v53_v32 = vmax.bf16 %v785_v14, %v21_v27 }
   0x8   :  { %660 = vmatprep.subr.bf16.mxu0 %v771_v4  ;;  %752 = vmatprep.subr.bf16.mxu1 %v771_v4  ;;  %v607_v21 = vcombine.high %v47_v15, %v49_v16  ;;  %v19_v26 = vld [vmem:[%s1078_s0 + $0x18] sm:$0xff]  ;;  %v783_v33 = vld [vmem:[%s1077_s1 + $0x80] sm:$0xff]   ;;  %v75_v34 = vmax.bf16 %v785_v14, %v43_v28  ;;  %v606_v36 = vcombine.low %v47_v15, %v49_v16  ;;  %v784_v39 = vld [vmem:[%s1077_s1 + $0x88] sm:$0xff]  }
   0x9   :  { %v625_v23 = vcombine.high %v71_v18, %v73_v19  ;;  %v45_v29 = vld [vmem:[%s1078_s0 + $0xb4] sm:$0xff]  ;;  %v51_v31 = vmax.bf16 %v785_v14, %v19_v26  ;;  %v624_v37 = vcombine.low %v71_v18, %v73_v19  ;;  %v25_v42 = vld [vmem:[%s1078_s0 + $0x3c] sm:$0xff]  ;;  %v16_v43 = vld [vmem:[%s1078_s0 + $0x8] sm:$0xf] }
   0xa   :  { %407 = vmatprep.mubr.bf16.mxu0 %v607_v21  ;;  %v782_v30 = vld [vmem:[%s1077_s1 + $0x38] sm:$0xff]   ;;  %v77_v35 = vmax.bf16 %v785_v14, %v45_v29  ;;  %v23_v40 = vld [vmem:[%s1078_s0 + $0x30] sm:$0xff]  ;;  %v57_v46 = vmax.bf16 %v785_v14, %v25_v42  ;;  %v48_v47 = vmax.bf16 %v785_v14, %v16_v43  ;;  %v20_v53 = vld [vmem:[%s1078_s0 + $0x20] sm:$0xf] }
   0xb   :  { %661 = vmatpush3.bf16.msra.mxu0 %v772_v5  ;;  %760 = vmatpush3.bf16.msra.mxu1 %v772_v5  ;;  %v610_v38 = vcombine.high %v51_v31, %v53_v32  ;;  %v18_v44 = vld [vmem:[%s1078_s0 + $0x14] sm:$0xf]  ;;  %v55_v45 = vmax.bf16 %v785_v14, %v23_v40  ;;  %v609_v49 = vcombine.low %v51_v31, %v53_v32  ;;  %v22_v54 = vld [vmem:[%s1078_s0 + $0x2c] sm:$0xf]  ;;  %v24_v57 = vld [vmem:[%s1078_s0 + $0x38] sm:$0xf] }
   0xc   :  { %662 = vmatprep.subr.bf16.mxu0 %v773_v6  ;;  %753 = vmatprep.subr.bf16.mxu1 %v773_v6  ;;  %v628_v41 = vcombine.high %v75_v34, %v77_v35  ;;  %v50_v48 = vmax.bf16 %v785_v14, %v18_v44  ;;  %v627_v50 = vcombine.low %v75_v34, %v77_v35  ;;  %v27_v55 = vld [vmem:[%s1078_s0 + $0x48] sm:$0xff]  ;;  %v29_v56 = vld [vmem:[%s1078_s0 + $0x54] sm:$0xff]  ;;  %v26_v58 = vld [vmem:[%s1078_s0 + $0x44] sm:$0xf] }
   0xd   :  { %455 = vmatprep.mubr.bf16.mxu1 %v625_v23  ;;  %v613_v51 = vcombine.high %v55_v45, %v57_v46  ;;  %v52_v59 = vmax.bf16 %v785_v14, %v20_v53  ;;  %v54_v60 = vmax.bf16 %v785_v14, %v22_v54  ;;  %v59_v61 = vmax.bf16 %v785_v14, %v27_v55  ;;  %v28_v5 = vld [vmem:[%s1078_s0 + $0x50] sm:$0xf]  ;;  %v30_v6 = vld [vmem:[%s1078_s0 + $0x5c] sm:$0xf]  ;;  %v38_v23 = vld [vmem:[%s1078_s0 + $0x8c] sm:$0xf] }
   0xe   :  { %v608_v52 = vcombine.low %v48_v47, %v50_v48  ;;  %v61_v62 = vmax.bf16 %v785_v14, %v29_v56  ;;  %v56_v63 = vmax.bf16 %v785_v14, %v24_v57  ;;  %v58_v0 = vmax.bf16 %v785_v14, %v26_v58  ;;  %v40_v26 = vld [vmem:[%s1078_s0 + $0x98] sm:$0xf]  ;;  %v42_v27 = vld [vmem:[%s1078_s0 + $0xa4] sm:$0xf] }
   0xf   :  { %663 = vmatpush3.bf16.msra.mxu0 %v774_v7  ;;  %761 = vmatpush3.bf16.msra.mxu1 %v774_v7  ;;  %v612_v1 = vcombine.low %v55_v45, %v57_v46  ;;  %v611_v2 = vcombine.low %v52_v59, %v54_v60  ;;  %v31_v7 = vld [vmem:[%s1078_s0 + $0x60] sm:$0xff]  ;;  %v60_v11 = vmax.bf16 %v785_v14, %v28_v5 }
  0x10   :  { %664 = vmatprep.subr.bf16.mxu0 %v775_v8  ;;  %754 = vmatprep.subr.bf16.mxu1 %v775_v8  ;;  %v616_v3 = vcombine.high %v59_v61, %v61_v62  ;;  %v614_v4 = vcombine.low %v56_v63, %v58_v0  ;;  %v33_v8 = vld [vmem:[%s1078_s0 + $0x6c] sm:$0xff]  ;;  %v62_v12 = vmax.bf16 %v785_v14, %v30_v6 }
  0x11   :  { %v63_v13 = vmax.bf16 %v785_v14, %v31_v7  ;;  %v65_v15 = vmax.bf16 %v785_v14, %v33_v8  ;;  %v615_v18 = vcombine.low %v59_v61, %v61_v62  ;;  %v70_v29 = vmax.bf16 %v785_v14, %v38_v23 }
  0x12   :  { %v617_v19 = vcombine.low %v60_v11, %v62_v12  ;;  %v72_v32 = vmax.bf16 %v785_v14, %v40_v26 }
  0x13   :  { %665 = vmatpush3.bf16.msra.mxu0 %v776_v9  ;;  %762 = vmatpush3.bf16.msra.mxu1 %v776_v9  ;;  %v32_v9 = vld [vmem:[%s1078_s0 + $0x68] sm:$0xf]  ;;  %v618_v34 = vcombine.low %v63_v13, %v65_v15 }
  0x14   :  { %666 = vmatprep.subr.bf16.mxu0 %v777_v10  ;;  %755 = vmatprep.subr.bf16.mxu1 %v777_v10  ;;  %v34_v10 = vld [vmem:[%s1078_s0 + $0x74] sm:$0xf]  ;;  %v64_v16 = vmax.bf16 %v785_v14, %v32_v9 }
  0x15   :  { %v66_v17 = vmax.bf16 %v785_v14, %v34_v10 }
  0x17   :  { %667 = vmatpush3.bf16.msra.mxu0 %v778_v20  ;;  %763 = vmatpush3.bf16.msra.mxu1 %v778_v20  ;;  %v619_v20 = vcombine.high %v63_v13, %v65_v15  ;;  %v620_v21 = vcombine.low %v64_v16, %v66_v17 }
  0x18   :  { %668 = vmatprep.subr.bf16.mxu0 %v779_v22  ;;  %756 = vmatprep.subr.bf16.mxu1 %v779_v22  ;;  %v36_v22 = vld [vmem:[%s1078_s0 + $0x80] sm:$0xf] }
  0x19   :  { %v68_v28 = vmax.bf16 %v785_v14, %v36_v22 }
  0x1b   :  { %669 = vmatpush3.bf16.msra.mxu0 %v780_v24  ;;  %764 = vmatpush3.bf16.msra.mxu1 %v780_v24  ;;  %v35_v24 = vld [vmem:[%s1078_s0 + $0x78] sm:$0xff]  ;;  %v623_v35 = vcombine.low %v68_v28, %v70_v29 }
  0x1c   :  { %670 = vmatprep.subr.bf16.mxu0 %v781_v25  ;;  %757 = vmatprep.subr.bf16.mxu1 %v781_v25  ;;  %v37_v25 = vld [vmem:[%s1078_s0 + $0x84] sm:$0xff] }
  0x1d   :  { %v69_v31 = vmax.bf16 %v785_v14, %v37_v25 }
  0x1f   :  { %671 = vmatpush3.bf16.msra.mxu0 %v782_v30  ;;  %765 = vmatpush3.bf16.msra.mxu1 %v782_v30  ;;  %v67_v30 = vmax.bf16 %v785_v14, %v35_v24 }
  0x20   :  { %730 = vmatprep.subr.bf16.mxu1 %v783_v33 }
  0x21   :  { %v621_v42 = vcombine.low %v67_v30, %v69_v31 }
  0x22   :  { %408 = vmatmul.mubr.bf16.vlgmr.msra.gmra.mrb[0].mxu0 %v606_v36  ;;  %456 = vmatmul.mubr.bf16.vlgmr.msra.gmra.mrb[0].mxu1 %v624_v37  ;;  %v622_v36 = vcombine.high %v67_v30, %v69_v31 }
  0x23   :  { %731 = vmatpush3.bf16.msra.mxu1 %v783_v33  ;;  %415 = vmatprep.mubr.bf16.mxu0 %v610_v38  ;;  %v74_v33 = vmax.bf16 %v785_v14, %v42_v27  ;;  %v44_v38 = vld [vmem:[%s1078_s0 + $0xb0] sm:$0xf] }
  0x24   :  { %463 = vmatprep.mubr.bf16.mxu1 %v628_v41  ;;  %732 = vmatprep.subr.bf16.mxu1 %v784_v39  ;;  %v76_v40 = vmax.bf16 %v785_v14, %v44_v38 }
  0x25   :  { %v626_v37 = vcombine.low %v72_v32, %v74_v33 }
  0x27   :  { %733 = vmatpush3.bf16.msra.mxu1 %v784_v39  ;;  %v46_v39 = vld [vmem:[%s1078_s0 + $0xbc] sm:$0xf] }
  0x28   :  { %v78_v41 = vmax.bf16 %v785_v14, %v46_v39 }
  0x2a   :  { %416 = vmatmul.mubr.bf16.gmra.mrb[4].mxu0 %v609_v49  ;;  %464 = vmatmul.mubr.bf16.gmra.mrb[4].mxu1 %v627_v50  ;;  %v629_v43 = vcombine.low %v76_v40, %v78_v41 }
  0x2b   :  { %423 = vmatprep.mubr.bf16.mxu0 %v613_v51  ;;  %734 = vmatprep.mubr.msk.bf16.mxu1 %vm350_vm0, %v608_v52 }
  0x32   :  { %424 = vmatmul.mubr.bf16.gmra.mrb[8].mxu0 %v612_v1  ;;  %735 = vmatmul.mubr.msk.bf16.vlgmr.msra.gmra.mrb[8].mxu1 %vm350_vm0, %v611_v2 }
  0x33   :  { %431 = vmatprep.mubr.bf16.mxu0 %v616_v3  ;;  %738 = vmatprep.mubr.msk.bf16.mxu1 %vm350_vm0, %v614_v4  ;;  %v1007_v3 = vld [vmem:[%s1079_s2] ss:$0 sm:$0xff] }
  0x3a   :  { %432 = vmatmul.mubr.bf16.gmra.mrb[12].mxu0 %v615_v18  ;;  %739 = vmatmul.mubr.msk.bf16.gmra.mrb[12].mxu1 %vm350_vm0, %v617_v19 }
  0x3b   :  { %439 = vmatprep.mubr.bf16.mxu0 %v619_v20  ;;  %742 = vmatprep.mubr.msk.bf16.mxu1 %vm350_vm0, %v620_v21 }
  0x42   :  { %440 = vmatmul.mubr.bf16.gmra.mrb[16].mxu0 %v618_v34  ;;  %743 = vmatmul.mubr.msk.bf16.gmra.mrb[16].mxu1 %vm350_vm0, %v623_v35 }
  0x43   :  { %447 = vmatprep.mubr.bf16.mxu0 %v622_v36  ;;  %746 = vmatprep.mubr.msk.bf16.mxu1 %vm350_vm0, %v626_v37 }
  0x4a   :  { %448 = vmatmul.mubr.bf16.gmra.mrb[20].mxu0 %v621_v42  ;;  %747 = vmatmul.mubr.msk.bf16.gmra.mrb[20].mxu1 %vm350_vm0, %v629_v43 }
  0xf5   :  { %v672_v44 = vpop.f32.mrb[0].mxu0  ;;  %v708_v45 = vpop.f32.mrb[0].mxu1 }
  0xf6   :  { %v673_v46 = vpop.f32.mrb[1].mxu0  ;;  %v709_v47 = vpop.f32.mrb[1].mxu1 }
  0xf7   :  { %v674_v48 = vadd.f32 %v673_v46, %v672_v44  ;;  %v675_v49 = vpop.f32.mrb[2].mxu0  ;;  %v996_v50 = vadd.f32 %v709_v47, %v708_v45  ;;  %v711_v51 = vpop.f32.mrb[2].mxu1 }
  0xf8   :  { %v676_v52 = vpop.f32.mrb[3].mxu0  ;;  %v712_v53 = vpop.f32.mrb[3].mxu1 }
  0xf9   :  { %v677_v14 = vadd.f32 %v676_v52, %v675_v49  ;;  %v998_v54 = vadd.f32 %v712_v53, %v711_v51  ;;  %v410_v7 = vadd.f32 %v674_v48, %v1007_v3 }
  0xfb   :  { %v413_v17 = vadd.f32 %v677_v14, %v1007_v3 }
  0xfd   :  { %v678_v55 = vpop.f32.mrb[4].mxu0  ;;  %v714_v56 = vpop.f32.mrb[4].mxu1 }
  0xfe   :  { %v679_v57 = vpop.f32.mrb[5].mxu0  ;;  %v715_v58 = vpop.f32.mrb[5].mxu1 }
  0xff   :  { %v680_v59 = vadd.f32 %v679_v57, %v678_v55  ;;  %v681_v60 = vpop.f32.mrb[6].mxu0  ;;  %v1000_v61 = vadd.f32 %v715_v58, %v714_v56  ;;  %v717_v62 = vpop.f32.mrb[6].mxu1 }
 0x100   :  { %v682_v63 = vpop.f32.mrb[7].mxu0  ;;  %v718_v0 = vpop.f32.mrb[7].mxu1 }
 0x101   :  { %v683_v1 = vadd.f32 %v682_v63, %v681_v60  ;;  %v1002_v2 = vadd.f32 %v718_v0, %v717_v62  ;;  %v418_v4 = vadd.f32 %v680_v59, %v1007_v3  ;;  %v466_v0 = vadd.f32 %v1000_v61, %v1007_v3 }
 0x103   :  { %v421_v11 = vadd.f32 %v683_v1, %v1007_v3 }
 0x105   :  { %v684_v5 = vpop.f32.mrb[8].mxu0  ;;  %v736_v6 = vpop.f32.mrb[8].mxu1 }
 0x106   :  { %v515_v8 = vadd.f32 %v736_v6, %v418_v4  ;;  %v685_v9 = vpop.f32.mrb[9].mxu0  ;;  %v506_v10 = vpop.f32.mrb[9].mxu1 }
 0x107   :  { %v686_v12 = vadd.f32 %v685_v9, %v684_v5  ;;  %v507_v13 = vadd.f32 %v506_v10, %v410_v7  ;;  %v687_v15 = vpop.f32.mrb[10].mxu0  ;;  %v737_v16 = vpop.f32.mrb[10].mxu1  ;;  %v458_v7 = vadd.f32 %v996_v50, %v1007_v3 }
 0x108   :  { %v571_v18 = vmax.f32 %v515_v8, 0.0  ;;  %v518_v19 = vadd.f32 %v737_v16, %v421_v11  ;;  %v688_v20 = vpop.f32.mrb[11].mxu0  ;;  %v509_v21 = vpop.f32.mrb[11].mxu1  ;;  %v469_v11 = vadd.f32 %v1002_v2, %v1007_v3 }
 0x109   :  { %v569_v22 = vmax.f32 %v507_v13, 0.0  ;;  %v689_v23 = vadd.f32 %v688_v20, %v687_v15  ;;  %v510_v24 = vadd.f32 %v509_v21, %v413_v17  ;;  %v426_v29 = vadd.f32 %v686_v12, %v1007_v3 }
 0x10a   :  { %587 = vst [vmem:[%s1080_s3 + $0x10] sm:$0xff] %v571_v18  ;;  %v572_v25 = vmax.f32 %v518_v19, 0.0  ;;  %v461_v17 = vadd.f32 %v998_v54, %v1007_v3 }
 0x10b   :  { %585 = vst [vmem:[%s1080_s3] sm:$0xff] %v569_v22  ;;  %v570_v26 = vmax.f32 %v510_v24, 0.0  ;;  %v429_v36 = vadd.f32 %v689_v23, %v1007_v3 }
 0x10c   :  { %588 = vst [vmem:[%s1080_s3 + $0x18] sm:$0xff] %v572_v25 }
 0x10d   :  { %586 = vst [vmem:[%s1080_s3 + $0x8] sm:$0xff] %v570_v26  ;;  %v690_v27 = vpop.f32.mrb[12].mxu0  ;;  %v740_v28 = vpop.f32.mrb[12].mxu1 }
 0x10e   :  { %v691_v30 = vpop.f32.mrb[13].mxu0  ;;  %v522_v31 = vpop.f32.mrb[13].mxu1 }
 0x10f   :  { %v692_v32 = vadd.f32 %v691_v30, %v690_v27  ;;  %v523_v33 = vadd.f32 %v522_v31, %v426_v29  ;;  %v693_v34 = vpop.f32.mrb[14].mxu0  ;;  %v741_v35 = vpop.f32.mrb[14].mxu1 }
 0x110   :  { %v694_v37 = vpop.f32.mrb[15].mxu0  ;;  %v525_v38 = vpop.f32.mrb[15].mxu1 }
 0x111   :  { %v434_v39 = vadd.f32 %v692_v32, %v1007_v3  ;;  %v573_v40 = vmax.f32 %v523_v33, 0.0  ;;  %v695_v41 = vadd.f32 %v694_v37, %v693_v34  ;;  %v526_v42 = vadd.f32 %v525_v38, %v429_v36 }
 0x113   :  { %v531_v43 = vadd.f32 %v740_v28, %v434_v39  ;;  %589 = vst [vmem:[%s1080_s3 + $0x20] sm:$0xff] %v573_v40  ;;  %v437_v44 = vadd.f32 %v695_v41, %v1007_v3  ;;  %v574_v45 = vmax.f32 %v526_v42, 0.0 }
 0x115   :  { %v575_v46 = vmax.f32 %v531_v43, 0.0  ;;  %v534_v47 = vadd.f32 %v741_v35, %v437_v44  ;;  %590 = vst [vmem:[%s1080_s3 + $0x28] sm:$0xff] %v574_v45  ;;  %v696_v48 = vpop.f32.mrb[16].mxu0  ;;  %v744_v49 = vpop.f32.mrb[16].mxu1 }
 0x116   :  { %v697_v51 = vpop.f32.mrb[17].mxu0  ;;  %v538_v52 = vpop.f32.mrb[17].mxu1 }
 0x117   :  { %591 = vst [vmem:[%s1080_s3 + $0x30] sm:$0xff] %v575_v46  ;;  %v576_v53 = vmax.f32 %v534_v47, 0.0  ;;  %v698_v14 = vadd.f32 %v697_v51, %v696_v48  ;;  %v699_v55 = vpop.f32.mrb[18].mxu0  ;;  %v745_v56 = vpop.f32.mrb[18].mxu1 }
 0x118   :  { %v700_v57 = vpop.f32.mrb[19].mxu0  ;;  %v541_v58 = vpop.f32.mrb[19].mxu1 }
 0x119   :  { %592 = vst [vmem:[%s1080_s3 + $0x38] sm:$0xff] %v576_v53  ;;  %v442_v59 = vadd.f32 %v698_v14, %v1007_v3  ;;  %v701_v60 = vadd.f32 %v700_v57, %v699_v55 }
 0x11b   :  { %v539_v62 = vadd.f32 %v538_v52, %v442_v59  ;;  %v445_v63 = vadd.f32 %v701_v60, %v1007_v3 }
 0x11d   :  { %v577_v1 = vmax.f32 %v539_v62, 0.0  ;;  %v542_v4 = vadd.f32 %v541_v58, %v445_v63  ;;  %v702_v5 = vpop.f32.mrb[20].mxu0  ;;  %v748_v6 = vpop.f32.mrb[20].mxu1 }
 0x11e   :  { %v563_v8 = vadd.f32 %v748_v6, %v466_v0  ;;  %v703_v9 = vpop.f32.mrb[21].mxu0  ;;  %v554_v10 = vpop.f32.mrb[21].mxu1 }
 0x11f   :  { %593 = vst [vmem:[%s1080_s3 + $0x40] sm:$0xff] %v577_v1  ;;  %v578_v12 = vmax.f32 %v542_v4, 0.0  ;;  %v704_v13 = vadd.f32 %v703_v9, %v702_v5  ;;  %v555_v61 = vadd.f32 %v554_v10, %v458_v7  ;;  %v705_v15 = vpop.f32.mrb[22].mxu0  ;;  %v749_v16 = vpop.f32.mrb[22].mxu1 }
 0x120   :  { %v583_v18 = vmax.f32 %v563_v8, 0.0  ;;  %v566_v50 = vadd.f32 %v749_v16, %v469_v11  ;;  %v706_v19 = vpop.f32.mrb[23].mxu0  ;;  %v557_v20 = vpop.f32.mrb[23].mxu1 }
 0x121   :  { %594 = vst [vmem:[%s1080_s3 + $0x48] sm:$0xff] %v578_v12  ;;  %v450_v2 = vadd.f32 %v704_v13, %v1007_v3  ;;  %v581_v21 = vmax.f32 %v555_v61, 0.0  ;;  %v707_v22 = vadd.f32 %v706_v19, %v705_v15  ;;  %v558_v23 = vadd.f32 %v557_v20, %v461_v17 }
 0x122   :  { %599 = vst [vmem:[%s1080_s3 + $0x70] sm:$0xff] %v583_v18  ;;  %v584_v24 = vmax.f32 %v566_v50, 0.0 }
 0x123   :  { %v547_v25 = vadd.f32 %v744_v49, %v450_v2  ;;  %597 = vst [vmem:[%s1080_s3 + $0x60] sm:$0xff] %v581_v21  ;;  %v453_v54 = vadd.f32 %v707_v22, %v1007_v3  ;;  %v582_v26 = vmax.f32 %v558_v23, 0.0 }
 0x124   :  { %600 = vst [vmem:[%s1080_s3 + $0x78] sm:$0xff] %v584_v24 }
 0x125   :  { %v579_v27 = vmax.f32 %v547_v25, 0.0  ;;  %v550_v28 = vadd.f32 %v745_v56, %v453_v54  ;;  %598 = vst [vmem:[%s1080_s3 + $0x68] sm:$0xff] %v582_v26 }
 0x127   :  { %595 = vst [vmem:[%s1080_s3 + $0x50] sm:$0xff] %v579_v27  ;;  %v580_v29 = vmax.f32 %v550_v28, 0.0 }
 0x129   :  { %596 = vst [vmem:[%s1080_s3 + $0x58] sm:$0xff] %v580_v29 }

// kernel: shake_resnet_forward.22
= control target key start
LH: loop header
LB: loop body
LE: loop exit
PB: predicated region body
PF: predicated region fallthrough
CT: control target
= control target key end

     0   :  { %vm40_vm0 = vcmask 523264   ;;  %vm88_vm1 = vcmask 1041409   ;;  %vm91_vm2 = vcmask 517120   ;;  %s174_s0 = inlined_call_operand.vmem [shape: f32[2,64,64], index: 0, kind: input, shape index: {}]   ;;  %s175_s1 = inlined_call_operand.vmem [shape: f32[2,64], index: 1, kind: output, shape index: {}]  }
   0x1   :  { %v8_v0 = vld [vmem:[%s174_s0] sm:$0xff]  ;;  %v9_v1 = vld [vmem:[%s174_s0 + $0x8] sm:$0xff]  ;;  %v10_v2 = vld [vmem:[%s174_s0 + $0x10] sm:$0xff] }
   0x2   :  { %v11_v3 = vld [vmem:[%s174_s0 + $0x18] sm:$0xff]  ;;  %v24_v4 = vmax.f32 %v8_v0, 0.0  ;;  %v12_v5 = vld [vmem:[%s174_s0 + $0x20] sm:$0xff]  ;;  %v25_v7 = vmax.f32 %v9_v1, 0.0  ;;  %v26_v8 = vmax.f32 %v10_v2, 0.0  ;;  %v17_v9 = vld [vmem:[%s174_s0 + $0x48] sm:$0xff] }
   0x3   :  { %v16_v6 = vld [vmem:[%s174_s0 + $0x40] sm:$0xff]  ;;  %v18_v10 = vld [vmem:[%s174_s0 + $0x50] sm:$0xff]  ;;  %v19_v11 = vld [vmem:[%s174_s0 + $0x58] sm:$0xff]  ;;  %v27_v14 = vmax.f32 %v11_v3, 0.0  ;;  %v33_v16 = vmax.f32 %v17_v9, 0.0  ;;  %v28_v19 = vmax.f32 %v12_v5, 0.0 }
   0x4   :  { %v13_v12 = vld [vmem:[%s174_s0 + $0x28] sm:$0xff]  ;;  %v20_v13 = vld [vmem:[%s174_s0 + $0x60] sm:$0xff]  ;;  %v32_v15 = vmax.f32 %v16_v6, 0.0  ;;  %v34_v17 = vmax.f32 %v18_v10, 0.0  ;;  %v41_v18 = vsel %vm40_vm0, %v24_v4, 0.0  ;;  %v35_v20 = vmax.f32 %v19_v11, 0.0 }
   0x5   :  { %v42_v21 = vsel %vm40_vm0, %v25_v7, 0.0  ;;  %v44_v22 = vsel %vm40_vm0, %v26_v8, 0.0  ;;  %v14_v23 = vld [vmem:[%s174_s0 + $0x30] sm:$0xff]  ;;  %v21_v24 = vld [vmem:[%s174_s0 + $0x68] sm:$0xff]  ;;  %v29_v25 = vmax.f32 %v13_v12, 0.0  ;;  %v36_v26 = vmax.f32 %v20_v13, 0.0 }
   0x6   :  { %v43_v27 = vadd.f32 %v42_v21, %v41_v18  ;;  %v46_v28 = vsel %vm40_vm0, %v27_v14, 0.0  ;;  %v62_v29 = vsel %vm40_vm0, %v32_v15, 0.0  ;;  %v63_v30 = vsel %vm40_vm0, %v33_v16, 0.0  ;;  %v15_v32 = vld [vmem:[%s174_s0 + $0x38] sm:$0xff]  ;;  %v22_v33 = vld [vmem:[%s174_s0 + $0x70] sm:$0xff] }
   0x7   :  { %v65_v31 = vsel %vm40_vm0, %v34_v17, 0.0  ;;  %v64_v35 = vadd.f32 %v63_v30, %v62_v29  ;;  %v30_v36 = vmax.f32 %v14_v23, 0.0  ;;  %v37_v37 = vmax.f32 %v21_v24, 0.0  ;;  %v23_v40 = vld [vmem:[%s174_s0 + $0x78] sm:$0xff] }
   0x8   :  { %v45_v34 = vadd.f32 %v44_v22, %v43_v27  ;;  %v48_v38 = vsel %vm40_vm0, %v28_v19, 0.0  ;;  %v67_v39 = vsel %vm40_vm0, %v35_v20, 0.0  ;;  %v31_v43 = vmax.f32 %v15_v32, 0.0 }
   0x9   :  { %v66_v42 = vadd.f32 %v65_v31, %v64_v35  ;;  %v38_v44 = vmax.f32 %v22_v33, 0.0  ;;  %v50_v45 = vsel %vm40_vm0, %v29_v25, 0.0  ;;  %v69_v46 = vsel %vm40_vm0, %v36_v26, 0.0 }
   0xa   :  { %v47_v41 = vadd.f32 %v46_v28, %v45_v34  ;;  %v39_v49 = vmax.f32 %v23_v40, 0.0  ;;  %v52_v50 = vsel %vm40_vm0, %v30_v36, 0.0  ;;  %v71_v51 = vsel %vm40_vm0, %v37_v37, 0.0 }
   0xb   :  { %v68_v48 = vadd.f32 %v67_v39, %v66_v42  ;;  %v54_v54 = vsel %vm40_vm0, %v31_v43, 0.0  ;;  %v73_v55 = vsel %vm40_vm0, %v38_v44, 0.0 }
   0xc   :  { %v49_v47 = vadd.f32 %v48_v38, %v47_v41  ;;  %v75_v58 = vsel %vm40_vm0, %v39_v49, 0.0 }
   0xd   :  { %v70_v53 = vadd.f32 %v69_v46, %v68_v48 }
   0xe   :  { %v51_v52 = vadd.f32 %v50_v45, %v49_v47 }
   0xf   :  { %v72_v57 = vadd.f32 %v71_v51, %v70_v53 }
  0x10   :  { %v53_v56 = vadd.f32 %v52_v50, %v51_v52 }
  0x11   :  { %v74_v60 = vadd.f32 %v73_v55, %v72_v57 }
  0x12   :  { %v55_v59 = vadd.f32 %v54_v54, %v53_v56 }
  0x13   :  { %v76_v62 = vadd.f32 %v75_v58, %v74_v60 }
  0x14   :  { %v56_v61 = vrot.slane %v55_v59, 4 }
  0x15   :  { %v77_v0 = vrot.slane %v76_v62, 4 }
  0x16   :  { %v57_v63 = vadd.f32 %v56_v61, %v55_v59 }
  0x17   :  { %v78_v2 = vadd.f32 %v77_v0, %v76_v62 }
  0x18   :  { %v58_v1 = vrot.slane %v57_v63, 2 }
  0x19   :  { %v79_v4 = vrot.slane %v78_v2, 2 }
  0x1a   :  { %v59_v3 = vadd.f32 %v58_v1, %v57_v63 }
  0x1b   :  { %v80_v6 = vadd.f32 %v79_v4, %v78_v2 }
  0x1c   :  { %v60_v5 = vrot.slane %v59_v3, 1 }
  0x1d   :  { %v81_v8 = vrot.slane %v80_v6, 1 }
  0x1e   :  { %v61_v7 = vadd.f32 %v60_v5, %v59_v3 }
  0x1f   :  { %v82_v9 = vadd.f32 %v81_v8, %v80_v6 }
  0x20   :  { %v84_v10 = vmul.f32 0.015625, %v61_v7 }
  0x21   :  { %v85_v11 = vmul.f32 0.015625, %v82_v9 }
  0x23   :  { %v89_v12 = vsel %vm88_vm1, %v85_v11, %v84_v10 }
  0x24   :  { %92 = vst.msk [vmem:[%s175_s1] sm:$0x3] %vm91_vm2, %v89_v12 }

// kernel: shake_resnet_forward.23
= control target key start
LH: loop header
LB: loop body
LE: loop exit
PB: predicated region body
PF: predicated region fallthrough
CT: control target
= control target key end

     0   :  { %v170_v1 = vmov 0.0   ;;  %vm171_vm0 = vmmov 0   ;;  %s223_s0 = inlined_call_operand.vmem [shape: bf16[2,64], index: 0, kind: input, shape index: {}]   ;;  %s224_s1 = inlined_call_operand.vmem [shape: bf16[64,10], index: 1, kind: input, shape index: {}]   ;;  %s225_s2 = inlined_call_operand.vmem [shape: f32[1,10], index: 2, kind: input, shape index: {}]   ;;  %s226_s3 = inlined_call_operand.hbm [shape: f32[2,10], index: 3, kind: output, shape index: {}]  }
   0x1   :  { %v142_v0 = vld [vmem:[%s224_s1] sm:$0xff]   ;;  %127 = vmatprep.subr.bf16.mxu0 %v170_v1  ;;  %v143_v2 = vld [vmem:[%s224_s1 + $0x8] sm:$0xff]   ;;  %135 = vmatprep.mubr.msk.bf16.mxu0 %vm171_vm0, %v170_v1 }
   0x2   :  { %128 = vmatpush3.bf16.msra.mxu0 %v142_v0 }
   0x3   :  { %129 = vmatprep.subr.bf16.mxu0 %v170_v1 }
   0x4   :  { %8 = vsyncpa [#allocation3], 0  ;;  %v144_v3 = vld [vmem:[%s224_s1 + $0x10] sm:$0xff]   ;;  %v145_v4 = vld [vmem:[%s224_s1 + $0x18] sm:$0xff]   ;;  %vm56_vm1 = vcmask 523264   ;;  %s172_s24 = smov [#allocation2]  }
   0x5   :  { %v16_v5 = vld [vmem:[%s223_s0] sm:$0x1]  ;;  %s108_s25 = sshll.u32 %s172_s24, 4  ;;  %vm100_vm2 = vcmask 74752   ;;  %s109_s25 = int_to_ptr.vmem [resolvable:$true] %s108_s25 }
   0x6   :  { %130 = vmatpush3.bf16.msra.mxu0 %v143_v2  ;;  %v116_v6 = vld [vmem:[%s225_s2] ss:$0 sm:$0xff]  ;;  %s146_s1 = scalar_lea.vmem %s109_s25, 32  ;;  %p151_p1 = scmp.lt.s32.totalorder %s109_s25, %s109_s25 }
   0x7   :  { %131 = vmatprep.subr.bf16.mxu0 %v170_v1  ;;  %p147_p0 = scmp.ne.s32.totalorder %s109_s25, %s146_s1  ;;  %p152_p2 = scmp.lt.s32.totalorder %s146_s1, %s146_s1 }
   0x9   :  { %p153_p3 = por %p152_p2, %p151_p1 }
   0xa   :  { %132 = vmatpush3.bf16.msra.mxu0 %v144_v3 }
   0xb   :  { %133 = vmatprep.subr.bf16.mxu0 %v170_v1  ;;  %p154_p4 = pnand %p153_p3, %p147_p0 }
   0xe   :  { %134 = vmatpush3.bf16.msra.mxu0 %v145_v4 }
  0x11   :  { %136 = vmatmul.mubr.msk.bf16.vlgmr.msra.gmra.mrb[0].mxu0 %vm56_vm1, %v16_v5 }
  0xe4   :  { %v94_v7 = vpop.f32.mrb[0].mxu0 }
  0xe5   :  { %v95_v8 = vadd.f32 %v116_v6, %v94_v7  ;;  %v137_v9 = vpop.f32.mrb[1].mxu0 }
  0xe6   :  { %v97_v10 = vpop.f32.mrb[2].mxu0 }
  0xe7   :  { %v138_v11 = vpop.f32.mrb[3].mxu0  ;;  %101 = vst.msk [vmem:[#allocation2] sm:$0x3] %vm100_vm2, %v95_v8 }
  0xe8   :  { %157 = shalt.err (!%p154_p4)
}
  0xe9   :  { %s158_s2 = scalar_lea.hbm %s226_s3, 32 }
  0xea   :  { %p159_p5 = scmp.ne.s32.totalorder %s226_s3, %s158_s2  ;;  %p162_p6 = scmp.lt.u32.totalorder %s158_s2, %s226_s3 }
  0xec   :  { %p164_p7 = pnand %p162_p6, %p159_p5 }
  0xee   :  { %167 = shalt.err (!%p164_p7)
}
  0xef   :  { %111 = dma.vmem_to_hbm [thread:$0]  %s109_s25, 32, %s226_s3, [#allocation3]  }
  0xf0   :  { %168 = dma.done.wait [#allocation3], 32  }
  0xf1   :  { %169 = vsyncadd [#allocation3], 4294967264 }
  0xf2   :  { %115 = vsyncpa [#allocation3], 1 }

// kernel: shake_resnet_forward.21
= control target key start
LH: loop header
LB: loop body
LE: loop exit
PB: predicated region body
PF: predicated region fallthrough
CT: control target
= control target key end

     0   :  { %vm1566_vm0 = vcmask 523264   ;;  %s2905_s1 = inlined_call_operand.vmem [shape: bf16[1152,64], index: 1, kind: input, shape index: {}]   ;;  %s2906_s0 = inlined_call_operand.vmem [shape: bf16[128,1152], index: 0, kind: input, shape index: {}]   ;;  %s2907_s2 = inlined_call_operand.vmem [shape: f32[1,64], index: 2, kind: input, shape index: {}]   ;;  %s2908_s3 = inlined_call_operand.vmem [shape: f32[128,64], index: 3, kind: input, shape index: {}]   ;;  %s2909_s4 = inlined_call_operand.vmem [shape: f32[128,64], index: 4, kind: output, shape index: {}]  }
   0x1   :  { %v2052_v0 = vld [vmem:[%s2905_s1 + $0x40] sm:$0xff]   ;;  %v2056_v4 = vld [vmem:[%s2905_s1 + $0x48] sm:$0xff]   ;;  %v2060_v8 = vld [vmem:[%s2905_s1 + $0x50] sm:$0xff]  }
   0x2   :  { %v2053_v1 = vld [vmem:[%s2905_s1 + $0xc0] sm:$0xff]   ;;  %1732 = vmatprep.subr.bf16.mxu0 %v2052_v0  ;;  %v2057_v5 = vld [vmem:[%s2905_s1 + $0xc8] sm:$0xff]   ;;  %v2061_v9 = vld [vmem:[%s2905_s1 + $0xd0] sm:$0xff]  }
   0x3   :  { %v2054_v2 = vld [vmem:[%s2905_s1] sm:$0xff]   ;;  %1796 = vmatprep.subr.bf16.mxu1 %v2053_v1  ;;  %v2058_v6 = vld [vmem:[%s2905_s1 + $0x8] sm:$0xff]   ;;  %v2062_v10 = vld [vmem:[%s2905_s1 + $0x10] sm:$0xff]  }
   0x4   :  { %v2055_v3 = vld [vmem:[%s2905_s1 + $0x80] sm:$0xff]   ;;  %1733 = vmatpush3.bf16.msra.mxu0 %v2054_v2  ;;  %v2059_v7 = vld [vmem:[%s2905_s1 + $0x88] sm:$0xff]   ;;  %v2063_v11 = vld [vmem:[%s2905_s1 + $0x90] sm:$0xff]  }
   0x5   :  { %1797 = vmatpush3.bf16.msra.mxu1 %v2055_v3  ;;  %1734 = vmatprep.subr.bf16.mxu0 %v2056_v4  ;;  %v2064_v12 = vld [vmem:[%s2905_s1 + $0x58] sm:$0xff]   ;;  %v2068_v16 = vld [vmem:[%s2905_s1 + $0x60] sm:$0xff]   ;;  %v2072_v20 = vld [vmem:[%s2905_s1 + $0x68] sm:$0xff]  }
   0x6   :  { %1798 = vmatprep.subr.bf16.mxu1 %v2057_v5  ;;  %v2065_v13 = vld [vmem:[%s2905_s1 + $0xd8] sm:$0xff]   ;;  %v2069_v17 = vld [vmem:[%s2905_s1 + $0xe0] sm:$0xff]   ;;  %v2073_v21 = vld [vmem:[%s2905_s1 + $0xe8] sm:$0xff]  }
   0x7   :  { %v2066_v14 = vld [vmem:[%s2905_s1 + $0x18] sm:$0xff]   ;;  %v2070_v18 = vld [vmem:[%s2905_s1 + $0x20] sm:$0xff]   ;;  %v2074_v22 = vld [vmem:[%s2905_s1 + $0x28] sm:$0xff]  }
   0x8   :  { %1735 = vmatpush3.bf16.msra.mxu0 %v2058_v6  ;;  %v2067_v15 = vld [vmem:[%s2905_s1 + $0x98] sm:$0xff]   ;;  %v2071_v19 = vld [vmem:[%s2905_s1 + $0xa0] sm:$0xff]   ;;  %v2075_v23 = vld [vmem:[%s2905_s1 + $0xa8] sm:$0xff]  }
   0x9   :  { %1799 = vmatpush3.bf16.msra.mxu1 %v2059_v7  ;;  %1736 = vmatprep.subr.bf16.mxu0 %v2060_v8  ;;  %v2076_v24 = vld [vmem:[%s2905_s1 + $0x70] sm:$0xff]   ;;  %v2080_v28 = vld [vmem:[%s2905_s1 + $0x78] sm:$0xff]   ;;  %v2084_v32 = vld [vmem:[%s2906_s0] ss:$36 sps:$4 sm:$0xff]  }
   0xa   :  { %1800 = vmatprep.subr.bf16.mxu1 %v2061_v9  ;;  %v2077_v25 = vld [vmem:[%s2905_s1 + $0xf0] sm:$0xff]   ;;  %v2081_v29 = vld [vmem:[%s2905_s1 + $0xf8] sm:$0xff]   ;;  %v2086_v33 = vld [vmem:[%s2906_s0 + $0x4] ss:$36 sps:$4 sm:$0xff]  }
   0xb   :  { %v2078_v26 = vld [vmem:[%s2905_s1 + $0x30] sm:$0xff]   ;;  %v2082_v30 = vld [vmem:[%s2905_s1 + $0x38] sm:$0xff]   ;;  %v2087_v34 = vld [vmem:[%s2906_s0 + $0x8] ss:$36 sps:$4 sm:$0xff]   ;;  %1081 = vmatprep.mubr.bf16.mxu0 %v2086_v33 }
   0xc   :  { %1737 = vmatpush3.bf16.msra.mxu0 %v2062_v10  ;;  %v2079_v27 = vld [vmem:[%s2905_s1 + $0xb0] sm:$0xff]   ;;  %v2083_v31 = vld [vmem:[%s2905_s1 + $0xb8] sm:$0xff]   ;;  %v2090_v36 = vld [vmem:[%s2905_s1 + $0x140] sm:$0xff]  }
   0xd   :  { %1801 = vmatpush3.bf16.msra.mxu1 %v2063_v11  ;;  %1738 = vmatprep.subr.bf16.mxu0 %v2064_v12  ;;  %v2089_v35 = vld [vmem:[%s2906_s0 + $0xc] ss:$36 sps:$4 sm:$0xff]   ;;  %v2091_v37 = vld [vmem:[%s2905_s1 + $0x1c0] sm:$0xff]   ;;  %v2096_v41 = vld [vmem:[%s2906_s0 + $0x54] ss:$36 sps:$4 sm:$0xff]  }
   0xe   :  { %1802 = vmatprep.subr.bf16.mxu1 %v2065_v13  ;;  %1178 = vmatprep.mubr.bf16.mxu1 %v2089_v35  ;;  %v2092_v38 = vld [vmem:[%s2905_s1 + $0x100] sm:$0xff]   ;;  %v2094_v40 = vld [vmem:[%s2906_s0 + $0x4c] ss:$36 sps:$4 sm:$0xff]   ;;  %v2104_v48 = vld [vmem:[%s2906_s0 + $0x94] ss:$36 sps:$4 sm:$0xff]  }
   0xf   :  { %v2093_v39 = vld [vmem:[%s2905_s1 + $0x180] sm:$0xff]   ;;  %v2098_v42 = vld [vmem:[%s2906_s0 + $0x48] ss:$36 sps:$4 sm:$0xff]   ;;  %v2099_v43 = vld [vmem:[%s2906_s0 + $0x50] ss:$36 sps:$4 sm:$0xff]  }
  0x10   :  { %1739 = vmatpush3.bf16.msra.mxu0 %v2066_v14  ;;  %v2100_v44 = vld [vmem:[%s2905_s1 + $0x148] sm:$0xff]   ;;  %v2106_v49 = vld [vmem:[%s2906_s0 + $0x9c] ss:$36 sps:$4 sm:$0xff]   ;;  %v2108_v50 = vld [vmem:[%s2906_s0 + $0x90] ss:$36 sps:$4 sm:$0xff]  }
  0x11   :  { %1803 = vmatpush3.bf16.msra.mxu1 %v2067_v15  ;;  %1740 = vmatprep.subr.bf16.mxu0 %v2068_v16  ;;  %v2101_v45 = vld [vmem:[%s2905_s1 + $0x1c8] sm:$0xff]   ;;  %v2109_v51 = vld [vmem:[%s2906_s0 + $0x98] ss:$36 sps:$4 sm:$0xff]   ;;  %v2110_v52 = vld [vmem:[%s2905_s1 + $0x150] sm:$0xff]  }
  0x12   :  { %1804 = vmatprep.subr.bf16.mxu1 %v2069_v17  ;;  %v2102_v46 = vld [vmem:[%s2905_s1 + $0x108] sm:$0xff]   ;;  %v2111_v53 = vld [vmem:[%s2905_s1 + $0x1d0] sm:$0xff]   ;;  %v2114_v56 = vld [vmem:[%s2906_s0 + $0xdc] ss:$36 sps:$4 sm:$0xff]  }
  0x13   :  { %v2103_v47 = vld [vmem:[%s2905_s1 + $0x188] sm:$0xff]   ;;  %v2112_v54 = vld [vmem:[%s2905_s1 + $0x110] sm:$0xff]   ;;  %v2118_v58 = vld [vmem:[%s2906_s0 + $0xd8] ss:$36 sps:$4 sm:$0xff]  }
  0x14   :  { %1741 = vmatpush3.bf16.msra.mxu0 %v2070_v18  ;;  %v2113_v55 = vld [vmem:[%s2905_s1 + $0x190] sm:$0xff]   ;;  %v2116_v57 = vld [vmem:[%s2906_s0 + $0xe4] ss:$36 sps:$4 sm:$0xff]   ;;  %v2120_v60 = vld [vmem:[%s2905_s1 + $0x158] sm:$0xff]  }
  0x15   :  { %1805 = vmatpush3.bf16.msra.mxu1 %v2071_v19  ;;  %1742 = vmatprep.subr.bf16.mxu0 %v2072_v20  ;;  %v2119_v59 = vld [vmem:[%s2906_s0 + $0xe0] ss:$36 sps:$4 sm:$0xff]   ;;  %v2121_v61 = vld [vmem:[%s2905_s1 + $0x1d8] sm:$0xff]   ;;  %v2126_v1 = vld [vmem:[%s2906_s0 + $0x12c] ss:$36 sps:$4 sm:$0xff]  }
  0x16   :  { %1806 = vmatprep.subr.bf16.mxu1 %v2073_v21  ;;  %v2122_v62 = vld [vmem:[%s2905_s1 + $0x118] sm:$0xff]   ;;  %v2124_v0 = vld [vmem:[%s2906_s0 + $0x124] ss:$36 sps:$4 sm:$0xff]   ;;  %v2134_v8 = vld [vmem:[%s2906_s0 + $0x16c] ss:$36 sps:$4 sm:$0xff]  }
  0x17   :  { %v2123_v63 = vld [vmem:[%s2905_s1 + $0x198] sm:$0xff]   ;;  %v2128_v2 = vld [vmem:[%s2906_s0 + $0x120] ss:$36 sps:$4 sm:$0xff]   ;;  %v2129_v4 = vld [vmem:[%s2906_s0 + $0x128] ss:$36 sps:$4 sm:$0xff]  }
  0x18   :  { %1743 = vmatpush3.bf16.msra.mxu0 %v2074_v22  ;;  %v2130_v3 = vld [vmem:[%s2905_s1 + $0x160] sm:$0xff]   ;;  %v2136_v9 = vld [vmem:[%s2906_s0 + $0x174] ss:$36 sps:$4 sm:$0xff]   ;;  %v2140_v10 = vld [vmem:[%s2905_s1 + $0x168] sm:$0xff]  }
  0x19   :  { %1807 = vmatpush3.bf16.msra.mxu1 %v2075_v23  ;;  %1744 = vmatprep.subr.bf16.mxu0 %v2076_v24  ;;  %v2131_v5 = vld [vmem:[%s2905_s1 + $0x1e0] sm:$0xff]   ;;  %v2141_v11 = vld [vmem:[%s2905_s1 + $0x1e8] sm:$0xff]   ;;  %v2139_v15 = vld [vmem:[%s2906_s0 + $0x170] ss:$36 sps:$4 sm:$0xff]  }
  0x1a   :  { %1808 = vmatprep.subr.bf16.mxu1 %v2077_v25  ;;  %v2132_v6 = vld [vmem:[%s2905_s1 + $0x120] sm:$0xff]   ;;  %v2138_v12 = vld [vmem:[%s2906_s0 + $0x168] ss:$36 sps:$4 sm:$0xff]   ;;  %v2144_v16 = vld [vmem:[%s2906_s0 + $0x1b4] ss:$36 sps:$4 sm:$0xff]  }
  0x1b   :  { %v2133_v7 = vld [vmem:[%s2905_s1 + $0x1a0] sm:$0xff]   ;;  %v2142_v13 = vld [vmem:[%s2905_s1 + $0x128] sm:$0xff]   ;;  %v2150_v18 = vld [vmem:[%s2905_s1 + $0x170] sm:$0xff]  }
  0x1c   :  { %1745 = vmatpush3.bf16.msra.mxu0 %v2078_v26  ;;  %v2143_v14 = vld [vmem:[%s2905_s1 + $0x1a8] sm:$0xff]   ;;  %v2146_v17 = vld [vmem:[%s2906_s0 + $0x1bc] ss:$36 sps:$4 sm:$0xff]   ;;  %v2151_v19 = vld [vmem:[%s2905_s1 + $0x1f0] sm:$0xff]  }
  0x1d   :  { %1809 = vmatpush3.bf16.msra.mxu1 %v2079_v27  ;;  %1746 = vmatprep.subr.bf16.mxu0 %v2080_v28  ;;  %v2152_v20 = vld [vmem:[%s2905_s1 + $0x130] sm:$0xff]   ;;  %v2149_v23 = vld [vmem:[%s2906_s0 + $0x1b8] ss:$36 sps:$4 sm:$0xff]   ;;  %v2156_v25 = vld [vmem:[%s2906_s0 + $0x204] ss:$36 sps:$4 sm:$0xff]  }
  0x1e   :  { %1810 = vmatprep.subr.bf16.mxu1 %v2081_v29  ;;  %v2153_v21 = vld [vmem:[%s2905_s1 + $0x1b0] sm:$0xff]   ;;  %v2154_v24 = vld [vmem:[%s2906_s0 + $0x1fc] ss:$36 sps:$4 sm:$0xff]  }
  0x1f   :  { %v2148_v22 = vld [vmem:[%s2906_s0 + $0x1b0] ss:$36 sps:$4 sm:$0xff]   ;;  %v2160_v26 = vld [vmem:[%s2905_s1 + $0x178] sm:$0xff]  }
  0x20   :  { %1747 = vmatpush3.bf16.msra.mxu0 %v2082_v30  ;;  %v2161_v27 = vld [vmem:[%s2905_s1 + $0x1f8] sm:$0xff]   ;;  %v2164_v35 = vld [vmem:[%s2906_s0 + $0x10] ss:$36 sps:$4 sm:$0xff]  }
  0x21   :  { %1811 = vmatpush3.bf16.msra.mxu1 %v2083_v31  ;;  %1860 = vmatprep.subr.bf16.mxu0 %v2090_v36  ;;  %v2162_v28 = vld [vmem:[%s2905_s1 + $0x138] sm:$0xff]   ;;  %v2159_v31 = vld [vmem:[%s2906_s0 + $0x200] ss:$36 sps:$4 sm:$0xff]  }
  0x22   :  { %1924 = vmatprep.subr.bf16.mxu1 %v2091_v37  ;;  %v2163_v29 = vld [vmem:[%s2905_s1 + $0x1b8] sm:$0xff]  }
  0x23   :  { %1082 = vmatmul.mubr.bf16.vlgmr.msra.gmra.mrb[0].mxu0 %v2084_v32  ;;  %v2158_v30 = vld [vmem:[%s2906_s0 + $0x1f8] ss:$36 sps:$4 sm:$0xff]   ;;  %v2170_v32 = vld [vmem:[%s2905_s1 + $0x200] sm:$0xff]  }
  0x24   :  { %1179 = vmatmul.mubr.bf16.vlgmr.msra.gmra.mrb[0].mxu1 %v2087_v34  ;;  %1861 = vmatpush3.bf16.msra.mxu0 %v2092_v38  ;;  %v2166_v33 = vld [vmem:[%s2906_s0 + $0x14] ss:$36 sps:$4 sm:$0xff]   ;;  %v2169_v34 = vld [vmem:[%s2906_s0 + $0x1c] ss:$36 sps:$4 sm:$0xff]   ;;  %v2173_v38 = vld [vmem:[%s2906_s0 + $0x64] ss:$36 sps:$4 sm:$0xff]  }
  0x25   :  { %1925 = vmatpush3.bf16.msra.mxu1 %v2093_v39  ;;  %1089 = vmatprep.mubr.bf16.mxu0 %v2094_v40  ;;  %v2167_v36 = vld [vmem:[%s2906_s0 + $0x18] ss:$36 sps:$4 sm:$0xff]   ;;  %v2177_v39 = vld [vmem:[%s2905_s1 + $0x208] sm:$0xff]   ;;  %v2184_v40 = vld [vmem:[%s2905_s1 + $0x210] sm:$0xff]  }
  0x26   :  { %1186 = vmatprep.mubr.bf16.mxu1 %v2096_v41  ;;  %1862 = vmatprep.subr.bf16.mxu0 %v2100_v44  ;;  %v2171_v37 = vld [vmem:[%s2906_s0 + $0x5c] ss:$36 sps:$4 sm:$0xff]   ;;  %v2180_v44 = vld [vmem:[%s2906_s0 + $0xac] ss:$36 sps:$4 sm:$0xff]  }
  0x27   :  { %1926 = vmatprep.subr.bf16.mxu1 %v2101_v45  ;;  %v2175_v41 = vld [vmem:[%s2906_s0 + $0x58] ss:$36 sps:$4 sm:$0xff]  }
  0x28   :  { %1863 = vmatpush3.bf16.msra.mxu0 %v2102_v46  ;;  %v2191_v45 = vld [vmem:[%s2905_s1 + $0x218] sm:$0xff]   ;;  %v2198_v46 = vld [vmem:[%s2905_s1 + $0x220] sm:$0xff]  }
  0x29   :  { %1927 = vmatpush3.bf16.msra.mxu1 %v2103_v47  ;;  %1864 = vmatprep.subr.bf16.mxu0 %v2110_v52  ;;  %v2182_v47 = vld [vmem:[%s2906_s0 + $0xa0] ss:$36 sps:$4 sm:$0xff]   ;;  %v2189_v52 = vld [vmem:[%s2906_s0 + $0xe8] ss:$36 sps:$4 sm:$0xff]  }
  0x2a   :  { %1928 = vmatprep.subr.bf16.mxu1 %v2111_v53  ;;  %v2212_v53 = vld [vmem:[%s2905_s1 + $0x230] sm:$0xff]  }
  0x2b   :  { %1090 = vmatmul.mubr.bf16.gmra.mrb[4].mxu0 %v2098_v42  ;;  %v2176_v42 = vld [vmem:[%s2906_s0 + $0x60] ss:$36 sps:$4 sm:$0xff]  }
  0x2c   :  { %1187 = vmatmul.mubr.bf16.gmra.mrb[4].mxu1 %v2099_v43  ;;  %1097 = vmatprep.mubr.bf16.mxu0 %v2104_v48  ;;  %v2178_v43 = vld [vmem:[%s2906_s0 + $0xa4] ss:$36 sps:$4 sm:$0xff]  }
  0x2d   :  { %1194 = vmatprep.mubr.bf16.mxu1 %v2106_v49  ;;  %1865 = vmatpush3.bf16.msra.mxu0 %v2112_v54  ;;  %v2183_v48 = vld [vmem:[%s2906_s0 + $0xa8] ss:$36 sps:$4 sm:$0xff]   ;;  %v2190_v54 = vld [vmem:[%s2906_s0 + $0xf0] ss:$36 sps:$4 sm:$0xff]  }
  0x2e   :  { %1929 = vmatpush3.bf16.msra.mxu1 %v2113_v55  ;;  %1866 = vmatprep.subr.bf16.mxu0 %v2120_v60  ;;  %v2185_v49 = vld [vmem:[%s2906_s0 + $0xec] ss:$36 sps:$4 sm:$0xff]   ;;  %v2192_v55 = vld [vmem:[%s2906_s0 + $0x134] ss:$36 sps:$4 sm:$0xff]   ;;  %v2199_v60 = vld [vmem:[%s2906_s0 + $0x17c] ss:$36 sps:$4 sm:$0xff]  }
  0x2f   :  { %1930 = vmatprep.subr.bf16.mxu1 %v2121_v61  ;;  %v2201_v61 = vld [vmem:[%s2906_s0 + $0x184] ss:$36 sps:$4 sm:$0xff]  }
  0x31   :  { %1867 = vmatpush3.bf16.msra.mxu0 %v2122_v62  ;;  %v2203_v62 = vld [vmem:[%s2906_s0 + $0x178] ss:$36 sps:$4 sm:$0xff]  }
  0x32   :  { %1931 = vmatpush3.bf16.msra.mxu1 %v2123_v63  ;;  %1868 = vmatprep.subr.bf16.mxu0 %v2130_v3  ;;  %v2204_v63 = vld [vmem:[%s2906_s0 + $0x180] ss:$36 sps:$4 sm:$0xff]   ;;  %v2211_v3 = vld [vmem:[%s2906_s0 + $0x1c8] ss:$36 sps:$4 sm:$0xff]  }
  0x33   :  { %1098 = vmatmul.mubr.bf16.gmra.mrb[8].mxu0 %v2108_v50  ;;  %1932 = vmatprep.subr.bf16.mxu1 %v2131_v5  ;;  %v2187_v50 = vld [vmem:[%s2906_s0 + $0xf4] ss:$36 sps:$4 sm:$0xff]  }
  0x34   :  { %1195 = vmatmul.mubr.bf16.gmra.mrb[8].mxu1 %v2109_v51  ;;  %1105 = vmatprep.mubr.bf16.mxu0 %v2114_v56  ;;  %v2205_v51 = vld [vmem:[%s2905_s1 + $0x228] sm:$0xff]   ;;  %v2194_v56 = vld [vmem:[%s2906_s0 + $0x13c] ss:$36 sps:$4 sm:$0xff]   ;;  %v2215_v5 = vld [vmem:[%s2906_s0 + $0x214] ss:$36 sps:$4 sm:$0xff]  }
  0x35   :  { %1202 = vmatprep.mubr.bf16.mxu1 %v2116_v57  ;;  %1869 = vmatpush3.bf16.msra.mxu0 %v2132_v6  ;;  %v2219_v57 = vld [vmem:[%s2905_s1 + $0x238] sm:$0xff]   ;;  %v2217_v6 = vld [vmem:[%s2906_s0 + $0x208] ss:$36 sps:$4 sm:$0xff]  }
  0x36   :  { %1933 = vmatpush3.bf16.msra.mxu1 %v2133_v7  ;;  %1870 = vmatprep.subr.bf16.mxu0 %v2140_v10  ;;  %v2218_v7 = vld [vmem:[%s2906_s0 + $0x210] ss:$36 sps:$4 sm:$0xff]   ;;  %v2222_v10 = vld [vmem:[%s2906_s0 + $0x68] ss:$36 sps:$4 sm:$0xff]  }
  0x37   :  { %1934 = vmatprep.subr.bf16.mxu1 %v2141_v11  ;;  %v2223_v11 = vld [vmem:[%s2906_s0 + $0x188] ss:$36 sps:$4 sm:$0xff]  }
  0x39   :  { %1871 = vmatpush3.bf16.msra.mxu0 %v2142_v13  ;;  %v2225_v13 = vld [vmem:[%s2906_s0 + $0x1d0] ss:$36 sps:$4 sm:$0xff]  }
  0x3a   :  { %1935 = vmatpush3.bf16.msra.mxu1 %v2143_v14  ;;  %1872 = vmatprep.subr.bf16.mxu0 %v2150_v18  ;;  %v2226_v14 = vld [vmem:[%s2906_s0 + $0xf8] ss:$36 sps:$4 sm:$0xff]   ;;  %v2688_v18 = vld [vmem:[%s2907_s2] ss:$0 sm:$0xff] }
  0x3b   :  { %1106 = vmatmul.mubr.bf16.gmra.mrb[12].mxu0 %v2118_v58  ;;  %1936 = vmatprep.subr.bf16.mxu1 %v2151_v19  ;;  %v2196_v58 = vld [vmem:[%s2906_s0 + $0x130] ss:$36 sps:$4 sm:$0xff]  }
  0x3c   :  { %1203 = vmatmul.mubr.bf16.gmra.mrb[12].mxu1 %v2119_v59  ;;  %1113 = vmatprep.mubr.bf16.mxu0 %v2124_v0  ;;  %v2197_v59 = vld [vmem:[%s2906_s0 + $0x138] ss:$36 sps:$4 sm:$0xff]   ;;  %v2206_v0 = vld [vmem:[%s2906_s0 + $0x1c4] ss:$36 sps:$4 sm:$0xff]  }
  0x3d   :  { %1210 = vmatprep.mubr.bf16.mxu1 %v2126_v1  ;;  %1873 = vmatpush3.bf16.msra.mxu0 %v2152_v20  ;;  %v2208_v1 = vld [vmem:[%s2906_s0 + $0x1cc] ss:$36 sps:$4 sm:$0xff]  }
  0x3e   :  { %1937 = vmatpush3.bf16.msra.mxu1 %v2153_v21  ;;  %1874 = vmatprep.subr.bf16.mxu0 %v2160_v26 }
  0x3f   :  { %1938 = vmatprep.subr.bf16.mxu1 %v2161_v27 }
  0x41   :  { %1875 = vmatpush3.bf16.msra.mxu0 %v2162_v28 }
  0x42   :  { %1939 = vmatpush3.bf16.msra.mxu1 %v2163_v29  ;;  %2004 = vmatprep.subr.bf16.mxu0 %v2170_v32 }
  0x43   :  { %1114 = vmatmul.mubr.bf16.gmra.mrb[16].mxu0 %v2128_v2  ;;  %2036 = vmatprep.subr.bf16.mxu1 %v2170_v32  ;;  %v2210_v2 = vld [vmem:[%s2906_s0 + $0x1c0] ss:$36 sps:$4 sm:$0xff]  }
  0x44   :  { %1211 = vmatmul.mubr.bf16.gmra.mrb[16].mxu1 %v2129_v4  ;;  %1121 = vmatprep.mubr.bf16.mxu0 %v2134_v8  ;;  %v2213_v4 = vld [vmem:[%s2906_s0 + $0x20c] ss:$36 sps:$4 sm:$0xff]   ;;  %v2220_v8 = vld [vmem:[%s2906_s0 + $0x20] ss:$36 sps:$4 sm:$0xff]  }
  0x45   :  { %1218 = vmatprep.mubr.bf16.mxu1 %v2136_v9  ;;  %v2221_v9 = vld [vmem:[%s2906_s0 + $0x140] ss:$36 sps:$4 sm:$0xff]  }
  0x4b   :  { %1122 = vmatmul.mubr.bf16.gmra.mrb[20].mxu0 %v2138_v12  ;;  %v2224_v12 = vld [vmem:[%s2906_s0 + $0xb0] ss:$36 sps:$4 sm:$0xff]  }
  0x4c   :  { %1219 = vmatmul.mubr.bf16.gmra.mrb[20].mxu1 %v2139_v15  ;;  %1129 = vmatprep.mubr.bf16.mxu0 %v2144_v16  ;;  %v2227_v15 = vld [vmem:[%s2906_s0 + $0x218] ss:$36 sps:$4 sm:$0xff]  }
  0x4d   :  { %1226 = vmatprep.mubr.bf16.mxu1 %v2146_v17 }
  0x53   :  { %1130 = vmatmul.mubr.bf16.gmra.mrb[24].mxu0 %v2148_v22 }
  0x54   :  { %1227 = vmatmul.mubr.bf16.gmra.mrb[24].mxu1 %v2149_v23  ;;  %1137 = vmatprep.mubr.bf16.mxu0 %v2154_v24 }
  0x55   :  { %1234 = vmatprep.mubr.bf16.mxu1 %v2156_v25 }
  0x5b   :  { %1138 = vmatmul.mubr.bf16.gmra.mrb[28].mxu0 %v2158_v30 }
  0x5c   :  { %1235 = vmatmul.mubr.bf16.gmra.mrb[28].mxu1 %v2159_v31  ;;  %1275 = vmatprep.mubr.bf16.mxu0 %v2166_v33 }
  0x5d   :  { %1372 = vmatprep.mubr.bf16.mxu1 %v2169_v34 }
  0x63   :  { %1276 = vmatmul.mubr.bf16.vlgmr.msra.gmra.mrb[32].mxu0 %v2164_v35 }
  0x64   :  { %1373 = vmatmul.mubr.bf16.vlgmr.msra.gmra.mrb[32].mxu1 %v2167_v36  ;;  %2005 = vmatpush3.bf16.msra.mxu0 %v2170_v32 }
  0x65   :  { %2044 = vmatpush3.bf16.msra.mxu1 %v2170_v32  ;;  %1283 = vmatprep.mubr.bf16.mxu0 %v2171_v37 }
  0x66   :  { %1380 = vmatprep.mubr.bf16.mxu1 %v2173_v38  ;;  %2006 = vmatprep.subr.bf16.mxu0 %v2177_v39 }
  0x67   :  { %2037 = vmatprep.subr.bf16.mxu1 %v2177_v39 }
  0x68   :  { %2007 = vmatpush3.bf16.msra.mxu0 %v2177_v39 }
  0x69   :  { %2045 = vmatpush3.bf16.msra.mxu1 %v2177_v39  ;;  %2008 = vmatprep.subr.bf16.mxu0 %v2184_v40 }
  0x6a   :  { %2038 = vmatprep.subr.bf16.mxu1 %v2184_v40 }
  0x6b   :  { %1284 = vmatmul.mubr.bf16.gmra.mrb[36].mxu0 %v2175_v41 }
  0x6c   :  { %1381 = vmatmul.mubr.bf16.gmra.mrb[36].mxu1 %v2176_v42  ;;  %1291 = vmatprep.mubr.bf16.mxu0 %v2178_v43 }
  0x6d   :  { %1388 = vmatprep.mubr.bf16.mxu1 %v2180_v44  ;;  %2009 = vmatpush3.bf16.msra.mxu0 %v2184_v40 }
  0x6e   :  { %2046 = vmatpush3.bf16.msra.mxu1 %v2184_v40  ;;  %2010 = vmatprep.subr.bf16.mxu0 %v2191_v45 }
  0x6f   :  { %2039 = vmatprep.subr.bf16.mxu1 %v2191_v45 }
  0x71   :  { %2011 = vmatpush3.bf16.msra.mxu0 %v2191_v45 }
  0x72   :  { %2047 = vmatpush3.bf16.msra.mxu1 %v2191_v45  ;;  %2012 = vmatprep.subr.bf16.mxu0 %v2198_v46 }
  0x73   :  { %1292 = vmatmul.mubr.bf16.gmra.mrb[40].mxu0 %v2182_v47  ;;  %2040 = vmatprep.subr.bf16.mxu1 %v2198_v46 }
  0x74   :  { %1389 = vmatmul.mubr.bf16.gmra.mrb[40].mxu1 %v2183_v48  ;;  %1299 = vmatprep.mubr.bf16.mxu0 %v2185_v49 }
  0x75   :  { %1396 = vmatprep.mubr.bf16.mxu1 %v2187_v50  ;;  %2013 = vmatpush3.bf16.msra.mxu0 %v2198_v46 }
  0x76   :  { %2048 = vmatpush3.bf16.msra.mxu1 %v2198_v46  ;;  %2014 = vmatprep.subr.bf16.mxu0 %v2205_v51 }
  0x77   :  { %2041 = vmatprep.subr.bf16.mxu1 %v2205_v51 }
  0x79   :  { %2015 = vmatpush3.bf16.msra.mxu0 %v2205_v51 }
  0x7a   :  { %2049 = vmatpush3.bf16.msra.mxu1 %v2205_v51  ;;  %2016 = vmatprep.subr.bf16.mxu0 %v2212_v53 }
  0x7b   :  { %1300 = vmatmul.mubr.bf16.gmra.mrb[44].mxu0 %v2189_v52  ;;  %2042 = vmatprep.subr.bf16.mxu1 %v2212_v53 }
  0x7c   :  { %1397 = vmatmul.mubr.bf16.gmra.mrb[44].mxu1 %v2190_v54  ;;  %1307 = vmatprep.mubr.bf16.mxu0 %v2192_v55 }
  0x7d   :  { %1404 = vmatprep.mubr.bf16.mxu1 %v2194_v56  ;;  %2017 = vmatpush3.bf16.msra.mxu0 %v2212_v53 }
  0x7e   :  { %2050 = vmatpush3.bf16.msra.mxu1 %v2212_v53  ;;  %2018 = vmatprep.subr.bf16.mxu0 %v2219_v57 }
  0x7f   :  { %2043 = vmatprep.subr.bf16.mxu1 %v2219_v57 }
  0x81   :  { %2019 = vmatpush3.bf16.msra.mxu0 %v2219_v57 }
  0x82   :  { %2051 = vmatpush3.bf16.msra.mxu1 %v2219_v57 }
  0x83   :  { %1308 = vmatmul.mubr.bf16.gmra.mrb[48].mxu0 %v2196_v58 }
  0x84   :  { %1405 = vmatmul.mubr.bf16.gmra.mrb[48].mxu1 %v2197_v59  ;;  %1315 = vmatprep.mubr.bf16.mxu0 %v2199_v60 }
  0x85   :  { %1412 = vmatprep.mubr.bf16.mxu1 %v2201_v61 }
  0x8b   :  { %1316 = vmatmul.mubr.bf16.gmra.mrb[52].mxu0 %v2203_v62 }
  0x8c   :  { %1413 = vmatmul.mubr.bf16.gmra.mrb[52].mxu1 %v2204_v63  ;;  %1323 = vmatprep.mubr.bf16.mxu0 %v2206_v0 }
  0x8d   :  { %1420 = vmatprep.mubr.bf16.mxu1 %v2208_v1 }
  0x93   :  { %1324 = vmatmul.mubr.bf16.gmra.mrb[56].mxu0 %v2210_v2 }
  0x94   :  { %1421 = vmatmul.mubr.bf16.gmra.mrb[56].mxu1 %v2211_v3  ;;  %1331 = vmatprep.mubr.bf16.mxu0 %v2213_v4 }
  0x95   :  { %1428 = vmatprep.mubr.bf16.mxu1 %v2215_v5 }
  0x9b   :  { %1332 = vmatmul.mubr.bf16.gmra.mrb[60].mxu0 %v2217_v6 }
  0x9c   :  { %1429 = vmatmul.mubr.bf16.gmra.mrb[60].mxu1 %v2218_v7  ;;  %2020 = vmatprep.mubr.bf16.mxu0 %v2220_v8 }
  0x9d   :  { %2028 = vmatprep.mubr.bf16.mxu1 %v2221_v9 }
  0xa3   :  { %2021 = vmatmul.mubr.bf16.vlgmr.msra.gmra.mrb[64].mxu0 %v2222_v10 }
  0xa4   :  { %2029 = vmatmul.mubr.bf16.vlgmr.msra.gmra.mrb[64].mxu1 %v2223_v11  ;;  %2024 = vmatprep.mubr.bf16.mxu0 %v2224_v12 }
  0xa5   :  { %2032 = vmatprep.mubr.bf16.mxu1 %v2225_v13 }
  0xab   :  { %2025 = vmatmul.mubr.bf16.gmra.mrb[68].mxu0 %v2226_v14 }
  0xac   :  { %2033 = vmatmul.mubr.bf16.gmra.mrb[68].mxu1 %v2227_v15 }
  0xf6   :  { %v1748_v16 = vpop.f32.mrb[0].mxu0 }
  0xf7   :  { %v1812_v17 = vpop.f32.mrb[0].mxu1  ;;  %v1749_v19 = vpop.f32.mrb[1].mxu0 }
  0xf8   :  { %v1750_v20 = vadd.f32 %v1749_v19, %v1748_v16  ;;  %v1813_v21 = vpop.f32.mrb[1].mxu1  ;;  %v1751_v22 = vpop.f32.mrb[2].mxu0 }
  0xf9   :  { %v1814_v23 = vadd.f32 %v1813_v21, %v1812_v17  ;;  %v1815_v24 = vpop.f32.mrb[2].mxu1  ;;  %v1752_v25 = vpop.f32.mrb[3].mxu0 }
  0xfa   :  { %v1084_v26 = vadd.f32 %v1750_v20, %v2688_v18  ;;  %v1753_v27 = vadd.f32 %v1752_v25, %v1751_v22  ;;  %v1816_v28 = vpop.f32.mrb[3].mxu1 }
  0xfb   :  { %v1817_v29 = vadd.f32 %v1816_v28, %v1815_v24 }
  0xfc   :  { %v2691_v30 = vadd.f32 %v1814_v23, %v1084_v26  ;;  %v1087_v31 = vadd.f32 %v1753_v27, %v2688_v18 }
  0xfe   :  { %v2694_v32 = vadd.f32 %v1817_v29, %v1087_v31  ;;  %v1754_v33 = vpop.f32.mrb[4].mxu0 }
  0xff   :  { %v1818_v34 = vpop.f32.mrb[4].mxu1  ;;  %v1755_v35 = vpop.f32.mrb[5].mxu0 }
 0x100   :  { %v1756_v36 = vadd.f32 %v1755_v35, %v1754_v33  ;;  %v1819_v37 = vpop.f32.mrb[5].mxu1  ;;  %v1757_v38 = vpop.f32.mrb[6].mxu0 }
 0x101   :  { %v1820_v39 = vadd.f32 %v1819_v37, %v1818_v34  ;;  %v1821_v40 = vpop.f32.mrb[6].mxu1  ;;  %v1758_v41 = vpop.f32.mrb[7].mxu0 }
 0x102   :  { %v1092_v42 = vadd.f32 %v1756_v36, %v2688_v18  ;;  %v1759_v43 = vadd.f32 %v1758_v41, %v1757_v38  ;;  %v1822_v44 = vpop.f32.mrb[7].mxu1 }
 0x103   :  { %v1823_v45 = vadd.f32 %v1822_v44, %v1821_v40 }
 0x104   :  { %v2697_v46 = vadd.f32 %v1820_v39, %v1092_v42  ;;  %v1095_v47 = vadd.f32 %v1759_v43, %v2688_v18 }
 0x106   :  { %v2700_v48 = vadd.f32 %v1823_v45, %v1095_v47  ;;  %v1760_v49 = vpop.f32.mrb[8].mxu0 }
 0x107   :  { %v1824_v50 = vpop.f32.mrb[8].mxu1  ;;  %v1761_v51 = vpop.f32.mrb[9].mxu0 }
 0x108   :  { %v1762_v52 = vadd.f32 %v1761_v51, %v1760_v49  ;;  %v1825_v53 = vpop.f32.mrb[9].mxu1  ;;  %v1763_v54 = vpop.f32.mrb[10].mxu0 }
 0x109   :  { %v1826_v55 = vadd.f32 %v1825_v53, %v1824_v50  ;;  %v1827_v56 = vpop.f32.mrb[10].mxu1  ;;  %v1764_v57 = vpop.f32.mrb[11].mxu0 }
 0x10a   :  { %v1100_v58 = vadd.f32 %v1762_v52, %v2688_v18  ;;  %v1765_v59 = vadd.f32 %v1764_v57, %v1763_v54  ;;  %v1828_v60 = vpop.f32.mrb[11].mxu1 }
 0x10b   :  { %v1829_v61 = vadd.f32 %v1828_v60, %v1827_v56 }
 0x10c   :  { %v2703_v62 = vadd.f32 %v1826_v55, %v1100_v58  ;;  %v1103_v63 = vadd.f32 %v1765_v59, %v2688_v18 }
 0x10e   :  { %v2706_v0 = vadd.f32 %v1829_v61, %v1103_v63  ;;  %v1766_v1 = vpop.f32.mrb[12].mxu0 }
 0x10f   :  { %v1830_v2 = vpop.f32.mrb[12].mxu1  ;;  %v1767_v3 = vpop.f32.mrb[13].mxu0 }
 0x110   :  { %v1768_v4 = vadd.f32 %v1767_v3, %v1766_v1  ;;  %v1831_v5 = vpop.f32.mrb[13].mxu1  ;;  %v1769_v6 = vpop.f32.mrb[14].mxu0 }
 0x111   :  { %v1832_v7 = vadd.f32 %v1831_v5, %v1830_v2  ;;  %v1833_v8 = vpop.f32.mrb[14].mxu1  ;;  %v1770_v9 = vpop.f32.mrb[15].mxu0 }
 0x112   :  { %v1108_v10 = vadd.f32 %v1768_v4, %v2688_v18  ;;  %v1771_v11 = vadd.f32 %v1770_v9, %v1769_v6  ;;  %v1834_v12 = vpop.f32.mrb[15].mxu1 }
 0x113   :  { %v1835_v13 = vadd.f32 %v1834_v12, %v1833_v8 }
 0x114   :  { %v2709_v14 = vadd.f32 %v1832_v7, %v1108_v10  ;;  %v1111_v15 = vadd.f32 %v1771_v11, %v2688_v18 }
 0x116   :  { %v2712_v16 = vadd.f32 %v1835_v13, %v1111_v15  ;;  %v1772_v17 = vpop.f32.mrb[16].mxu0 }
 0x117   :  { %v1836_v19 = vpop.f32.mrb[16].mxu1  ;;  %v1773_v20 = vpop.f32.mrb[17].mxu0 }
 0x118   :  { %v1774_v21 = vadd.f32 %v1773_v20, %v1772_v17  ;;  %v1837_v22 = vpop.f32.mrb[17].mxu1  ;;  %v1775_v23 = vpop.f32.mrb[18].mxu0 }
 0x119   :  { %v1838_v24 = vadd.f32 %v1837_v22, %v1836_v19  ;;  %v1839_v25 = vpop.f32.mrb[18].mxu1  ;;  %v1776_v26 = vpop.f32.mrb[19].mxu0 }
 0x11a   :  { %v1116_v27 = vadd.f32 %v1774_v21, %v2688_v18  ;;  %v1777_v28 = vadd.f32 %v1776_v26, %v1775_v23  ;;  %v1840_v29 = vpop.f32.mrb[19].mxu1 }
 0x11b   :  { %v1841_v31 = vadd.f32 %v1840_v29, %v1839_v25 }
 0x11c   :  { %v2715_v33 = vadd.f32 %v1838_v24, %v1116_v27  ;;  %v1119_v34 = vadd.f32 %v1777_v28, %v2688_v18 }
 0x11e   :  { %v2718_v35 = vadd.f32 %v1841_v31, %v1119_v34  ;;  %v1778_v36 = vpop.f32.mrb[20].mxu0 }
 0x11f   :  { %v1842_v37 = vpop.f32.mrb[20].mxu1  ;;  %v1779_v38 = vpop.f32.mrb[21].mxu0 }
 0x120   :  { %v1780_v39 = vadd.f32 %v1779_v38, %v1778_v36  ;;  %v1843_v40 = vpop.f32.mrb[21].mxu1  ;;  %v1781_v41 = vpop.f32.mrb[22].mxu0 }
 0x121   :  { %v1844_v42 = vadd.f32 %v1843_v40, %v1842_v37  ;;  %v1845_v43 = vpop.f32.mrb[22].mxu1  ;;  %v1782_v44 = vpop.f32.mrb[23].mxu0 }
 0x122   :  { %v1124_v45 = vadd.f32 %v1780_v39, %v2688_v18  ;;  %v1783_v47 = vadd.f32 %v1782_v44, %v1781_v41  ;;  %v1846_v49 = vpop.f32.mrb[23].mxu1 }
 0x123   :  { %v1847_v50 = vadd.f32 %v1846_v49, %v1845_v43 }
 0x124   :  { %v2721_v51 = vadd.f32 %v1844_v42, %v1124_v45  ;;  %v1127_v52 = vadd.f32 %v1783_v47, %v2688_v18 }
 0x126   :  { %v2724_v53 = vadd.f32 %v1847_v50, %v1127_v52  ;;  %v1784_v54 = vpop.f32.mrb[24].mxu0 }
 0x127   :  { %v1848_v55 = vpop.f32.mrb[24].mxu1  ;;  %v1785_v56 = vpop.f32.mrb[25].mxu0 }
 0x128   :  { %v1786_v57 = vadd.f32 %v1785_v56, %v1784_v54  ;;  %v1849_v58 = vpop.f32.mrb[25].mxu1  ;;  %v1787_v59 = vpop.f32.mrb[26].mxu0 }
 0x129   :  { %v1850_v60 = vadd.f32 %v1849_v58, %v1848_v55  ;;  %v1851_v61 = vpop.f32.mrb[26].mxu1  ;;  %v1788_v63 = vpop.f32.mrb[27].mxu0 }
 0x12a   :  { %v1132_v1 = vadd.f32 %v1786_v57, %v2688_v18  ;;  %v1789_v2 = vadd.f32 %v1788_v63, %v1787_v59  ;;  %v1852_v3 = vpop.f32.mrb[27].mxu1 }
 0x12b   :  { %v1853_v4 = vadd.f32 %v1852_v3, %v1851_v61 }
 0x12c   :  { %v2727_v5 = vadd.f32 %v1850_v60, %v1132_v1  ;;  %v1135_v6 = vadd.f32 %v1789_v2, %v2688_v18 }
 0x12e   :  { %v2730_v7 = vadd.f32 %v1853_v4, %v1135_v6  ;;  %v1790_v8 = vpop.f32.mrb[28].mxu0 }
 0x12f   :  { %v1854_v9 = vpop.f32.mrb[28].mxu1  ;;  %v1791_v10 = vpop.f32.mrb[29].mxu0 }
 0x130   :  { %v1792_v11 = vadd.f32 %v1791_v10, %v1790_v8  ;;  %v1855_v12 = vpop.f32.mrb[29].mxu1  ;;  %v1793_v13 = vpop.f32.mrb[30].mxu0 }
 0x131   :  { %v1856_v15 = vadd.f32 %v1855_v12, %v1854_v9  ;;  %v1857_v17 = vpop.f32.mrb[30].mxu1  ;;  %v1794_v19 = vpop.f32.mrb[31].mxu0 }
 0x132   :  { %v1140_v20 = vadd.f32 %v1792_v11, %v2688_v18  ;;  %v1795_v21 = vadd.f32 %v1794_v19, %v1793_v13  ;;  %v1858_v22 = vpop.f32.mrb[31].mxu1 }
 0x133   :  { %v1859_v23 = vadd.f32 %v1858_v22, %v1857_v17 }
 0x134   :  { %v2733_v24 = vadd.f32 %v1856_v15, %v1140_v20  ;;  %v1143_v25 = vadd.f32 %v1795_v21, %v2688_v18 }
 0x136   :  { %v2736_v26 = vadd.f32 %v1859_v23, %v1143_v25  ;;  %v1876_v27 = vpop.f32.mrb[32].mxu0 }
 0x137   :  { %v1940_v28 = vpop.f32.mrb[32].mxu1  ;;  %v1877_v29 = vpop.f32.mrb[33].mxu0 }
 0x138   :  { %v1878_v31 = vadd.f32 %v1877_v29, %v1876_v27  ;;  %v1941_v34 = vpop.f32.mrb[33].mxu1  ;;  %v1879_v36 = vpop.f32.mrb[34].mxu0 }
 0x139   :  { %v1942_v37 = vadd.f32 %v1941_v34, %v1940_v28  ;;  %v1943_v38 = vpop.f32.mrb[34].mxu1  ;;  %v1880_v39 = vpop.f32.mrb[35].mxu0 }
 0x13a   :  { %v1278_v40 = vadd.f32 %v1878_v31, %v2691_v30  ;;  %v1881_v41 = vadd.f32 %v1880_v39, %v1879_v36  ;;  %v1944_v42 = vpop.f32.mrb[35].mxu1 }
 0x13b   :  { %v1945_v43 = vadd.f32 %v1944_v42, %v1943_v38 }
 0x13c   :  { %v1281_v44 = vadd.f32 %v1881_v41, %v2694_v32  ;;  %v2740_v45 = vadd.f32 %v1942_v37, %v1278_v40 }
 0x13e   :  { %v1882_v18 = vpop.f32.mrb[36].mxu0  ;;  %v2742_v47 = vadd.f32 %v1945_v43, %v1281_v44 }
 0x13f   :  { %v1946_v49 = vpop.f32.mrb[36].mxu1  ;;  %v1883_v50 = vpop.f32.mrb[37].mxu0 }
 0x140   :  { %v1884_v52 = vadd.f32 %v1883_v50, %v1882_v18  ;;  %v1947_v54 = vpop.f32.mrb[37].mxu1  ;;  %v1885_v55 = vpop.f32.mrb[38].mxu0 }
 0x141   :  { %v1948_v56 = vadd.f32 %v1947_v54, %v1946_v49  ;;  %v1949_v57 = vpop.f32.mrb[38].mxu1  ;;  %v1886_v58 = vpop.f32.mrb[39].mxu0 }
 0x142   :  { %v1286_v30 = vadd.f32 %v1884_v52, %v2697_v46  ;;  %v1887_v59 = vadd.f32 %v1886_v58, %v1885_v55  ;;  %v1950_v60 = vpop.f32.mrb[39].mxu1 }
 0x143   :  { %v1951_v61 = vadd.f32 %v1950_v60, %v1949_v57 }
 0x144   :  { %v1289_v32 = vadd.f32 %v1887_v59, %v2700_v48  ;;  %v2746_v63 = vadd.f32 %v1948_v56, %v1286_v30 }
 0x146   :  { %v1888_v1 = vpop.f32.mrb[40].mxu0  ;;  %v2748_v2 = vadd.f32 %v1951_v61, %v1289_v32 }
 0x147   :  { %v1952_v3 = vpop.f32.mrb[40].mxu1  ;;  %v1889_v4 = vpop.f32.mrb[41].mxu0 }
 0x148   :  { %v1890_v6 = vadd.f32 %v1889_v4, %v1888_v1  ;;  %v1953_v8 = vpop.f32.mrb[41].mxu1  ;;  %v1891_v9 = vpop.f32.mrb[42].mxu0 }
 0x149   :  { %v1954_v10 = vadd.f32 %v1953_v8, %v1952_v3  ;;  %v1955_v11 = vpop.f32.mrb[42].mxu1  ;;  %v1892_v12 = vpop.f32.mrb[43].mxu0 }
 0x14a   :  { %v1294_v46 = vadd.f32 %v1890_v6, %v2703_v62  ;;  %v1893_v13 = vadd.f32 %v1892_v12, %v1891_v9  ;;  %v1956_v15 = vpop.f32.mrb[43].mxu1 }
 0x14b   :  { %v1957_v17 = vadd.f32 %v1956_v15, %v1955_v11 }
 0x14c   :  { %v1297_v48 = vadd.f32 %v1893_v13, %v2706_v0  ;;  %v2752_v19 = vadd.f32 %v1954_v10, %v1294_v46 }
 0x14e   :  { %v1894_v20 = vpop.f32.mrb[44].mxu0  ;;  %v2754_v21 = vadd.f32 %v1957_v17, %v1297_v48 }
 0x14f   :  { %v1958_v22 = vpop.f32.mrb[44].mxu1  ;;  %v1895_v23 = vpop.f32.mrb[45].mxu0 }
 0x150   :  { %v1896_v25 = vadd.f32 %v1895_v23, %v1894_v20  ;;  %v1959_v27 = vpop.f32.mrb[45].mxu1  ;;  %v1897_v28 = vpop.f32.mrb[46].mxu0 }
 0x151   :  { %v1960_v29 = vadd.f32 %v1959_v27, %v1958_v22  ;;  %v1961_v31 = vpop.f32.mrb[46].mxu1  ;;  %v1898_v34 = vpop.f32.mrb[47].mxu0 }
 0x152   :  { %v1302_v62 = vadd.f32 %v1896_v25, %v2709_v14  ;;  %v1899_v36 = vadd.f32 %v1898_v34, %v1897_v28  ;;  %v1962_v37 = vpop.f32.mrb[47].mxu1 }
 0x153   :  { %v1963_v38 = vadd.f32 %v1962_v37, %v1961_v31 }
 0x154   :  { %v1305_v0 = vadd.f32 %v1899_v36, %v2712_v16  ;;  %v2758_v39 = vadd.f32 %v1960_v29, %v1302_v62 }
 0x156   :  { %v1900_v40 = vpop.f32.mrb[48].mxu0  ;;  %v2760_v41 = vadd.f32 %v1963_v38, %v1305_v0 }
 0x157   :  { %v1964_v42 = vpop.f32.mrb[48].mxu1  ;;  %v1901_v43 = vpop.f32.mrb[49].mxu0 }
 0x158   :  { %v1902_v44 = vadd.f32 %v1901_v43, %v1900_v40  ;;  %v1965_v18 = vpop.f32.mrb[49].mxu1  ;;  %v1903_v49 = vpop.f32.mrb[50].mxu0 }
 0x159   :  { %v1966_v50 = vadd.f32 %v1965_v18, %v1964_v42  ;;  %v1967_v52 = vpop.f32.mrb[50].mxu1  ;;  %v1904_v54 = vpop.f32.mrb[51].mxu0 }
 0x15a   :  { %v1310_v14 = vadd.f32 %v1902_v44, %v2715_v33  ;;  %v1905_v55 = vadd.f32 %v1904_v54, %v1903_v49  ;;  %v1968_v56 = vpop.f32.mrb[51].mxu1 }
 0x15b   :  { %v1969_v57 = vadd.f32 %v1968_v56, %v1967_v52 }
 0x15c   :  { %v1313_v16 = vadd.f32 %v1905_v55, %v2718_v35  ;;  %v2764_v58 = vadd.f32 %v1966_v50, %v1310_v14  ;;  %v1536_v55 = vld [vmem:[%s2908_s3 + $0x10] sm:$0xff] }
 0x15e   :  { %v1906_v30 = vpop.f32.mrb[52].mxu0  ;;  %v2766_v59 = vadd.f32 %v1969_v57, %v1313_v16 }
 0x15f   :  { %v1970_v60 = vpop.f32.mrb[52].mxu1  ;;  %v1907_v61 = vpop.f32.mrb[53].mxu0 }
 0x160   :  { %v1908_v32 = vadd.f32 %v1907_v61, %v1906_v30  ;;  %v1971_v1 = vpop.f32.mrb[53].mxu1  ;;  %v1909_v3 = vpop.f32.mrb[54].mxu0 }
 0x161   :  { %v1972_v4 = vadd.f32 %v1971_v1, %v1970_v60  ;;  %v1973_v6 = vpop.f32.mrb[54].mxu1  ;;  %v1910_v8 = vpop.f32.mrb[55].mxu0  ;;  %v1542_v1 = vld [vmem:[%s2908_s3 + $0x40] sm:$0xff] }
 0x162   :  { %v1318_v33 = vadd.f32 %v1908_v32, %v2721_v51  ;;  %v1911_v9 = vadd.f32 %v1910_v8, %v1909_v3  ;;  %v1974_v10 = vpop.f32.mrb[55].mxu1  ;;  %v1537_v3 = vld [vmem:[%s2908_s3 + $0x18] sm:$0xff] }
 0x163   :  { %v1975_v11 = vadd.f32 %v1974_v10, %v1973_v6  ;;  %v1535_v10 = vld [vmem:[%s2908_s3 + $0x8] sm:$0xff] }
 0x164   :  { %v1321_v35 = vadd.f32 %v1911_v9, %v2724_v53  ;;  %v1415_v12 = vadd.f32 %v1972_v4, %v1318_v33 }
 0x166   :  { %v1912_v46 = vpop.f32.mrb[56].mxu0  ;;  %v1418_v13 = vadd.f32 %v1975_v11, %v1321_v35 }
 0x167   :  { %v1976_v15 = vpop.f32.mrb[56].mxu1  ;;  %v1913_v17 = vpop.f32.mrb[57].mxu0 }
 0x168   :  { %v1914_v48 = vadd.f32 %v1913_v17, %v1912_v46  ;;  %v1977_v20 = vpop.f32.mrb[57].mxu1  ;;  %v1915_v22 = vpop.f32.mrb[58].mxu0 }
 0x169   :  { %v1978_v23 = vadd.f32 %v1977_v20, %v1976_v15  ;;  %v1979_v25 = vpop.f32.mrb[58].mxu1  ;;  %v1916_v27 = vpop.f32.mrb[59].mxu0 }
 0x16a   :  { %v1326_v28 = vadd.f32 %v1914_v48, %v2727_v5  ;;  %v1917_v29 = vadd.f32 %v1916_v27, %v1915_v22  ;;  %v1980_v51 = vpop.f32.mrb[59].mxu1  ;;  %v1540_v22 = vld [vmem:[%s2908_s3 + $0x30] sm:$0xff] }
 0x16b   :  { %v1981_v31 = vadd.f32 %v1980_v51, %v1979_v25  ;;  %v1548_v27 = vld [vmem:[%s2908_s3 + $0x70] sm:$0xff] }
 0x16c   :  { %v1329_v34 = vadd.f32 %v1917_v29, %v2730_v7  ;;  %v2772_v62 = vadd.f32 %v1978_v23, %v1326_v28  ;;  %v1538_v29 = vld [vmem:[%s2908_s3 + $0x20] sm:$0xff] }
 0x16e   :  { %v1918_v53 = vpop.f32.mrb[60].mxu0  ;;  %v2774_v36 = vadd.f32 %v1981_v31, %v1329_v34 }
 0x16f   :  { %v1982_v37 = vpop.f32.mrb[60].mxu1  ;;  %v1919_v38 = vpop.f32.mrb[61].mxu0 }
 0x170   :  { %v1920_v0 = vadd.f32 %v1919_v38, %v1918_v53  ;;  %v1983_v40 = vpop.f32.mrb[61].mxu1  ;;  %v1921_v42 = vpop.f32.mrb[62].mxu0  ;;  %v1546_v53 = vld [vmem:[%s2908_s3 + $0x60] sm:$0xff] }
 0x171   :  { %v1984_v43 = vadd.f32 %v1983_v40, %v1982_v37  ;;  %v1985_v44 = vpop.f32.mrb[62].mxu1  ;;  %v1922_v18 = vpop.f32.mrb[63].mxu0 }
 0x172   :  { %v1334_v5 = vadd.f32 %v1920_v0, %v2733_v24  ;;  %v1923_v49 = vadd.f32 %v1922_v18, %v1921_v42  ;;  %v1986_v50 = vpop.f32.mrb[63].mxu1  ;;  %v1544_v24 = vld [vmem:[%s2908_s3 + $0x50] sm:$0xff] }
 0x173   :  { %v1987_v52 = vadd.f32 %v1986_v50, %v1985_v44  ;;  %v1539_v44 = vld [vmem:[%s2908_s3 + $0x28] sm:$0xff] }
 0x174   :  { %v1337_v7 = vadd.f32 %v1923_v49, %v2736_v26  ;;  %v1431_v54 = vadd.f32 %v1984_v43, %v1334_v5  ;;  %v1534_v26 = vld [vmem:[%s2908_s3] sm:$0xff] }
 0x176   :  { %v2022_v14 = vpop.f32.mrb[64].mxu0  ;;  %v2781_v56 = vadd.f32 %v1987_v52, %v1337_v7 }
 0x177   :  { %v1480_v57 = vadd.f32 %v2022_v14, %v2746_v63  ;;  %v2030_v16 = vpop.f32.mrb[64].mxu1  ;;  %v1471_v30 = vpop.f32.mrb[65].mxu0 }
 0x178   :  { %v1512_v60 = vadd.f32 %v2030_v16, %v1415_v12  ;;  %v1472_v61 = vadd.f32 %v1471_v30, %v2740_v45  ;;  %v1503_v32 = vpop.f32.mrb[65].mxu1  ;;  %v2023_v63 = vpop.f32.mrb[66].mxu0  ;;  %v1545_v45 = vld [vmem:[%s2908_s3 + $0x58] sm:$0xff] }
 0x179   :  { %v1552_v4 = vadd.f32 %v1536_v55, %v1480_v57  ;;  %v1504_v6 = vadd.f32 %v1503_v32, %v2764_v58  ;;  %v1483_v8 = vadd.f32 %v2023_v63, %v2748_v2  ;;  %v2031_v33 = vpop.f32.mrb[66].mxu1  ;;  %v1474_v9 = vpop.f32.mrb[67].mxu0  ;;  %v1543_v2 = vld [vmem:[%s2908_s3 + $0x48] sm:$0xff] }
 0x17a   :  { %v1560_v11 = vadd.f32 %v1544_v24, %v1512_v60  ;;  %v1550_v35 = vadd.f32 %v1534_v26, %v1472_v61  ;;  %v1515_v12 = vadd.f32 %v2031_v33, %v1418_v13  ;;  %v1475_v46 = vadd.f32 %v1474_v9, %v2742_v47  ;;  %v1506_v15 = vpop.f32.mrb[67].mxu1 }
 0x17b   :  { %1569 = vst.msk [vmem:[%s2909_s4 + $0x10] sm:$0xff] %vm1566_vm0, %v1552_v4  ;;  %v1558_v58 = vadd.f32 %v1542_v1, %v1504_v6  ;;  %v1553_v17 = vadd.f32 %v1537_v3, %v1483_v8  ;;  %v1507_v48 = vadd.f32 %v1506_v15, %v2766_v59 }
 0x17c   :  { %1577 = vst.msk [vmem:[%s2909_s4 + $0x50] sm:$0xff] %vm1566_vm0, %v1560_v11  ;;  %1567 = vst.msk [vmem:[%s2909_s4] sm:$0xff] %vm1566_vm0, %v1550_v35  ;;  %v1561_v47 = vadd.f32 %v1545_v45, %v1515_v12  ;;  %v1551_v13 = vadd.f32 %v1535_v10, %v1475_v46 }
 0x17d   :  { %1575 = vst.msk [vmem:[%s2909_s4 + $0x40] sm:$0xff] %vm1566_vm0, %v1558_v58  ;;  %1570 = vst.msk [vmem:[%s2909_s4 + $0x18] sm:$0xff] %vm1566_vm0, %v1553_v17  ;;  %v1559_v59 = vadd.f32 %v1543_v2, %v1507_v48 }
 0x17e   :  { %1578 = vst.msk [vmem:[%s2909_s4 + $0x58] sm:$0xff] %vm1566_vm0, %v1561_v47  ;;  %1568 = vst.msk [vmem:[%s2909_s4 + $0x8] sm:$0xff] %vm1566_vm0, %v1551_v13  ;;  %v2026_v20 = vpop.f32.mrb[68].mxu0 }
 0x17f   :  { %1576 = vst.msk [vmem:[%s2909_s4 + $0x48] sm:$0xff] %vm1566_vm0, %v1559_v59  ;;  %v1496_v23 = vadd.f32 %v2026_v20, %v2758_v39  ;;  %v2034_v25 = vpop.f32.mrb[68].mxu1  ;;  %v1487_v28 = vpop.f32.mrb[69].mxu0  ;;  %v1541_v39 = vld [vmem:[%s2908_s3 + $0x38] sm:$0xff] }
 0x180   :  { %v1528_v51 = vadd.f32 %v2034_v25, %v1431_v54  ;;  %v1488_v31 = vadd.f32 %v1487_v28, %v2752_v19  ;;  %v1519_v34 = vpop.f32.mrb[69].mxu1  ;;  %v2027_v37 = vpop.f32.mrb[70].mxu0  ;;  %v1549_v19 = vld [vmem:[%s2908_s3 + $0x78] sm:$0xff] }
 0x181   :  { %v1556_v38 = vadd.f32 %v1540_v22, %v1496_v23  ;;  %v1520_v0 = vadd.f32 %v1519_v34, %v2772_v62  ;;  %v1499_v40 = vadd.f32 %v2027_v37, %v2760_v41  ;;  %v2035_v42 = vpop.f32.mrb[70].mxu1  ;;  %v1490_v43 = vpop.f32.mrb[71].mxu0  ;;  %v1547_v41 = vld [vmem:[%s2908_s3 + $0x68] sm:$0xff] }
 0x182   :  { %v1564_v18 = vadd.f32 %v1548_v27, %v1528_v51  ;;  %v1554_v5 = vadd.f32 %v1538_v29, %v1488_v31  ;;  %v1531_v49 = vadd.f32 %v2035_v42, %v2781_v56  ;;  %v1491_v50 = vadd.f32 %v1490_v43, %v2754_v21  ;;  %v1522_v52 = vpop.f32.mrb[71].mxu1 }
 0x183   :  { %1573 = vst.msk [vmem:[%s2909_s4 + $0x30] sm:$0xff] %vm1566_vm0, %v1556_v38  ;;  %v1562_v62 = vadd.f32 %v1546_v53, %v1520_v0  ;;  %v1557_v7 = vadd.f32 %v1541_v39, %v1499_v40  ;;  %v1523_v54 = vadd.f32 %v1522_v52, %v2774_v36 }
 0x184   :  { %1581 = vst.msk [vmem:[%s2909_s4 + $0x70] sm:$0xff] %vm1566_vm0, %v1564_v18  ;;  %1571 = vst.msk [vmem:[%s2909_s4 + $0x20] sm:$0xff] %vm1566_vm0, %v1554_v5  ;;  %v1565_v21 = vadd.f32 %v1549_v19, %v1531_v49  ;;  %v1555_v14 = vadd.f32 %v1539_v44, %v1491_v50 }
 0x185   :  { %1579 = vst.msk [vmem:[%s2909_s4 + $0x60] sm:$0xff] %vm1566_vm0, %v1562_v62  ;;  %1574 = vst.msk [vmem:[%s2909_s4 + $0x38] sm:$0xff] %vm1566_vm0, %v1557_v7  ;;  %v1563_v36 = vadd.f32 %v1547_v41, %v1523_v54 }
 0x186   :  { %1582 = vst.msk [vmem:[%s2909_s4 + $0x78] sm:$0xff] %vm1566_vm0, %v1565_v21  ;;  %1572 = vst.msk [vmem:[%s2909_s4 + $0x28] sm:$0xff] %vm1566_vm0, %v1555_v14 }
 0x187   :  { %1580 = vst.msk [vmem:[%s2909_s4 + $0x68] sm:$0xff] %vm1566_vm0, %v1563_v36 }

</bundles_post_ra>
